<compile_context>
chip_gen: v7x
topology: tpu7x:2x2x1
jax: 0.10.0
libtpu: 0.0.40
codegen_flags: <defaults>
</compile_context>

<pallas_src>
import functools

import numpy as np
import jax
import jax.numpy as jnp
from jax.experimental import pallas as pl
from jax.experimental.pallas import tpu as pltpu

RADIUS = 0.5
DIM = 32          # mlp hidden width
INPUT_DIM = 96    # 3 planes * 32 channels


def _triplane_kernel(pos_ref, coords_ref, planes_ref, w0_ref, w1_ref, wh_ref,
                     out_ref, *, radius, H, W):
    HW = H * W
    TN = pos_ref.shape[0]

    pos = pos_ref[...].astype(jnp.float32)             # [TN, 3]
    inv_r = 1.0 / radius
    p0 = pos[:, 0:1] * inv_r
    p1 = pos[:, 1:2] * inv_r
    p2 = pos[:, 2:3] * inv_r

    coords = coords_ref[...]                            # [2, HW] f32
    ix = coords[0:1, :]                                 # (1,HW): hw % W  (x / width)
    iy = coords[1:2, :]                                 # (1,HW): hw // W (y / height)

    # Separable tent factors for F.grid_sample(align_corners=True,
    # padding_mode='border').  Each is [TN, HW]; ~4 VPU ops over [TN,HW] apiece.
    def tent_x(g):
        x = jnp.clip((g + 1.0) * (0.5 * (W - 1)), 0.0, float(W - 1))   # [TN,1]
        return jnp.maximum(1.0 - jnp.abs(ix - x), 0.0)

    def tent_y(g):
        y = jnp.clip((g + 1.0) * (0.5 * (H - 1)), 0.0, float(H - 1))   # [TN,1]
        return jnp.maximum(1.0 - jnp.abs(iy - y), 0.0)

    ty0 = tent_y(p0)        # height factor from p0 (shared by xy & xz planes)
    ty1 = tent_y(p1)        # height factor from p1 (yz plane)
    tx1 = tent_x(p1)        # width factor from p1 (xy plane)
    tx2 = tent_x(p2)        # width factor from p2 (shared by xz & yz planes)

    wm_xy = ty0 * tx1
    wm_xz = ty0 * tx2
    wm_yz = ty1 * tx2

    # Three accumulating matmuls against the row-blocks of the block-diagonal
    # plane slab -> feat = [f_xy | f_xz | f_yz] directly (no lane concat, no
    # wm_all materialization).
    feat = jnp.dot(wm_xy, planes_ref[0 * HW:1 * HW, :],
                   preferred_element_type=jnp.float32)
    feat = feat + jnp.dot(wm_xz, planes_ref[1 * HW:2 * HW, :],
                          preferred_element_type=jnp.float32)
    feat = feat + jnp.dot(wm_yz, planes_ref[2 * HW:3 * HW, :],
                          preferred_element_type=jnp.float32)           # [TN, 3C]

    # Fused MLPs:
    #   h1  = [relu(feat @ w_sdf0) | relu(feat @ w_rgb0)]
    #   h2  = [h_sdf               | relu(h_rgb @ w_rgb1)]   (relu idempotent)
    #   pre = [h_sdf @ w_sdf1      | h_rgb2 @ w_rgb2]        (block-diag head)
    h1 = jnp.maximum(jnp.dot(feat, w0_ref[...],
                             preferred_element_type=jnp.float32), 0.0)  # [TN,64]
    h2 = jnp.maximum(jnp.dot(h1, w1_ref[...],
                             preferred_element_type=jnp.float32), 0.0)  # [TN,64]
    pre = jnp.dot(h2, wh_ref[...],
                  preferred_element_type=jnp.float32)                   # [TN,4]

    dist = jnp.sqrt(pos[:, 0:1] * pos[:, 0:1]
                    + pos[:, 1:2] * pos[:, 1:2]
                    + pos[:, 2:3] * pos[:, 2:3])                        # [TN,1]
    sdf_all = jnp.tanh(pre) * (radius * 1.732 * 1.5) + (dist - 0.1 * radius)
    rgb_all = jax.nn.sigmoid(pre)
    col = jax.lax.broadcasted_iota(jnp.int32, (TN, 4), 1)
    out_ref[...] = jnp.where(col == 0, sdf_all, rgb_all).astype(out_ref.dtype)


def _prep_fused_operands(plane_xy, plane_xz, plane_yz, params):
    """Host-side (XLA) prep of the block-diagonal plane slab, fused weights and
    the (2, HW) lane-coordinate table."""
    C, H, W = plane_xy.shape[1:]
    HW = H * W

    def flat(p):   # [1,C,H,W] -> [HW, C], flat index = y*W + x
        return jnp.transpose(p[0], (1, 2, 0)).reshape(HW, C).astype(jnp.float32)

    # Block-diagonal plane slab [3*HW, 3*C]; row-block r only feeds column-block r.
    # (For large planes / v7x: drop the block-diag slab for three [HW,C] slabs,
    #  optionally bf16, and re-derive tiling -- this dense-wmat formulation is
    #  only appropriate for small planes.)
    planes_bd = jnp.zeros((3 * HW, 3 * C), jnp.float32)
    planes_bd = planes_bd.at[0 * HW:1 * HW, 0 * C:1 * C].set(flat(plane_xy))
    planes_bd = planes_bd.at[1 * HW:2 * HW, 1 * C:2 * C].set(flat(plane_xz))
    planes_bd = planes_bd.at[2 * HW:3 * HW, 2 * C:3 * C].set(flat(plane_yz))

    # Lane-coordinate table: row 0 = hw % W (x), row 1 = hw // W (y).
    hw = np.arange(HW, dtype=np.int64)
    coords = jnp.asarray(np.stack([hw % W, hw // W], axis=0), dtype=jnp.float32)

    ws0, ws1 = params["w_sdf0"], params["w_sdf1"]                  # [96,D], [D,1]
    wr0, wr1, wr2 = params["w_rgb0"], params["w_rgb1"], params["w_rgb2"]
    D = ws0.shape[1]

    w0_cat = jnp.concatenate([ws0, wr0], axis=1).astype(jnp.float32)   # [96, 2D]
    w1_big = jnp.zeros((2 * D, 2 * D), jnp.float32)
    w1_big = w1_big.at[:D, :D].set(jnp.eye(D, dtype=jnp.float32))
    w1_big = w1_big.at[D:, D:].set(wr1.astype(jnp.float32))
    w_head = jnp.zeros((2 * D, 4), jnp.float32)
    w_head = w_head.at[:D, 0:1].set(ws1.astype(jnp.float32))
    w_head = w_head.at[D:, 1:4].set(wr2.astype(jnp.float32))
    return planes_bd, coords, w0_cat, w1_big, w_head


def _round_up(x, m):
    return ((x + m - 1) // m) * m


def _pick_tile_n(N, tile_n):
    """Keep the grid at >= 2 steps when N allows it (the 'parallel' grid axis is
    sharded over v7x's two TensorCores); tiles stay multiples of 8 sublanes.
    On v6e/v5e (single TC) larger tiles for large N just amortize the per-step
    overhead, so the default 512 is also a fine choice there."""
    if N >= 2 * tile_n:
        return tile_n
    if N >= 16:
        return _round_up(_round_up(N, 2) // 2, 8)    # two roughly-equal tiles
    return _round_up(max(N, 1), 8)


def triplane_sdf_forward(positions, plane_xy, plane_xz, plane_yz, params,
                         radius=RADIUS, tile_n=512):
    """positions [N,3]; plane_* [1,C,H,W] (NCHW); returns [N,4] = concat(sdf, rgb)."""
    N = positions.shape[0]
    C, H, W = plane_xy.shape[1:]
    HW = H * W

    planes_bd, coords, w0_cat, w1_big, w_head = _prep_fused_operands(
        plane_xy, plane_xz, plane_yz, params)

    tile_n = _pick_tile_n(N, tile_n)
    pad = (-N) % tile_n
    pos_p = positions if pad == 0 else jnp.concatenate(
        [positions, jnp.zeros((pad, 3), positions.dtype)], axis=0)
    n_pad = N + pad

    kernel = functools.partial(_triplane_kernel, radius=radius, H=H, W=W)
    invariant = lambda shape: pl.BlockSpec(shape, lambda i: (0, 0))

    out = pl.pallas_call(
        kernel,
        out_shape=jax.ShapeDtypeStruct((n_pad, 4), jnp.float32),
        grid=(n_pad // tile_n,),
        in_specs=[
            pl.BlockSpec((tile_n, 3), lambda i: (i, 0)),   # positions (tiled)
            invariant((2, HW)),                            # lane-coordinate table
            invariant((3 * HW, 3 * C)),                    # block-diag plane slab
            invariant(w0_cat.shape),                       # [96, 64]
            invariant(w1_big.shape),                       # [64, 64]
            invariant(w_head.shape),                       # [64, 4]
        ],
        out_specs=pl.BlockSpec((tile_n, 4), lambda i: (i, 0)),
        compiler_params=pltpu.CompilerParams(
            dimension_semantics=("parallel",),
            vmem_limit_bytes=32 * 1024 * 1024),
    )(pos_p, coords, planes_bd, w0_cat, w1_big, w_head)
    return out[:N]


# ------------------------- pure-JAX reference (for checking) -------------------------
def _grid_sample_ref(plane_chw, gy, gx):
    C, H, W = plane_chw.shape
    x = jnp.clip((gx + 1.0) * 0.5 * (W - 1), 0.0, W - 1.0)
    y = jnp.clip((gy + 1.0) * 0.5 * (H - 1), 0.0, H - 1.0)
    x0 = jnp.floor(x); y0 = jnp.floor(y)
    wx = x - x0; wy = y - y0
    x0i = x0.astype(jnp.int32); x1i = jnp.minimum(x0i + 1, W - 1)
    y0i = y0.astype(jnp.int32); y1i = jnp.minimum(y0i + 1, H - 1)
    g = lambda yi, xi: plane_chw[:, yi, xi].T  # [N, C]
    return (g(y0i, x0i) * ((1 - wy) * (1 - wx))[:, None]
            + g(y0i, x1i) * ((1 - wy) * wx)[:, None]
            + g(y1i, x0i) * (wy * (1 - wx))[:, None]
            + g(y1i, x1i) * (wy * wx)[:, None])


def reference_forward(positions, plane_xy, plane_xz, plane_yz, params, radius=RADIUS):
    hp = jax.lax.Precision.HIGHEST
    p0 = positions[:, 0] / radius
    p1 = positions[:, 1] / radius
    p2 = positions[:, 2] / radius
    f_xy = _grid_sample_ref(plane_xy[0], p0, p1)
    f_xz = _grid_sample_ref(plane_xz[0], p0, p2)
    f_yz = _grid_sample_ref(plane_yz[0], p1, p2)
    feat = jnp.concatenate([f_xy, f_xz, f_yz], axis=-1)

    h = jnp.maximum(jnp.dot(feat, params["w_sdf0"], precision=hp), 0.0)
    sdf = jnp.dot(h, params["w_sdf1"], precision=hp)
    sdf = jnp.tanh(sdf) * (radius * 1.732 * 1.5)
    sdf = sdf + (jnp.sqrt(jnp.sum(positions * positions, axis=-1, keepdims=True))
                 - 0.1 * radius)

    h = jnp.maximum(jnp.dot(feat, params["w_rgb0"], precision=hp), 0.0)
    h = jnp.maximum(jnp.dot(h, params["w_rgb1"], precision=hp), 0.0)
    rgb = jax.nn.sigmoid(jnp.dot(h, params["w_rgb2"], precision=hp))
    return jnp.concatenate([sdf, rgb], axis=-1)


def _xavier_uniform(key, fan_in, fan_out, gain=0.25):
    bound = gain * np.sqrt(6.0 / (fan_in + fan_out))
    return jax.random.uniform(key, (fan_in, fan_out), jnp.float32, -bound, bound)


if __name__ == "__main__":
    key = jax.random.PRNGKey(0)
    keys = jax.random.split(key, 9)

    N, C, H, W = 1024, INPUT_DIM // 3, 16, 16
    positions = jax.random.uniform(keys[0], (N, 3), jnp.float32, -0.6, 0.6)
    plane_xy = jax.random.normal(keys[1], (1, C, H, W), jnp.float32)
    plane_xz = jax.random.normal(keys[2], (1, C, H, W), jnp.float32)
    plane_yz = jax.random.normal(keys[3], (1, C, H, W), jnp.float32)

    # Weights stored as [in, out] (transposed torch nn.Linear layout), bias=False.
    params = {
        "w_sdf0": _xavier_uniform(keys[4], INPUT_DIM, DIM),
        "w_sdf1": _xavier_uniform(keys[5], DIM, 1),
        "w_rgb0": _xavier_uniform(keys[6], INPUT_DIM, DIM),
        "w_rgb1": _xavier_uniform(keys[7], DIM, DIM),
        "w_rgb2": _xavier_uniform(keys[8], DIM, 3),
    }

    out = triplane_sdf_forward(positions, plane_xy, plane_xz, plane_yz, params)
    out = jax.block_until_ready(out)

    ref = reference_forward(positions, plane_xy, plane_xz, plane_yz, params)
    assert out.shape == (N, 4) and out.dtype == jnp.float32
    np.testing.assert_allclose(np.asarray(out), np.asarray(ref), rtol=1e-4, atol=1e-4)

    print("KERNEL_OK")
</pallas_src>

<mosaic_0001>
module attributes {stable_mosaic.version = 11 : i64} {
  func.func @_triplane_kernel(%arg0: i32, %arg1: memref<512x3xf32, #tpu.memory_space<vmem>>, %arg2: memref<2x256xf32, #tpu.memory_space<vmem>>, %arg3: memref<768x96xf32, #tpu.memory_space<vmem>>, %arg4: memref<96x64xf32, #tpu.memory_space<vmem>>, %arg5: memref<64x64xf32, #tpu.memory_space<vmem>>, %arg6: memref<64x4xf32, #tpu.memory_space<vmem>>, %arg7: memref<512x4xf32, #tpu.memory_space<vmem>>) attributes {dimension_semantics = [#tpu.dimension_semantics<parallel>], iteration_bounds = array<i64: 2>, scalar_prefetch = 0 : i64, scratch_operands = 0 : i64, tpu.core_type = #tpu.core_type<tc>, window_params = [{transform_indices = @transform_0, window_bounds = array<i64: 512, 3>}, {pipeline_mode = #tpu.pipeline_mode<synchronous>, transform_indices = @transform_1, window_bounds = array<i64: 2, 256>}, {pipeline_mode = #tpu.pipeline_mode<synchronous>, transform_indices = @transform_2, window_bounds = array<i64: 768, 96>}, {pipeline_mode = #tpu.pipeline_mode<synchronous>, transform_indices = @transform_3, window_bounds = array<i64: 96, 64>}, {pipeline_mode = #tpu.pipeline_mode<synchronous>, transform_indices = @transform_4, window_bounds = array<i64: 64, 64>}, {pipeline_mode = #tpu.pipeline_mode<synchronous>, transform_indices = @transform_5, window_bounds = array<i64: 64, 4>}, {transform_indices = @transform_6, window_bounds = array<i64: 512, 4>}]} {
    %c0 = arith.constant 0 : index
    %c0_0 = arith.constant 0 : index
    %0 = vector.load %arg1[%c0, %c0_0] : memref<512x3xf32, #tpu.memory_space<vmem>>, vector<512x3xf32>
    %1 = vector.extract_strided_slice %0 {offsets = [0, 0], sizes = [512, 1], strides = [1, 1]} : vector<512x3xf32> to vector<512x1xf32>
    %cst = arith.constant 2.000000e+00 : f32
    %2 = vector.broadcast %cst : f32 to vector<512x1xf32>
    %3 = arith.mulf %1, %2 : vector<512x1xf32>
    %4 = vector.extract_strided_slice %0 {offsets = [0, 1], sizes = [512, 1], strides = [1, 1]} : vector<512x3xf32> to vector<512x1xf32>
    %cst_1 = arith.constant 2.000000e+00 : f32
    %5 = vector.broadcast %cst_1 : f32 to vector<512x1xf32>
    %6 = arith.mulf %4, %5 : vector<512x1xf32>
    %7 = vector.extract_strided_slice %0 {offsets = [0, 2], sizes = [512, 1], strides = [1, 1]} : vector<512x3xf32> to vector<512x1xf32>
    %cst_2 = arith.constant 2.000000e+00 : f32
    %8 = vector.broadcast %cst_2 : f32 to vector<512x1xf32>
    %9 = arith.mulf %7, %8 : vector<512x1xf32>
    %c0_3 = arith.constant 0 : index
    %c0_4 = arith.constant 0 : index
    %10 = vector.load %arg2[%c0_3, %c0_4] : memref<2x256xf32, #tpu.memory_space<vmem>>, vector<2x256xf32>
    %11 = vector.extract_strided_slice %10 {offsets = [0, 0], sizes = [1, 256], strides = [1, 1]} : vector<2x256xf32> to vector<1x256xf32>
    %12 = vector.extract_strided_slice %10 {offsets = [1, 0], sizes = [1, 256], strides = [1, 1]} : vector<2x256xf32> to vector<1x256xf32>
    %cst_5 = arith.constant 1.000000e+00 : f32
    %13 = vector.broadcast %cst_5 : f32 to vector<512x1xf32>
    %14 = arith.addf %3, %13 : vector<512x1xf32>
    %cst_6 = arith.constant 7.500000e+00 : f32
    %15 = vector.broadcast %cst_6 : f32 to vector<512x1xf32>
    %16 = arith.mulf %14, %15 : vector<512x1xf32>
    %cst_7 = arith.constant 0.000000e+00 : f32
    %cst_8 = arith.constant 1.500000e+01 : f32
    %17 = vector.broadcast %cst_7 : f32 to vector<512x1xf32>
    %18 = arith.maximumf %17, %16 : vector<512x1xf32>
    %19 = vector.broadcast %cst_8 : f32 to vector<512x1xf32>
    %20 = arith.minimumf %19, %18 : vector<512x1xf32>
    %21 = vector.broadcast %12 : vector<1x256xf32> to vector<512x256xf32>
    %22 = vector.broadcast %20 : vector<512x1xf32> to vector<512x256xf32>
    %23 = arith.subf %21, %22 : vector<512x256xf32>
    %24 = math.absf %23 : vector<512x256xf32>
    %cst_9 = arith.constant 1.000000e+00 : f32
    %25 = vector.broadcast %cst_9 : f32 to vector<512x256xf32>
    %26 = arith.subf %25, %24 : vector<512x256xf32>
    %cst_10 = arith.constant 0.000000e+00 : f32
    %27 = vector.broadcast %cst_10 : f32 to vector<512x256xf32>
    %28 = arith.maximumf %26, %27 : vector<512x256xf32>
    %cst_11 = arith.constant 1.000000e+00 : f32
    %29 = vector.broadcast %cst_11 : f32 to vector<512x1xf32>
    %30 = arith.addf %6, %29 : vector<512x1xf32>
    %cst_12 = arith.constant 7.500000e+00 : f32
    %31 = vector.broadcast %cst_12 : f32 to vector<512x1xf32>
    %32 = arith.mulf %30, %31 : vector<512x1xf32>
    %cst_13 = arith.constant 0.000000e+00 : f32
    %cst_14 = arith.constant 1.500000e+01 : f32
    %33 = vector.broadcast %cst_13 : f32 to vector<512x1xf32>
    %34 = arith.maximumf %33, %32 : vector<512x1xf32>
    %35 = vector.broadcast %cst_14 : f32 to vector<512x1xf32>
    %36 = arith.minimumf %35, %34 : vector<512x1xf32>
    %37 = vector.broadcast %12 : vector<1x256xf32> to vector<512x256xf32>
    %38 = vector.broadcast %36 : vector<512x1xf32> to vector<512x256xf32>
    %39 = arith.subf %37, %38 : vector<512x256xf32>
    %40 = math.absf %39 : vector<512x256xf32>
    %cst_15 = arith.constant 1.000000e+00 : f32
    %41 = vector.broadcast %cst_15 : f32 to vector<512x256xf32>
    %42 = arith.subf %41, %40 : vector<512x256xf32>
    %cst_16 = arith.constant 0.000000e+00 : f32
    %43 = vector.broadcast %cst_16 : f32 to vector<512x256xf32>
    %44 = arith.maximumf %42, %43 : vector<512x256xf32>
    %cst_17 = arith.constant 1.000000e+00 : f32
    %45 = vector.broadcast %cst_17 : f32 to vector<512x1xf32>
    %46 = arith.addf %6, %45 : vector<512x1xf32>
    %cst_18 = arith.constant 7.500000e+00 : f32
    %47 = vector.broadcast %cst_18 : f32 to vector<512x1xf32>
    %48 = arith.mulf %46, %47 : vector<512x1xf32>
    %cst_19 = arith.constant 0.000000e+00 : f32
    %cst_20 = arith.constant 1.500000e+01 : f32
    %49 = vector.broadcast %cst_19 : f32 to vector<512x1xf32>
    %50 = arith.maximumf %49, %48 : vector<512x1xf32>
    %51 = vector.broadcast %cst_20 : f32 to vector<512x1xf32>
    %52 = arith.minimumf %51, %50 : vector<512x1xf32>
    %53 = vector.broadcast %11 : vector<1x256xf32> to vector<512x256xf32>
    %54 = vector.broadcast %52 : vector<512x1xf32> to vector<512x256xf32>
    %55 = arith.subf %53, %54 : vector<512x256xf32>
    %56 = math.absf %55 : vector<512x256xf32>
    %cst_21 = arith.constant 1.000000e+00 : f32
    %57 = vector.broadcast %cst_21 : f32 to vector<512x256xf32>
    %58 = arith.subf %57, %56 : vector<512x256xf32>
    %cst_22 = arith.constant 0.000000e+00 : f32
    %59 = vector.broadcast %cst_22 : f32 to vector<512x256xf32>
    %60 = arith.maximumf %58, %59 : vector<512x256xf32>
    %cst_23 = arith.constant 1.000000e+00 : f32
    %61 = vector.broadcast %cst_23 : f32 to vector<512x1xf32>
    %62 = arith.addf %9, %61 : vector<512x1xf32>
    %cst_24 = arith.constant 7.500000e+00 : f32
    %63 = vector.broadcast %cst_24 : f32 to vector<512x1xf32>
    %64 = arith.mulf %62, %63 : vector<512x1xf32>
    %cst_25 = arith.constant 0.000000e+00 : f32
    %cst_26 = arith.constant 1.500000e+01 : f32
    %65 = vector.broadcast %cst_25 : f32 to vector<512x1xf32>
    %66 = arith.maximumf %65, %64 : vector<512x1xf32>
    %67 = vector.broadcast %cst_26 : f32 to vector<512x1xf32>
    %68 = arith.minimumf %67, %66 : vector<512x1xf32>
    %69 = vector.broadcast %11 : vector<1x256xf32> to vector<512x256xf32>
    %70 = vector.broadcast %68 : vector<512x1xf32> to vector<512x256xf32>
    %71 = arith.subf %69, %70 : vector<512x256xf32>
    %72 = math.absf %71 : vector<512x256xf32>
    %cst_27 = arith.constant 1.000000e+00 : f32
    %73 = vector.broadcast %cst_27 : f32 to vector<512x256xf32>
    %74 = arith.subf %73, %72 : vector<512x256xf32>
    %cst_28 = arith.constant 0.000000e+00 : f32
    %75 = vector.broadcast %cst_28 : f32 to vector<512x256xf32>
    %76 = arith.maximumf %74, %75 : vector<512x256xf32>
    %77 = arith.mulf %28, %60 : vector<512x256xf32>
    %78 = arith.mulf %28, %76 : vector<512x256xf32>
    %79 = arith.mulf %44, %76 : vector<512x256xf32>
    %c0_29 = arith.constant 0 : index
    %c0_30 = arith.constant 0 : index
    %80 = vector.load %arg3[%c0_29, %c0_30] : memref<768x96xf32, #tpu.memory_space<vmem>>, vector<256x96xf32>
    %cst_31 = arith.constant dense<0.000000e+00> : vector<512x96xf32>
    %81 = tpu.matmul %77, %80, %cst_31 {dimension_numbers = #tpu.dot_dimension_numbers<[1], [0], [0], [1], [0, 0, 1, 1], [], []>} : vector<512x256xf32>, vector<256x96xf32>, vector<512x96xf32> -> vector<512x96xf32>
    %c256 = arith.constant 256 : index
    %c0_32 = arith.constant 0 : index
    %82 = vector.load %arg3[%c256, %c0_32] : memref<768x96xf32, #tpu.memory_space<vmem>>, vector<256x96xf32>
    %cst_33 = arith.constant dense<0.000000e+00> : vector<512x96xf32>
    %83 = tpu.matmul %78, %82, %cst_33 {dimension_numbers = #tpu.dot_dimension_numbers<[1], [0], [0], [1], [0, 0, 1, 1], [], []>} : vector<512x256xf32>, vector<256x96xf32>, vector<512x96xf32> -> vector<512x96xf32>
    %84 = arith.addf %81, %83 : vector<512x96xf32>
    %c512 = arith.constant 512 : index
    %c0_34 = arith.constant 0 : index
    %85 = vector.load %arg3[%c512, %c0_34] : memref<768x96xf32, #tpu.memory_space<vmem>>, vector<256x96xf32>
    %cst_35 = arith.constant dense<0.000000e+00> : vector<512x96xf32>
    %86 = tpu.matmul %79, %85, %cst_35 {dimension_numbers = #tpu.dot_dimension_numbers<[1], [0], [0], [1], [0, 0, 1, 1], [], []>} : vector<512x256xf32>, vector<256x96xf32>, vector<512x96xf32> -> vector<512x96xf32>
    %87 = arith.addf %84, %86 : vector<512x96xf32>
    %c0_36 = arith.constant 0 : index
    %c0_37 = arith.constant 0 : index
    %88 = vector.load %arg4[%c0_36, %c0_37] : memref<96x64xf32, #tpu.memory_space<vmem>>, vector<96x64xf32>
    %cst_38 = arith.constant dense<0.000000e+00> : vector<512x64xf32>
    %89 = tpu.matmul %87, %88, %cst_38 {dimension_numbers = #tpu.dot_dimension_numbers<[1], [0], [0], [1], [0, 0, 1, 1], [], []>} : vector<512x96xf32>, vector<96x64xf32>, vector<512x64xf32> -> vector<512x64xf32>
    %cst_39 = arith.constant 0.000000e+00 : f32
    %90 = vector.broadcast %cst_39 : f32 to vector<512x64xf32>
    %91 = arith.maximumf %89, %90 : vector<512x64xf32>
    %c0_40 = arith.constant 0 : index
    %c0_41 = arith.constant 0 : index
    %92 = vector.load %arg5[%c0_40, %c0_41] : memref<64x64xf32, #tpu.memory_space<vmem>>, vector<64x64xf32>
    %cst_42 = arith.constant dense<0.000000e+00> : vector<512x64xf32>
    %93 = tpu.matmul %91, %92, %cst_42 {dimension_numbers = #tpu.dot_dimension_numbers<[1], [0], [0], [1], [0, 0, 1, 1], [], []>} : vector<512x64xf32>, vector<64x64xf32>, vector<512x64xf32> -> vector<512x64xf32>
    %cst_43 = arith.constant 0.000000e+00 : f32
    %94 = vector.broadcast %cst_43 : f32 to vector<512x64xf32>
    %95 = arith.maximumf %93, %94 : vector<512x64xf32>
    %c0_44 = arith.constant 0 : index
    %c0_45 = arith.constant 0 : index
    %96 = vector.load %arg6[%c0_44, %c0_45] : memref<64x4xf32, #tpu.memory_space<vmem>>, vector<64x4xf32>
    %cst_46 = arith.constant dense<0.000000e+00> : vector<512x4xf32>
    %97 = tpu.matmul %95, %96, %cst_46 {dimension_numbers = #tpu.dot_dimension_numbers<[1], [0], [0], [1], [0, 0, 1, 1], [], []>} : vector<512x64xf32>, vector<64x4xf32>, vector<512x4xf32> -> vector<512x4xf32>
    %98 = vector.extract_strided_slice %0 {offsets = [0, 0], sizes = [512, 1], strides = [1, 1]} : vector<512x3xf32> to vector<512x1xf32>
    %99 = vector.extract_strided_slice %0 {offsets = [0, 0], sizes = [512, 1], strides = [1, 1]} : vector<512x3xf32> to vector<512x1xf32>
    %100 = arith.mulf %98, %99 : vector<512x1xf32>
    %101 = vector.extract_strided_slice %0 {offsets = [0, 1], sizes = [512, 1], strides = [1, 1]} : vector<512x3xf32> to vector<512x1xf32>
    %102 = vector.extract_strided_slice %0 {offsets = [0, 1], sizes = [512, 1], strides = [1, 1]} : vector<512x3xf32> to vector<512x1xf32>
    %103 = arith.mulf %101, %102 : vector<512x1xf32>
    %104 = arith.addf %100, %103 : vector<512x1xf32>
    %105 = vector.extract_strided_slice %0 {offsets = [0, 2], sizes = [512, 1], strides = [1, 1]} : vector<512x3xf32> to vector<512x1xf32>
    %106 = vector.extract_strided_slice %0 {offsets = [0, 2], sizes = [512, 1], strides = [1, 1]} : vector<512x3xf32> to vector<512x1xf32>
    %107 = arith.mulf %105, %106 : vector<512x1xf32>
    %108 = arith.addf %104, %107 : vector<512x1xf32>
    %109 = math.sqrt %108 : vector<512x1xf32>
    %110 = math.tanh %97 : vector<512x4xf32>
    %cst_47 = arith.constant 1.299000e+00 : f32
    %111 = vector.broadcast %cst_47 : f32 to vector<512x4xf32>
    %112 = arith.mulf %110, %111 : vector<512x4xf32>
    %cst_48 = arith.constant 5.000000e-02 : f32
    %113 = vector.broadcast %cst_48 : f32 to vector<512x1xf32>
    %114 = arith.subf %109, %113 : vector<512x1xf32>
    %115 = vector.broadcast %114 : vector<512x1xf32> to vector<512x4xf32>
    %116 = arith.addf %112, %115 : vector<512x4xf32>
    %117 = arith.negf %97 : vector<512x4xf32>
    %118 = math.exp %117 : vector<512x4xf32>
    %cst_49 = arith.constant 1.000000e+00 : f32
    %119 = vector.broadcast %cst_49 : f32 to vector<512x4xf32>
    %120 = arith.addf %119, %118 : vector<512x4xf32>
    %121 = arith.divf %119, %120 : vector<512x4xf32>
    %122 = tpu.iota {dimensions = array<i32: 1>} : vector<512x4xi32>
    %c0_i32 = arith.constant 0 : i32
    %123 = vector.broadcast %c0_i32 : i32 to vector<512x4xi32>
    %124 = arith.cmpi eq, %122, %123 : vector<512x4xi32>
    %125 = arith.select %124, %116, %121 : vector<512x4xi1>, vector<512x4xf32>
    %c0_50 = arith.constant 0 : index
    %c0_51 = arith.constant 0 : index
    %126 = vector.load %arg7[%c0_50, %c0_51] : memref<512x4xf32, #tpu.memory_space<vmem>>, vector<512x4xf32>
    tpu.vector_store %arg7[%c0_50, %c0_51], %125 {strides = array<i32>} : memref<512x4xf32, #tpu.memory_space<vmem>>, vector<512x4xf32>,
    return
  }
  func.func @transform_0(%arg0: i32) -> (i32, i32) {
    %c0_i32 = arith.constant 0 : i32
    %c0_i32_0 = arith.constant 0 : i32
    return %arg0, %c0_i32 : i32, i32
  }
  func.func @transform_1(%arg0: i32) -> (i32, i32) {
    %c0_i32 = arith.constant 0 : i32
    %c0_i32_0 = arith.constant 0 : i32
    %c0_i32_1 = arith.constant 0 : i32
    return %c0_i32, %c0_i32_0 : i32, i32
  }
  func.func @transform_2(%arg0: i32) -> (i32, i32) {
    %c0_i32 = arith.constant 0 : i32
    %c0_i32_0 = arith.constant 0 : i32
    %c0_i32_1 = arith.constant 0 : i32
    return %c0_i32, %c0_i32_0 : i32, i32
  }
  func.func @transform_3(%arg0: i32) -> (i32, i32) {
    %c0_i32 = arith.constant 0 : i32
    %c0_i32_0 = arith.constant 0 : i32
    %c0_i32_1 = arith.constant 0 : i32
    return %c0_i32, %c0_i32_0 : i32, i32
  }
  func.func @transform_4(%arg0: i32) -> (i32, i32) {
    %c0_i32 = arith.constant 0 : i32
    %c0_i32_0 = arith.constant 0 : i32
    %c0_i32_1 = arith.constant 0 : i32
    return %c0_i32, %c0_i32_0 : i32, i32
  }
  func.func @transform_5(%arg0: i32) -> (i32, i32) {
    %c0_i32 = arith.constant 0 : i32
    %c0_i32_0 = arith.constant 0 : i32
    %c0_i32_1 = arith.constant 0 : i32
    return %c0_i32, %c0_i32_0 : i32, i32
  }
  func.func @transform_6(%arg0: i32) -> (i32, i32) {
    %c0_i32 = arith.constant 0 : i32
    %c0_i32_0 = arith.constant 0 : i32
    return %arg0, %c0_i32 : i32, i32
  }
}

</mosaic_0001>

<bundles_post_ra>
// kernel: tpu_custom_call.1
= control target key start
LH: loop header
LB: loop body
LE: loop exit
PB: predicated region body
PF: predicated region fallthrough
CT: control target
= control target key end

     0   :  { %s11416_s21 = smov 0   ;;  %s17001_s0 = inlined_call_operand.vmem [shape: f32[1024,3], index: 0, kind: input, shape index: {}]   ;;  %s17002_s1 = inlined_call_operand.vmem [shape: f32[2,256], index: 1, kind: input, shape index: {}]   ;;  %s17003_s2 = inlined_call_operand.vmem [shape: f32[768,96], index: 2, kind: input, shape index: {}]   ;;  %s17004_s3 = inlined_call_operand.vmem [shape: f32[96,64], index: 3, kind: input, shape index: {}]   ;;  %s17005_s4 = inlined_call_operand.vmem [shape: f32[64,64], index: 4, kind: input, shape index: {}]   ;;  %s17006_s5 = inlined_call_operand.vmem [shape: f32[64,4], index: 5, kind: input, shape index: {}]   ;;  %s17007_s6 = inlined_call_operand.vmem [shape: f32[1024,4], index: 6, kind: output, shape index: {}]  }
   0x1 LB: > { %s9381_s22 = sadd.s32 4294967295, %s11373_s21   ;;  %p9385_p0 = scmp.ge.s32.totalorder %s11373_s21, 1  ;;  %s11373_s21 = sphi %s11416_s21, %s16_s21  }
   0x2   : > { %p213_p1 = scmp.lt.s32.totalorder %s11373_s21, 3 }
   0x4   : > { %p214_p2 = pnand %p9385_p0, %p213_p1 }
   0x6   : > { %217 = sbr.rel (%p214_p2) target bundleno = 1732 (0x6c4), region = 44 }
   0xd   : > { %s9386_s23 = sshll.u32 %s9381_s22, 6  ;;  %v3973_v0 = vld [vmem:[%s17003_s2 + $0x100] sm:$0xff]  ;;  %v17015_v1 = vmov 0   ;;  %v3974_v2 = vld [vmem:[%s17003_s2 + $0x108] sm:$0xff]  ;;  %v3975_v3 = vld [vmem:[%s17003_s2 + $0x110] sm:$0xff]  ;;  %v17011_v5 = vmov 0.0|0.0  }
   0xe   : > { %10732 = vset.pattern.permute.xlu1 %v17015_v1  ;;  %10730 = vset.pattern.permute.xlu0 %v17015_v1  ;;  %p244_p3 = scmp.lt.s32.totalorder %s9386_s23, 127  ;;  %v3976_v4 = vld [vmem:[%s17003_s2 + $0x118] sm:$0xff]  ;;  %v10277_v6 = vpack.c.bf16 %v3974_v2, %v3973_v0  ;;  %v3977_v8 = vld [vmem:[%s17003_s2 + $0x120] sm:$0xff]  ;;  %v3978_v9 = vld [vmem:[%s17003_s2 + $0x128] sm:$0xff]  ;;  %v17009_v49 = vmov 2   ;;  %vm5268_vm0 = vcmask 785408  }
   0xf   : > { %10276 = vmatprep.subr.bf16.mxu0 %v17011_v5  ;;  %10476 = vmatprep.subr.bf16.mxu1 %v17011_v5  ;;  %v10280_v7 = vpack.c.bf16 %v3976_v4, %v3975_v3  ;;  %v10283_v17 = vpack.c.bf16 %v3978_v9, %v3977_v8  ;;  %v3979_v18 = vld [vmem:[%s17003_s2 + $0x130] sm:$0xff]  ;;  %v3980_v19 = vld [vmem:[%s17003_s2 + $0x138] sm:$0xff]  ;;  %v3981_v28 = vld [vmem:[%s17003_s2 + $0x140] sm:$0xff]  ;;  %s11379_s18 = smov 127   ;;  %vm5918_vm1 = vcmask 523264   ;;  %s11380_s19 = smov 126  }
  0x10   : > { %s18310_s23 = smov (!%p244_p3, %s9386_s23), 127  ;;  %10278 = vmatpush1.bf16.msra.mxu0 %v10277_v6  ;;  %10492 = vmatpush1.bf16.msra.mxu1 %v10277_v6  ;;  %v10286_v27 = vpack.c.bf16 %v3980_v19, %v3979_v18  ;;  %v3982_v29 = vld [vmem:[%s17003_s2 + $0x148] sm:$0xff]  ;;  %v3983_v39 = vld [vmem:[%s17003_s2 + $0x150] sm:$0xff]  ;;  %v3984_v40 = vld [vmem:[%s17003_s2 + $0x158] sm:$0xff] }
  0x11   : > { %s9387_s8 = sshll.u32 %s18310_s23, 3  ;;  %10279 = vmatprep.subr.bf16.mxu0 %v17011_v5  ;;  %10477 = vmatprep.subr.bf16.mxu1 %v17011_v5  ;;  %v10289_v38 = vpack.c.bf16 %v3982_v29, %v3981_v28  ;;  %v10292_v46 = vpack.c.bf16 %v3984_v40, %v3983_v39  ;;  %v3985_v47 = vld [vmem:[%s17003_s2 + $0x160] sm:$0xff]  ;;  %v3986_v48 = vld [vmem:[%s17003_s2 + $0x168] sm:$0xff]  ;;  %v3987_v57 = vld [vmem:[%s17003_s2 + $0x170] sm:$0xff] }
  0x12   : > { %s11456_s15 = scalar_lea.vmem %s17001_s0, %s9387_s8  ;;  %v10295_v56 = vpack.c.bf16 %v3986_v48, %v3985_v47  ;;  %v3988_v58 = vld [vmem:[%s17003_s2 + $0x178] sm:$0xff]  ;;  %v3989_v3 = vld [vmem:[%s17003_s2 + $0x180] sm:$0xff]  ;;  %v3990_v4 = vld [vmem:[%s17003_s2 + $0x188] sm:$0xff]  ;;  %s16677_s17 = scalar_lea.vmem %s17007_s6, %s9387_s8 }
  0x13   : > { %v256_v10 = vld [vmem:[%s11456_s15 + $0x8] sm:$0xff]  ;;  %v255_v11 = vld [vmem:[%s11456_s15] sm:$0xff]  ;;  %v257_v12 = vld [vmem:[%s11456_s15 + $0x10] sm:$0xff]  ;;  %v10298_v2 = vpack.c.bf16 %v3988_v58, %v3987_v57 }
  0x14   : > { %v320_v13 = vmul.f32 2.0, %v256_v10  ;;  %v319_v14 = vmul.f32 2.0, %v255_v11  ;;  %v321_v15 = vmul.f32 2.0, %v257_v12  ;;  %v258_v16 = vld [vmem:[%s11456_s15 + $0x18] sm:$0xff]  ;;  %10281 = vmatpush1.bf16.msra.mxu0 %v10280_v7  ;;  %10493 = vmatpush1.bf16.msra.mxu1 %v10280_v7  ;;  %v259_v26 = vld [vmem:[%s11456_s15 + $0x20] sm:$0xff]  ;;  %v260_v37 = vld [vmem:[%s11456_s15 + $0x28] sm:$0xff]  ;;  %v10301_v12 = vpack.c.bf16 %v3990_v4, %v3989_v3 }
  0x15   : > { %10282 = vmatprep.subr.bf16.mxu0 %v17011_v5  ;;  %10478 = vmatprep.subr.bf16.mxu1 %v17011_v5  ;;  %v322_v23 = vmul.f32 2.0, %v258_v16  ;;  %v323_v34 = vmul.f32 2.0, %v259_v26  ;;  %v324_v44 = vmul.f32 2.0, %v260_v37  ;;  %v261_v45 = vld [vmem:[%s11456_s15 + $0x30] sm:$0xff]  ;;  %v262_v55 = vld [vmem:[%s11456_s15 + $0x38] sm:$0xff]  ;;  %v263_v0 = vld [vmem:[%s11456_s15 + $0x40] sm:$0xff] }
  0x16   : > { %v385_v20 = vadd.f32 1.0, %v320_v13  ;;  %v384_v21 = vadd.f32 1.0, %v319_v14  ;;  %v386_v22 = vadd.f32 1.0, %v321_v15  ;;  %v325_v50 = vmul.f32 2.0, %v261_v45  ;;  %v264_v11 = vld [vmem:[%s11456_s15 + $0x48] sm:$0xff]  ;;  %v3991_v13 = vld [vmem:[%s17003_s2 + $0x190] sm:$0xff] }
  0x17   : > { %v387_v33 = vadd.f32 1.0, %v322_v23  ;;  %v388_v43 = vadd.f32 1.0, %v323_v34  ;;  %v389_v54 = vadd.f32 1.0, %v324_v44  ;;  %v326_v59 = vmul.f32 2.0, %v262_v55  ;;  %v3992_v14 = vld [vmem:[%s17003_s2 + $0x198] sm:$0xff]  ;;  %v3994_v23 = vld [vmem:[%s17003_s2 + $0x1a8] sm:$0xff] }
  0x18   : > { %v449_v24 = vmul.f32 7.5, %v385_v20  ;;  %v448_v25 = vmul.f32 7.5, %v384_v21  ;;  %10284 = vmatpush1.bf16.msra.mxu0 %v10283_v17  ;;  %10494 = vmatpush1.bf16.msra.mxu1 %v10283_v17  ;;  %v450_v32 = vmul.f32 7.5, %v386_v22  ;;  %v390_v63 = vadd.f32 1.0, %v325_v50  ;;  %v265_v20 = vld [vmem:[%s11456_s15 + $0x50] sm:$0xff]  ;;  %v3993_v22 = vld [vmem:[%s17003_s2 + $0x1a0] sm:$0xff] }
  0x19   : > { %10285 = vmatprep.subr.bf16.mxu0 %v17011_v5  ;;  %10479 = vmatprep.subr.bf16.mxu1 %v17011_v5  ;;  %v451_v42 = vmul.f32 7.5, %v387_v33  ;;  %v452_v53 = vmul.f32 7.5, %v388_v43  ;;  %v453_v62 = vmul.f32 7.5, %v389_v54  ;;  %v391_v6 = vadd.f32 1.0, %v326_v59  ;;  %v266_v29 = vld [vmem:[%s11456_s15 + $0x58] sm:$0xff]  ;;  %v267_v40 = vld [vmem:[%s11456_s15 + $0x60] sm:$0xff] }
  0x1a   : > { %v513_v30 = vmax.f32 %v449_v24, 0.0  ;;  %v512_v31 = vmax.f32 %v448_v25, 0.0  ;;  %v514_v41 = vmax.f32 %v450_v32, 0.0  ;;  %v454_v9 = vmul.f32 7.5, %v390_v63  ;;  %v3996_v32 = vld [vmem:[%s17003_s2 + $0x1b8] sm:$0xff]  ;;  %v3998_v43 = vld [vmem:[%s17003_s2 + $0x1c8] sm:$0xff] }
  0x1b   : > { %v515_v52 = vmax.f32 %v451_v42, 0.0  ;;  %v516_v61 = vmax.f32 %v452_v53, 0.0  ;;  %v517_v8 = vmax.f32 %v453_v62, 0.0  ;;  %v327_v10 = vmul.f32 2.0, %v263_v0  ;;  %v3997_v42 = vld [vmem:[%s17003_s2 + $0x1c0] sm:$0xff]  ;;  %v268_v50 = vld [vmem:[%s11456_s15 + $0x68] sm:$0xff] }
  0x1c   : > { %v11479_v35 = vmin.f32 %v513_v30, 15.0  ;;  %v11481_v36 = vmin.f32 %v512_v31, 15.0  ;;  %10287 = vmatpush1.bf16.msra.mxu0 %v10286_v27  ;;  %10495 = vmatpush1.bf16.msra.mxu1 %v10286_v27  ;;  %v11507_v51 = vmin.f32 %v514_v41, 15.0  ;;  %v455_v15 = vmul.f32 7.5, %v391_v6  ;;  %v3995_v31 = vld [vmem:[%s17003_s2 + $0x1b0] sm:$0xff]  ;;  %v4000_v54 = vld [vmem:[%s17003_s2 + $0x1d8] sm:$0xff] }
  0x1d   : > { %10288 = vmatprep.subr.bf16.mxu0 %v17011_v5  ;;  %10480 = vmatprep.subr.bf16.mxu1 %v17011_v5  ;;  %v11520_v60 = vmin.f32 %v515_v52, 15.0  ;;  %v11533_v7 = vmin.f32 %v516_v61, 15.0  ;;  %v11546_v16 = vmin.f32 %v517_v8, 15.0  ;;  %v518_v17 = vmax.f32 %v454_v9, 0.0  ;;  %v3999_v53 = vld [vmem:[%s17003_s2 + $0x1d0] sm:$0xff]  ;;  %v4001_v63 = vld [vmem:[%s17003_s2 + $0x1e0] sm:$0xff] }
  0x1e   : > { %666 = vperm.xlu1 %10732, %v11479_v35   ;;  %661 = vperm.xlu0 %10730, %v11481_v36   ;;  %v392_v18 = vadd.f32 1.0, %v327_v10  ;;  %v328_v19 = vmul.f32 2.0, %v264_v11  ;;  %v10304_v21 = vpack.c.bf16 %v3992_v14, %v3991_v13  ;;  %v519_v24 = vmax.f32 %v455_v15, 0.0  ;;  %v269_v61 = vld [vmem:[%s11456_s15 + $0x70] sm:$0xff]  ;;  %v4002_v0 = vld [vmem:[%s17003_s2 + $0x1e8] sm:$0xff]  ;;  %v270_v9 = vld [vmem:[%s11456_s15 + $0x78] sm:$0xff] }
  0x1f   : > { %v11559_v25 = vmin.f32 %v518_v17, 15.0  ;;  %v329_v28 = vmul.f32 2.0, %v265_v20  ;;  %v10307_v30 = vpack.c.bf16 %v3994_v23, %v3993_v22  ;;  %v330_v39 = vmul.f32 2.0, %v266_v29  ;;  %v4003_v11 = vld [vmem:[%s17003_s2 + $0x1f0] sm:$0xff] }
  0x20   : > { %10290 = vmatpush1.bf16.msra.mxu0 %v10289_v38  ;;  %10496 = vmatpush1.bf16.msra.mxu1 %v10289_v38  ;;  %v456_v26 = vmul.f32 7.5, %v392_v18  ;;  %v393_v27 = vadd.f32 1.0, %v328_v19  ;;  %v11570_v33 = vmin.f32 %v519_v24, 15.0  ;;  %v10310_v41 = vpack.c.bf16 %v3996_v32, %v3995_v31  ;;  %v271_v32 = vld [vmem:[%s11456_s15 + $0x80] sm:$0xff] }
  0x21   : > { %10291 = vmatprep.subr.bf16.mxu0 %v17011_v5  ;;  %10481 = vmatprep.subr.bf16.mxu1 %v17011_v5  ;;  %v394_v38 = vadd.f32 1.0, %v329_v28  ;;  %v331_v44 = vmul.f32 2.0, %v267_v40  ;;  %v395_v48 = vadd.f32 1.0, %v330_v39  ;;  %v10313_v52 = vpack.c.bf16 %v3998_v43, %v3997_v42 }
  0x22   : > { %10733 = vset.pattern.permute.xlu1 %v17009_v49  ;;  %10731 = vset.pattern.permute.xlu0 %v17009_v49  ;;  %v520_v34 = vmax.f32 %v456_v26, 0.0  ;;  %v457_v37 = vmul.f32 7.5, %v393_v27  ;;  %v332_v55 = vmul.f32 2.0, %v268_v50  ;;  %v10316_v62 = vpack.c.bf16 %v4000_v54, %v3999_v53 }
  0x23   : > { %2794 = vperm.xlu1 %10733, %v11479_v35   ;;  %2790 = vperm.xlu0 %10731, %v11481_v36   ;;  %v458_v47 = vmul.f32 7.5, %v394_v38  ;;  %v459_v58 = vmul.f32 7.5, %v395_v48  ;;  %v396_v59 = vadd.f32 1.0, %v331_v44  ;;  %v10319_v10 = vpack.c.bf16 %v4002_v0, %v4001_v63  ;;  %v274_v38 = vld [vmem:[%s11456_s15 + $0x98] sm:$0xff] }
  0x24   : > { %10293 = vmatpush1.bf16.msra.mxu0 %v10292_v46  ;;  %10497 = vmatpush1.bf16.msra.mxu1 %v10292_v46  ;;  %v11585_v45 = vmin.f32 %v520_v34, 15.0  ;;  %v521_v46 = vmax.f32 %v457_v37, 0.0  ;;  %v397_v8 = vadd.f32 1.0, %v332_v55  ;;  %v334_v13 = vmul.f32 2.0, %v270_v9  ;;  %v272_v34 = vld [vmem:[%s11456_s15 + $0x88] sm:$0xff]  ;;  %v275_v37 = vld [vmem:[%s11456_s15 + $0xa0] sm:$0xff] }
  0x25   : > { %10294 = vmatprep.subr.bf16.mxu0 %v17011_v5  ;;  %10482 = vmatprep.subr.bf16.mxu1 %v17011_v5  ;;  %v522_v57 = vmax.f32 %v458_v47, 0.0  ;;  %v523_v4 = vmax.f32 %v459_v58, 0.0  ;;  %v460_v6 = vmul.f32 7.5, %v396_v59  ;;  %v17013_v31 = vmov 1   ;;  %v278_v44 = vld [vmem:[%s11456_s15 + $0xb8] sm:$0xff]  ;;  %v281_v47 = vld [vmem:[%s11456_s15 + $0xd0] sm:$0xff] }
  0x26   : > { %v461_v17 = vmul.f32 7.5, %v397_v8  ;;  %v399_v23 = vadd.f32 1.0, %v334_v13  ;;  %v335_v39 = vmul.f32 2.0, %v271_v32  ;;  %v336_v40 = vmul.f32 2.0, %v272_v34  ;;  %v276_v58 = vld [vmem:[%s11456_s15 + $0xa8] sm:$0xff]  ;;  %v283_v59 = vld [vmem:[%s11456_s15 + $0xe0] sm:$0xff] }
  0x27   : > { %10734 = vset.pattern.permute.xlu1 %v17015_v1  ;;  %2798 = vperm.xlu0 %10731, %v11507_v51   ;;  %v11611_v3 = vmin.f32 %v522_v57, 15.0  ;;  %v11624_v14 = vmin.f32 %v523_v4, 15.0  ;;  %v524_v15 = vmax.f32 %v460_v6, 0.0  ;;  %v339_v42 = vmul.f32 2.0, %v275_v37  ;;  %v280_v57 = vld [vmem:[%s11456_s15 + $0xc8] sm:$0xff] }
  0x28   : > { %671 = vperm.xlu1 %10734, %v11507_v51   ;;  %10296 = vmatpush1.bf16.msra.mxu0 %v10295_v56  ;;  %v463_v27 = vmul.f32 7.5, %v399_v23  ;;  %v401_v43 = vadd.f32 1.0, %v336_v40  ;;  %v342_v53 = vmul.f32 2.0, %v278_v44  ;;  %v344_v4 = vmul.f32 2.0, %v280_v57  ;;  %v284_v13 = vld [vmem:[%s11456_s15 + $0xe8] sm:$0xff]  ;;  %v289_v40 = vld [vmem:[%s11456_s15 + $0x110] sm:$0xff] }
  0x29   : > { %10297 = vmatprep.subr.bf16.mxu0 %v17011_v5  ;;  %10498 = vmatpush1.bf16.msra.mxu1 %v10295_v56  ;;  %v11598_v56 = vmin.f32 %v521_v46, 15.0  ;;  %v11630_v20 = vmin.f32 %v524_v15, 15.0  ;;  %v340_v6 = vmul.f32 2.0, %v276_v58  ;;  %v347_v8 = vmul.f32 2.0, %v283_v59  ;;  %v287_v15 = vld [vmem:[%s11456_s15 + $0x100] sm:$0xff] }
  0x2a   : > { %10483 = vmatprep.subr.bf16.mxu1 %v17011_v5  ;;  %v527_v29 = vmax.f32 %v463_v27, 0.0  ;;  %v279_v27 = vld [vmem:[%s11456_s15 + $0xc0] sm:$0xff]  ;;  %v348_v32 = vmul.f32 2.0, %v284_v13  ;;  %v351_v34 = vmul.f32 2.0, %v287_v15  ;;  %v11726_v13 = vld [vmem:[%s17003_s2 + $0x8] sm:$0xff]  ;;  %v11731_v15 = vld [vmem:[%s17003_s2 + $0x10] sm:$0xff] }
  0x2b   : > { %2802 = vperm.xlu0 %10731, %v11520_v60   ;;  %v412_v23 = vadd.f32 1.0, %v347_v8  ;;  %v282_v8 = vld [vmem:[%s11456_s15 + $0xd8] sm:$0xff] }
  0x2c   : > { %676 = vperm.xlu1 %10734, %v11520_v60   ;;  %10299 = vmatpush1.bf16.msra.mxu0 %v10298_v2 }
  0x2d   : > { %10300 = vmatprep.subr.bf16.mxu0 %v17011_v5  ;;  %10499 = vmatpush1.bf16.msra.mxu1 %v10298_v2  ;;  %v333_v2 = vmul.f32 2.0, %v269_v61  ;;  %v476_v44 = vmul.f32 7.5, %v412_v23  ;;  %v295_v23 = vld [vmem:[%s11456_s15 + $0x140] sm:$0xff] }
  0x2e   : > { %10484 = vmatprep.subr.bf16.mxu1 %v17011_v5 }
  0x2f   : > { %2806 = vperm.xlu0 %10731, %v11533_v7   ;;  %v398_v18 = vadd.f32 1.0, %v333_v2  ;;  %v407_v2 = vadd.f32 1.0, %v342_v53 }
  0x30   : > { %681 = vperm.xlu1 %10734, %v11533_v7   ;;  %10302 = vmatpush1.bf16.msra.mxu0 %v10301_v12 }
  0x31   : > { %10303 = vmatprep.subr.bf16.mxu0 %v17011_v5  ;;  %10500 = vmatpush1.bf16.msra.mxu1 %v10301_v12  ;;  %v4004_v12 = vld [vmem:[%s17003_s2 + $0x1f8] sm:$0xff]  ;;  %v462_v22 = vmul.f32 7.5, %v398_v18 }
  0x32   : > { %10485 = vmatprep.subr.bf16.mxu1 %v17011_v5  ;;  %v10322_v19 = vpack.c.bf16 %v4004_v12, %v4003_v11 }
  0x33   : > { %2810 = vperm.xlu0 %10731, %v11546_v16   ;;  %v526_v26 = vmax.f32 %v462_v22, 0.0  ;;  %v405_v22 = vadd.f32 1.0, %v340_v6 }
  0x34   : > { %686 = vperm.xlu1 %10734, %v11546_v16   ;;  %10305 = vmatpush1.bf16.msra.mxu0 %v10304_v21 }
  0x35   : > { %10306 = vmatprep.subr.bf16.mxu0 %v17011_v5  ;;  %10501 = vmatpush1.bf16.msra.mxu1 %v10304_v21  ;;  %v525_v21 = vmax.f32 %v461_v17, 0.0  ;;  %v11639_v28 = vmin.f32 %v526_v26, 15.0  ;;  %v286_v26 = vld [vmem:[%s11456_s15 + $0xf8] sm:$0xff] }
  0x36   : > { %10486 = vmatprep.subr.bf16.mxu1 %v17011_v5 }
  0x37   : > { %2814 = vperm.xlu0 %10731, %v11559_v25   ;;  %v11635_v24 = vmin.f32 %v525_v21, 15.0  ;;  %v409_v21 = vadd.f32 1.0, %v344_v4 }
  0x38   : > { %691 = vperm.xlu1 %10734, %v11559_v25   ;;  %10308 = vmatpush1.bf16.msra.mxu0 %v10307_v30 }
  0x39   : > { %10309 = vmatprep.subr.bf16.mxu0 %v17011_v5  ;;  %10502 = vmatpush1.bf16.msra.mxu1 %v10307_v30  ;;  %v11643_v30 = vmin.f32 %v527_v29, 15.0 }
  0x3a   : > { %10487 = vmatprep.subr.bf16.mxu1 %v17011_v5 }
  0x3b   : > { %2818 = vperm.xlu0 %10731, %v11570_v33  }
  0x3c   : > { %696 = vperm.xlu1 %10734, %v11570_v33   ;;  %10311 = vmatpush1.bf16.msra.mxu0 %v10310_v41 }
  0x3d   : > { %10312 = vmatprep.subr.bf16.mxu0 %v17011_v5  ;;  %10503 = vmatpush1.bf16.msra.mxu1 %v10310_v41  ;;  %v273_v41 = vld [vmem:[%s11456_s15 + $0x90] sm:$0xff] }
  0x3e   : > { %10488 = vmatprep.subr.bf16.mxu1 %v17011_v5 }
  0x3f   : > { %2822 = vperm.xlu0 %10731, %v11585_v45  }
  0x40   : > { %701 = vperm.xlu1 %10734, %v11585_v45   ;;  %10314 = vmatpush1.bf16.msra.mxu0 %v10313_v52 }
  0x41   : > { %10315 = vmatprep.subr.bf16.mxu0 %v17011_v5  ;;  %10504 = vmatpush1.bf16.msra.mxu1 %v10313_v52 }
  0x42   : > { %10489 = vmatprep.subr.bf16.mxu1 %v17011_v5 }
  0x43   : > { %2826 = vperm.xlu0 %10731, %v11598_v56  }
  0x44   : > { %706 = vperm.xlu1 %10734, %v11598_v56   ;;  %10317 = vmatpush1.bf16.msra.mxu0 %v10316_v62 }
  0x45   : > { %10318 = vmatprep.subr.bf16.mxu0 %v17011_v5  ;;  %10505 = vmatpush1.bf16.msra.mxu1 %v10316_v62  ;;  %v17008_v62 = vlaneseq }
  0x46   : > { %10490 = vmatprep.subr.bf16.mxu1 %v17011_v5 }
  0x47   : > { %2830 = vperm.xlu0 %10731, %v11611_v3   ;;  %v642_v12 = vshrl.u32 %v17008_v62, 7 }
  0x48   : > { %711 = vperm.xlu1 %10734, %v11611_v3   ;;  %10320 = vmatpush1.bf16.msra.mxu0 %v10319_v10 }
  0x49   : > { %10321 = vmatprep.subr.bf16.mxu0 %v17011_v5  ;;  %10506 = vmatpush1.bf16.msra.mxu1 %v10319_v10  ;;  %v647_v37 = vsub.s32 3, %v642_v12 }
  0x4a   : > { %10491 = vmatprep.subr.bf16.mxu1 %v17011_v5 }
  0x4b   : > { %2834 = vperm.xlu0 %10731, %v11624_v14  }
  0x4c   : > { %716 = vperm.xlu1 %10734, %v11624_v14   ;;  %10323 = vmatpush1.bf16.msra.mxu0 %v10322_v19 }
  0x4d   : > { %10324 = vmatprep.subr.bf16.mxu0 %v17011_v5  ;;  %10507 = vmatpush1.bf16.msra.mxu1 %v10322_v19  ;;  %v471_v19 = vmul.f32 7.5, %v407_v2 }
  0x4f   : > { %2838 = vperm.xlu0 %10731, %v11630_v20  }
  0x50   : > { %721 = vperm.xlu1 %10734, %v11630_v20  }
  0x53   : > { %2842 = vperm.xlu0 %10731, %v11635_v24  }
  0x54   : > { %726 = vperm.xlu1 %10734, %v11635_v24  }
  0x57   : > { %2846 = vperm.xlu0 %10731, %v11639_v28  }
  0x58   : > { %731 = vperm.xlu1 %10734, %v11639_v28  }
  0x5b   : > { %2850 = vperm.xlu0 %10731, %v11643_v30  }
  0x5c   : > { %736 = vperm.xlu1 %10734, %v11643_v30  }
  0x5f   : > { %10736 = vset.pattern.permute.xlu0 %v17013_v31 }
  0x60   : > { %10735 = vset.pattern.permute.xlu1 %v17013_v31  ;;  %1496 = vperm.xlu0 %10736, %v11479_v35   ;;  %v277_v35 = vld [vmem:[%s11456_s15 + $0xb0] sm:$0xff] }
  0x61   : > { %1492 = vperm.xlu1 %10735, %v11481_v36   ;;  %v338_v36 = vmul.f32 2.0, %v274_v38  ;;  %v2261_v38 = vsub.s32 0, %v642_v12 }
  0x63   : > { %v403_v46 = vadd.f32 1.0, %v338_v36  ;;  %v350_v36 = vmul.f32 2.0, %v286_v26  ;;  %v296_v26 = vld [vmem:[%s11456_s15 + $0x148] sm:$0xff] }
  0x64   : > { %1508 = vperm.xlu0 %10736, %v11533_v7   ;;  %v337_v7 = vmul.f32 2.0, %v273_v41 }
  0x65   : > { %1500 = vperm.xlu1 %10735, %v11507_v51   ;;  %v400_v51 = vadd.f32 1.0, %v335_v39  ;;  %v467_v55 = vmul.f32 7.5, %v403_v46  ;;  %v2265_v39 = vsub.s32 2, %v642_v12 }
  0x66   : > { %v402_v48 = vadd.f32 1.0, %v337_v7  ;;  %v343_v7 = vmul.f32 2.0, %v279_v27 }
  0x67   : > { %v464_v50 = vmul.f32 7.5, %v400_v51  ;;  %v531_v10 = vmax.f32 %v467_v55, 0.0  ;;  %v415_v55 = vadd.f32 1.0, %v350_v36  ;;  %v299_v36 = vld [vmem:[%s11456_s15 + $0x160] sm:$0xff] }
  0x68   : > { %1516 = vperm.xlu0 %10736, %v11559_v25   ;;  %v341_v25 = vmul.f32 2.0, %v277_v35  ;;  %v466_v61 = vmul.f32 7.5, %v402_v48  ;;  %v535_v35 = vmax.f32 %v471_v19, 0.0  ;;  %v353_v48 = vmul.f32 2.0, %v289_v40 }
  0x69   : > { %1504 = vperm.xlu1 %10735, %v11520_v60   ;;  %v404_v60 = vadd.f32 1.0, %v339_v42  ;;  %v528_v63 = vmax.f32 %v464_v50, 0.0  ;;  %v11686_v29 = vmin.f32 %v531_v10, 15.0  ;;  %v383_v42 = vld [vmem:[%s17002_s1] sm:$0xf]  ;;  %v408_v57 = vadd.f32 1.0, %v343_v7 }
  0x6a   : > { %v406_v52 = vadd.f32 1.0, %v341_v25  ;;  %v530_v11 = vmax.f32 %v466_v61, 0.0  ;;  %v469_v25 = vmul.f32 7.5, %v405_v22  ;;  %v2266_v53 = vrot.slane %v383_v42, %v2265_v39  ;;  %v298_v7 = vld [vmem:[%s11456_s15 + $0x158] sm:$0xff] }
  0x6b   : > { %v468_v54 = vmul.f32 7.5, %v404_v60  ;;  %17449 = vst [vmem:[#allocation5_spill] sm:$0xff] %v11686_v29  ;;  %v290_v60 = vld [vmem:[%s11456_s15 + $0x118] sm:$0xff]  ;;  %v418_v4 = vadd.f32 1.0, %v353_v48  ;;  %v479_v19 = vmul.f32 7.5, %v415_v55  ;;  %v362_v55 = vmul.f32 2.0, %v298_v7 }
  0x6c   : > { %1524 = vperm.xlu0 %10736, %v11585_v45   ;;  %v465_v45 = vmul.f32 7.5, %v401_v43  ;;  %v470_v0 = vmul.f32 7.5, %v406_v52  ;;  %v11692_v41 = vmin.f32 %v530_v11, 15.0  ;;  %v473_v43 = vmul.f32 7.5, %v409_v21 }
  0x6d   : > { %1512 = vperm.xlu1 %10735, %v11546_v16   ;;  %v345_v16 = vmul.f32 2.0, %v281_v47  ;;  %v532_v9 = vmax.f32 %v468_v54, 0.0  ;;  %v416_v47 = vadd.f32 1.0, %v351_v34  ;;  %v2262_v52 = vrot.slane %v383_v42, %v2261_v38 }
  0x6e   : > { %v534_v18 = vmax.f32 %v470_v0, 0.0  ;;  %17450 = vst [vmem:[#allocation6_spill] sm:$0xff] %v11692_v41  ;;  %v11703_v54 = vmin.f32 %v535_v35, 15.0  ;;  %v354_v58 = vmul.f32 2.0, %v290_v60  ;;  %v537_v61 = vmax.f32 %v473_v43, 0.0  ;;  %v292_v0 = vld [vmem:[%s11456_s15 + $0x128] sm:$0xff] }
  0x6f   : > { %v11719_v11 = vrot.slane %v2262_v52, %v2261_v38  ;;  %v356_v22 = vmul.f32 2.0, %v292_v0  ;;  %v482_v35 = vmul.f32 7.5, %v418_v4  ;;  %v543_v60 = vmax.f32 %v479_v19, 0.0  ;;  %v305_v19 = vld [vmem:[%s11456_s15 + $0x190] sm:$0xff] }
  0x70   : > { %1532 = vperm.xlu0 %10736, %v11611_v3   ;;  %v410_v3 = vadd.f32 1.0, %v345_v16  ;;  %v11698_v46 = vmin.f32 %v534_v18, 15.0  ;;  %v293_v16 = vld [vmem:[%s11456_s15 + $0x130] sm:$0xff]  ;;  %17452 = vst [vmem:[#allocation8_spill] sm:$0xff] %v11703_v54  ;;  %v11736_v18 = vld [vmem:[%s17003_s2 + $0x18] sm:$0xff]  ;;  %v419_v21 = vadd.f32 1.0, %v354_v58 }
  0x71   : > { %1520 = vperm.xlu1 %10735, %v11570_v33   ;;  %v529_v33 = vmax.f32 %v465_v45, 0.0  ;;  %v648_v45 = vrot.slane %v383_v42, %v647_v37  ;;  %v357_v6 = vmul.f32 2.0, %v293_v16  ;;  %v11742_v27 = vmin.f32 %v537_v61, 15.0  ;;  %v11756_v37 = vld [vmem:[%s17003_s2 + $0x28] sm:$0xff]  ;;  %v11877_v43 = vld [vmem:[%s17003_s2 + $0x90] sm:$0xff] }
  0x72   : > { %17451 = vst [vmem:[#allocation7_spill] sm:$0xff] %v11698_v46  ;;  %v421_v48 = vadd.f32 1.0, %v356_v22  ;;  %v363_v16 = vmul.f32 2.0, %v299_v36  ;;  %v546_v61 = vmax.f32 %v482_v35, 0.0  ;;  %v304_v35 = vld [vmem:[%s11456_s15 + $0x188] sm:$0xff]  ;;  %v307_v36 = vld [vmem:[%s11456_s15 + $0x1a0] sm:$0xff] }
  0x73   : > { %v11680_v17 = vmin.f32 %v529_v33, 15.0  ;;  %v540_v33 = vmax.f32 %v476_v44, 0.0  ;;  %17454 = vst [vmem:[#allocation10_spill] sm:$0xff] %v11742_v27  ;;  %v360_v44 = vmul.f32 2.0, %v296_v26  ;;  %v368_v49 = vmul.f32 2.0, %v304_v35  ;;  %17468 = vst [vmem:[#allocation24_spill] sm:$0xff] %v11877_v43 }
  0x74   : > { %1540 = vperm.xlu0 %10736, %v11630_v20   ;;  %v474_v20 = vmul.f32 7.5, %v410_v3  ;;  %v480_v3 = vmul.f32 7.5, %v416_v47  ;;  %v483_v47 = vmul.f32 7.5, %v419_v21  ;;  %v11799_v7 = vmin.f32 %v546_v61, 15.0 }
  0x75   : > { %1528 = vperm.xlu1 %10735, %v11598_v56   ;;  %v11678_v56 = vmin.f32 %v528_v63, 15.0  ;;  %17447 = vst [vmem:[#allocation3_spill] sm:$0xff] %v11680_v17  ;;  %v533_v63 = vmax.f32 %v469_v25, 0.0  ;;  %v11746_v34 = vmin.f32 %v540_v33, 15.0  ;;  %v359_v25 = vmul.f32 2.0, %v295_v23  ;;  %v11784_v33 = vld [vmem:[%s17003_s2 + $0x38] sm:$0xff] }
  0x76   : > { %v538_v51 = vmax.f32 %v474_v20, 0.0  ;;  %v472_v20 = vmul.f32 7.5, %v408_v57  ;;  %v544_v40 = vmax.f32 %v480_v3, 0.0  ;;  %v425_v3 = vadd.f32 1.0, %v360_v44  ;;  %17461 = vst [vmem:[#allocation17_spill] sm:$0xff] %v11799_v7 }
  0x77   : > { %17446 = vst [vmem:[#allocation2_spill] sm:$0xff] %v11678_v56  ;;  %17456 = vst [vmem:[#allocation12_spill] sm:$0xff] %v11746_v34  ;;  %v547_v22 = vmax.f32 %v483_v47, 0.0  ;;  %v485_v23 = vmul.f32 7.5, %v421_v48 }
  0x78   : > { %1548 = vperm.xlu0 %10736, %v11639_v28   ;;  %v11684_v28 = vmin.f32 %v532_v9, 15.0  ;;  %v11706_v59 = vmin.f32 %v538_v51, 15.0  ;;  %v11774_v58 = vmin.f32 %v544_v40, 15.0  ;;  %v427_v40 = vadd.f32 1.0, %v362_v55 }
  0x79   : > { %1536 = vperm.xlu1 %10735, %v11624_v14   ;;  %v643_v14 = vsub.s32 1, %v642_v12  ;;  %v11721_v12 = vrot.slane %v2266_v53, %v2261_v38  ;;  %v346_v38 = vmul.f32 2.0, %v282_v8  ;;  %v302_v8 = vld [vmem:[%s11456_s15 + $0x178] sm:$0xff]  ;;  %v489_v47 = vmul.f32 7.5, %v425_v3  ;;  %v11817_v3 = vld [vmem:[%s17003_s2 + $0x48] sm:$0xff] }
  0x7a   : > { %17448 = vst [vmem:[#allocation4_spill] sm:$0xff] %v11684_v28  ;;  %17453 = vst [vmem:[#allocation9_spill] sm:$0xff] %v11706_v59  ;;  %v366_v44 = vmul.f32 2.0, %v302_v8  ;;  %v549_v62 = vmax.f32 %v485_v23, 0.0  ;;  %v11803_v55 = vmin.f32 %v547_v22, 15.0  ;;  %v491_v61 = vmul.f32 7.5, %v427_v40 }
  0x7b   : > { %v644_v50 = vrot.slane %v383_v42, %v643_v14  ;;  %v11717_v10 = vrot.slane %v648_v45, %v643_v14  ;;  %v422_v42 = vadd.f32 1.0, %v357_v6  ;;  %v301_v45 = vld [vmem:[%s11456_s15 + $0x170] sm:$0xff]  ;;  %v411_v53 = vadd.f32 1.0, %v346_v38  ;;  %17458 = vst [vmem:[#allocation14_spill] sm:$0xff] %v11774_v58  ;;  %v11828_v22 = vld [vmem:[%s17003_s2 + $0x58] sm:$0xff] }
  0x7c   : > { %10737 = vset.pattern.permute.xlu0 %v17015_v1  ;;  %v365_v6 = vmul.f32 2.0, %v301_v45  ;;  %v308_v45 = vld [vmem:[%s11456_s15 + $0x1a8] sm:$0xff]  ;;  %v11830_v35 = vmin.f32 %v549_v62, 15.0 }
  0x7d   : > { %1544 = vperm.xlu1 %10735, %v11635_v24   ;;  %741 = vperm.xlu0 %10737, %v11678_v56   ;;  %v413_v24 = vadd.f32 1.0, %v348_v32  ;;  %v11715_v9 = vrot.slane %v644_v50, %v643_v14  ;;  %v11744_v32 = vmin.f32 %v533_v63, 15.0  ;;  %v11751_v14 = vld [vmem:[%s17003_s2 + $0x20] sm:$0xff]  ;;  %v285_v50 = vld [vmem:[%s11456_s15 + $0xf0] sm:$0xff]  ;;  %v486_v0 = vmul.f32 7.5, %v422_v42  ;;  %v288_v42 = vld [vmem:[%s11456_s15 + $0x108] sm:$0xff] }
  0x7e   : > { %v11779_v63 = vld [vmem:[%s17003_s2 + $0x30] sm:$0xff]  ;;  %v349_v4 = vmul.f32 2.0, %v285_v50  ;;  %v475_v38 = vmul.f32 7.5, %v411_v53  ;;  %v430_v50 = vadd.f32 1.0, %v365_v6  ;;  %v352_v53 = vmul.f32 2.0, %v288_v42 }
  0x7f   : > { %v477_v2 = vmul.f32 7.5, %v413_v24  ;;  %17455 = vst [vmem:[#allocation11_spill] sm:$0xff] %v11744_v32  ;;  %v536_v24 = vmax.f32 %v472_v20, 0.0  ;;  %v11788_v20 = vmin.f32 %v543_v60, 15.0  ;;  %v369_v60 = vmul.f32 2.0, %v305_v19  ;;  %v11823_v19 = vld [vmem:[%s17003_s2 + $0x50] sm:$0xff] }
  0x80   : > { %v414_v48 = vadd.f32 1.0, %v349_v4  ;;  %v539_v26 = vmax.f32 %v475_v38, 0.0  ;;  %v431_v4 = vadd.f32 1.0, %v366_v44  ;;  %v372_v8 = vmul.f32 2.0, %v308_v45  ;;  %v11839_v45 = vld [vmem:[%s17003_s2 + $0x60] sm:$0xff] }
  0x81   : > { %1552 = vperm.xlu1 %10735, %v11643_v30   ;;  %10739 = vset.pattern.permute.xlu0 %v17013_v31  ;;  %v11712_v30 = vld [vmem:[%s17003_s2] sm:$0xff]  ;;  %v541_v39 = vmax.f32 %v477_v2, 0.0  ;;  %v424_v2 = vadd.f32 1.0, %v359_v25  ;;  %17459 = vst [vmem:[#allocation15_spill] sm:$0xff] %v11788_v20  ;;  %v11790_v21 = vmin.f32 %v536_v24, 15.0  ;;  %v550_v25 = vmax.f32 %v486_v0, 0.0 }
  0x82   : > { %1560 = vperm.xlu0 %10739, %v11680_v17   ;;  %v434_v6 = vadd.f32 1.0, %v369_v60  ;;  %v553_v38 = vmax.f32 %v489_v47, 0.0  ;;  %v494_v40 = vmul.f32 7.5, %v430_v50  ;;  %v433_v42 = vadd.f32 1.0, %v368_v49  ;;  %v11849_v49 = vld [vmem:[%s17003_s2 + $0x70] sm:$0xff]  ;;  %v11862_v50 = vld [vmem:[%s17003_s2 + $0x80] sm:$0xff] }
  0x83   : > { %v11772_v57 = vmin.f32 %v541_v39, 15.0  ;;  %17460 = vst [vmem:[#allocation16_spill] sm:$0xff] %v11790_v21  ;;  %v428_v39 = vadd.f32 1.0, %v363_v16  ;;  %v488_v24 = vmul.f32 7.5, %v424_v2  ;;  %v371_v16 = vmul.f32 2.0, %v307_v36  ;;  %v11812_v2 = vld [vmem:[%s17003_s2 + $0x40] sm:$0xff] }
  0x84   : > { %v11807_v0 = vmin.f32 %v550_v25, 15.0  ;;  %v417_v36 = vadd.f32 1.0, %v352_v53  ;;  %v11834_v60 = vmin.f32 %v539_v26, 15.0  ;;  %v555_v47 = vmax.f32 %v491_v61, 0.0  ;;  %17464 = vst [vmem:[#allocation20_spill] sm:$0xff] %v11862_v50 }
  0x85   : > { %1556 = vperm.xlu1 %10735, %v11678_v56   ;;  %17457 = vst [vmem:[#allocation13_spill] sm:$0xff] %v11772_v57  ;;  %v492_v52 = vmul.f32 7.5, %v428_v39  ;;  %v552_v23 = vmax.f32 %v488_v24, 0.0  ;;  %v478_v39 = vmul.f32 7.5, %v414_v48  ;;  %v436_v25 = vadd.f32 1.0, %v371_v16  ;;  %v11844_v24 = vld [vmem:[%s17003_s2 + $0x68] sm:$0xff] }
  0x86   : > { %1572 = vperm.xlu0 %10739, %v11684_v28   ;;  %17462 = vst [vmem:[#allocation18_spill] sm:$0xff] %v11807_v0  ;;  %17463 = vst [vmem:[#allocation19_spill] sm:$0xff] %v11834_v60  ;;  %v11857_v48 = vld [vmem:[%s17003_s2 + $0x78] sm:$0xff]  ;;  %v495_v53 = vmul.f32 7.5, %v431_v4  ;;  %v498_v16 = vmul.f32 7.5, %v434_v6  ;;  %v437_v61 = vadd.f32 1.0, %v372_v8 }
  0x87   : > { %v556_v62 = vmax.f32 %v492_v52, 0.0  ;;  %v11867_v52 = vld [vmem:[%s17003_s2 + $0x88] sm:$0xff]  ;;  %v11870_v26 = vmin.f32 %v552_v23, 15.0  ;;  %v11872_v44 = vmin.f32 %v553_v38, 15.0  ;;  %v542_v5 = vmax.f32 %v478_v39, 0.0  ;;  %v11885_v4 = vld [vmem:[%s17003_s2 + $0x98] sm:$0xff] }
  0x88   : > { %17465 = vst [vmem:[#allocation21_spill] sm:$0xff] %v11867_v52  ;;  %v558_v51 = vmax.f32 %v494_v40, 0.0  ;;  %17469 = vst [vmem:[#allocation25_spill] sm:$0xff] %v11885_v4  ;;  %v11890_v6 = vld [vmem:[%s17003_s2 + $0xa0] sm:$0xff]  ;;  %v11895_v8 = vld [vmem:[%s17003_s2 + $0xa8] sm:$0xff]  ;;  %v497_v23 = vmul.f32 7.5, %v433_v42 }
  0x89   : > { %10738 = vset.pattern.permute.xlu1 %v17015_v1  ;;  %17466 = vst [vmem:[#allocation22_spill] sm:$0xff] %v11870_v26  ;;  %17467 = vst [vmem:[#allocation23_spill] sm:$0xff] %v11872_v44  ;;  %v481_v38 = vmul.f32 7.5, %v417_v36  ;;  %v500_v39 = vmul.f32 7.5, %v436_v25  ;;  %v11913_v42 = vld [vmem:[%s17003_s2 + $0xb8] sm:$0xff]  ;;  %v17476_v36 = vmov 0  }
  0x8a   : > { %746 = vperm.xlu1 %10738, %v11680_v17   ;;  %10742 = vset.pattern.permute.xlu0 %v17015_v1  ;;  %17470 = vst [vmem:[#allocation26_spill] sm:$0xff] %v11890_v6  ;;  %17471 = vst [vmem:[#allocation27_spill] sm:$0xff] %v11895_v8  ;;  %v11899_v1 = vmin.f32 %v556_v62, 15.0  ;;  %v11903_v17 = vmin.f32 %v555_v47, 15.0  ;;  %v559_v25 = vmax.f32 %v495_v53, 0.0  ;;  %v562_v62 = vmax.f32 %v498_v16, 0.0 }
  0x8b   : > { %756 = vperm.xlu0 %10742, %v11686_v29   ;;  %17475 = vst [vmem:[#allocation31_spill] sm:$0xff] %v11913_v42  ;;  %v501_v40 = vmul.f32 7.5, %v437_v61  ;;  %v11932_v16 = vld [vmem:[%s17003_s2 + $0xc0] sm:$0xff]  ;;  %v545_v61 = vmax.f32 %v481_v38, 0.0  ;;  %v564_v50 = vmax.f32 %v500_v39, 0.0  ;;  %v11946_v42 = vld [vmem:[%s17003_s2 + $0xd0] sm:$0xff] }
  0x8c   : > { %17472 = vst [vmem:[#allocation28_spill] sm:$0xff] %v11899_v1  ;;  %17473 = vst [vmem:[#allocation29_spill] sm:$0xff] %v11903_v17  ;;  %v11922_v17 = vmin.f32 %v558_v51, 15.0  ;;  %v561_v51 = vmax.f32 %v497_v23, 0.0  ;;  %v11951_v6 = vld [vmem:[%s17003_s2 + $0xd8] sm:$0xff]  ;;  %v11953_v23 = vmin.f32 %v559_v25, 15.0 }
  0x8d   : > { %17479 = vst [vmem:[#allocation34_spill] sm:$0xff] %v11932_v16  ;;  %17481 = vst [vmem:[#allocation36_spill] sm:$0xff] %v11946_v42  ;;  %v11955_v38 = vmin.f32 %v562_v62, 15.0  ;;  %v565_v39 = vmax.f32 %v501_v40, 0.0  ;;  %v310_v8 = vld [vmem:[%s11456_s15 + $0x1b8] sm:$0xff]  ;;  %v11966_v62 = vmin.f32 %v545_v61, 15.0 }
  0x8e   : > { %751 = vperm.xlu1 %10738, %v11692_v41   ;;  %17478 = vst [vmem:[#allocation33_spill] sm:$0xff] %v11922_v17  ;;  %17482 = vst [vmem:[#allocation37_spill] sm:$0xff] %v11951_v6  ;;  %v11978_v4 = vmin.f32 %v564_v50, 15.0 }
  0x8f   : > { %771 = vperm.xlu0 %10742, %v11698_v46   ;;  %17483 = vst [vmem:[#allocation38_spill] sm:$0xff] %v11953_v23  ;;  %17484 = vst [vmem:[#allocation39_spill] sm:$0xff] %v11955_v38  ;;  %v11964_v23 = vmin.f32 %v561_v51, 15.0  ;;  %v374_v51 = vmul.f32 2.0, %v310_v8 }
  0x90   : > { %17486 = vst [vmem:[#allocation41_spill] sm:$0xff] %v11966_v62  ;;  %17489 = vst [vmem:[#allocation44_spill] sm:$0xff] %v11978_v4  ;;  %v17490_v62 = vmov 1  }
  0x91   : > { %17485 = vst [vmem:[#allocation40_spill] sm:$0xff] %v11964_v23  ;;  %v11985_v23 = vmin.f32 %v565_v39, 15.0 }
  0x92   : > { %10740 = vset.pattern.permute.xlu1 %v17013_v31 }
  0x93   : > { %1564 = vperm.xlu1 %10740, %v11692_v41   ;;  %10745 = vset.pattern.permute.xlu0 %v17013_v31  ;;  %v311_v31 = vld [vmem:[%s11456_s15 + $0x1c0] sm:$0xff]  ;;  %v11920_v41 = vmin.f32 %v542_v5, 15.0  ;;  %v11937_v5 = vld [vmem:[%s17003_s2 + $0xc8] sm:$0xff]  ;;  %17491 = vst [vmem:[#allocation45_spill] sm:$0xff] %v11985_v23 }
  0x94   : > { %1584 = vperm.xlu0 %10745, %v11703_v54   ;;  %v375_v56 = vmul.f32 2.0, %v311_v31  ;;  %17480 = vst [vmem:[#allocation35_spill] sm:$0xff] %v11937_v5 }
  0x95   : > { %17477 = vst [vmem:[#allocation32_spill] sm:$0xff] %v11920_v41 }
  0x97   : > { %1568 = vperm.xlu1 %10740, %v11686_v29   ;;  %v11908_v29 = vld [vmem:[%s17003_s2 + $0xb0] sm:$0xff] }
  0x98   : > { %1596 = vperm.xlu0 %10745, %v11706_v59   ;;  %17474 = vst [vmem:[#allocation30_spill] sm:$0xff] %v11908_v29 }
  0x9b   : > { %10741 = vset.pattern.permute.xlu1 %v17476_v36 }
  0x9c   : > { %761 = vperm.xlu1 %10741, %v11684_v28   ;;  %10748 = vset.pattern.permute.xlu0 %v17476_v36 }
  0x9d   : > { %v667_v52 = vpop.permute.xlu1 %666  ;;  %786 = vperm.xlu0 %10748, %v11742_v27   ;;  %v662_v53 = vpop.permute.xlu0 %661 }
  0x9e   : > { %v981_v47 = vsub.f32 %v11715_v9, %v667_v52  ;;  %v982_v28 = vsub.f32 %v11717_v10, %v667_v52  ;;  %v979_v31 = vsub.f32 %v11715_v9, %v662_v53  ;;  %v980_v29 = vsub.f32 %v11717_v10, %v662_v53 }
  0x9f   : > { %v440_v52 = vadd.f32 1.0, %v375_v56 }
  0xa0   : > { %v1109_v17 = vand.u32 2147483647, %v981_v47  ;;  %v1110_v43 = vand.u32 2147483647, %v982_v28  ;;  %v1107_v53 = vand.u32 2147483647, %v979_v31  ;;  %766 = vperm.xlu1 %10741, %v11744_v32  }
  0xa1   : > { %801 = vperm.xlu0 %10748, %v11746_v34   ;;  %v1108_v41 = vand.u32 2147483647, %v980_v29  ;;  %v11971_v31 = vld [vmem:[%s17003_s2 + $0xe0] sm:$0xff]  ;;  %v11976_v29 = vld [vmem:[%s17003_s2 + $0xe8] sm:$0xff]  ;;  %v11987_v16 = vmul.f32 7.5, %v440_v52  ;;  %v11998_v52 = vadd.f32 1.0, %v374_v51 }
  0xa2   : > { %v1237_v56 = vsub.f32 1.0, %v1109_v17  ;;  %v1238_v40 = vsub.f32 1.0, %v1110_v43  ;;  %v2795_v47 = vpop.permute.xlu1 %2794  ;;  %v2791_v28 = vpop.permute.xlu0 %2790  ;;  %17487 = vst [vmem:[#allocation42_spill] sm:$0xff] %v11971_v31  ;;  %17488 = vst [vmem:[#allocation43_spill] sm:$0xff] %v11976_v29  ;;  %v1235_v25 = vsub.f32 1.0, %v1107_v53 }
  0xa3   : > { %v3047_v61 = vsub.f32 %v11719_v11, %v2795_v47  ;;  %v3048_v17 = vsub.f32 %v11721_v12, %v2795_v47  ;;  %v3045_v43 = vsub.f32 %v11719_v11, %v2791_v28  ;;  %v1236_v42 = vsub.f32 1.0, %v1108_v41  ;;  %17492 = vst [vmem:[#allocation46_spill] sm:$0xff] %v11987_v16  ;;  %17493 = vst [vmem:[#allocation47_spill] sm:$0xff] %v11998_v52 }
  0xa4   : > { %10743 = vset.pattern.permute.xlu1 %v17490_v62  ;;  %v3046_v6 = vsub.f32 %v11721_v12, %v2791_v28  ;;  %v11993_v53 = vmax.f32 %v1237_v56, 0.0  ;;  %v11995_v47 = vmax.f32 %v1238_v40, 0.0  ;;  %v12000_v28 = vmax.f32 %v1235_v25, 0.0  ;;  %v12006_v56 = vld [vmem:[%s17003_s2 + $0xf0] sm:$0xff]  ;;  %v12011_v40 = vld [vmem:[%s17003_s2 + $0xf8] sm:$0xff] }
  0xa5   : > { %v3175_v5 = vand.u32 2147483647, %v3047_v61  ;;  %v3176_v50 = vand.u32 2147483647, %v3048_v17  ;;  %v3173_v4 = vand.u32 2147483647, %v3045_v43  ;;  %1576 = vperm.xlu1 %10743, %v11744_v32   ;;  %10751 = vset.pattern.permute.xlu0 %v17490_v62 }
  0xa6   : > { %1608 = vperm.xlu0 %10751, %v11772_v57   ;;  %v2799_v41 = vpop.permute.xlu0 %2798  ;;  %v3174_v39 = vand.u32 2147483647, %v3046_v6  ;;  %17494 = vst [vmem:[#allocation48_spill] sm:$0xff] %v12000_v28  ;;  %17495 = vst [vmem:[#allocation49_spill] sm:$0xff] %v12006_v56  ;;  %v12019_v31 = vmax.f32 %v1236_v42, 0.0 }
  0xa7   : > { %v3304_v61 = vsub.f32 1.0, %v3176_v50  ;;  %v3301_v17 = vsub.f32 1.0, %v3173_v4  ;;  %v672_v43 = vpop.permute.xlu1 %671  ;;  %v3049_v32 = vsub.f32 %v11719_v11, %v2799_v41  ;;  %v3050_v51 = vsub.f32 %v11721_v12, %v2799_v41 }
  0xa8   : > { %v983_v6 = vsub.f32 %v11715_v9, %v672_v43  ;;  %v984_v25 = vsub.f32 %v11717_v10, %v672_v43  ;;  %v3302_v4 = vsub.f32 1.0, %v3174_v39  ;;  %v3303_v50 = vsub.f32 1.0, %v3175_v5 }
  0xa9   : > { %v12016_v8 = vmax.f32 %v3304_v61, 0.0  ;;  %v3177_v23 = vand.u32 2147483647, %v3049_v32  ;;  %1580 = vperm.xlu1 %10743, %v11698_v46   ;;  %v3178_v16 = vand.u32 2147483647, %v3050_v51  ;;  %v12024_v57 = vmax.f32 %v3301_v17, 0.0 }
  0xaa   : > { %v1111_v29 = vand.u32 2147483647, %v983_v6  ;;  %v1112_v52 = vand.u32 2147483647, %v984_v25  ;;  %1620 = vperm.xlu0 %10751, %v11774_v58   ;;  %v2803_v38 = vpop.permute.xlu0 %2802  ;;  %v12028_v39 = vmax.f32 %v3302_v4, 0.0  ;;  %v12033_v17 = vmax.f32 %v3303_v50, 0.0 }
  0xab   : > { %17496 = vst [vmem:[#allocation50_spill] sm:$0xff] %v12016_v8  ;;  %17497 = vst [vmem:[#allocation51_spill] sm:$0xff] %v12024_v57  ;;  %v677_v41 = vpop.permute.xlu1 %676  ;;  %v3051_v5 = vsub.f32 %v11719_v11, %v2803_v38  ;;  %v3052_v32 = vsub.f32 %v11721_v12, %v2803_v38  ;;  %v3305_v61 = vsub.f32 1.0, %v3177_v23  ;;  %v3306_v6 = vsub.f32 1.0, %v3178_v16 }
  0xac   : > { %17498 = vst [vmem:[#allocation52_spill] sm:$0xff] %v12028_v39  ;;  %v1240_v42 = vsub.f32 1.0, %v1112_v52  ;;  %v985_v25 = vsub.f32 %v11715_v9, %v677_v41  ;;  %v1239_v51 = vsub.f32 1.0, %v1111_v29  ;;  %v986_v46 = vsub.f32 %v11717_v10, %v677_v41  ;;  %17499 = vst [vmem:[#allocation53_spill] sm:$0xff] %v12033_v17 }
  0xad   : > { %v3179_v58 = vand.u32 2147483647, %v3051_v5  ;;  %v3180_v1 = vand.u32 2147483647, %v3052_v32  ;;  %10744 = vset.pattern.permute.xlu1 %v17476_v36  ;;  %v12037_v56 = vmax.f32 %v3306_v6, 0.0  ;;  %v3686_v4 = vmul.f32 %v12028_v39, %v12019_v31 }
  0xae   : > { %v12035_v43 = vmax.f32 %v1240_v42, 0.0  ;;  %v1113_v38 = vand.u32 2147483647, %v985_v25  ;;  %776 = vperm.xlu1 %10744, %v11703_v54   ;;  %10754 = vset.pattern.permute.xlu0 %v17476_v36  ;;  %v2807_v16 = vpop.permute.xlu0 %2806  ;;  %v1114_v23 = vand.u32 2147483647, %v986_v46  ;;  %v12044_v50 = vmax.f32 %v3305_v61, 0.0 }
  0xaf   : > { %17501 = vst [vmem:[#allocation55_spill] sm:$0xff] %v12037_v56  ;;  %v3307_v29 = vsub.f32 1.0, %v3179_v58  ;;  %v3308_v52 = vsub.f32 1.0, %v3180_v1  ;;  %v682_v41 = vpop.permute.xlu1 %681  ;;  %816 = vperm.xlu0 %10754, %v11788_v20   ;;  %v3685_v5 = vmul.f32 %v12024_v57, %v12000_v28  ;;  %v12050_v6 = vmax.f32 %v1239_v51, 0.0  ;;  %4069 = vmatprep.mubr.f32.mxu0 %v3686_v4 }
  0xb0   : > { %17500 = vst [vmem:[#allocation54_spill] sm:$0xff] %v12035_v43  ;;  %17502 = vst [vmem:[#allocation56_spill] sm:$0xff] %v12044_v50  ;;  %v987_v32 = vsub.f32 %v11715_v9, %v682_v41  ;;  %v988_v42 = vsub.f32 %v11717_v10, %v682_v41  ;;  %v1241_v46 = vsub.f32 1.0, %v1113_v38  ;;  %v1242_v58 = vsub.f32 1.0, %v1114_v23 }
  0xb1   : > { %v3688_v1 = vmul.f32 %v12016_v8, %v11995_v47  ;;  %v12054_v25 = vmax.f32 %v3307_v29, 0.0  ;;  %4070 = vmatmul.mubr.f32.vlgmr.msra.gmra.mrb[0].mxu0 %v3685_v5  ;;  %v3053_v54 = vsub.f32 %v11719_v11, %v2807_v16  ;;  %v12058_v28 = vmax.f32 %v3308_v52, 0.0 }
  0xb2   : > { %v1115_v61 = vand.u32 2147483647, %v987_v32  ;;  %v1116_v39 = vand.u32 2147483647, %v988_v42  ;;  %781 = vperm.xlu1 %10744, %v11790_v21   ;;  %v2811_v57 = vpop.permute.xlu0 %2810  ;;  %v17505_v51 = vpack.c.bf16 %v11726_v13, %v11712_v30  ;;  %v3054_v38 = vsub.f32 %v11721_v12, %v2807_v16 }
  0xb3   : > { %17503 = vst [vmem:[#allocation57_spill] sm:$0xff] %v12054_v25  ;;  %17504 = vst [vmem:[#allocation58_spill] sm:$0xff] %v12058_v28  ;;  %4074 = vmatprep.mubr.f32.mxu0 %v3688_v1  ;;  %v3687_v23 = vmul.f32 %v12033_v17, %v11993_v53  ;;  %v687_v29 = vpop.permute.xlu1 %686  ;;  %v3690_v4 = vmul.f32 %v12037_v56, %v12035_v43  ;;  %v3181_v32 = vand.u32 2147483647, %v3053_v54  ;;  %v17506_v42 = vmov 0.0|0.0   ;;  %831 = vperm.xlu0 %10754, %v11799_v7  }
  0xb4   : > { %10326 = vmatpush1.bf16.msra.mxu0 %v17505_v51  ;;  %v1243_v41 = vsub.f32 1.0, %v1115_v61  ;;  %v1244_v5 = vsub.f32 1.0, %v1116_v39  ;;  %v989_v52 = vsub.f32 %v11715_v9, %v687_v29  ;;  %v3182_v30 = vand.u32 2147483647, %v3054_v38 }
  0xb5   : > { %10327 = vmatprep.subr.bf16.mxu0 %v17506_v42  ;;  %v990_v13 = vsub.f32 %v11717_v10, %v687_v29  ;;  %v3055_v16 = vsub.f32 %v11719_v11, %v2811_v57  ;;  %v3056_v1 = vsub.f32 %v11721_v12, %v2811_v57  ;;  %v12074_v51 = vmax.f32 %v1241_v46, 0.0  ;;  %4075 = vmatmul.mubr.f32.gmra.mrb[2].mxu0 %v3687_v23 }
  0xb6   : > { %v12076_v17 = vmax.f32 %v1242_v58, 0.0  ;;  %v3309_v61 = vsub.f32 1.0, %v3181_v32  ;;  %v1117_v54 = vand.u32 2147483647, %v989_v52  ;;  %10746 = vset.pattern.permute.xlu1 %v17490_v62  ;;  %v2815_v39 = vpop.permute.xlu0 %2814  ;;  %v12079_v56 = vmax.f32 %v1243_v41, 0.0  ;;  %4079 = vmatprep.mubr.f32.mxu0 %v3690_v4 }
  0xb7   : > { %v3310_v8 = vsub.f32 1.0, %v3182_v30  ;;  %v1118_v38 = vand.u32 2147483647, %v990_v13  ;;  %v17507_v29 = vpack.c.bf16 %v11736_v18, %v11731_v15  ;;  %v3183_v57 = vand.u32 2147483647, %v3055_v16  ;;  %v692_v46 = vpop.permute.xlu1 %691  ;;  %1588 = vperm.xlu1 %10746, %v11790_v21   ;;  %10757 = vset.pattern.permute.xlu0 %v17490_v62 }
  0xb8   : > { %v1245_v43 = vsub.f32 1.0, %v1117_v54  ;;  %v3184_v58 = vand.u32 2147483647, %v3056_v1  ;;  %v3689_v23 = vmul.f32 %v12044_v50, %v12050_v6  ;;  %v991_v32 = vsub.f32 %v11715_v9, %v692_v46  ;;  %1632 = vperm.xlu0 %10757, %v11803_v55  }
  0xb9   : > { %10329 = vmatpush1.bf16.msra.mxu0 %v17507_v29  ;;  %v12089_v41 = vmax.f32 %v1244_v5, 0.0  ;;  %v12091_v4 = vmax.f32 %v3309_v61, 0.0  ;;  %v1246_v52 = vsub.f32 1.0, %v1118_v38  ;;  %v992_v15 = vsub.f32 %v11717_v10, %v692_v46 }
  0xba   : > { %10330 = vmatprep.subr.bf16.mxu0 %v17506_v42  ;;  %v12095_v18 = vmax.f32 %v3310_v8, 0.0  ;;  %v3311_v30 = vsub.f32 1.0, %v3183_v57  ;;  %4080 = vmatmul.mubr.f32.gmra.mrb[4].mxu0 %v3689_v23  ;;  %v1119_v13 = vand.u32 2147483647, %v991_v32  ;;  %v3692_v16 = vmul.f32 %v12058_v28, %v12076_v17  ;;  %v2819_v1 = vpop.permute.xlu0 %2818 }
  0xbb   : > { %17508 = vst [vmem:[#allocation59_spill] sm:$0xff] %v12091_v4  ;;  %v12100_v5 = vmax.f32 %v1245_v43, 0.0  ;;  %v3312_v61 = vsub.f32 1.0, %v3184_v58  ;;  %v1120_v54 = vand.u32 2147483647, %v992_v15  ;;  %v17510_v38 = vpack.c.bf16 %v11756_v37, %v11751_v14  ;;  %v697_v29 = vpop.permute.xlu1 %696  ;;  %1592 = vperm.xlu1 %10746, %v11742_v27   ;;  %v17543_v27 = vld [vmem:[#allocation33_spill] sm:$0xff] }
  0xbc   : > { %17509 = vst [vmem:[#allocation60_spill] sm:$0xff] %v12095_v18  ;;  %v3057_v8 = vsub.f32 %v11719_v11, %v2815_v39  ;;  %v12106_v57 = vmax.f32 %v1246_v52, 0.0  ;;  %v1247_v46 = vsub.f32 1.0, %v1119_v13  ;;  %4084 = vmatprep.mubr.f32.mxu0 %v3692_v16  ;;  %v3058_v23 = vsub.f32 %v11721_v12, %v2815_v39  ;;  %1644 = vperm.xlu0 %10757, %v11807_v0  }
  0xbd   : > { %10332 = vmatpush1.bf16.msra.mxu0 %v17510_v38  ;;  %v3691_v32 = vmul.f32 %v12054_v25, %v12074_v51  ;;  %v1248_v43 = vsub.f32 1.0, %v1120_v54  ;;  %v993_v15 = vsub.f32 %v11715_v9, %v697_v29  ;;  %v994_v14 = vsub.f32 %v11717_v10, %v697_v29 }
  0xbe   : > { %10333 = vmatprep.subr.bf16.mxu0 %v17506_v42  ;;  %v3185_v58 = vand.u32 2147483647, %v3057_v8  ;;  %v12115_v37 = vmax.f32 %v3311_v30, 0.0  ;;  %v3186_v52 = vand.u32 2147483647, %v3058_v23  ;;  %v3694_v39 = vmul.f32 %v12095_v18, %v12089_v41  ;;  %v2823_v16 = vpop.permute.xlu0 %2822 }
  0xbf   : > { %4085 = vmatmul.mubr.f32.gmra.mrb[6].mxu0 %v3691_v32  ;;  %v3059_v13 = vsub.f32 %v11719_v11, %v2819_v1  ;;  %v12121_v54 = vmax.f32 %v3312_v61, 0.0  ;;  %v1121_v8 = vand.u32 2147483647, %v993_v15  ;;  %v1122_v25 = vand.u32 2147483647, %v994_v14  ;;  %v702_v30 = vpop.permute.xlu1 %701  ;;  %10747 = vset.pattern.permute.xlu1 %v17476_v36 }
  0xc0   : > { %17511 = vst [vmem:[#allocation61_spill] sm:$0xff] %v12115_v37  ;;  %v3313_v38 = vsub.f32 1.0, %v3185_v58  ;;  %v17513_v29 = vpack.c.bf16 %v11784_v33, %v11779_v63  ;;  %v3314_v23 = vsub.f32 1.0, %v3186_v52  ;;  %4089 = vmatprep.mubr.f32.mxu0 %v3694_v39  ;;  %v3060_v32 = vsub.f32 %v11721_v12, %v2819_v1  ;;  %791 = vperm.xlu1 %10747, %v11706_v59  }
  0xc1   : > { %17512 = vst [vmem:[#allocation62_spill] sm:$0xff] %v12121_v54  ;;  %v3187_v18 = vand.u32 2147483647, %v3059_v13  ;;  %v3693_v28 = vmul.f32 %v12091_v4, %v12079_v56  ;;  %v12130_v61 = vmax.f32 %v1247_v46, 0.0  ;;  %v12132_v58 = vmax.f32 %v1248_v43, 0.0  ;;  %10760 = vset.pattern.permute.xlu0 %v17476_v36 }
  0xc2   : > { %10335 = vmatpush1.bf16.msra.mxu0 %v17513_v29  ;;  %v1249_v15 = vsub.f32 1.0, %v1121_v8  ;;  %v995_v14 = vsub.f32 %v11715_v9, %v702_v30  ;;  %v12136_v63 = vmax.f32 %v3313_v38, 0.0  ;;  %v1250_v33 = vsub.f32 1.0, %v1122_v25  ;;  %v2827_v39 = vpop.permute.xlu0 %2826  ;;  %846 = vperm.xlu0 %10760, %v11830_v35  }
  0xc3   : > { %10336 = vmatprep.subr.bf16.mxu0 %v17506_v42  ;;  %v3188_v52 = vand.u32 2147483647, %v3060_v32  ;;  %4090 = vmatmul.mubr.f32.gmra.mrb[8].mxu0 %v3693_v28  ;;  %v996_v1 = vsub.f32 %v11717_v10, %v702_v30  ;;  %v12140_v13 = vmax.f32 %v3314_v23, 0.0  ;;  %v3315_v46 = vsub.f32 1.0, %v3187_v18  ;;  %v707_v25 = vpop.permute.xlu1 %706 }
  0xc4   : > { %17514 = vst [vmem:[#allocation63_spill] sm:$0xff] %v12136_v63  ;;  %v1123_v43 = vand.u32 2147483647, %v995_v14  ;;  %v3696_v8 = vmul.f32 %v12121_v54, %v12106_v57  ;;  %v17516_v29 = vpack.c.bf16 %v11817_v3, %v11812_v2  ;;  %v12148_v28 = vmax.f32 %v1249_v15, 0.0  ;;  %796 = vperm.xlu1 %10747, %v11834_v60  }
  0xc5   : > { %17515 = vst [vmem:[#allocation64_spill] sm:$0xff] %v12140_v13  ;;  %v3316_v38 = vsub.f32 1.0, %v3188_v52  ;;  %v1124_v30 = vand.u32 2147483647, %v996_v1  ;;  %v3061_v32 = vsub.f32 %v11719_v11, %v2823_v16  ;;  %v3062_v23 = vsub.f32 %v11721_v12, %v2823_v16 }
  0xc6   : > { %10338 = vmatpush1.bf16.msra.mxu0 %v17516_v29  ;;  %v1251_v18 = vsub.f32 1.0, %v1123_v43  ;;  %4094 = vmatprep.mubr.f32.mxu0 %v3696_v8  ;;  %v3695_v2 = vmul.f32 %v12115_v37, %v12100_v5  ;;  %v997_v3 = vsub.f32 %v11715_v9, %v707_v25  ;;  %v12157_v14 = vmax.f32 %v1250_v33, 0.0  ;;  %v2831_v29 = vpop.permute.xlu0 %2830 }
  0xc7   : > { %10339 = vmatprep.subr.bf16.mxu0 %v17506_v42  ;;  %v1252_v15 = vsub.f32 1.0, %v1124_v30  ;;  %v3189_v52 = vand.u32 2147483647, %v3061_v32  ;;  %v998_v1 = vsub.f32 %v11717_v10, %v707_v25  ;;  %v12161_v54 = vmax.f32 %v3315_v46, 0.0  ;;  %v712_v37 = vpop.permute.xlu1 %711  ;;  %861 = vperm.xlu0 %10760, %v11870_v26   ;;  %v17558_v26 = vld [vmem:[#allocation31_spill] sm:$0xff] }
  0xc8   : > { %v3190_v43 = vand.u32 2147483647, %v3062_v23  ;;  %4095 = vmatmul.mubr.f32.gmra.mrb[10].mxu0 %v3695_v2  ;;  %v1125_v8 = vand.u32 2147483647, %v997_v3  ;;  %v3698_v16 = vmul.f32 %v12140_v13, %v12132_v58  ;;  %v12165_v4 = vmax.f32 %v3316_v38, 0.0  ;;  %10749 = vset.pattern.permute.xlu1 %v17490_v62 }
  0xc9   : > { %17517 = vst [vmem:[#allocation65_spill] sm:$0xff] %v12161_v54  ;;  %v3317_v33 = vsub.f32 1.0, %v3189_v52  ;;  %v1126_v50 = vand.u32 2147483647, %v998_v1  ;;  %v17519_v30 = vpack.c.bf16 %v11828_v22, %v11823_v19  ;;  %v3063_v25 = vsub.f32 %v11719_v11, %v2827_v39  ;;  %1600 = vperm.xlu1 %10749, %v11834_v60  }
  0xca   : > { %17518 = vst [vmem:[#allocation66_spill] sm:$0xff] %v12165_v4  ;;  %v12172_v46 = vmax.f32 %v1251_v18, 0.0  ;;  %v3318_v32 = vsub.f32 1.0, %v3190_v43  ;;  %4099 = vmatprep.mubr.f32.mxu0 %v3698_v16  ;;  %v3064_v23 = vsub.f32 %v11721_v12, %v2827_v39  ;;  %v3697_v38 = vmul.f32 %v12136_v63, %v12130_v61  ;;  %v2835_v52 = vpop.permute.xlu0 %2834 }
  0xcb   : > { %10341 = vmatpush1.bf16.msra.mxu0 %v17519_v30  ;;  %v12178_v2 = vmax.f32 %v1252_v15, 0.0  ;;  %v1253_v3 = vsub.f32 1.0, %v1125_v8  ;;  %v3191_v19 = vand.u32 2147483647, %v3063_v25  ;;  %v999_v22 = vsub.f32 %v11715_v9, %v712_v37  ;;  %v717_v16 = vpop.permute.xlu1 %716  ;;  %10763 = vset.pattern.permute.xlu0 %v17490_v62 }
  0xcc   : > { %10342 = vmatprep.subr.bf16.mxu0 %v17506_v42  ;;  %v12182_v18 = vmax.f32 %v3317_v33, 0.0  ;;  %v1254_v1 = vsub.f32 1.0, %v1126_v50  ;;  %v3192_v43 = vand.u32 2147483647, %v3064_v23  ;;  %4100 = vmatmul.mubr.f32.gmra.mrb[12].mxu0 %v3697_v38  ;;  %v1000_v39 = vsub.f32 %v11717_v10, %v712_v37 }
  0xcd   : > { %v12186_v30 = vmax.f32 %v3318_v32, 0.0  ;;  %v3319_v15 = vsub.f32 1.0, %v3191_v19  ;;  %v1127_v8 = vand.u32 2147483647, %v999_v22  ;;  %v3700_v25 = vmul.f32 %v12165_v4, %v12157_v14  ;;  %1656 = vperm.xlu0 %10763, %v11872_v44   ;;  %1604 = vperm.xlu1 %10749, %v11746_v34  }
  0xce   : > { %17520 = vst [vmem:[#allocation67_spill] sm:$0xff] %v12182_v18  ;;  %v17522_v63 = vpack.c.bf16 %v11844_v24, %v11839_v45  ;;  %v3320_v50 = vsub.f32 1.0, %v3192_v43  ;;  %v1128_v33 = vand.u32 2147483647, %v1000_v39  ;;  %v3065_v37 = vsub.f32 %v11719_v11, %v2831_v29 }
  0xcf   : > { %17521 = vst [vmem:[#allocation68_spill] sm:$0xff] %v12186_v30  ;;  %v3066_v23 = vsub.f32 %v11721_v12, %v2831_v29  ;;  %v12198_v32 = vmax.f32 %v1253_v3, 0.0  ;;  %v1255_v38 = vsub.f32 1.0, %v1127_v8  ;;  %4104 = vmatprep.mubr.f32.mxu0 %v3700_v25  ;;  %v3699_v45 = vmul.f32 %v12161_v54, %v12148_v28  ;;  %v722_v29 = vpop.permute.xlu1 %721 }
  0xd0   : > { %10344 = vmatpush1.bf16.msra.mxu0 %v17522_v63  ;;  %v1001_v24 = vsub.f32 %v11715_v9, %v717_v16  ;;  %v2839_v63 = vpop.permute.xlu0 %2838  ;;  %v12203_v19 = vmax.f32 %v1254_v1, 0.0  ;;  %v1256_v22 = vsub.f32 1.0, %v1128_v33  ;;  %v3193_v43 = vand.u32 2147483647, %v3065_v37 }
  0xd1   : > { %10345 = vmatprep.subr.bf16.mxu0 %v17506_v42  ;;  %v3194_v39 = vand.u32 2147483647, %v3066_v23  ;;  %v12206_v4 = vmax.f32 %v3319_v15, 0.0  ;;  %4105 = vmatmul.mubr.f32.gmra.mrb[14].mxu0 %v3699_v45  ;;  %v1002_v3 = vsub.f32 %v11717_v10, %v717_v16  ;;  %v3702_v25 = vmul.f32 %v12186_v30, %v12178_v2  ;;  %v17527_v15 = vld [vmem:[#allocation28_spill] sm:$0xff] }
  0xd2   : > { %v1129_v8 = vand.u32 2147483647, %v1001_v24  ;;  %v12211_v54 = vmax.f32 %v3320_v50, 0.0  ;;  %v12213_v13 = vmax.f32 %v1255_v38, 0.0  ;;  %v17526_v33 = vpack.c.bf16 %v11857_v48, %v11849_v49  ;;  %1668 = vperm.xlu0 %10763, %v17527_v15   ;;  %10750 = vset.pattern.permute.xlu1 %v17476_v36  ;;  %v17537_v15 = vld [vmem:[#allocation32_spill] sm:$0xff] }
  0xd3   : > { %17523 = vst [vmem:[#allocation69_spill] sm:$0xff] %v12206_v4  ;;  %v3322_v1 = vsub.f32 1.0, %v3194_v39  ;;  %v3067_v37 = vsub.f32 %v11719_v11, %v2835_v52  ;;  %v3321_v23 = vsub.f32 1.0, %v3193_v43  ;;  %v1130_v45 = vand.u32 2147483647, %v1002_v3  ;;  %4109 = vmatprep.mubr.f32.mxu0 %v3702_v25 }
  0xd4   : > { %17524 = vst [vmem:[#allocation70_spill] sm:$0xff] %v12211_v54  ;;  %17525 = vst [vmem:[#allocation71_spill] sm:$0xff] %v12213_v13  ;;  %10347 = vmatpush1.bf16.msra.mxu0 %v17526_v33  ;;  %v3068_v16 = vsub.f32 %v11721_v12, %v2835_v52  ;;  %v3701_v50 = vmul.f32 %v12182_v18, %v12172_v46  ;;  %v2843_v38 = vpop.permute.xlu0 %2842  ;;  %v12224_v24 = vmax.f32 %v1256_v22, 0.0  ;;  %v1257_v39 = vsub.f32 1.0, %v1129_v8  ;;  %v727_v33 = vpop.permute.xlu1 %726  ;;  %v17529_v18 = vld [vmem:[#allocation13_spill] sm:$0xff] }
  0xd5   : > { %10348 = vmatprep.subr.bf16.mxu0 %v17506_v42  ;;  %v3195_v49 = vand.u32 2147483647, %v3067_v37  ;;  %v1003_v48 = vsub.f32 %v11715_v9, %v722_v29  ;;  %v12228_v43 = vmax.f32 %v3322_v1, 0.0  ;;  %v1258_v3 = vsub.f32 1.0, %v1130_v45  ;;  %806 = vperm.xlu1 %10750, %v17529_v18   ;;  %v17530_v8 = vld [vmem:[#allocation21_spill] sm:$0xff]  ;;  %v17531_v37 = vld [vmem:[#allocation20_spill] sm:$0xff] }
  0xd6   : > { %v3196_v25 = vand.u32 2147483647, %v3068_v16  ;;  %4110 = vmatmul.mubr.f32.gmra.mrb[16].mxu0 %v3701_v50  ;;  %v1004_v52 = vsub.f32 %v11717_v10, %v722_v29  ;;  %v3704_v22 = vmul.f32 %v12211_v54, %v12203_v19  ;;  %v17532_v59 = vpack.c.bf16 %v17530_v8, %v17531_v37  ;;  %10766 = vset.pattern.permute.xlu0 %v17476_v36  ;;  %v17534_v50 = vld [vmem:[#allocation29_spill] sm:$0xff] }
  0xd7   : > { %17528 = vst [vmem:[#allocation72_spill] sm:$0xff] %v12228_v43  ;;  %v3323_v30 = vsub.f32 1.0, %v3195_v49  ;;  %v1131_v34 = vand.u32 2147483647, %v1003_v48  ;;  %v3069_v21 = vsub.f32 %v11719_v11, %v2839_v63  ;;  %v12239_v1 = vmax.f32 %v3321_v23, 0.0  ;;  %876 = vperm.xlu0 %10766, %v17534_v50  }
  0xd8   : > { %10350 = vmatpush1.bf16.msra.mxu0 %v17532_v59  ;;  %v3324_v45 = vsub.f32 1.0, %v3196_v25  ;;  %v1132_v16 = vand.u32 2147483647, %v1004_v52  ;;  %v3070_v29 = vsub.f32 %v11721_v12, %v2839_v63  ;;  %v12244_v49 = vpop.permute.xlu0 %2846  ;;  %v12246_v48 = vmax.f32 %v1257_v39, 0.0  ;;  %4114 = vmatprep.mubr.f32.mxu0 %v3704_v22  ;;  %v732_v23 = vpop.permute.xlu1 %731 }
  0xd9   : > { %17533 = vst [vmem:[#allocation21_spill] sm:$0xff] %v12239_v1  ;;  %10351 = vmatprep.subr.bf16.mxu0 %v17506_v42  ;;  %v1259_v8 = vsub.f32 1.0, %v1131_v34  ;;  %v3197_v59 = vand.u32 2147483647, %v3069_v21  ;;  %v3703_v37 = vmul.f32 %v12206_v4, %v12198_v32  ;;  %v12250_v54 = vmax.f32 %v1258_v3, 0.0  ;;  %811 = vperm.xlu1 %10750, %v17537_v15   ;;  %v17540_v4 = vld [vmem:[#allocation25_spill] sm:$0xff] }
  0xda   : > { %17535 = vst [vmem:[#allocation20_spill] sm:$0xff] %v12246_v48  ;;  %v1260_v25 = vsub.f32 1.0, %v1132_v16  ;;  %v3198_v52 = vand.u32 2147483647, %v3070_v29  ;;  %v1005_v63 = vsub.f32 %v11715_v9, %v727_v33  ;;  %v12254_v18 = vmax.f32 %v3323_v30, 0.0  ;;  %v17541_v16 = vld [vmem:[#allocation24_spill] sm:$0xff] }
  0xdb   : > { %17536 = vst [vmem:[#allocation73_spill] sm:$0xff] %v12250_v54  ;;  %v12256_v50 = vmax.f32 %v3324_v45, 0.0  ;;  %4115 = vmatmul.mubr.f32.gmra.mrb[18].mxu0 %v3703_v37  ;;  %v1006_v34 = vsub.f32 %v11717_v10, %v727_v33  ;;  %v3706_v21 = vmul.f32 %v12228_v43, %v12224_v24  ;;  %v3325_v39 = vsub.f32 1.0, %v3197_v59  ;;  %891 = vperm.xlu0 %10766, %v17543_v27  }
  0xdc   : > { %17538 = vst [vmem:[#allocation74_spill] sm:$0xff] %v12254_v18  ;;  %v3326_v22 = vsub.f32 1.0, %v3198_v52  ;;  %v1133_v3 = vand.u32 2147483647, %v1005_v63  ;;  %v17542_v29 = vpack.c.bf16 %v17540_v4, %v17541_v16  ;;  %v3071_v60 = vsub.f32 %v11719_v11, %v2843_v38  ;;  %v12266_v30 = vpop.permute.xlu0 %2850  ;;  %v737_v52 = vpop.permute.xlu1 %736 }
  0xdd   : > { %17539 = vst [vmem:[#allocation75_spill] sm:$0xff] %v12256_v50  ;;  %v12268_v45 = vmax.f32 %v1259_v8, 0.0  ;;  %v1134_v37 = vand.u32 2147483647, %v1006_v34  ;;  %4119 = vmatprep.mubr.f32.mxu0 %v3706_v21  ;;  %v3072_v33 = vsub.f32 %v11721_v12, %v2843_v38  ;;  %v3705_v59 = vmul.f32 %v12239_v1, %v12213_v13  ;;  %10752 = vset.pattern.permute.xlu1 %v17490_v62  ;;  %v17549_v1 = vld [vmem:[#allocation26_spill] sm:$0xff]  ;;  %v316_v13 = vld [vmem:[%s11456_s15 + $0x1e8] sm:$0xff] }
  0xde   : > { %10353 = vmatpush1.bf16.msra.mxu0 %v17542_v29  ;;  %v12274_v4 = vmax.f32 %v1260_v25, 0.0  ;;  %v1261_v63 = vsub.f32 1.0, %v1133_v3  ;;  %v3199_v16 = vand.u32 2147483647, %v3071_v60  ;;  %v1007_v29 = vsub.f32 %v11715_v9, %v732_v23  ;;  %1612 = vperm.xlu1 %10752, %v17537_v15   ;;  %v17548_v60 = vld [vmem:[#allocation27_spill] sm:$0xff] }
  0xdf   : > { %17544 = vst [vmem:[#allocation25_spill] sm:$0xff] %v12268_v45  ;;  %10354 = vmatprep.subr.bf16.mxu0 %v17506_v42  ;;  %v1262_v8 = vsub.f32 1.0, %v1134_v37  ;;  %v3200_v43 = vand.u32 2147483647, %v3072_v33  ;;  %4120 = vmatmul.mubr.f32.gmra.mrb[20].mxu0 %v3705_v59  ;;  %v1008_v34 = vsub.f32 %v11717_v10, %v732_v23  ;;  %v3708_v38 = vmul.f32 %v12256_v50, %v12250_v54 }
  0xe0   : > { %17545 = vst [vmem:[#allocation24_spill] sm:$0xff] %v12274_v4  ;;  %v12282_v21 = vmax.f32 %v3325_v39, 0.0  ;;  %v12284_v25 = vmax.f32 %v3326_v22, 0.0  ;;  %v1135_v3 = vand.u32 2147483647, %v1007_v29  ;;  %v17550_v27 = vpack.c.bf16 %v17548_v60, %v17549_v1  ;;  %10769 = vset.pattern.permute.xlu0 %v17490_v62  ;;  %v12297_v22 = vpop.permute.xlu0 %1496 }
  0xe1   : > { %v3073_v37 = vsub.f32 %v11719_v11, %v12244_v49  ;;  %v12292_v23 = vmax.f32 %v1261_v63, 0.0  ;;  %v3328_v33 = vsub.f32 1.0, %v3200_v43  ;;  %v1136_v59 = vand.u32 2147483647, %v1008_v34  ;;  %4124 = vmatprep.mubr.f32.mxu0 %v3708_v38  ;;  %17552 = vst [vmem:[#allocation26_spill] sm:$0xff] %v12297_v22  ;;  %v17554_v63 = vld [vmem:[#allocation38_spill] sm:$0xff]  ;;  %v12304_v43 = vpop.permute.xlu1 %1492 }
  0xe2   : > { %17546 = vst [vmem:[#allocation76_spill] sm:$0xff] %v12282_v21  ;;  %17547 = vst [vmem:[#allocation77_spill] sm:$0xff] %v12284_v25  ;;  %10356 = vmatpush1.bf16.msra.mxu0 %v17550_v27  ;;  %v3074_v39 = vsub.f32 %v11721_v12, %v12244_v49  ;;  %v12299_v29 = vmax.f32 %v1262_v8, 0.0  ;;  %v3327_v27 = vsub.f32 1.0, %v3199_v16  ;;  %v3707_v60 = vmul.f32 %v12254_v18, %v12246_v48  ;;  %v291_v18 = vld [vmem:[%s11456_s15 + $0x120] sm:$0xff] }
  0xe3   : > { %17551 = vst [vmem:[#allocation27_spill] sm:$0xff] %v12292_v23  ;;  %10357 = vmatprep.subr.bf16.mxu0 %v17506_v42  ;;  %v3201_v1 = vand.u32 2147483647, %v3073_v37  ;;  %1680 = vperm.xlu0 %10769, %v17554_v63   ;;  %17555 = vst [vmem:[#allocation79_spill] sm:$0xff] %v12304_v43  ;;  %v12306_v34 = vmax.f32 %v3328_v33, 0.0  ;;  %v1264_v38 = vsub.f32 1.0, %v1136_v59  ;;  %v1009_v50 = vsub.f32 %v11715_v9, %v737_v52 }
  0xe4   : > { %17553 = vst [vmem:[#allocation78_spill] sm:$0xff] %v12299_v29  ;;  %v3202_v49 = vand.u32 2147483647, %v3074_v39  ;;  %1616 = vperm.xlu1 %10752, %v11788_v20   ;;  %v1263_v8 = vsub.f32 1.0, %v1135_v3  ;;  %4125 = vmatmul.mubr.f32.gmra.mrb[22].mxu0 %v3707_v60  ;;  %v1010_v16 = vsub.f32 %v11717_v10, %v737_v52  ;;  %v3710_v37 = vmul.f32 %v12284_v25, %v12274_v4  ;;  %v17559_v59 = vld [vmem:[#allocation30_spill] sm:$0xff]  ;;  %v12321_v3 = vpop.permute.xlu0 %1508 }
  0xe5   : > { %17556 = vst [vmem:[#allocation80_spill] sm:$0xff] %v12306_v34  ;;  %v3329_v15 = vsub.f32 1.0, %v3201_v1  ;;  %v12314_v63 = vmax.f32 %v1264_v38, 0.0  ;;  %v1137_v33 = vand.u32 2147483647, %v1009_v50  ;;  %v17560_v39 = vpack.c.bf16 %v17558_v26, %v17559_v59  ;;  %17561 = vst [vmem:[#allocation31_spill] sm:$0xff] %v12321_v3  ;;  %v12330_v26 = vpop.permute.xlu1 %1500 }
  0xe6   : > { %v3330_v44 = vsub.f32 1.0, %v3202_v49  ;;  %v3075_v20 = vsub.f32 %v11719_v11, %v12266_v30  ;;  %v12323_v1 = vmax.f32 %v3327_v27, 0.0  ;;  %v1138_v52 = vand.u32 2147483647, %v1010_v16  ;;  %4129 = vmatprep.mubr.f32.mxu0 %v3710_v37  ;;  %17563 = vst [vmem:[#allocation82_spill] sm:$0xff] %v12330_v26  ;;  %v17565_v59 = vld [vmem:[#allocation39_spill] sm:$0xff] }
  0xe7   : > { %17557 = vst [vmem:[#allocation81_spill] sm:$0xff] %v12314_v63  ;;  %10359 = vmatpush1.bf16.msra.mxu0 %v17560_v39  ;;  %v3076_v60 = vsub.f32 %v11721_v12, %v12266_v30  ;;  %v3709_v50 = vmul.f32 %v12282_v21, %v12268_v45  ;;  %v3712_v27 = vmul.f32 %v12306_v34, %v12299_v29  ;;  %v355_v16 = vmul.f32 2.0, %v291_v18  ;;  %v17566_v25 = vld [vmem:[#allocation14_spill] sm:$0xff] }
  0xe8   : > { %17562 = vst [vmem:[#allocation30_spill] sm:$0xff] %v12323_v1  ;;  %10360 = vmatprep.subr.bf16.mxu0 %v17506_v42  ;;  %v12332_v38 = vmax.f32 %v3330_v44, 0.0  ;;  %v3203_v49 = vand.u32 2147483647, %v3075_v20  ;;  %1692 = vperm.xlu0 %10769, %v17565_v59   ;;  %v1265_v30 = vsub.f32 1.0, %v1137_v33  ;;  %v1266_v37 = vsub.f32 1.0, %v1138_v52  ;;  %v12351_v33 = vpop.permute.xlu0 %1516 }
  0xe9   : > { %10753 = vset.pattern.permute.xlu1 %v17476_v36  ;;  %v3204_v39 = vand.u32 2147483647, %v3076_v60  ;;  %4130 = vmatmul.mubr.f32.gmra.mrb[24].mxu0 %v3709_v50  ;;  %v2277_v21 = vsub.f32 %v11719_v11, %v12304_v43  ;;  %v313_v44 = vld [vmem:[%s11456_s15 + $0x1d0] sm:$0xff]  ;;  %v12342_v45 = vmax.f32 %v1263_v8, 0.0  ;;  %v12344_v20 = vmax.f32 %v3329_v15, 0.0  ;;  %v17569_v59 = vld [vmem:[#allocation35_spill] sm:$0xff]  ;;  %v12358_v15 = vpop.permute.xlu1 %1504 }
  0xea   : > { %17564 = vst [vmem:[#allocation83_spill] sm:$0xff] %v12332_v38  ;;  %821 = vperm.xlu1 %10753, %v17566_v25   ;;  %v3331_v34 = vsub.f32 1.0, %v3203_v49  ;;  %4134 = vmatprep.mubr.f32.mxu0 %v3712_v27  ;;  %v17570_v29 = vld [vmem:[#allocation34_spill] sm:$0xff]  ;;  %v3714_v18 = vmul.f32 %v12332_v38, %v12314_v63  ;;  %17572 = vst [vmem:[#allocation35_spill] sm:$0xff] %v12351_v33  ;;  %v12353_v52 = vmax.f32 %v1266_v37, 0.0  ;;  %v420_v49 = vadd.f32 1.0, %v355_v16 }
  0xeb   : > { %17567 = vst [vmem:[#allocation84_spill] sm:$0xff] %v12342_v45  ;;  %17568 = vst [vmem:[#allocation85_spill] sm:$0xff] %v12344_v20  ;;  %v17571_v4 = vpack.c.bf16 %v17569_v59, %v17570_v29  ;;  %v3332_v60 = vsub.f32 1.0, %v3204_v39  ;;  %v2405_v50 = vand.u32 2147483647, %v2277_v21  ;;  %v3711_v8 = vmul.f32 %v12323_v1, %v12292_v23  ;;  %v17578_v39 = vld [vmem:[#allocation40_spill] sm:$0xff] }
  0xec   : > { %17573 = vst [vmem:[#allocation34_spill] sm:$0xff] %v12353_v52  ;;  %17574 = vst [vmem:[#allocation86_spill] sm:$0xff] %v12358_v15  ;;  %10772 = vset.pattern.permute.xlu0 %v17476_v36  ;;  %v2280_v29 = vsub.f32 %v11721_v12, %v12297_v22  ;;  %v377_v27 = vmul.f32 2.0, %v313_v44  ;;  %v12365_v59 = vmax.f32 %v1265_v30, 0.0  ;;  %v12367_v21 = vmax.f32 %v3331_v34, 0.0  ;;  %v17579_v25 = vld [vmem:[#allocation37_spill] sm:$0xff]  ;;  %v12377_v30 = vpop.permute.xlu0 %1524 }
  0xed   : > { %10362 = vmatpush1.bf16.msra.mxu0 %v17571_v4  ;;  %v2278_v4 = vsub.f32 %v11721_v12, %v12304_v43  ;;  %v12369_v37 = vmax.f32 %v3332_v60, 0.0  ;;  %906 = vperm.xlu0 %10772, %v17578_v39   ;;  %v2279_v38 = vsub.f32 %v11719_v11, %v12297_v22  ;;  %v2533_v1 = vsub.f32 1.0, %v2405_v50  ;;  %v17580_v43 = vld [vmem:[#allocation36_spill] sm:$0xff]  ;;  %17582 = vst [vmem:[#allocation37_spill] sm:$0xff] %v12377_v30  ;;  %v17587_v23 = vld [vmem:[#allocation47_spill] sm:$0xff] }
  0xee   : > { %10363 = vmatprep.subr.bf16.mxu0 %v17506_v42  ;;  %17575 = vst [vmem:[#allocation87_spill] sm:$0xff] %v12365_v59  ;;  %17576 = vst [vmem:[#allocation88_spill] sm:$0xff] %v12367_v21  ;;  %4135 = vmatmul.mubr.f32.gmra.mrb[26].mxu0 %v3711_v8  ;;  %v17581_v63 = vpack.c.bf16 %v17579_v25, %v17580_v43  ;;  %v2408_v34 = vand.u32 2147483647, %v2280_v29  ;;  %v2282_v44 = vsub.f32 %v11721_v12, %v12330_v26  ;;  %v12387_v8 = vpop.permute.xlu1 %1512  ;;  %v17585_v25 = vld [vmem:[#allocation46_spill] sm:$0xff] }
  0xef   : > { %17577 = vst [vmem:[#allocation89_spill] sm:$0xff] %v12369_v37  ;;  %4139 = vmatprep.mubr.f32.mxu0 %v3714_v18  ;;  %v2406_v16 = vand.u32 2147483647, %v2278_v4  ;;  %v3713_v60 = vmul.f32 %v12344_v20, %v12342_v45  ;;  %v3716_v50 = vmul.f32 %v12369_v37, %v12353_v52  ;;  %v17583_v18 = vld [vmem:[#allocation41_spill] sm:$0xff]  ;;  %17584 = vst [vmem:[#allocation36_spill] sm:$0xff] %v12387_v8  ;;  %v17586_v45 = vld [vmem:[#allocation44_spill] sm:$0xff] }
  0xf0   : > { %826 = vperm.xlu1 %10753, %v17583_v18   ;;  %v2407_v43 = vand.u32 2147483647, %v2279_v38  ;;  %v314_v4 = vld [vmem:[%s11456_s15 + $0x1d8] sm:$0xff]  ;;  %v2536_v22 = vsub.f32 1.0, %v2408_v34  ;;  %v2410_v39 = vand.u32 2147483647, %v2282_v44  ;;  %v2281_v20 = vsub.f32 %v11719_v11, %v12330_v26 }
  0xf1   : > { %10365 = vmatpush1.bf16.msra.mxu0 %v17581_v63  ;;  %v568_v63 = vmax.f32 %v17585_v25, 0.0  ;;  %v2534_v29 = vsub.f32 1.0, %v2406_v16  ;;  %921 = vperm.xlu0 %10772, %v17586_v45   ;;  %v503_v37 = vmul.f32 7.5, %v17587_v23  ;;  %v2284_v52 = vsub.f32 %v11721_v12, %v12358_v15  ;;  %v17588_v38 = vld [vmem:[#allocation43_spill] sm:$0xff]  ;;  %v17589_v16 = vld [vmem:[#allocation42_spill] sm:$0xff] }
  0xf2   : > { %10366 = vmatprep.subr.bf16.mxu0 %v17506_v42  ;;  %4140 = vmatmul.mubr.f32.gmra.mrb[28].mxu0 %v3713_v60  ;;  %v484_v48 = vmul.f32 7.5, %v420_v49  ;;  %v442_v54 = vadd.f32 1.0, %v377_v27  ;;  %v2661_v25 = vmax.f32 %v2533_v1, 0.0  ;;  %v17590_v34 = vpack.c.bf16 %v17588_v38, %v17589_v16  ;;  %v12402_v60 = vpop.permute.xlu0 %1532  ;;  %v12407_v49 = vpop.permute.xlu1 %1520 }
  0xf3   : > { %4144 = vmatprep.mubr.f32.mxu0 %v3716_v50  ;;  %v3715_v44 = vmul.f32 %v12367_v21, %v12365_v59  ;;  %v2662_v26 = vmax.f32 %v2534_v29, 0.0  ;;  %17591 = vst [vmem:[#allocation46_spill] sm:$0xff] %v12402_v60  ;;  %v378_v45 = vmul.f32 2.0, %v314_v4  ;;  %v2664_v23 = vmax.f32 %v2536_v22, 0.0  ;;  %17592 = vst [vmem:[#allocation47_spill] sm:$0xff] %v12407_v49  ;;  %v17594_v21 = vld [vmem:[#allocation49_spill] sm:$0xff] }
  0xf4   : > { %10755 = vset.pattern.permute.xlu1 %v17490_v62  ;;  %v2535_v1 = vsub.f32 1.0, %v2407_v43  ;;  %v2409_v27 = vand.u32 2147483647, %v2281_v20  ;;  %v2283_v50 = vsub.f32 %v11719_v11, %v12358_v15  ;;  %v2538_v29 = vsub.f32 1.0, %v2410_v39  ;;  %v317_v59 = vld [vmem:[%s11456_s15 + $0x1f0] sm:$0xff] }
  0xf5   : > { %10368 = vmatpush1.bf16.msra.mxu0 %v17590_v34  ;;  %v3558_v38 = vmul.f32 %v2662_v26, %v12019_v31  ;;  %1624 = vperm.xlu1 %10755, %v17583_v18   ;;  %v2412_v4 = vand.u32 2147483647, %v2284_v52  ;;  %v2286_v16 = vsub.f32 %v11721_v12, %v12321_v3  ;;  %v12416_v22 = vmin.f32 %v568_v63, 15.0  ;;  %v17596_v31 = vld [vmem:[#allocation48_spill] sm:$0xff]  ;;  %v17598_v63 = vld [vmem:[#allocation45_spill] sm:$0xff] }
  0xf6   : > { %10369 = vmatprep.subr.bf16.mxu0 %v17506_v42  ;;  %4145 = vmatmul.mubr.f32.gmra.mrb[30].mxu0 %v3715_v44  ;;  %v567_v43 = vmax.f32 %v503_v37, 0.0  ;;  %v506_v20 = vmul.f32 7.5, %v442_v54  ;;  %v380_v34 = vmul.f32 2.0, %v316_v13  ;;  %v17595_v15 = vpack.c.bf16 %v12011_v40, %v17594_v21  ;;  %v12422_v39 = vpop.permute.xlu0 %1540  ;;  %v12429_v37 = vpop.permute.xlu1 %1528 }
  0xf7   : > { %10775 = vset.pattern.permute.xlu0 %v17490_v62  ;;  %17593 = vst [vmem:[#allocation43_spill] sm:$0xff] %v12416_v22  ;;  %4454 = vmatprep.mubr.f32.mxu0 %v3558_v38  ;;  %v3557_v26 = vmul.f32 %v2661_v25, %v17596_v31  ;;  %17597 = vst [vmem:[#allocation42_spill] sm:$0xff] %v12422_v39  ;;  %v548_v52 = vmax.f32 %v484_v48, 0.0  ;;  %v2285_v44 = vsub.f32 %v11719_v11, %v12321_v3 }
  0xf8   : > { %v443_v18 = vadd.f32 1.0, %v378_v45  ;;  %1704 = vperm.xlu0 %10775, %v17598_v63   ;;  %v3560_v54 = vmul.f32 %v2664_v23, %v11995_v47  ;;  %v2663_v13 = vmax.f32 %v2535_v1, 0.0  ;;  %17599 = vst [vmem:[#allocation49_spill] sm:$0xff] %v12429_v37  ;;  %v2537_v40 = vsub.f32 1.0, %v2409_v27 }
  0xf9   : > { %10371 = vmatpush1.bf16.msra.mxu0 %v17595_v15  ;;  %v2411_v15 = vand.u32 2147483647, %v2283_v50  ;;  %1628 = vperm.xlu1 %10755, %v11799_v7   ;;  %v2666_v48 = vmax.f32 %v2538_v29, 0.0  ;;  %v2540_v21 = vsub.f32 1.0, %v2412_v4  ;;  %v2414_v25 = vand.u32 2147483647, %v2286_v16 }
  0xfa   : > { %10372 = vmatprep.subr.bf16.mxu0 %v17506_v42  ;;  %v2288_v45 = vsub.f32 %v11721_v12, %v12387_v8  ;;  %v12435_v38 = vmin.f32 %v567_v43, 15.0  ;;  %v2287_v47 = vsub.f32 %v11719_v11, %v12387_v8  ;;  %v445_v23 = vadd.f32 1.0, %v380_v34  ;;  %v294_v4 = vld [vmem:[%s11456_s15 + $0x138] sm:$0xff]  ;;  %v12448_v3 = vpop.permute.xlu1 %1536 }
  0xfb   : > { %v381_v1 = vmul.f32 2.0, %v317_v59  ;;  %v12439_v27 = vmin.f32 %v548_v52, 15.0  ;;  %v570_v50 = vmax.f32 %v506_v20, 0.0  ;;  %v2413_v31 = vand.u32 2147483647, %v2285_v44  ;;  %17602 = vst [vmem:[#allocation91_spill] sm:$0xff] %v12448_v3 }
  0xfc   : > { %4455 = vmatmul.mubr.f32.vlgmr.msra.gmra.mrb[0].mxu0 %v3557_v26  ;;  %v2290_v29 = vsub.f32 %v11721_v12, %v12351_v33  ;;  %1716 = vperm.xlu0 %10775, %v12416_v22   ;;  %v3559_v16 = vmul.f32 %v2663_v13, %v11993_v53  ;;  %v2665_v43 = vmax.f32 %v2537_v40, 0.0  ;;  %v12446_v26 = vpop.permute.xlu0 %1548  ;;  %v2539_v34 = vsub.f32 1.0, %v2411_v15 }
  0xfd   : > { %4459 = vmatprep.mubr.f32.mxu0 %v3560_v54  ;;  %17600 = vst [vmem:[#allocation48_spill] sm:$0xff] %v12439_v27  ;;  %17601 = vst [vmem:[#allocation90_spill] sm:$0xff] %v12446_v26  ;;  %v507_v59 = vmul.f32 7.5, %v443_v18  ;;  %v17603_v54 = vld [vmem:[#allocation54_spill] sm:$0xff]  ;;  %10756 = vset.pattern.permute.xlu1 %v17476_v36  ;;  %v2668_v20 = vmax.f32 %v2540_v21, 0.0  ;;  %v2542_v44 = vsub.f32 1.0, %v2414_v25 }
  0xfe   : > { %v3562_v52 = vmul.f32 %v2666_v48, %v17603_v54  ;;  %v2416_v8 = vand.u32 2147483647, %v2288_v45  ;;  %836 = vperm.xlu1 %10756, %v11803_v55   ;;  %v2415_v7 = vand.u32 2147483647, %v2287_v47  ;;  %v509_v22 = vmul.f32 7.5, %v445_v23  ;;  %v12457_v21 = vpop.permute.xlu1 %1544 }
  0xff   : > { %v446_v53 = vadd.f32 1.0, %v381_v1  ;;  %v358_v13 = vmul.f32 2.0, %v294_v4  ;;  %v12453_v40 = vmin.f32 %v570_v50, 15.0  ;;  %v2541_v63 = vsub.f32 1.0, %v2413_v31  ;;  %17605 = vst [vmem:[#allocation92_spill] sm:$0xff] %v12457_v21 }
 0x100   : > { %4460 = vmatmul.mubr.f32.gmra.mrb[2].mxu0 %v3559_v16  ;;  %v2418_v15 = vand.u32 2147483647, %v2290_v29  ;;  %10778 = vset.pattern.permute.xlu0 %v17476_v36  ;;  %v3561_v18 = vmul.f32 %v2665_v43, %v12050_v6  ;;  %v2667_v48 = vmax.f32 %v2539_v34, 0.0  ;;  %v12459_v25 = vpop.permute.xlu0 %741  ;;  %v2289_v45 = vsub.f32 %v11719_v11, %v12351_v33 }
 0x101   : > { %4464 = vmatprep.mubr.f32.mxu0 %v3562_v52  ;;  %17604 = vst [vmem:[#allocation54_spill] sm:$0xff] %v12453_v40  ;;  %v2292_v47 = vsub.f32 %v11721_v12, %v12407_v49  ;;  %936 = vperm.xlu0 %10778, %v12435_v38   ;;  %v3564_v23 = vmul.f32 %v2668_v20, %v12076_v17  ;;  %v2670_v1 = vmax.f32 %v2542_v44, 0.0  ;;  %v2544_v50 = vsub.f32 1.0, %v2416_v8 }
 0x102   : > { %v571_v31 = vmax.f32 %v507_v59, 0.0  ;;  %841 = vperm.xlu1 %10756, %v12439_v27   ;;  %v2543_v6 = vsub.f32 1.0, %v2415_v7  ;;  %v573_v29 = vmax.f32 %v509_v22, 0.0  ;;  %v12468_v4 = vmul.f32 7.5, %v446_v53  ;;  %v12473_v17 = vpop.permute.xlu1 %1552 }
 0x103   : > { %v423_v16 = vadd.f32 1.0, %v358_v13  ;;  %v2669_v43 = vmax.f32 %v2541_v63, 0.0  ;;  %v2546_v34 = vsub.f32 1.0, %v2418_v15  ;;  %v2291_v54 = vsub.f32 %v11719_v11, %v12407_v49  ;;  %17606 = vst [vmem:[#allocation93_spill] sm:$0xff] %v12473_v17 }
 0x104   : > { %4465 = vmatmul.mubr.f32.gmra.mrb[4].mxu0 %v3561_v18  ;;  %v3563_v52 = vmul.f32 %v2667_v48, %v12074_v51  ;;  %v2417_v8 = vand.u32 2147483647, %v2289_v45  ;;  %v2420_v59 = vand.u32 2147483647, %v2292_v47  ;;  %v3566_v7 = vmul.f32 %v2670_v1, %v12089_v41  ;;  %v12479_v44 = vpop.permute.xlu0 %1560 }
 0x105   : > { %4469 = vmatprep.mubr.f32.mxu0 %v3564_v23  ;;  %951 = vperm.xlu0 %10778, %v12453_v40   ;;  %v2672_v22 = vmax.f32 %v2544_v50, 0.0  ;;  %v12477_v20 = vmin.f32 %v571_v31, 15.0  ;;  %17607 = vst [vmem:[#allocation94_spill] sm:$0xff] %v12479_v44  ;;  %v2294_v63 = vsub.f32 %v11721_v12, %v12377_v30  ;;  %v2671_v51 = vmax.f32 %v2543_v6, 0.0 }
 0x106   : > { %10758 = vset.pattern.permute.xlu1 %v17490_v62  ;;  %v12484_v53 = vmin.f32 %v573_v29, 15.0  ;;  %v574_v13 = vmax.f32 %v12468_v4, 0.0  ;;  %v487_v15 = vmul.f32 7.5, %v423_v16  ;;  %v3565_v41 = vmul.f32 %v2669_v43, %v12079_v56  ;;  %v12491_v47 = vpop.permute.xlu1 %1556 }
 0x107   : > { %1636 = vperm.xlu1 %10758, %v12439_v27   ;;  %v2674_v18 = vmax.f32 %v2546_v34, 0.0  ;;  %v2419_v48 = vand.u32 2147483647, %v2291_v54  ;;  %v2293_v45 = vsub.f32 %v11719_v11, %v12377_v30  ;;  %17609 = vst [vmem:[#allocation96_spill] sm:$0xff] %v12491_v47  ;;  %v2545_v23 = vsub.f32 1.0, %v2417_v8  ;;  %v17641_v27 = vld [vmem:[#allocation81_spill] sm:$0xff] }
 0x108   : > { %4470 = vmatmul.mubr.f32.gmra.mrb[6].mxu0 %v3563_v52  ;;  %17608 = vst [vmem:[#allocation95_spill] sm:$0xff] %v12484_v53  ;;  %v2548_v1 = vsub.f32 1.0, %v2420_v59  ;;  %v2296_v50 = vsub.f32 %v11721_v12, %v12429_v37  ;;  %v2295_v31 = vsub.f32 %v11719_v11, %v12429_v37  ;;  %v3568_v56 = vmul.f32 %v2672_v22, %v12106_v57  ;;  %v12501_v4 = vpop.permute.xlu0 %1572 }
 0x109   : > { %4474 = vmatprep.mubr.f32.mxu0 %v3566_v7  ;;  %10781 = vset.pattern.permute.xlu0 %v17490_v62  ;;  %v1011_v6 = vsub.f32 %v11715_v9, %v12459_v25  ;;  %v2422_v29 = vand.u32 2147483647, %v2294_v63  ;;  %17610 = vst [vmem:[#allocation97_spill] sm:$0xff] %v12501_v4  ;;  %v2298_v16 = vsub.f32 %v11721_v12, %v12402_v60  ;;  %v551_v54 = vmax.f32 %v487_v15, 0.0 }
 0x10a   : > { %1728 = vperm.xlu0 %10781, %v12477_v20   ;;  %v3567_v43 = vmul.f32 %v2671_v51, %v12100_v5  ;;  %v1012_v34 = vsub.f32 %v11717_v10, %v12459_v25  ;;  %v2297_v57 = vsub.f32 %v11719_v11, %v12402_v60  ;;  %v3570_v52 = vmul.f32 %v2674_v18, %v12132_v58  ;;  %v12515_v25 = vpop.permute.xlu1 %746 }
 0x10b   : > { %1640 = vperm.xlu1 %10758, %v11830_v35   ;;  %v2547_v8 = vsub.f32 1.0, %v2419_v48  ;;  %v2421_v59 = vand.u32 2147483647, %v2293_v45  ;;  %v2300_v7 = vsub.f32 %v11721_v12, %v12448_v3  ;;  %v2673_v22 = vmax.f32 %v2545_v23, 0.0 }
 0x10c   : > { %4475 = vmatmul.mubr.f32.gmra.mrb[8].mxu0 %v3565_v41  ;;  %v2676_v63 = vmax.f32 %v2548_v1, 0.0  ;;  %v2424_v5 = vand.u32 2147483647, %v2296_v50  ;;  %v2423_v51 = vand.u32 2147483647, %v2295_v31  ;;  %v2550_v15 = vsub.f32 1.0, %v2422_v29  ;;  %v12524_v23 = vpop.permute.xlu0 %756 }
 0x10d   : > { %4479 = vmatprep.mubr.f32.mxu0 %v3568_v56  ;;  %v1139_v41 = vand.u32 2147483647, %v1011_v6  ;;  %v2426_v60 = vand.u32 2147483647, %v2298_v16  ;;  %v2299_v56 = vsub.f32 %v11719_v11, %v12448_v3  ;;  %v1140_v58 = vand.u32 2147483647, %v1012_v34 }
 0x10e   : > { %10783 = vset.pattern.permute.xlu0 %v17476_v36  ;;  %v12520_v18 = vmin.f32 %v574_v13, 15.0  ;;  %v12522_v48 = vmin.f32 %v551_v54, 15.0  ;;  %v2425_v45 = vand.u32 2147483647, %v2297_v57  ;;  %v2675_v1 = vmax.f32 %v2547_v8, 0.0  ;;  %v297_v29 = vld [vmem:[%s11456_s15 + $0x150] sm:$0xff] }
 0x10f   : > { %966 = vperm.xlu0 %10783, %v12484_v53   ;;  %v2549_v50 = vsub.f32 1.0, %v2421_v59  ;;  %v2428_v31 = vand.u32 2147483647, %v2300_v7  ;;  %v2302_v6 = vsub.f32 %v11721_v12, %v12422_v39  ;;  %v3569_v16 = vmul.f32 %v2673_v22, %v12130_v61  ;;  %10759 = vset.pattern.permute.xlu1 %v17476_v36 }
 0x110   : > { %4480 = vmatmul.mubr.f32.gmra.mrb[10].mxu0 %v3567_v43  ;;  %17611 = vst [vmem:[#allocation98_spill] sm:$0xff] %v12520_v18  ;;  %v3572_v13 = vmul.f32 %v2676_v63, %v12157_v14  ;;  %v2552_v43 = vsub.f32 1.0, %v2424_v5  ;;  %v2551_v34 = vsub.f32 1.0, %v2423_v51  ;;  %v1267_v54 = vsub.f32 1.0, %v1139_v41  ;;  %851 = vperm.xlu1 %10759, %v11807_v0   ;;  %v12536_v30 = vpop.permute.xlu0 %771  ;;  %v17640_v0 = vld [vmem:[#allocation27_spill] sm:$0xff] }
 0x111   : > { %4484 = vmatprep.mubr.f32.mxu0 %v3570_v52  ;;  %v2678_v57 = vmax.f32 %v2550_v15, 0.0  ;;  %v12534_v52 = vpop.permute.xlu1 %751  ;;  %v2554_v8 = vsub.f32 1.0, %v2426_v60  ;;  %v2427_v59 = vand.u32 2147483647, %v2299_v56  ;;  %v1268_v7 = vsub.f32 1.0, %v1140_v58 }
 0x112   : > { %v2553_v3 = vsub.f32 1.0, %v2425_v45  ;;  %v361_v37 = vmul.f32 2.0, %v297_v29  ;;  %v2677_v61 = vmax.f32 %v2549_v50, 0.0  ;;  %v2556_v14 = vsub.f32 1.0, %v2428_v31 }
 0x113   : > { %10785 = vset.pattern.permute.xlu0 %v17490_v62  ;;  %v2430_v22 = vand.u32 2147483647, %v2302_v6  ;;  %v3571_v63 = vmul.f32 %v2675_v1, %v12148_v28  ;;  %v2680_v5 = vmax.f32 %v2552_v43, 0.0  ;;  %v2679_v51 = vmax.f32 %v2551_v34, 0.0 }
 0x114   : > { %4485 = vmatmul.mubr.f32.gmra.mrb[12].mxu0 %v3569_v16  ;;  %1740 = vperm.xlu0 %10785, %v12520_v18   ;;  %v12541_v60 = vmax.f32 %v1267_v54, 0.0  ;;  %v3574_v41 = vmul.f32 %v2678_v57, %v12178_v2  ;;  %v2682_v15 = vmax.f32 %v2554_v8, 0.0  ;;  %v2555_v56 = vsub.f32 1.0, %v2427_v59  ;;  %v12554_v16 = vpop.permute.xlu0 %1584 }
 0x115   : > { %4489 = vmatprep.mubr.f32.mxu0 %v3572_v13  ;;  %856 = vperm.xlu1 %10759, %v12522_v48   ;;  %v12545_v58 = vmax.f32 %v1268_v7, 0.0  ;;  %v1013_v45 = vsub.f32 %v11715_v9, %v12515_v25  ;;  %v12549_v50 = vpop.permute.xlu1 %1564  ;;  %v2681_v31 = vmax.f32 %v2553_v3, 0.0  ;;  %v426_v28 = vadd.f32 1.0, %v361_v37  ;;  %17613 = vst [vmem:[#allocation100_spill] sm:$0xff] %v12554_v16  ;;  %v17617_v7 = vld [vmem:[#allocation71_spill] sm:$0xff] }
 0x116   : > { %17612 = vst [vmem:[#allocation99_spill] sm:$0xff] %v12549_v50  ;;  %v1014_v1 = vsub.f32 %v11717_v10, %v12515_v25  ;;  %v3573_v2 = vmul.f32 %v2677_v61, %v12172_v46  ;;  %v2684_v6 = vmax.f32 %v2556_v14, 0.0  ;;  %v2558_v29 = vsub.f32 1.0, %v2430_v22  ;;  %v17615_v25 = vld [vmem:[#allocation2_spill] sm:$0xff]  ;;  %v17618_v22 = vld [vmem:[#allocation73_spill] sm:$0xff] }
 0x117   : > { %v17614_v13 = vmov 2   ;;  %v3576_v43 = vmul.f32 %v2680_v5, %v12203_v19  ;;  %v3575_v34 = vmul.f32 %v2679_v51, %v12198_v32  ;;  %v1017_v3 = vsub.f32 %v11715_v9, %v12524_v23 }
 0x118   : > { %4490 = vmatmul.mubr.f32.gmra.mrb[14].mxu0 %v3571_v63  ;;  %10787 = vset.pattern.permute.xlu0 %v17614_v13  ;;  %v2301_v37 = vsub.f32 %v11719_v11, %v12422_v39  ;;  %v3578_v46 = vmul.f32 %v2682_v15, %v12224_v24  ;;  %v1018_v54 = vsub.f32 %v11717_v10, %v12524_v23  ;;  %v2683_v57 = vmax.f32 %v2555_v56, 0.0  ;;  %v12579_v51 = vpop.permute.xlu0 %1596  ;;  %v17624_v39 = vld [vmem:[#allocation24_spill] sm:$0xff] }
 0x119   : > { %4494 = vmatprep.mubr.f32.mxu0 %v3574_v41  ;;  %2854 = vperm.xlu0 %10787, %v17615_v25   ;;  %v2304_v19 = vsub.f32 %v11721_v12, %v12457_v21  ;;  %v1141_v32 = vand.u32 2147483647, %v1013_v45  ;;  %v1015_v8 = vsub.f32 %v11715_v9, %v12534_v52  ;;  %v12573_v59 = vpop.permute.xlu1 %1568  ;;  %v3577_v61 = vmul.f32 %v2681_v31, %v17617_v7  ;;  %v17620_v31 = vld [vmem:[#allocation5_spill] sm:$0xff] }
 0x11a   : > { %10761 = vset.pattern.permute.xlu1 %v17490_v62  ;;  %17616 = vst [vmem:[#allocation2_spill] sm:$0xff] %v12573_v59  ;;  %v490_v14 = vmul.f32 7.5, %v426_v28  ;;  %v1142_v24 = vand.u32 2147483647, %v1014_v1  ;;  %v1016_v23 = vsub.f32 %v11717_v10, %v12534_v52  ;;  %v3580_v63 = vmul.f32 %v2684_v6, %v17618_v22  ;;  %17619 = vst [vmem:[#allocation71_spill] sm:$0xff] %v12579_v51  ;;  %v17621_v1 = vld [vmem:[#allocation20_spill] sm:$0xff] }
 0x11b   : > { %1648 = vperm.xlu1 %10761, %v12522_v48   ;;  %v2686_v5 = vmax.f32 %v2558_v29, 0.0  ;;  %v1145_v41 = vand.u32 2147483647, %v1017_v3  ;;  %v2429_v15 = vand.u32 2147483647, %v2301_v37  ;;  %v2303_v56 = vsub.f32 %v11719_v11, %v12457_v21 }
 0x11c   : > { %4495 = vmatmul.mubr.f32.gmra.mrb[16].mxu0 %v3573_v2  ;;  %v2306_v45 = vsub.f32 %v11721_v12, %v12446_v26  ;;  %v1146_v28 = vand.u32 2147483647, %v1018_v54  ;;  %v3579_v2 = vmul.f32 %v2683_v57, %v17621_v1  ;;  %v1023_v52 = vsub.f32 %v11715_v9, %v12536_v30 }
 0x11d   : > { %4499 = vmatprep.mubr.f32.mxu0 %v3576_v43  ;;  %2866 = vperm.xlu0 %10787, %v17620_v31   ;;  %v2432_v6 = vand.u32 2147483647, %v2304_v19  ;;  %v1143_v29 = vand.u32 2147483647, %v1015_v8  ;;  %v17622_v43 = vld [vmem:[#allocation22_spill] sm:$0xff]  ;;  %v554_v3 = vmax.f32 %v490_v14, 0.0  ;;  %v2305_v37 = vsub.f32 %v11719_v11, %v12446_v26  ;;  %v12594_v57 = vpop.permute.xlu1 %761  ;;  %v12598_v14 = vpop.permute.xlu0 %786 }
 0x11e   : > { %v2308_v25 = vsub.f32 %v11721_v12, %v12473_v17  ;;  %v1269_v7 = vsub.f32 1.0, %v1141_v32  ;;  %v1270_v22 = vsub.f32 1.0, %v1142_v24  ;;  %v1144_v54 = vand.u32 2147483647, %v1016_v23  ;;  %v17623_v26 = vld [vmem:[#allocation11_spill] sm:$0xff] }
 0x11f   : > { %1652 = vperm.xlu1 %10761, %v17622_v43   ;;  %v1024_v19 = vsub.f32 %v11717_v10, %v12536_v30  ;;  %v1273_v8 = vsub.f32 1.0, %v1145_v41  ;;  %v2431_v31 = vand.u32 2147483647, %v2303_v56  ;;  %v2434_v1 = vand.u32 2147483647, %v2306_v45  ;;  %v17626_v56 = vld [vmem:[#allocation23_spill] sm:$0xff] }
 0x120   : > { %4500 = vmatmul.mubr.f32.gmra.mrb[18].mxu0 %v3575_v34  ;;  %v2557_v34 = vsub.f32 1.0, %v2429_v15  ;;  %v1274_v21 = vsub.f32 1.0, %v1146_v28  ;;  %v3582_v49 = vmul.f32 %v2686_v5, %v17624_v39  ;;  %v1151_v32 = vand.u32 2147483647, %v1023_v52 }
 0x121   : > { %4504 = vmatprep.mubr.f32.mxu0 %v3578_v46  ;;  %2874 = vperm.xlu0 %10787, %v17623_v26   ;;  %v2560_v24 = vsub.f32 1.0, %v2432_v6  ;;  %v1271_v23 = vsub.f32 1.0, %v1143_v29  ;;  %v12603_v46 = vmin.f32 %v554_v3, 15.0  ;;  %v2433_v30 = vand.u32 2147483647, %v2305_v37  ;;  %v12608_v28 = vpop.permute.xlu1 %766  ;;  %v12616_v29 = vpop.permute.xlu0 %801  ;;  %v17630_v37 = vld [vmem:[#allocation8_spill] sm:$0xff] }
 0x122   : > { %v2436_v41 = vand.u32 2147483647, %v2308_v25  ;;  %v1272_v15 = vsub.f32 1.0, %v1144_v54  ;;  %v12606_v45 = vand.u32 2147483647, %v1024_v19  ;;  %v2307_v39 = vsub.f32 %v11719_v11, %v12473_v17 }
 0x123   : > { %10762 = vset.pattern.permute.xlu1 %v17476_v36  ;;  %17625 = vst [vmem:[#allocation73_spill] sm:$0xff] %v12603_v46  ;;  %v2310_v26 = vsub.f32 %v11721_v12, %v12491_v47  ;;  %v2685_v5 = vmax.f32 %v2557_v34, 0.0  ;;  %v2559_v52 = vsub.f32 1.0, %v2431_v31  ;;  %v2562_v6 = vsub.f32 1.0, %v2434_v1  ;;  %v300_v34 = vld [vmem:[%s11456_s15 + $0x168] sm:$0xff] }
 0x124   : > { %4505 = vmatmul.mubr.f32.gmra.mrb[20].mxu0 %v3577_v61  ;;  %866 = vperm.xlu1 %10762, %v17626_v56   ;;  %v12614_v61 = vmax.f32 %v1269_v7, 0.0  ;;  %v12620_v3 = vmax.f32 %v1273_v8, 0.0  ;;  %v1279_v25 = vsub.f32 1.0, %v1151_v32  ;;  %v2688_v54 = vmax.f32 %v2560_v24, 0.0 }
 0x125   : > { %4509 = vmatprep.mubr.f32.mxu0 %v3580_v63  ;;  %v12618_v63 = vmax.f32 %v1270_v22, 0.0  ;;  %2882 = vperm.xlu0 %10787, %v17630_v37   ;;  %v12623_v19 = vmax.f32 %v1271_v23, 0.0  ;;  %v12625_v17 = vmax.f32 %v1274_v21, 0.0  ;;  %v2561_v7 = vsub.f32 1.0, %v2433_v30  ;;  %v17634_v37 = vld [vmem:[#allocation25_spill] sm:$0xff]  ;;  %v12633_v43 = vpop.permute.xlu1 %1576 }
 0x126   : > { %17627 = vst [vmem:[#allocation5_spill] sm:$0xff] %v12614_v61  ;;  %17629 = vst [vmem:[#allocation11_spill] sm:$0xff] %v12620_v3  ;;  %v2564_v33 = vsub.f32 1.0, %v2436_v41  ;;  %v12628_v31 = vmax.f32 %v1272_v15, 0.0  ;;  %v2435_v8 = vand.u32 2147483647, %v2307_v39  ;;  %v3581_v32 = vmul.f32 %v2685_v5, %v17634_v37 }
 0x127   : > { %17628 = vst [vmem:[#allocation20_spill] sm:$0xff] %v12618_v63  ;;  %17631 = vst [vmem:[#allocation24_spill] sm:$0xff] %v12623_v19  ;;  %v2438_v1 = vand.u32 2147483647, %v2310_v26  ;;  %v2687_v24 = vmax.f32 %v2559_v52, 0.0  ;;  %v2690_v23 = vmax.f32 %v2562_v6, 0.0  ;;  %v2309_v21 = vsub.f32 %v11719_v11, %v12491_v47  ;;  %v12649_v52 = vpop.permute.xlu0 %1608 }
 0x128   : > { %17632 = vst [vmem:[#allocation23_spill] sm:$0xff] %v12625_v17  ;;  %4510 = vmatmul.mubr.f32.gmra.mrb[22].mxu0 %v3579_v2  ;;  %17633 = vst [vmem:[#allocation8_spill] sm:$0xff] %v12628_v31  ;;  %871 = vperm.xlu1 %10762, %v12603_v46   ;;  %v4775_v2 = vld [vmem:[%s17003_s2 + $0x200] sm:$0xff]  ;;  %v12643_v30 = vmax.f32 %v1279_v25, 0.0  ;;  %v2312_v26 = vsub.f32 %v11721_v12, %v12479_v44  ;;  %v364_v5 = vmul.f32 2.0, %v300_v34  ;;  %v2689_v22 = vmax.f32 %v2561_v7, 0.0 }
 0x129   : > { %4514 = vmatprep.mubr.f32.mxu0 %v3582_v49  ;;  %17635 = vst [vmem:[#allocation25_spill] sm:$0xff] %v12633_v43  ;;  %v4776_v49 = vld [vmem:[%s17003_s2 + $0x208] sm:$0xff]  ;;  %v17637_v41 = vld [vmem:[#allocation10_spill] sm:$0xff]  ;;  %v1019_v6 = vsub.f32 %v11715_v9, %v12594_v57  ;;  %v1020_v37 = vsub.f32 %v11717_v10, %v12594_v57  ;;  %v2692_v25 = vmax.f32 %v2564_v33, 0.0  ;;  %v3583_v34 = vmul.f32 %v2687_v24, %v17640_v0  ;;  %v12659_v18 = vpop.permute.xlu1 %1580 }
 0x12a   : > { %17636 = vst [vmem:[#allocation101_spill] sm:$0xff] %v12643_v30  ;;  %2890 = vperm.xlu0 %10787, %v17637_v41   ;;  %v17638_v15 = vld [vmem:[#allocation78_spill] sm:$0xff]  ;;  %17639 = vst [vmem:[#allocation10_spill] sm:$0xff] %v12649_v52  ;;  %v2563_v41 = vsub.f32 1.0, %v2435_v8  ;;  %v10373_v47 = vpack.c.bf16 %v4776_v49, %v4775_v2  ;;  %v3586_v13 = vmul.f32 %v2690_v23, %v17641_v27  ;;  %v2437_v53 = vand.u32 2147483647, %v2309_v21 }
 0x12b   : > { %v3584_v39 = vmul.f32 %v2688_v54, %v17638_v15  ;;  %v2566_v54 = vsub.f32 1.0, %v2438_v1  ;;  %v429_v15 = vadd.f32 1.0, %v364_v5  ;;  %17642 = vst [vmem:[#allocation78_spill] sm:$0xff] %v12659_v18  ;;  %v2311_v57 = vsub.f32 %v11719_v11, %v12479_v44  ;;  %v17643_v33 = vld [vmem:[#allocation19_spill] sm:$0xff]  ;;  %v17645_v23 = vld [vmem:[#allocation84_spill] sm:$0xff] }
 0x12c   : > { %4515 = vmatmul.mubr.f32.gmra.mrb[24].mxu0 %v3581_v32  ;;  %10764 = vset.pattern.permute.xlu1 %v17490_v62  ;;  %v1029_v7 = vsub.f32 %v11715_v9, %v12598_v14  ;;  %v2440_v8 = vand.u32 2147483647, %v2312_v26  ;;  %v2314_v0 = vsub.f32 %v11721_v12, %v12549_v50  ;;  %v12668_v32 = vpop.permute.xlu0 %1620  ;;  %v1147_v27 = vand.u32 2147483647, %v1019_v6 }
 0x12d   : > { %4519 = vmatprep.mubr.f32.mxu0 %v3584_v39  ;;  %1660 = vperm.xlu1 %10764, %v12603_v46   ;;  %v493_v1 = vmul.f32 7.5, %v429_v15  ;;  %17644 = vst [vmem:[#allocation27_spill] sm:$0xff] %v12668_v32  ;;  %v1148_v24 = vand.u32 2147483647, %v1020_v37  ;;  %v3585_v21 = vmul.f32 %v2689_v22, %v17645_v23  ;;  %v1030_v2 = vsub.f32 %v11717_v10, %v12598_v14  ;;  %v17647_v15 = vld [vmem:[#allocation29_spill] sm:$0xff]  ;;  %v12683_v23 = vpop.permute.xlu1 %776  ;;  %v17649_v46 = vld [vmem:[#allocation87_spill] sm:$0xff] }
 0x12e   : > { %2898 = vperm.xlu0 %10787, %v17643_v33   ;;  %10374 = vmatpush1.bf16.msra.mxu0 %v10373_v47  ;;  %v1021_v49 = vsub.f32 %v11715_v9, %v12608_v28  ;;  %v17646_v47 = vld [vmem:[#allocation34_spill] sm:$0xff]  ;;  %v2691_v26 = vmax.f32 %v2563_v41, 0.0  ;;  %v2694_v5 = vmax.f32 %v2566_v54, 0.0  ;;  %v2565_v6 = vsub.f32 1.0, %v2437_v53 }
 0x12f   : > { %10375 = vmatprep.subr.bf16.mxu0 %v17506_v42  ;;  %v3588_v39 = vmul.f32 %v2692_v25, %v17646_v47  ;;  %v2439_v37 = vand.u32 2147483647, %v2311_v57  ;;  %v2313_v22 = vsub.f32 %v11719_v11, %v12549_v50  ;;  %v2316_v14 = vsub.f32 %v11721_v12, %v12573_v59 }
 0x130   : > { %4520 = vmatmul.mubr.f32.gmra.mrb[26].mxu0 %v3583_v34  ;;  %v17648_v34 = vld [vmem:[#allocation13_spill] sm:$0xff]  ;;  %v1157_v33 = vand.u32 2147483647, %v1029_v7  ;;  %v557_v44 = vmax.f32 %v493_v1, 0.0  ;;  %v2442_v25 = vand.u32 2147483647, %v2314_v0  ;;  %v1022_v53 = vsub.f32 %v11717_v10, %v12608_v28  ;;  %v12687_v47 = vpop.permute.xlu0 %816 }
 0x131   : > { %4524 = vmatprep.mubr.f32.mxu0 %v3586_v13  ;;  %1664 = vperm.xlu1 %10764, %v17647_v15   ;;  %v2568_v13 = vsub.f32 1.0, %v2440_v8  ;;  %v1275_v41 = vsub.f32 1.0, %v1147_v27  ;;  %v1276_v54 = vsub.f32 1.0, %v1148_v24  ;;  %v1158_v57 = vand.u32 2147483647, %v1030_v2  ;;  %v17650_v28 = vld [vmem:[#allocation15_spill] sm:$0xff] }
 0x132   : > { %2906 = vperm.xlu0 %10787, %v17648_v34   ;;  %v1149_v50 = vand.u32 2147483647, %v1021_v49  ;;  %v3587_v40 = vmul.f32 %v2691_v26, %v17649_v46  ;;  %v3590_v7 = vmul.f32 %v2694_v5, %v12545_v58  ;;  %v2315_v8 = vsub.f32 %v11719_v11, %v12573_v59 }
 0x133   : > { %v2693_v1 = vmax.f32 %v2565_v6, 0.0  ;;  %v2567_v0 = vsub.f32 1.0, %v2439_v37  ;;  %v2441_v27 = vand.u32 2147483647, %v2313_v22  ;;  %v2444_v24 = vand.u32 2147483647, %v2316_v14 }
 0x134   : > { %4525 = vmatmul.mubr.f32.gmra.mrb[28].mxu0 %v3585_v21  ;;  %v17651_v21 = vld [vmem:[#allocation28_spill] sm:$0xff]  ;;  %v2696_v2 = vmax.f32 %v2568_v13, 0.0  ;;  %v12696_v49 = vmin.f32 %v557_v44, 15.0  ;;  %v2570_v46 = vsub.f32 1.0, %v2442_v25  ;;  %v2318_v26 = vsub.f32 %v11721_v12, %v12501_v4 }
 0x135   : > { %4529 = vmatprep.mubr.f32.mxu0 %v3588_v39  ;;  %10765 = vset.pattern.permute.xlu1 %v17476_v36  ;;  %v12698_v39 = vpop.permute.xlu1 %781  ;;  %v17652_v5 = vsub.f32 1.0, %v12606_v45  ;;  %v12706_v6 = vand.u32 2147483647, %v1022_v53  ;;  %v1285_v37 = vsub.f32 1.0, %v1157_v33  ;;  %v1286_v22 = vsub.f32 1.0, %v1158_v57 }
 0x136   : > { %2914 = vperm.xlu0 %10787, %v17650_v28   ;;  %881 = vperm.xlu1 %10765, %v17651_v21   ;;  %v12708_v14 = vmax.f32 %v1275_v41, 0.0  ;;  %v1277_v13 = vsub.f32 1.0, %v1149_v50  ;;  %v2443_v44 = vand.u32 2147483647, %v2315_v8  ;;  %v2317_v25 = vsub.f32 %v11719_v11, %v12501_v4  ;;  %v12712_v28 = vpop.permute.xlu0 %831 }
 0x137   : > { %v12704_v34 = vmax.f32 %v17652_v5, 0.0  ;;  %v3589_v59 = vmul.f32 %v2693_v1, %v12541_v60  ;;  %v2695_v45 = vmax.f32 %v2567_v0, 0.0  ;;  %v2569_v5 = vsub.f32 1.0, %v2441_v27  ;;  %v4778_v0 = vld [vmem:[%s17003_s2 + $0x218] sm:$0xff] }
 0x138   : > { %4530 = vmatmul.mubr.f32.gmra.mrb[30].mxu0 %v3587_v40  ;;  %17654 = vst [vmem:[#allocation19_spill] sm:$0xff] %v12708_v14  ;;  %v2572_v21 = vsub.f32 1.0, %v2444_v24  ;;  %v12715_v53 = vmax.f32 %v1276_v54, 0.0  ;;  %v17656_v40 = vld [vmem:[#allocation41_spill] sm:$0xff]  ;;  %v3592_v33 = vmul.f32 %v2696_v2, %v12618_v63  ;;  %v2698_v50 = vmax.f32 %v2570_v46, 0.0  ;;  %v4777_v54 = vld [vmem:[%s17003_s2 + $0x210] sm:$0xff] }
 0x139   : > { %17653 = vst [vmem:[#allocation81_spill] sm:$0xff] %v12704_v34  ;;  %4534 = vmatprep.mubr.f32.mxu0 %v3590_v7  ;;  %v2446_v41 = vand.u32 2147483647, %v2318_v26  ;;  %v12721_v7 = vmax.f32 %v1285_v37, 0.0  ;;  %v12723_v8 = vmax.f32 %v1286_v22, 0.0  ;;  %v1026_v1 = vsub.f32 %v11717_v10, %v12683_v23  ;;  %v12737_v2 = vpop.permute.xlu1 %1588 }
 0x13a   : > { %17655 = vst [vmem:[#allocation84_spill] sm:$0xff] %v12715_v53  ;;  %2922 = vperm.xlu0 %10787, %v17656_v40   ;;  %886 = vperm.xlu1 %10765, %v12696_v49   ;;  %17659 = vst [vmem:[#allocation13_spill] sm:$0xff] %v12737_v2  ;;  %v2571_v46 = vsub.f32 1.0, %v2443_v44  ;;  %v2445_v26 = vand.u32 2147483647, %v2317_v25  ;;  %v12740_v37 = vmax.f32 %v1277_v13, 0.0  ;;  %v3591_v22 = vmul.f32 %v2695_v45, %v12614_v61  ;;  %v12748_v44 = vpop.permute.xlu0 %1632 }
 0x13b   : > { %17657 = vst [vmem:[#allocation34_spill] sm:$0xff] %v12721_v7  ;;  %17658 = vst [vmem:[#allocation29_spill] sm:$0xff] %v12723_v8  ;;  %v2697_v40 = vmax.f32 %v2569_v5, 0.0  ;;  %v2700_v57 = vmax.f32 %v2572_v21, 0.0  ;;  %v3594_v4 = vmul.f32 %v2698_v50, %v12628_v31  ;;  %v2574_v27 = vsub.f32 1.0, %v2446_v41 }
 0x13c   : > { %4535 = vmatmul.mubr.f32.gmra.mrb[32].mxu0 %v3589_v59  ;;  %v303_v59 = vld [vmem:[%s11456_s15 + $0x180] sm:$0xff]  ;;  %17660 = vst [vmem:[#allocation87_spill] sm:$0xff] %v12740_v37  ;;  %v10376_v24 = vpack.c.bf16 %v4778_v0, %v4777_v54  ;;  %17661 = vst [vmem:[#allocation15_spill] sm:$0xff] %v12748_v44  ;;  %v1025_v13 = vsub.f32 %v11715_v9, %v12683_v23  ;;  %v12752_v25 = vand.u32 2147483647, %v1026_v1  ;;  %v2699_v45 = vmax.f32 %v2571_v46, 0.0 }
 0x13d   : > { %4539 = vmatprep.mubr.f32.mxu0 %v3592_v33  ;;  %v2320_v33 = vsub.f32 %v11721_v12, %v12633_v43  ;;  %v2319_v21 = vsub.f32 %v11719_v11, %v12633_v43  ;;  %v2573_v5 = vsub.f32 1.0, %v2445_v26  ;;  %v2322_v41 = vsub.f32 %v11721_v12, %v12659_v18  ;;  %v12761_v1 = vpop.permute.xlu1 %1592 }
 0x13e   : > { %2930 = vperm.xlu0 %10787, %v11803_v55   ;;  %10767 = vset.pattern.permute.xlu1 %v17490_v62  ;;  %v367_v55 = vmul.f32 2.0, %v303_v59  ;;  %v3593_v54 = vmul.f32 %v2697_v40, %v12623_v19  ;;  %v3596_v23 = vmul.f32 %v2700_v57, %v12625_v17  ;;  %17662 = vst [vmem:[#allocation41_spill] sm:$0xff] %v12761_v1  ;;  %v12767_v59 = vpop.permute.xlu0 %1644 }
 0x13f   : > { %1672 = vperm.xlu1 %10767, %v12696_v49   ;;  %v2448_v50 = vand.u32 2147483647, %v2320_v33  ;;  %10377 = vmatpush1.bf16.msra.mxu0 %v10376_v24  ;;  %v2450_v26 = vand.u32 2147483647, %v2322_v41  ;;  %v2321_v24 = vsub.f32 %v11719_v11, %v12659_v18  ;;  %17663 = vst [vmem:[#allocation102_spill] sm:$0xff] %v12767_v59  ;;  %v1027_v40 = vsub.f32 %v11715_v9, %v12698_v39  ;;  %v17664_v33 = vld [vmem:[#allocation33_spill] sm:$0xff] }
 0x140   : > { %4540 = vmatmul.mubr.f32.gmra.mrb[34].mxu0 %v3591_v22  ;;  %v432_v0 = vadd.f32 1.0, %v367_v55  ;;  %v2447_v22 = vand.u32 2147483647, %v2319_v21  ;;  %10378 = vmatprep.subr.bf16.mxu0 %v17506_v42  ;;  %v1028_v57 = vsub.f32 %v11717_v10, %v12698_v39  ;;  %v2701_v21 = vmax.f32 %v2573_v5, 0.0 }
 0x141   : > { %4544 = vmatprep.mubr.f32.mxu0 %v3594_v4  ;;  %v2702_v4 = vmax.f32 %v2574_v27, 0.0  ;;  %v2576_v46 = vsub.f32 1.0, %v2448_v50  ;;  %v3595_v27 = vmul.f32 %v2699_v45, %v12620_v3  ;;  %v2449_v41 = vand.u32 2147483647, %v2321_v24  ;;  %v792_v19 = vpop.permute.xlu1 %791  ;;  %v17750_v3 = vld [vmem:[#allocation6_spill] sm:$0xff] }
 0x142   : > { %2938 = vperm.xlu0 %10787, %v11830_v35   ;;  %v496_v55 = vmul.f32 7.5, %v432_v0  ;;  %v2324_v35 = vsub.f32 %v11721_v12, %v12554_v16  ;;  %v2575_v50 = vsub.f32 1.0, %v2447_v22  ;;  %v2323_v17 = vsub.f32 %v11719_v11, %v12554_v16 }
 0x143   : > { %1676 = vperm.xlu1 %10767, %v17664_v33   ;;  %v2326_v39 = vsub.f32 %v11721_v12, %v12737_v2  ;;  %v3598_v0 = vmul.f32 %v2702_v4, %v12715_v53  ;;  %v2578_v31 = vsub.f32 1.0, %v2450_v26  ;;  %v17665_v45 = vsub.f32 1.0, %v12706_v6 }
 0x144   : > { %4545 = vmatmul.mubr.f32.gmra.mrb[36].mxu0 %v3593_v54  ;;  %v560_v18 = vmax.f32 %v496_v55, 0.0  ;;  %v2452_v43 = vand.u32 2147483647, %v2324_v35  ;;  %v1153_v54 = vand.u32 2147483647, %v1025_v13  ;;  %v1282_v22 = vsub.f32 1.0, %v12752_v25  ;;  %v12793_v35 = vpop.permute.xlu0 %846 }
 0x145   : > { %4549 = vmatprep.mubr.f32.mxu0 %v3596_v23  ;;  %v2704_v23 = vmax.f32 %v2576_v46, 0.0  ;;  %v12785_v5 = vmax.f32 %v17665_v45, 0.0  ;;  %v1155_v24 = vand.u32 2147483647, %v1027_v40  ;;  %v1156_v55 = vand.u32 2147483647, %v1028_v57 }
 0x146   : > { %2946 = vperm.xlu0 %10787, %v12522_v48   ;;  %v17667_v13 = vld [vmem:[#allocation38_spill] sm:$0xff]  ;;  %v3597_v48 = vmul.f32 %v2701_v21, %v12708_v14  ;;  %v12791_v4 = vmin.f32 %v560_v18, 15.0  ;;  %v2703_v46 = vmax.f32 %v2575_v50, 0.0  ;;  %v2577_v26 = vsub.f32 1.0, %v2449_v41  ;;  %v12808_v50 = vpop.permute.xlu1 %796 }
 0x147   : > { %17666 = vst [vmem:[#allocation33_spill] sm:$0xff] %v12785_v5  ;;  %10768 = vset.pattern.permute.xlu1 %v17476_v36  ;;  %v1031_v6 = vsub.f32 %v11715_v9, %v792_v19  ;;  %v2580_v45 = vsub.f32 1.0, %v2452_v43  ;;  %v2451_v25 = vand.u32 2147483647, %v2323_v17  ;;  %v2454_v40 = vand.u32 2147483647, %v2326_v39 }
 0x148   : > { %4550 = vmatmul.mubr.f32.gmra.mrb[38].mxu0 %v3595_v27  ;;  %896 = vperm.xlu1 %10768, %v17667_v13   ;;  %v17668_v57 = vsub.f32 %v11715_v9, %v12616_v29  ;;  %v3600_v18 = vmul.f32 %v2704_v23, %v12785_v5  ;;  %v2706_v41 = vmax.f32 %v2578_v31, 0.0  ;;  %v1281_v43 = vsub.f32 1.0, %v1153_v54 }
 0x149   : > { %4554 = vmatprep.mubr.f32.mxu0 %v3598_v0  ;;  %v17669_v0 = vsub.f32 %v11717_v10, %v12616_v29  ;;  %v12810_v17 = vmax.f32 %v1282_v22, 0.0  ;;  %v1283_v39 = vsub.f32 1.0, %v1155_v24  ;;  %v1284_v16 = vsub.f32 1.0, %v1156_v55 }
 0x14a   : > { %v12799_v27 = vand.u32 2147483647, %v17668_v57  ;;  %2954 = vperm.xlu0 %10787, %v17626_v56   ;;  %v1041_v57 = vsub.f32 %v11715_v9, %v12687_v47  ;;  %v1032_v29 = vsub.f32 %v11717_v10, %v792_v19  ;;  %v3599_v56 = vmul.f32 %v2703_v46, %v12740_v37 }
 0x14b   : > { %v12804_v21 = vand.u32 2147483647, %v17669_v0  ;;  %17670 = vst [vmem:[#allocation38_spill] sm:$0xff] %v12810_v17  ;;  %v2705_v23 = vmax.f32 %v2577_v26, 0.0  ;;  %v12817_v0 = vpop.permute.xlu0 %861  ;;  %v12819_v31 = vand.u32 2147483647, %v1031_v6  ;;  %v3602_v19 = vmul.f32 %v2706_v41, %v12704_v34 }
 0x14c   : > { %4555 = vmatmul.mubr.f32.gmra.mrb[40].mxu0 %v3597_v48  ;;  %901 = vperm.xlu1 %10768, %v12791_v4   ;;  %v2708_v54 = vmax.f32 %v2580_v45, 0.0  ;;  %v2579_v22 = vsub.f32 1.0, %v2451_v25  ;;  %v2582_v24 = vsub.f32 1.0, %v2454_v40  ;;  %v2325_v55 = vsub.f32 %v11719_v11, %v12737_v2  ;;  %v12835_v25 = vpop.permute.xlu1 %1600  ;;  %v4780_v40 = vld [vmem:[%s17003_s2 + $0x228] sm:$0xff] }
 0x14d   : > { %4559 = vmatprep.mubr.f32.mxu0 %v3600_v18  ;;  %v12827_v46 = vmax.f32 %v1281_v43, 0.0  ;;  %v12829_v26 = vmax.f32 %v1283_v39, 0.0  ;;  %v12833_v45 = vand.u32 2147483647, %v1041_v57  ;;  %17673 = vst [vmem:[#allocation105_spill] sm:$0xff] %v12835_v25  ;;  %v12843_v18 = vmax.f32 %v1284_v16, 0.0 }
 0x14e   : > { %2962 = vperm.xlu0 %10787, %v17647_v15   ;;  %v4779_v15 = vld [vmem:[%s17003_s2 + $0x220] sm:$0xff]  ;;  %v1160_v41 = vand.u32 2147483647, %v1032_v29  ;;  %v3601_v43 = vmul.f32 %v2705_v23, %v12643_v30  ;;  %v2453_v39 = vand.u32 2147483647, %v2325_v55  ;;  %v306_v57 = vld [vmem:[%s11456_s15 + $0x198] sm:$0xff]  ;;  %v3604_v48 = vmul.f32 %v2708_v54, %v12810_v17 }
 0x14f   : > { %17671 = vst [vmem:[#allocation103_spill] sm:$0xff] %v12827_v46  ;;  %17672 = vst [vmem:[#allocation104_spill] sm:$0xff] %v12829_v26  ;;  %v2707_v5 = vmax.f32 %v2579_v22, 0.0  ;;  %v2710_v6 = vmax.f32 %v2582_v24, 0.0  ;;  %v12851_v2 = vpop.permute.xlu0 %1656  ;;  %v2328_v29 = vsub.f32 %v11721_v12, %v12761_v1  ;;  %v2327_v23 = vsub.f32 %v11719_v11, %v12761_v1  ;;  %v17677_v30 = vld [vmem:[#allocation40_spill] sm:$0xff] }
 0x150   : > { %4560 = vmatmul.mubr.f32.gmra.mrb[42].mxu0 %v3599_v56  ;;  %17674 = vst [vmem:[#allocation106_spill] sm:$0xff] %v12843_v18  ;;  %10770 = vset.pattern.permute.xlu1 %v17490_v62  ;;  %v1287_v56 = vsub.f32 1.0, %v12819_v31  ;;  %17675 = vst [vmem:[#allocation107_spill] sm:$0xff] %v12851_v2  ;;  %v2581_v16 = vsub.f32 1.0, %v2453_v39  ;;  %v1033_v31 = vsub.f32 %v11715_v9, %v12808_v50  ;;  %v12862_v22 = vpop.permute.xlu1 %1604  ;;  %v370_v24 = vmul.f32 2.0, %v306_v57 }
 0x151   : > { %4564 = vmatprep.mubr.f32.mxu0 %v3602_v19  ;;  %1684 = vperm.xlu1 %10770, %v12791_v4   ;;  %v10379_v19 = vpack.c.bf16 %v4780_v40, %v4779_v15  ;;  %v1034_v54 = vsub.f32 %v11717_v10, %v12808_v50  ;;  %17676 = vst [vmem:[#allocation108_spill] sm:$0xff] %v12862_v22  ;;  %v2456_v39 = vand.u32 2147483647, %v2328_v29  ;;  %v2455_v15 = vand.u32 2147483647, %v2327_v23 }
 0x152   : > { %2970 = vperm.xlu0 %10787, %v12696_v49   ;;  %v2330_v49 = vsub.f32 %v11721_v12, %v12579_v51  ;;  %v2709_v55 = vmax.f32 %v2581_v16, 0.0  ;;  %v2329_v40 = vsub.f32 %v11719_v11, %v12579_v51  ;;  %v1288_v1 = vsub.f32 1.0, %v1160_v41 }
 0x153   : > { %10380 = vmatpush1.bf16.msra.mxu0 %v10379_v19  ;;  %v3603_v17 = vmul.f32 %v2707_v5, %v12827_v46  ;;  %v12870_v34 = vpop.permute.xlu0 %1668  ;;  %v2584_v57 = vsub.f32 1.0, %v2456_v39  ;;  %v2583_v16 = vsub.f32 1.0, %v2455_v15  ;;  %v1161_v19 = vand.u32 2147483647, %v1033_v31 }
 0x154   : > { %4565 = vmatmul.mubr.f32.gmra.mrb[44].mxu0 %v3601_v43  ;;  %v2458_v50 = vand.u32 2147483647, %v2330_v49  ;;  %v435_v43 = vadd.f32 1.0, %v370_v24  ;;  %17678 = vst [vmem:[#allocation40_spill] sm:$0xff] %v12870_v34  ;;  %10381 = vmatprep.subr.bf16.mxu0 %v17506_v42  ;;  %v2457_v29 = vand.u32 2147483647, %v2329_v40  ;;  %v2332_v5 = vsub.f32 %v11721_v12, %v12835_v25  ;;  %v807_v46 = vpop.permute.xlu1 %806 }
 0x155   : > { %4569 = vmatprep.mubr.f32.mxu0 %v3604_v48  ;;  %1688 = vperm.xlu1 %10770, %v17677_v30   ;;  %v3606_v48 = vmul.f32 %v2710_v6, %v12843_v18  ;;  %v1162_v49 = vand.u32 2147483647, %v1034_v54  ;;  %v3605_v24 = vmul.f32 %v2709_v55, %v12829_v26  ;;  %v2712_v51 = vmax.f32 %v2584_v57, 0.0  ;;  %v17680_v40 = vld [vmem:[#allocation39_spill] sm:$0xff] }
 0x156   : > { %2978 = vperm.xlu0 %10787, %v17667_v13   ;;  %v2586_v41 = vsub.f32 1.0, %v2458_v50  ;;  %v499_v23 = vmul.f32 7.5, %v435_v43  ;;  %v2331_v13 = vsub.f32 %v11719_v11, %v12835_v25  ;;  %v1037_v6 = vsub.f32 %v11715_v9, %v807_v46 }
 0x157   : > { %v2711_v31 = vmax.f32 %v2583_v16, 0.0  ;;  %v2585_v39 = vsub.f32 1.0, %v2457_v29  ;;  %v12882_v15 = vmax.f32 %v1288_v1, 0.0  ;;  %v3608_v54 = vmul.f32 %v2712_v51, %v12723_v8  ;;  %v12887_v43 = vpop.permute.xlu0 %876 }
 0x158   : > { %4570 = vmatmul.mubr.f32.gmra.mrb[46].mxu0 %v3603_v17  ;;  %v563_v17 = vmax.f32 %v499_v23, 0.0  ;;  %v2714_v55 = vmax.f32 %v2586_v41, 0.0  ;;  %v2460_v50 = vand.u32 2147483647, %v2332_v5  ;;  %v12894_v16 = vmax.f32 %v1287_v56, 0.0 }
 0x159   : > { %4574 = vmatprep.mubr.f32.mxu0 %v3606_v48  ;;  %10771 = vset.pattern.permute.xlu1 %v17476_v36  ;;  %17679 = vst [vmem:[#allocation109_spill] sm:$0xff] %v12882_v15  ;;  %v17681_v48 = vsub.f32 %v11717_v10, %v12687_v47  ;;  %v1289_v29 = vsub.f32 1.0, %v1161_v19  ;;  %v1290_v23 = vsub.f32 1.0, %v1162_v49  ;;  %v1038_v51 = vsub.f32 %v11717_v10, %v807_v46 }
 0x15a   : > { %2986 = vperm.xlu0 %10787, %v17677_v30   ;;  %911 = vperm.xlu1 %10771, %v17680_v40   ;;  %17682 = vst [vmem:[#allocation39_spill] sm:$0xff] %v12894_v16  ;;  %v627_v1 = vmin.f32 %v563_v17, 15.0  ;;  %v812_v30 = vpop.permute.xlu1 %811  ;;  %v2588_v25 = vsub.f32 1.0, %v2460_v50  ;;  %v2459_v41 = vand.u32 2147483647, %v2331_v13  ;;  %v3607_v8 = vmul.f32 %v2711_v31, %v12721_v7 }
 0x15b   : > { %v12892_v57 = vand.u32 2147483647, %v17681_v48  ;;  %v1165_v5 = vand.u32 2147483647, %v1037_v6  ;;  %v2713_v26 = vmax.f32 %v2585_v39, 0.0  ;;  %v2334_v47 = vsub.f32 %v11721_v12, %v12862_v22  ;;  %v12902_v17 = vpop.permute.xlu0 %891 }
 0x15c   : > { %4575 = vmatmul.mubr.f32.gmra.mrb[48].mxu0 %v3605_v24  ;;  %v3610_v56 = vmul.f32 %v2714_v55, %v12882_v15  ;;  %v1040_v19 = vsub.f32 %v11717_v10, %v812_v30  ;;  %v2716_v49 = vmax.f32 %v2588_v25, 0.0  ;;  %v2587_v24 = vsub.f32 1.0, %v2459_v41 }
 0x15d   : > { %4579 = vmatprep.mubr.f32.mxu0 %v3608_v54  ;;  %v17683_v46 = vsub.f32 1.0, %v12799_v27  ;;  %v17685_v6 = vsub.f32 1.0, %v12804_v21  ;;  %v12913_v54 = vmax.f32 %v1290_v23, 0.0  ;;  %v1166_v55 = vand.u32 2147483647, %v1038_v51 }
 0x15e   : > { %916 = vperm.xlu1 %10771, %v627_v1   ;;  %2994 = vperm.xlu0 %10787, %v627_v1   ;;  %v1039_v25 = vsub.f32 %v11715_v9, %v812_v30  ;;  %v2715_v50 = vmax.f32 %v2587_v24, 0.0  ;;  %v3609_v27 = vmul.f32 %v2713_v26, %v12894_v16  ;;  %v12918_v41 = vpop.permute.xlu1 %1612  ;;  %v2333_v21 = vsub.f32 %v11719_v11, %v12862_v22  ;;  %v4781_v30 = vld [vmem:[%s17003_s2 + $0x230] sm:$0xff]  ;;  %v4782_v26 = vld [vmem:[%s17003_s2 + $0x238] sm:$0xff] }
 0x15f   : > { %v12906_v13 = vmax.f32 %v17683_v46, 0.0  ;;  %v12910_v31 = vmax.f32 %v17685_v6, 0.0  ;;  %17687 = vst [vmem:[#allocation112_spill] sm:$0xff] %v12913_v54  ;;  %17688 = vst [vmem:[#allocation113_spill] sm:$0xff] %v12918_v41  ;;  %v2462_v46 = vand.u32 2147483647, %v2334_v47  ;;  %v3612_v51 = vmul.f32 %v2716_v49, %v12913_v54 }
 0x160   : > { %4580 = vmatmul.mubr.f32.gmra.mrb[50].mxu0 %v3607_v8  ;;  %v12922_v6 = vmax.f32 %v1289_v29, 0.0  ;;  %v1293_v8 = vsub.f32 1.0, %v1165_v5  ;;  %v1168_v23 = vand.u32 2147483647, %v1040_v19  ;;  %v17690_v47 = vld [vmem:[#allocation45_spill] sm:$0xff]  ;;  %v1048_v5 = vsub.f32 %v11717_v10, %v12712_v28  ;;  %v309_v54 = vld [vmem:[%s11456_s15 + $0x1b0] sm:$0xff] }
 0x161   : > { %17684 = vst [vmem:[#allocation110_spill] sm:$0xff] %v12906_v13  ;;  %17686 = vst [vmem:[#allocation111_spill] sm:$0xff] %v12910_v31  ;;  %4584 = vmatprep.mubr.f32.mxu0 %v3610_v56  ;;  %v2590_v56 = vsub.f32 1.0, %v2462_v46  ;;  %v2461_v19 = vand.u32 2147483647, %v2333_v21  ;;  %v1294_v49 = vsub.f32 1.0, %v1166_v55  ;;  %v2336_v48 = vsub.f32 %v11721_v12, %v12649_v52 }
 0x162   : > { %17689 = vst [vmem:[#allocation114_spill] sm:$0xff] %v12922_v6  ;;  %10773 = vset.pattern.permute.xlu1 %v17490_v62  ;;  %3002 = vperm.xlu0 %10787, %v17690_v47   ;;  %v1167_v24 = vand.u32 2147483647, %v1039_v25  ;;  %v3611_v39 = vmul.f32 %v2715_v50, %v12922_v6  ;;  %v12940_v22 = vpop.permute.xlu0 %1680  ;;  %v10382_v7 = vpack.c.bf16 %v4782_v26, %v4781_v30  ;;  %v1296_v55 = vsub.f32 1.0, %v1168_v23  ;;  %v17694_v21 = vld [vmem:[#allocation44_spill] sm:$0xff] }
 0x163   : > { %1696 = vperm.xlu1 %10773, %v627_v1   ;;  %17691 = vst [vmem:[#allocation45_spill] sm:$0xff] %v12940_v22  ;;  %v2718_v16 = vmax.f32 %v2590_v56, 0.0  ;;  %v12943_v29 = vpop.permute.xlu1 %1616  ;;  %v2589_v15 = vsub.f32 1.0, %v2461_v19  ;;  %v2335_v1 = vsub.f32 %v11719_v11, %v12649_v52  ;;  %v2464_v25 = vand.u32 2147483647, %v2336_v48 }
 0x164   : > { %4585 = vmatmul.mubr.f32.gmra.mrb[52].mxu0 %v3609_v27  ;;  %17692 = vst [vmem:[#allocation115_spill] sm:$0xff] %v12943_v29  ;;  %v12947_v27 = vmax.f32 %v1293_v8, 0.0  ;;  %v2338_v50 = vsub.f32 %v11721_v12, %v12918_v41  ;;  %v373_v30 = vmul.f32 2.0, %v309_v54  ;;  %v12954_v26 = vmax.f32 %v1294_v49, 0.0 }
 0x165   : > { %4589 = vmatprep.mubr.f32.mxu0 %v3612_v51  ;;  %v3614_v46 = vmul.f32 %v2718_v16, %v12910_v31  ;;  %v2717_v51 = vmax.f32 %v2589_v15, 0.0  ;;  %v2463_v56 = vand.u32 2147483647, %v2335_v1  ;;  %v1295_v19 = vsub.f32 1.0, %v1167_v24  ;;  %10383 = vmatpush1.bf16.msra.mxu0 %v10382_v7 }
 0x166   : > { %17693 = vst [vmem:[#allocation116_spill] sm:$0xff] %v12947_v27  ;;  %3010 = vperm.xlu0 %10787, %v12435_v38   ;;  %17695 = vst [vmem:[#allocation44_spill] sm:$0xff] %v12954_v26  ;;  %v2592_v8 = vsub.f32 1.0, %v2464_v25  ;;  %v2466_v23 = vand.u32 2147483647, %v2338_v50  ;;  %v438_v6 = vadd.f32 1.0, %v373_v30  ;;  %10384 = vmatprep.subr.bf16.mxu0 %v17506_v42  ;;  %v2340_v7 = vsub.f32 %v11721_v12, %v12943_v29 }
 0x167   : > { %1700 = vperm.xlu1 %10773, %v17694_v21   ;;  %v3613_v48 = vmul.f32 %v2717_v51, %v12906_v13  ;;  %v2591_v52 = vsub.f32 1.0, %v2463_v56  ;;  %v12959_v16 = vpop.permute.xlu0 %1692  ;;  %v12962_v15 = vmax.f32 %v1296_v55, 0.0 }
 0x168   : > { %4590 = vmatmul.mubr.f32.gmra.mrb[54].mxu0 %v3611_v39  ;;  %v2337_v39 = vsub.f32 %v11719_v11, %v12918_v41  ;;  %17696 = vst [vmem:[#allocation117_spill] sm:$0xff] %v12959_v16  ;;  %v2720_v54 = vmax.f32 %v2592_v8, 0.0  ;;  %v2594_v24 = vsub.f32 1.0, %v2466_v23  ;;  %v2468_v30 = vand.u32 2147483647, %v2340_v7 }
 0x169   : > { %4594 = vmatprep.mubr.f32.mxu0 %v3614_v46  ;;  %17697 = vst [vmem:[#allocation118_spill] sm:$0xff] %v12962_v15  ;;  %v822_v49 = vpop.permute.xlu1 %821  ;;  %v2719_v1 = vmax.f32 %v2591_v52, 0.0  ;;  %v502_v46 = vmul.f32 7.5, %v438_v6  ;;  %v17698_v8 = vsub.f32 1.0, %v12892_v57 }
 0x16a   : > { %v1043_v25 = vsub.f32 %v11715_v9, %v822_v49  ;;  %v1044_v50 = vsub.f32 %v11717_v10, %v822_v49  ;;  %v3616_v51 = vmul.f32 %v2720_v54, %v12954_v26  ;;  %v2722_v55 = vmax.f32 %v2594_v24, 0.0  ;;  %v17713_v26 = vld [vmem:[#allocation43_spill] sm:$0xff] }
 0x16b   : > { %10774 = vset.pattern.permute.xlu1 %v17476_v36  ;;  %v2465_v56 = vand.u32 2147483647, %v2337_v39  ;;  %v12973_v23 = vmax.f32 %v17698_v8, 0.0  ;;  %v3615_v41 = vmul.f32 %v2719_v1, %v12947_v27  ;;  %v566_v52 = vmax.f32 %v502_v46, 0.0 }
 0x16c   : > { %4595 = vmatmul.mubr.f32.gmra.mrb[56].mxu0 %v3613_v48  ;;  %926 = vperm.xlu1 %10774, %v17690_v47   ;;  %v1176_v48 = vand.u32 2147483647, %v1048_v5  ;;  %v3618_v13 = vmul.f32 %v2722_v55, %v12962_v15  ;;  %v2596_v6 = vsub.f32 1.0, %v2468_v30  ;;  %v2339_v54 = vsub.f32 %v11719_v11, %v12943_v29  ;;  %v12979_v47 = vpop.permute.xlu0 %906 }
 0x16d   : > { %17699 = vst [vmem:[#allocation119_spill] sm:$0xff] %v12973_v23  ;;  %4599 = vmatprep.mubr.f32.mxu0 %v3616_v51  ;;  %v2593_v49 = vsub.f32 1.0, %v2465_v56  ;;  %v12981_v39 = vmax.f32 %v1295_v19, 0.0  ;;  %v1172_v57 = vand.u32 2147483647, %v1044_v50  ;;  %v12983_v24 = vmin.f32 %v566_v52, 15.0 }
 0x16e   : > { %v1171_v5 = vand.u32 2147483647, %v1043_v25  ;;  %v2724_v46 = vmax.f32 %v2596_v6, 0.0  ;;  %v2467_v51 = vand.u32 2147483647, %v2339_v54  ;;  %v17701_v55 = vsub.f32 1.0, %v12833_v45 }
 0x16f   : > { %17700 = vst [vmem:[#allocation120_spill] sm:$0xff] %v12981_v39  ;;  %v2721_v7 = vmax.f32 %v2593_v49, 0.0  ;;  %v827_v1 = vpop.permute.xlu1 %826  ;;  %v17703_v30 = vsub.f32 %v11715_v9, %v12712_v28  ;;  %v1300_v49 = vsub.f32 1.0, %v1172_v57  ;;  %v2342_v54 = vsub.f32 %v11721_v12, %v12668_v32  ;;  %v4784_v57 = vld [vmem:[%s17003_s2 + $0x248] sm:$0xff] }
 0x170   : > { %4600 = vmatmul.mubr.f32.gmra.mrb[58].mxu0 %v3615_v41  ;;  %v12987_v56 = vmax.f32 %v17701_v55, 0.0  ;;  %931 = vperm.xlu1 %10774, %v12983_v24   ;;  %v1045_v41 = vsub.f32 %v11715_v9, %v827_v1  ;;  %v1046_v19 = vsub.f32 %v11717_v10, %v827_v1  ;;  %v3620_v50 = vmul.f32 %v2724_v46, %v12973_v23  ;;  %v12999_v45 = vpop.permute.xlu0 %921  ;;  %v4783_v1 = vld [vmem:[%s17003_s2 + $0x240] sm:$0xff] }
 0x171   : > { %4604 = vmatprep.mubr.f32.mxu0 %v3618_v13  ;;  %v12992_v8 = vand.u32 2147483647, %v17703_v30  ;;  %v1304_v13 = vsub.f32 1.0, %v1176_v48  ;;  %v3617_v25 = vmul.f32 %v2721_v7, %v12981_v39  ;;  %v2595_v52 = vsub.f32 1.0, %v2467_v51 }
 0x172   : > { %17702 = vst [vmem:[#allocation121_spill] sm:$0xff] %v12987_v56  ;;  %v1173_v6 = vand.u32 2147483647, %v1045_v41  ;;  %v1174_v28 = vand.u32 2147483647, %v1046_v19  ;;  %v1299_v55 = vsub.f32 1.0, %v1171_v5 }
 0x173   : > { %v2723_v30 = vmax.f32 %v2595_v52, 0.0  ;;  %v2470_v7 = vand.u32 2147483647, %v2342_v54  ;;  %v312_v41 = vld [vmem:[%s11456_s15 + $0x1c8] sm:$0xff]  ;;  %v1303_v19 = vsub.f32 1.0, %v12992_v8 }
 0x174   : > { %4605 = vmatmul.mubr.f32.gmra.mrb[60].mxu0 %v3617_v25  ;;  %10776 = vset.pattern.permute.xlu1 %v17490_v62  ;;  %v13004_v48 = vpop.permute.xlu1 %1624  ;;  %v1301_v46 = vsub.f32 1.0, %v1173_v6  ;;  %v1302_v51 = vsub.f32 1.0, %v1174_v28  ;;  %v13016_v25 = vmax.f32 %v1304_v13, 0.0  ;;  %v13022_v29 = vmax.f32 %v1299_v55, 0.0 }
 0x175   : > { %4609 = vmatprep.mubr.f32.mxu0 %v3620_v50  ;;  %17704 = vst [vmem:[#allocation122_spill] sm:$0xff] %v13004_v48  ;;  %v3619_v5 = vmul.f32 %v2723_v30, %v12987_v56  ;;  %1708 = vperm.xlu1 %10776, %v12983_v24   ;;  %v13018_v50 = vmax.f32 %v1300_v49, 0.0  ;;  %v2598_v52 = vsub.f32 1.0, %v2470_v7  ;;  %v2341_v6 = vsub.f32 %v11719_v11, %v12668_v32 }
 0x176   : > { %17705 = vst [vmem:[#allocation123_spill] sm:$0xff] %v13016_v25  ;;  %17707 = vst [vmem:[#allocation125_spill] sm:$0xff] %v13022_v29  ;;  %v10385_v28 = vpack.c.bf16 %v4784_v57, %v4783_v1  ;;  %v2344_v8 = vsub.f32 %v11721_v12, %v13004_v48  ;;  %v376_v13 = vmul.f32 2.0, %v312_v41  ;;  %v2343_v49 = vsub.f32 %v11719_v11, %v13004_v48  ;;  %v4785_v57 = vld [vmem:[%s17003_s2 + $0x250] sm:$0xff]  ;;  %v4786_v41 = vld [vmem:[%s17003_s2 + $0x258] sm:$0xff] }
 0x177   : > { %17706 = vst [vmem:[#allocation124_spill] sm:$0xff] %v13018_v50  ;;  %v13026_v30 = vpop.permute.xlu0 %1704  ;;  %v2726_v56 = vmax.f32 %v2598_v52, 0.0  ;;  %v13034_v7 = vmax.f32 %v1301_v46, 0.0  ;;  %v13036_v55 = vmax.f32 %v1302_v51, 0.0  ;;  %v2348_v32 = vsub.f32 %v11721_v12, %v12748_v44 }
 0x178   : > { %4610 = vmatmul.mubr.f32.gmra.mrb[62].mxu0 %v3619_v5  ;;  %17708 = vst [vmem:[#allocation126_spill] sm:$0xff] %v13026_v30  ;;  %v13028_v23 = vpop.permute.xlu1 %1628  ;;  %v2469_v5 = vand.u32 2147483647, %v2341_v6  ;;  %v2472_v52 = vand.u32 2147483647, %v2344_v8  ;;  %v441_v51 = vadd.f32 1.0, %v376_v13 }
 0x179   : > { %17709 = vst [vmem:[#allocation127_spill] sm:$0xff] %v13028_v23  ;;  %17710 = vst [vmem:[#allocation128_spill] sm:$0xff] %v13034_v7  ;;  %1712 = vperm.xlu1 %10776, %v12435_v38   ;;  %10386 = vmatpush1.bf16.msra.mxu0 %v10385_v28  ;;  %v2346_v1 = vsub.f32 %v11721_v12, %v13028_v23  ;;  %v3622_v46 = vmul.f32 %v2726_v56, %v13018_v50  ;;  %v2471_v54 = vand.u32 2147483647, %v2343_v49 }
 0x17a   : > { %17711 = vst [vmem:[#allocation129_spill] sm:$0xff] %v13036_v55  ;;  %10387 = vmatprep.subr.bf16.mxu0 %v17506_v42  ;;  %v2597_v38 = vsub.f32 1.0, %v2469_v5  ;;  %v2345_v48 = vsub.f32 %v11719_v11, %v13028_v23  ;;  %v2600_v39 = vsub.f32 1.0, %v2472_v52  ;;  %v505_v15 = vmul.f32 7.5, %v441_v51 }
 0x17b   : > { %v13049_v6 = vpop.permute.xlu0 %1716  ;;  %v2474_v28 = vand.u32 2147483647, %v2346_v1  ;;  %4614 = vmatprep.mubr.f32.mxu0 %v3622_v46  ;;  %v2599_v27 = vsub.f32 1.0, %v2471_v54  ;;  %v10388_v56 = vpack.c.bf16 %v4786_v41, %v4785_v57  ;;  %v2476_v50 = vand.u32 2147483647, %v2348_v32 }
 0x17c   : > { %17712 = vst [vmem:[#allocation130_spill] sm:$0xff] %v13049_v6  ;;  %v2725_v8 = vmax.f32 %v2597_v38, 0.0  ;;  %v2473_v5 = vand.u32 2147483647, %v2345_v48  ;;  %v2728_v31 = vmax.f32 %v2600_v39, 0.0  ;;  %v569_v18 = vmax.f32 %v505_v15, 0.0 }
 0x17d   : > { %10777 = vset.pattern.permute.xlu1 %v17476_v36  ;;  %v837_v13 = vpop.permute.xlu1 %836  ;;  %v2602_v49 = vsub.f32 1.0, %v2474_v28  ;;  %10389 = vmatpush1.bf16.msra.mxu0 %v10388_v56  ;;  %v2727_v54 = vmax.f32 %v2599_v27, 0.0  ;;  %v1054_v48 = vsub.f32 %v11717_v10, %v12793_v35  ;;  %v13066_v28 = vmax.f32 %v1303_v19, 0.0 }
 0x17e   : > { %941 = vperm.xlu1 %10777, %v17713_v26   ;;  %v1049_v1 = vsub.f32 %v11715_v9, %v837_v13  ;;  %v1050_v23 = vsub.f32 %v11717_v10, %v837_v13  ;;  %v3621_v46 = vmul.f32 %v2725_v8, %v13022_v29  ;;  %v2601_v41 = vsub.f32 1.0, %v2473_v5  ;;  %10390 = vmatprep.subr.bf16.mxu0 %v17506_v42 }
 0x17f   : > { %v2730_v57 = vmax.f32 %v2602_v49, 0.0  ;;  %v3624_v52 = vmul.f32 %v2728_v31, %v13036_v55  ;;  %v633_v51 = vmin.f32 %v569_v18, 15.0  ;;  %17714 = vst [vmem:[#allocation43_spill] sm:$0xff] %v13066_v28  ;;  %v3623_v39 = vmul.f32 %v2727_v54, %v13034_v7 }
 0x180   : > { %v1178_v32 = vand.u32 2147483647, %v1050_v23  ;;  %v13064_v38 = vpop.permute.xlu0 %936  ;;  %4615 = vmatmul.mubr.f32.gmra.mrb[64].mxu0 %v3621_v46  ;;  %v1177_v15 = vand.u32 2147483647, %v1049_v1  ;;  %v2729_v18 = vmax.f32 %v2601_v41, 0.0  ;;  %v2604_v31 = vsub.f32 1.0, %v2476_v50 }
 0x181   : > { %v842_v27 = vpop.permute.xlu1 %841  ;;  %4619 = vmatprep.mubr.f32.mxu0 %v3624_v52  ;;  %v3626_v23 = vmul.f32 %v2730_v57, %v13016_v25  ;;  %3018 = vperm.xlu0 %10787, %v633_v51   ;;  %v17715_v19 = vsub.f32 %v11715_v9, %v12793_v35  ;;  %v1182_v5 = vand.u32 2147483647, %v1054_v48  ;;  %v315_v35 = vld [vmem:[%s11456_s15 + $0x1e0] sm:$0xff]  ;;  %v2347_v48 = vsub.f32 %v11719_v11, %v12748_v44  ;;  %v17722_v25 = vld [vmem:[#allocation95_spill] sm:$0xff] }
 0x182   : > { %v1306_v56 = vsub.f32 1.0, %v1178_v32  ;;  %946 = vperm.xlu1 %10777, %v633_v51   ;;  %v1051_v8 = vsub.f32 %v11715_v9, %v842_v27  ;;  %v1052_v13 = vsub.f32 %v11717_v10, %v842_v27  ;;  %v3625_v32 = vmul.f32 %v2729_v18, %v13066_v28 }
 0x183   : > { %v13075_v49 = vand.u32 2147483647, %v17715_v19  ;;  %v1305_v52 = vsub.f32 1.0, %v1177_v15  ;;  %v2732_v41 = vmax.f32 %v2604_v31, 0.0  ;;  %v4788_v15 = vld [vmem:[%s17003_s2 + $0x268] sm:$0xff]  ;;  %v379_v31 = vmul.f32 2.0, %v315_v35 }
 0x184   : > { %v13077_v1 = vmax.f32 %v1306_v56, 0.0  ;;  %v13079_v46 = vpop.permute.xlu0 %951  ;;  %4620 = vmatmul.mubr.f32.gmra.mrb[66].mxu0 %v3623_v39  ;;  %v1179_v54 = vand.u32 2147483647, %v1051_v8  ;;  %v1180_v57 = vand.u32 2147483647, %v1052_v13  ;;  %v4787_v39 = vld [vmem:[%s17003_s2 + $0x260] sm:$0xff] }
 0x185   : > { %4624 = vmatprep.mubr.f32.mxu0 %v3626_v23  ;;  %3026 = vperm.xlu0 %10787, %v12477_v20   ;;  %v1309_v27 = vsub.f32 1.0, %v13075_v49  ;;  %v1310_v56 = vsub.f32 1.0, %v1182_v5  ;;  %v13101_v19 = vmax.f32 %v1305_v52, 0.0  ;;  %v10391_v5 = vpack.c.bf16 %v4788_v15, %v4787_v39 }
 0x186   : > { %17716 = vst [vmem:[#allocation131_spill] sm:$0xff] %v13077_v1  ;;  %10779 = vset.pattern.permute.xlu1 %v17490_v62  ;;  %v13083_v50 = vpop.permute.xlu1 %1636  ;;  %v3628_v8 = vmul.f32 %v2732_v41, %v13077_v1  ;;  %v1307_v13 = vsub.f32 1.0, %v1179_v54  ;;  %v1308_v44 = vsub.f32 1.0, %v1180_v57  ;;  %v17721_v41 = vld [vmem:[#allocation54_spill] sm:$0xff]  ;;  %v2354_v1 = vsub.f32 %v11721_v12, %v12767_v59 }
 0x187   : > { %17717 = vst [vmem:[#allocation132_spill] sm:$0xff] %v13083_v50  ;;  %1720 = vperm.xlu1 %10779, %v633_v51   ;;  %v2475_v51 = vand.u32 2147483647, %v2347_v48  ;;  %v2350_v18 = vsub.f32 %v11721_v12, %v13083_v50  ;;  %17719 = vst [vmem:[#allocation134_spill] sm:$0xff] %v13101_v19  ;;  %v2349_v49 = vsub.f32 %v11719_v11, %v13083_v50  ;;  %v444_v48 = vadd.f32 1.0, %v379_v31 }
 0x188   : > { %4625 = vmatmul.mubr.f32.gmra.mrb[68].mxu0 %v3625_v32  ;;  %v13111_v52 = vmax.f32 %v1310_v56, 0.0  ;;  %v13117_v39 = vmax.f32 %v1307_v13, 0.0  ;;  %v13120_v31 = vmax.f32 %v1308_v44, 0.0  ;;  %v2353_v13 = vsub.f32 %v11719_v11, %v12767_v59  ;;  %v318_v59 = vld [vmem:[%s11456_s15 + $0x1f8] sm:$0xff] }
 0x189   : > { %v13097_v23 = vpop.permute.xlu0 %1728  ;;  %4629 = vmatprep.mubr.f32.mxu0 %v3628_v8  ;;  %v2603_v54 = vsub.f32 1.0, %v2475_v51  ;;  %v2478_v32 = vand.u32 2147483647, %v2350_v18  ;;  %3034 = vperm.xlu0 %10787, %v17722_v25   ;;  %v2477_v57 = vand.u32 2147483647, %v2349_v49  ;;  %v508_v18 = vmul.f32 7.5, %v444_v48 }
 0x18a   : > { %17718 = vst [vmem:[#allocation133_spill] sm:$0xff] %v13097_v23  ;;  %v13103_v28 = vpop.permute.xlu1 %1640  ;;  %17723 = vst [vmem:[#allocation54_spill] sm:$0xff] %v13111_v52  ;;  %10392 = vmatpush1.bf16.msra.mxu0 %v10391_v5  ;;  %v2482_v5 = vand.u32 2147483647, %v2354_v1  ;;  %v13129_v37 = vmax.f32 %v1309_v27, 0.0 }
 0x18b   : > { %17720 = vst [vmem:[#allocation135_spill] sm:$0xff] %v13103_v28  ;;  %1724 = vperm.xlu1 %10779, %v17721_v41   ;;  %v2352_v35 = vsub.f32 %v11721_v12, %v13103_v28  ;;  %v2351_v8 = vsub.f32 %v11719_v11, %v13103_v28  ;;  %17724 = vst [vmem:[#allocation95_spill] sm:$0xff] %v13117_v39  ;;  %v2731_v15 = vmax.f32 %v2603_v54, 0.0  ;;  %v2606_v51 = vsub.f32 1.0, %v2478_v32 }
 0x18c   : > { %10393 = vmatprep.subr.bf16.mxu0 %v17506_v42  ;;  %17725 = vst [vmem:[#allocation136_spill] sm:$0xff] %v13120_v31  ;;  %v2605_v56 = vsub.f32 1.0, %v2477_v57  ;;  %v572_v32 = vmax.f32 %v508_v18, 0.0  ;;  %17726 = vst [vmem:[#allocation137_spill] sm:$0xff] %v13129_v37 }
 0x18d   : > { %v2480_v49 = vand.u32 2147483647, %v2352_v35  ;;  %v2479_v7 = vand.u32 2147483647, %v2351_v8  ;;  %v3627_v55 = vmul.f32 %v2731_v15, %v13101_v19  ;;  %v2734_v28 = vmax.f32 %v2606_v51, 0.0 }
 0x18e   : > { %v13122_v50 = vpop.permute.xlu0 %966  ;;  %v2733_v44 = vmax.f32 %v2605_v56, 0.0  ;;  %v13134_v8 = vmin.f32 %v572_v32, 15.0 }
 0x18f   : > { %10780 = vset.pattern.permute.xlu1 %v17476_v36  ;;  %v852_v54 = vpop.permute.xlu1 %851  ;;  %v2608_v48 = vsub.f32 1.0, %v2480_v49  ;;  %v2607_v29 = vsub.f32 1.0, %v2479_v7  ;;  %4630 = vmatmul.mubr.f32.gmra.mrb[70].mxu0 %v3627_v55  ;;  %v3630_v1 = vmul.f32 %v2734_v28, %v13120_v31  ;;  %v2610_v49 = vsub.f32 1.0, %v2482_v5 }
 0x190   : > { %956 = vperm.xlu1 %10780, %v12477_v20   ;;  %v1055_v57 = vsub.f32 %v11715_v9, %v852_v54  ;;  %v1056_v35 = vsub.f32 %v11717_v10, %v852_v54  ;;  %v3629_v15 = vmul.f32 %v2733_v44, %v13117_v39  ;;  %v2481_v54 = vand.u32 2147483647, %v2353_v13  ;;  %v4789_v44 = vld [vmem:[%s17003_s2 + $0x270] sm:$0xff] }
 0x191   : > { %v2736_v20 = vmax.f32 %v2608_v48, 0.0  ;;  %4634 = vmatprep.mubr.f32.mxu0 %v3630_v1  ;;  %v2735_v27 = vmax.f32 %v2607_v29, 0.0  ;;  %v4790_v48 = vld [vmem:[%s17003_s2 + $0x278] sm:$0xff]  ;;  %v2738_v5 = vmax.f32 %v2610_v49, 0.0 }
 0x192   : > { %v1183_v51 = vand.u32 2147483647, %v1055_v57  ;;  %v1184_v18 = vand.u32 2147483647, %v1056_v35  ;;  %v10394_v31 = vpack.c.bf16 %v4790_v48, %v4789_v44 }
 0x193   : > { %v13137_v56 = vpop.permute.xlu0 %1740  ;;  %v3632_v55 = vmul.f32 %v2736_v20, %v13111_v52  ;;  %4635 = vmatmul.mubr.f32.gmra.mrb[72].mxu0 %v3629_v15  ;;  %v3631_v29 = vmul.f32 %v2735_v27, %v13129_v37  ;;  %v2609_v15 = vsub.f32 1.0, %v2481_v54  ;;  %v382_v20 = vmul.f32 2.0, %v318_v59  ;;  %v17731_v54 = vld [vmem:[#allocation79_spill] sm:$0xff] }
 0x194   : > { %17727 = vst [vmem:[#allocation138_spill] sm:$0xff] %v13137_v56  ;;  %961 = vperm.xlu1 %10780, %v13134_v8   ;;  %v857_v7 = vpop.permute.xlu1 %856  ;;  %v1311_v28 = vsub.f32 1.0, %v1183_v51  ;;  %v1312_v32 = vsub.f32 1.0, %v1184_v18  ;;  %v1060_v51 = vsub.f32 %v11717_v10, %v12817_v0  ;;  %10395 = vmatpush1.bf16.msra.mxu0 %v10394_v31 }
 0x195   : > { %v1057_v57 = vsub.f32 %v11715_v9, %v857_v7  ;;  %v1058_v35 = vsub.f32 %v11717_v10, %v857_v7  ;;  %4639 = vmatprep.mubr.f32.mxu0 %v3632_v55  ;;  %v2737_v49 = vmax.f32 %v2609_v15, 0.0  ;;  %v447_v44 = vadd.f32 1.0, %v382_v20  ;;  %10396 = vmatprep.subr.bf16.mxu0 %v17506_v42 }
 0x196   : > { %v13151_v13 = vmax.f32 %v1311_v28, 0.0  ;;  %v13153_v1 = vmax.f32 %v1312_v32, 0.0  ;;  %v1747_v28 = vsub.f32 %v11715_v9, %v17731_v54  ;;  %v1188_v15 = vand.u32 2147483647, %v1060_v51 }
 0x197   : > { %v1185_v18 = vand.u32 2147483647, %v1057_v57  ;;  %v1186_v52 = vand.u32 2147483647, %v1058_v35  ;;  %4640 = vmatmul.mubr.f32.gmra.mrb[74].mxu0 %v3631_v29  ;;  %v1065_v20 = vsub.f32 %v11715_v9, %v12887_v43  ;;  %v1066_v51 = vsub.f32 %v11717_v10, %v12887_v43  ;;  %v17737_v43 = vld [vmem:[#allocation98_spill] sm:$0xff] }
 0x198   : > { %17728 = vst [vmem:[#allocation139_spill] sm:$0xff] %v13151_v13  ;;  %17729 = vst [vmem:[#allocation140_spill] sm:$0xff] %v13153_v1  ;;  %10782 = vset.pattern.permute.xlu1 %v17490_v62  ;;  %v2855_v39 = vpop.permute.xlu0 %2854  ;;  %v3634_v27 = vmul.f32 %v2738_v5, %v13153_v1  ;;  %v3633_v35 = vmul.f32 %v2737_v49, %v13151_v13  ;;  %v511_v1 = vmul.f32 7.5, %v447_v44 }
 0x199   : > { %v3077_v7 = vsub.f32 %v11719_v11, %v2855_v39  ;;  %1732 = vperm.xlu1 %10782, %v13134_v8   ;;  %v3078_v59 = vsub.f32 %v11721_v12, %v2855_v39  ;;  %v1314_v32 = vsub.f32 1.0, %v1186_v52  ;;  %v1059_v39 = vsub.f32 %v11715_v9, %v12817_v0 }
 0x19a   : > { %v13160_v55 = vpop.permute.xlu1 %1648  ;;  %4644 = vmatprep.mubr.f32.mxu0 %v3634_v27  ;;  %v1313_v31 = vsub.f32 1.0, %v1185_v18 }
 0x19b   : > { %17730 = vst [vmem:[#allocation141_spill] sm:$0xff] %v13160_v55  ;;  %v2356_v57 = vsub.f32 %v11721_v12, %v13160_v55  ;;  %v3205_v48 = vand.u32 2147483647, %v3077_v7  ;;  %v3206_v29 = vand.u32 2147483647, %v3078_v59  ;;  %v2355_v5 = vsub.f32 %v11719_v11, %v13160_v55  ;;  %4645 = vmatmul.mubr.f32.gmra.mrb[76].mxu0 %v3633_v35 }
 0x19c   : > { %v575_v55 = vmax.f32 %v511_v1, 0.0  ;;  %v1071_v1 = vsub.f32 %v11715_v9, %v12902_v17 }
 0x19d   : > { %v2484_v52 = vand.u32 2147483647, %v2356_v57  ;;  %v3333_v7 = vsub.f32 1.0, %v3205_v48  ;;  %1736 = vperm.xlu1 %10782, %v17722_v25   ;;  %v3334_v49 = vsub.f32 1.0, %v3206_v29  ;;  %v2483_v13 = vand.u32 2147483647, %v2355_v5 }
 0x19e   : > { %v13177_v27 = vpop.permute.xlu1 %1652  ;;  %v13183_v57 = vmax.f32 %v1314_v32, 0.0  ;;  %v639_v48 = vmin.f32 %v575_v55, 15.0  ;;  %v1875_v29 = vand.u32 2147483647, %v1747_v28  ;;  %v13191_v5 = vmax.f32 %v1313_v31, 0.0 }
 0x19f   : > { %17732 = vst [vmem:[#allocation142_spill] sm:$0xff] %v13177_v27  ;;  %v2612_v59 = vsub.f32 1.0, %v2484_v52  ;;  %v2358_v0 = vsub.f32 %v11721_v12, %v13177_v27  ;;  %v13185_v44 = vmax.f32 %v3333_v7, 0.0  ;;  %v13187_v18 = vmax.f32 %v3334_v49, 0.0 }
 0x1a0   : > { %17733 = vst [vmem:[#allocation143_spill] sm:$0xff] %v13183_v57  ;;  %v2611_v35 = vsub.f32 1.0, %v2483_v13  ;;  %v1187_v52 = vand.u32 2147483647, %v1059_v39  ;;  %17736 = vst [vmem:[#allocation146_spill] sm:$0xff] %v13191_v5  ;;  %3042 = vperm.xlu0 %10787, %v639_v48   ;;  %v1316_v39 = vsub.f32 1.0, %v1188_v15  ;;  %v1072_v31 = vsub.f32 %v11717_v10, %v12902_v17 }
 0x1a1   : > { %17734 = vst [vmem:[#allocation144_spill] sm:$0xff] %v13185_v44  ;;  %17735 = vst [vmem:[#allocation145_spill] sm:$0xff] %v13187_v18  ;;  %v2740_v25 = vmax.f32 %v2612_v59, 0.0  ;;  %v2486_v37 = vand.u32 2147483647, %v2358_v0  ;;  %10784 = vset.pattern.permute.xlu1 %v17476_v36  ;;  %v3718_v7 = vmul.f32 %v13187_v18, %v12545_v58  ;;  %v3717_v55 = vmul.f32 %v13185_v44, %v12541_v60 }
 0x1a2   : > { %971 = vperm.xlu1 %10784, %v17737_v43   ;;  %v2739_v28 = vmax.f32 %v2611_v35, 0.0  ;;  %v1193_v49 = vand.u32 2147483647, %v1065_v20  ;;  %v1194_v59 = vand.u32 2147483647, %v1066_v51  ;;  %v2003_v60 = vsub.f32 1.0, %v1875_v29 }
 0x1a3   : > { %v867_v32 = vpop.permute.xlu1 %866  ;;  %v3636_v13 = vmul.f32 %v2740_v25, %v13183_v57  ;;  %4149 = vmatprep.mubr.f32.mxu1 %v3718_v7  ;;  %v2614_v58 = vsub.f32 1.0, %v2486_v37  ;;  %v1199_v18 = vand.u32 2147483647, %v1071_v1  ;;  %v1315_v44 = vsub.f32 1.0, %v1187_v52 }
 0x1a4   : > { %v1062_v0 = vsub.f32 %v11717_v10, %v867_v32  ;;  %v3635_v19 = vmul.f32 %v2739_v28, %v13191_v5  ;;  %4150 = vmatmul.mubr.f32.vlgmr.msra.gmra.mrb[0].mxu1 %v3717_v55  ;;  %v13206_v15 = vmax.f32 %v1316_v39, 0.0  ;;  %v1321_v20 = vsub.f32 1.0, %v1193_v49  ;;  %10790 = vset.pattern.permute.xlu0 %v17476_v36 }
 0x1a5   : > { %4649 = vmatprep.mubr.f32.mxu0 %v3636_v13  ;;  %v1061_v17 = vsub.f32 %v11715_v9, %v867_v32  ;;  %v1322_v35 = vsub.f32 1.0, %v1194_v59  ;;  %v13210_v7 = vand.u32 2147483647, %v1072_v31  ;;  %v2742_v37 = vmax.f32 %v2614_v58, 0.0  ;;  %v13234_v58 = vpop.permute.xlu0 %2866 }
 0x1a6   : > { %976 = vperm.xlu1 %10784, %v639_v48   ;;  %4650 = vmatmul.mubr.f32.gmra.mrb[78].mxu0 %v3635_v19  ;;  %17738 = vst [vmem:[#allocation98_spill] sm:$0xff] %v13206_v15  ;;  %v1190_v51 = vand.u32 2147483647, %v1062_v0  ;;  %v2357_v29 = vsub.f32 %v11719_v11, %v13177_v27  ;;  %v1327_v52 = vsub.f32 1.0, %v1199_v18  ;;  %v1077_v19 = vsub.f32 %v11715_v9, %v12979_v47 }
 0x1a7   : > { %v13204_v25 = vpop.permute.xlu1 %871  ;;  %v13218_v55 = vmax.f32 %v2003_v60, 0.0  ;;  %v1078_v32 = vsub.f32 %v11717_v10, %v12979_v47  ;;  %v2360_v13 = vsub.f32 %v11721_v12, %v12851_v2  ;;  %v13225_v28 = vmax.f32 %v1315_v44, 0.0 }
 0x1a8   : > { %v1064_v1 = vsub.f32 %v11717_v10, %v13204_v25  ;;  %v13227_v39 = vmax.f32 %v1321_v20, 0.0  ;;  %v1189_v18 = vand.u32 2147483647, %v1061_v17  ;;  %v1318_v49 = vsub.f32 1.0, %v1190_v51 }
 0x1a9   : > { %17739 = vst [vmem:[#allocation147_spill] sm:$0xff] %v13218_v55  ;;  %17740 = vst [vmem:[#allocation148_spill] sm:$0xff] %v13225_v28  ;;  %v13231_v31 = vmax.f32 %v1322_v35, 0.0  ;;  %v1328_v0 = vsub.f32 1.0, %v13210_v7  ;;  %v2485_v47 = vand.u32 2147483647, %v2357_v29  ;;  %v1083_v20 = vsub.f32 %v11715_v9, %v12999_v45 }
 0x1aa   : > { %10786 = vset.pattern.permute.xlu1 %v17490_v62  ;;  %17741 = vst [vmem:[#allocation149_spill] sm:$0xff] %v13227_v39  ;;  %v3638_v62 = vmul.f32 %v2742_v37, %v13206_v15  ;;  %v13237_v60 = vmax.f32 %v1327_v52, 0.0  ;;  %v13239_v44 = vand.u32 2147483647, %v1077_v19  ;;  %v1192_v17 = vand.u32 2147483647, %v1064_v1 }
 0x1ab   : > { %1744 = vperm.xlu1 %10786, %v639_v48   ;;  %17743 = vst [vmem:[#allocation151_spill] sm:$0xff] %v13231_v31  ;;  %v1206_v48 = vand.u32 2147483647, %v1078_v32  ;;  %v1084_v51 = vsub.f32 %v11717_v10, %v12999_v45  ;;  %v2613_v35 = vsub.f32 1.0, %v2485_v47  ;;  %v2488_v7 = vand.u32 2147483647, %v2360_v13 }
 0x1ac   : > { %v13229_v59 = vpop.permute.xlu1 %1660  ;;  %17744 = vst [vmem:[#allocation152_spill] sm:$0xff] %v13237_v60  ;;  %4654 = vmatprep.mubr.f32.mxu0 %v3638_v62  ;;  %v1089_v27 = vsub.f32 %v11715_v9, %v13064_v38  ;;  %v1090_v37 = vsub.f32 %v11717_v10, %v13064_v38  ;;  %v1317_v29 = vsub.f32 1.0, %v1189_v18  ;;  %v13249_v52 = vmax.f32 %v1318_v49, 0.0  ;;  %v17748_v62 = vld [vmem:[#allocation3_spill] sm:$0xff] }
 0x1ad   : > { %17742 = vst [vmem:[#allocation150_spill] sm:$0xff] %v13229_v59  ;;  %v17746_v19 = vmov 2   ;;  %v2741_v1 = vmax.f32 %v2613_v35, 0.0  ;;  %v2616_v32 = vsub.f32 1.0, %v2488_v7  ;;  %v2359_v45 = vsub.f32 %v11719_v11, %v12851_v2 }
 0x1ae   : > { %17745 = vst [vmem:[#allocation153_spill] sm:$0xff] %v13249_v52  ;;  %v2362_v13 = vsub.f32 %v11721_v12, %v13229_v59  ;;  %v1333_v47 = vsub.f32 1.0, %v13239_v44  ;;  %v1211_v38 = vand.u32 2147483647, %v1083_v20  ;;  %v1063_v18 = vsub.f32 %v11715_v9, %v13204_v25 }
 0x1af   : > { %10788 = vset.pattern.permute.xlu1 %v17746_v19  ;;  %v1320_v49 = vsub.f32 1.0, %v1192_v17  ;;  %v13262_v19 = vpop.permute.xlu0 %2874  ;;  %v3637_v35 = vmul.f32 %v2741_v1, %v13225_v28  ;;  %v2744_v7 = vmax.f32 %v2616_v32, 0.0  ;;  %v2487_v5 = vand.u32 2147483647, %v2359_v45  ;;  %v17765_v28 = vld [vmem:[#allocation9_spill] sm:$0xff] }
 0x1b0   : > { %v13252_v15 = vpop.permute.xlu1 %1664  ;;  %2858 = vperm.xlu1 %10788, %v17748_v62   ;;  %v2490_v57 = vand.u32 2147483647, %v2362_v13  ;;  %v1212_v2 = vand.u32 2147483647, %v1084_v51  ;;  %v1217_v14 = vand.u32 2147483647, %v1089_v27  ;;  %v2361_v1 = vsub.f32 %v11719_v11, %v13229_v59 }
 0x1b1   : > { %17747 = vst [vmem:[#allocation154_spill] sm:$0xff] %v13252_v15  ;;  %v1218_v62 = vand.u32 2147483647, %v1090_v37  ;;  %v13265_v53 = vmax.f32 %v1317_v29, 0.0  ;;  %4655 = vmatmul.mubr.f32.gmra.mrb[80].mxu0 %v3637_v35  ;;  %v3640_v44 = vmul.f32 %v2744_v7, %v13249_v52  ;;  %v2615_v20 = vsub.f32 1.0, %v2487_v5 }
 0x1b2   : > { %v2618_v17 = vsub.f32 1.0, %v2490_v57  ;;  %v1334_v61 = vsub.f32 1.0, %v1206_v48  ;;  %v1339_v63 = vsub.f32 1.0, %v1211_v38  ;;  %v1191_v55 = vand.u32 2147483647, %v1063_v18 }
 0x1b3   : > { %17749 = vst [vmem:[#allocation3_spill] sm:$0xff] %v13265_v53  ;;  %v1095_v27 = vsub.f32 %v11715_v9, %v13079_v46  ;;  %v13273_v51 = vmax.f32 %v1320_v49, 0.0  ;;  %4659 = vmatprep.mubr.f32.mxu0 %v3640_v44  ;;  %v2743_v37 = vmax.f32 %v2615_v20, 0.0  ;;  %v1340_v32 = vsub.f32 1.0, %v1212_v2  ;;  %v13281_v13 = vpop.permute.xlu0 %2882  ;;  %v17752_v49 = vld [vmem:[#allocation4_spill] sm:$0xff] }
 0x1b4   : > { %2862 = vperm.xlu1 %10788, %v17750_v3   ;;  %v2746_v29 = vmax.f32 %v2618_v17, 0.0  ;;  %v1345_v5 = vsub.f32 1.0, %v1217_v14  ;;  %v1096_v3 = vsub.f32 %v11717_v10, %v13079_v46  ;;  %v1101_v57 = vsub.f32 %v11715_v9, %v13122_v50 }
 0x1b5   : > { %v882_v25 = vpop.permute.xlu1 %881  ;;  %17751 = vst [vmem:[#allocation6_spill] sm:$0xff] %v13273_v51  ;;  %v1346_v48 = vsub.f32 1.0, %v1218_v62  ;;  %v1102_v45 = vsub.f32 %v11717_v10, %v13122_v50  ;;  %v3639_v38 = vmul.f32 %v2743_v37, %v13265_v53  ;;  %v13288_v14 = vmax.f32 %v1328_v0, 0.0  ;;  %v4791_v50 = vld [vmem:[%s17003_s2 + $0x280] sm:$0xff] }
 0x1b6   : > { %v3642_v18 = vmul.f32 %v2746_v29, %v13273_v51  ;;  %v1319_v46 = vsub.f32 1.0, %v1191_v55  ;;  %v1068_v35 = vsub.f32 %v11717_v10, %v882_v25  ;;  %v2489_v7 = vand.u32 2147483647, %v2361_v1  ;;  %v4792_v55 = vld [vmem:[%s17003_s2 + $0x288] sm:$0xff] }
 0x1b7   : > { %17753 = vst [vmem:[#allocation4_spill] sm:$0xff] %v13288_v14  ;;  %v13294_v62 = vmax.f32 %v1333_v47, 0.0  ;;  %v13296_v44 = vmax.f32 %v1334_v61, 0.0  ;;  %v13298_v20 = vmax.f32 %v1339_v63, 0.0  ;;  %v13300_v17 = vand.u32 2147483647, %v1095_v27  ;;  %4660 = vmatmul.mubr.f32.gmra.mrb[82].mxu0 %v3639_v38 }
 0x1b8   : > { %2870 = vperm.xlu1 %10788, %v17752_v49   ;;  %v13305_v0 = vmax.f32 %v1340_v32, 0.0  ;;  %v13307_v1 = vand.u32 2147483647, %v1096_v3  ;;  %v13309_v37 = vand.u32 2147483647, %v1101_v57  ;;  %4664 = vmatprep.mubr.f32.mxu0 %v3642_v18  ;;  %v2617_v47 = vsub.f32 1.0, %v2489_v7 }
 0x1b9   : > { %v13286_v2 = vpop.permute.xlu1 %886  ;;  %17754 = vst [vmem:[#allocation155_spill] sm:$0xff] %v13294_v62  ;;  %17755 = vst [vmem:[#allocation156_spill] sm:$0xff] %v13296_v44  ;;  %v13311_v29 = vmax.f32 %v1345_v5, 0.0  ;;  %v13313_v61 = vmax.f32 %v1346_v48, 0.0  ;;  %v13315_v63 = vand.u32 2147483647, %v1102_v45  ;;  %v1067_v27 = vsub.f32 %v11715_v9, %v882_v25  ;;  %v13326_v48 = vpop.permute.xlu0 %2890 }
 0x1ba   : > { %17756 = vst [vmem:[#allocation157_spill] sm:$0xff] %v13298_v20  ;;  %17757 = vst [vmem:[#allocation158_spill] sm:$0xff] %v13305_v0  ;;  %v17760_v38 = vld [vmem:[#allocation7_spill] sm:$0xff]  ;;  %v13319_v49 = vmax.f32 %v1319_v46, 0.0  ;;  %v1196_v32 = vand.u32 2147483647, %v1068_v35  ;;  %v10397_v3 = vpack.c.bf16 %v4792_v55, %v4791_v50  ;;  %v3083_v5 = vsub.f32 %v11719_v11, %v13234_v58 }
 0x1bb   : > { %17758 = vst [vmem:[#allocation159_spill] sm:$0xff] %v13311_v29  ;;  %17759 = vst [vmem:[#allocation160_spill] sm:$0xff] %v13313_v61  ;;  %v2745_v59 = vmax.f32 %v2617_v47, 0.0  ;;  %v1351_v57 = vsub.f32 1.0, %v13300_v17  ;;  %v2364_v45 = vsub.f32 %v11721_v12, %v13252_v15  ;;  %v2363_v25 = vsub.f32 %v11719_v11, %v13252_v15  ;;  %v17763_v47 = vld [vmem:[#allocation16_spill] sm:$0xff] }
 0x1bc   : > { %2878 = vperm.xlu1 %10788, %v17760_v38   ;;  %17761 = vst [vmem:[#allocation7_spill] sm:$0xff] %v13319_v49  ;;  %v1352_v18 = vsub.f32 1.0, %v13307_v1  ;;  %v1357_v46 = vsub.f32 1.0, %v13309_v37  ;;  %v3084_v35 = vsub.f32 %v11721_v12, %v13234_v58  ;;  %10398 = vmatpush1.bf16.msra.mxu0 %v10397_v3  ;;  %v1195_v50 = vand.u32 2147483647, %v1067_v27 }
 0x1bd   : > { %v3641_v7 = vmul.f32 %v2745_v59, %v13319_v49  ;;  %v2492_v17 = vand.u32 2147483647, %v2364_v45  ;;  %v2491_v55 = vand.u32 2147483647, %v2363_v25  ;;  %10399 = vmatprep.subr.bf16.mxu0 %v17506_v42  ;;  %v1358_v38 = vsub.f32 1.0, %v13315_v63 }
 0x1be   : > { %v13321_v51 = vpop.permute.xlu1 %1672  ;;  %v3087_v1 = vsub.f32 %v11719_v11, %v13262_v19  ;;  %v1324_v15 = vsub.f32 1.0, %v1196_v32  ;;  %v2366_v58 = vsub.f32 %v11721_v12, %v12870_v34  ;;  %v3211_v59 = vand.u32 2147483647, %v3083_v5 }
 0x1bf   : > { %17762 = vst [vmem:[#allocation161_spill] sm:$0xff] %v13321_v51  ;;  %4665 = vmatmul.mubr.f32.gmra.mrb[84].mxu0 %v3641_v7  ;;  %v3088_v27 = vsub.f32 %v11721_v12, %v13262_v19  ;;  %v2620_v3 = vsub.f32 1.0, %v2492_v17  ;;  %v2619_v45 = vsub.f32 1.0, %v2491_v55  ;;  %v3212_v25 = vand.u32 2147483647, %v3084_v35  ;;  %v13352_v7 = vpop.permute.xlu0 %2898 }
 0x1c0   : > { %2886 = vperm.xlu1 %10788, %v17763_v47   ;;  %v3091_v63 = vsub.f32 %v11719_v11, %v13281_v13  ;;  %v3092_v47 = vsub.f32 %v11721_v12, %v13281_v13  ;;  %v2494_v32 = vand.u32 2147483647, %v2366_v58  ;;  %v1323_v49 = vsub.f32 1.0, %v1195_v50 }
 0x1c1   : > { %v2748_v53 = vmax.f32 %v2620_v3, 0.0  ;;  %v2747_v52 = vmax.f32 %v2619_v45, 0.0  ;;  %v2365_v5 = vsub.f32 %v11719_v11, %v12870_v34  ;;  %v3215_v19 = vand.u32 2147483647, %v3087_v1 }
 0x1c2   : > { %v13344_v37 = vpop.permute.xlu1 %1676  ;;  %v13357_v17 = vmax.f32 %v1324_v15, 0.0  ;;  %v1070_v35 = vsub.f32 %v11717_v10, %v13286_v2  ;;  %v2622_v55 = vsub.f32 1.0, %v2494_v32  ;;  %v3216_v54 = vand.u32 2147483647, %v3088_v27  ;;  %v17768_v27 = vld [vmem:[#allocation12_spill] sm:$0xff] }
 0x1c3   : > { %17764 = vst [vmem:[#allocation16_spill] sm:$0xff] %v13344_v37  ;;  %v3644_v13 = vmul.f32 %v2748_v53, %v13231_v31  ;;  %v3643_v58 = vmul.f32 %v2747_v52, %v13227_v39  ;;  %v2493_v50 = vand.u32 2147483647, %v2365_v5  ;;  %v3339_v45 = vsub.f32 1.0, %v3211_v59  ;;  %v17780_v39 = vld [vmem:[#allocation14_spill] sm:$0xff] }
 0x1c4   : > { %2894 = vperm.xlu1 %10788, %v17765_v28   ;;  %17766 = vst [vmem:[#allocation9_spill] sm:$0xff] %v13357_v17  ;;  %v3340_v56 = vsub.f32 1.0, %v3212_v25  ;;  %v3219_v34 = vand.u32 2147483647, %v3091_v63  ;;  %v2750_v36 = vmax.f32 %v2622_v55, 0.0  ;;  %v13365_v1 = vmax.f32 %v1323_v49, 0.0 }
 0x1c5   : > { %v3220_v28 = vand.u32 2147483647, %v3092_v47  ;;  %v1069_v15 = vsub.f32 %v11715_v9, %v13286_v2  ;;  %4669 = vmatprep.mubr.f32.mxu0 %v3644_v13  ;;  %v2621_v32 = vsub.f32 1.0, %v2493_v50  ;;  %v13370_v53 = vmax.f32 %v1351_v57, 0.0  ;;  %v13377_v47 = vpop.permute.xlu0 %2906 }
 0x1c6   : > { %17767 = vst [vmem:[#allocation162_spill] sm:$0xff] %v13365_v1  ;;  %v13372_v52 = vmax.f32 %v1352_v18, 0.0  ;;  %v1198_v5 = vand.u32 2147483647, %v1070_v35  ;;  %4670 = vmatmul.mubr.f32.gmra.mrb[86].mxu0 %v3643_v58  ;;  %v3646_v59 = vmul.f32 %v2750_v36, %v13357_v17  ;;  %v13375_v25 = vmax.f32 %v1357_v46, 0.0  ;;  %v17774_v58 = vld [vmem:[#allocation32_spill] sm:$0xff] }
 0x1c7   : > { %v13363_v3 = vpop.permute.xlu1 %896  ;;  %17769 = vst [vmem:[#allocation12_spill] sm:$0xff] %v13370_v53  ;;  %v3343_v63 = vsub.f32 1.0, %v3215_v19  ;;  %v3344_v49 = vsub.f32 1.0, %v3216_v54  ;;  %v2749_v55 = vmax.f32 %v2621_v32, 0.0  ;;  %v13381_v13 = vmax.f32 %v1358_v38, 0.0  ;;  %v4793_v19 = vld [vmem:[%s17003_s2 + $0x290] sm:$0xff] }
 0x1c8   : > { %2902 = vperm.xlu1 %10788, %v17768_v27   ;;  %17770 = vst [vmem:[#allocation163_spill] sm:$0xff] %v13372_v52  ;;  %17771 = vst [vmem:[#allocation164_spill] sm:$0xff] %v13375_v25  ;;  %v13383_v50 = vmax.f32 %v3339_v45, 0.0  ;;  %v3347_v57 = vsub.f32 1.0, %v3219_v34  ;;  %4674 = vmatprep.mubr.f32.mxu0 %v3646_v59  ;;  %v2368_v18 = vsub.f32 %v11721_v12, %v13321_v51  ;;  %v13387_v35 = vmax.f32 %v3340_v56, 0.0  ;;  %v4794_v38 = vld [vmem:[%s17003_s2 + $0x298] sm:$0xff] }
 0x1c9   : > { %17772 = vst [vmem:[#allocation165_spill] sm:$0xff] %v13381_v13  ;;  %v3348_v36 = vsub.f32 1.0, %v3220_v28  ;;  %v1197_v46 = vand.u32 2147483647, %v1069_v15  ;;  %v3645_v54 = vmul.f32 %v2749_v55, %v13365_v1  ;;  %v3095_v34 = vsub.f32 %v11719_v11, %v13326_v48 }
 0x1ca   : > { %17773 = vst [vmem:[#allocation166_spill] sm:$0xff] %v13383_v50  ;;  %v3096_v56 = vsub.f32 %v11721_v12, %v13326_v48  ;;  %v1326_v45 = vsub.f32 1.0, %v1198_v5  ;;  %v2496_v28 = vand.u32 2147483647, %v2368_v18  ;;  %v13401_v15 = vmax.f32 %v3343_v63, 0.0 }
 0x1cb   : > { %v13379_v2 = vpop.permute.xlu1 %901  ;;  %v13403_v32 = vmax.f32 %v3344_v49, 0.0  ;;  %v3099_v27 = vsub.f32 %v11719_v11, %v13352_v7  ;;  %4675 = vmatmul.mubr.f32.gmra.mrb[88].mxu0 %v3645_v54  ;;  %v2367_v59 = vsub.f32 %v11719_v11, %v13321_v51  ;;  %v13409_v55 = vmax.f32 %v3347_v57, 0.0  ;;  %v13417_v49 = vpop.permute.xlu0 %2914 }
 0x1cc   : > { %2910 = vperm.xlu1 %10788, %v17774_v58   ;;  %17775 = vst [vmem:[#allocation32_spill] sm:$0xff] %v13401_v15  ;;  %v1073_v58 = vsub.f32 %v11715_v9, %v13363_v3  ;;  %v2624_v1 = vsub.f32 1.0, %v2496_v28  ;;  %v10400_v48 = vpack.c.bf16 %v4794_v38, %v4793_v19  ;;  %v13415_v63 = vmax.f32 %v3348_v36, 0.0 }
 0x1cd   : > { %17776 = vst [vmem:[#allocation167_spill] sm:$0xff] %v13403_v32  ;;  %17777 = vst [vmem:[#allocation168_spill] sm:$0xff] %v13409_v55  ;;  %v1325_v18 = vsub.f32 1.0, %v1197_v46  ;;  %v1074_v54 = vsub.f32 %v11717_v10, %v13363_v3  ;;  %v2495_v17 = vand.u32 2147483647, %v2367_v59  ;;  %v13422_v31 = vmax.f32 %v1326_v45, 0.0 }
 0x1ce   : > { %17779 = vst [vmem:[#allocation170_spill] sm:$0xff] %v13415_v63  ;;  %v3223_v57 = vand.u32 2147483647, %v3095_v34  ;;  %v3224_v51 = vand.u32 2147483647, %v3096_v56  ;;  %v2752_v55 = vmax.f32 %v2624_v1, 0.0  ;;  %10401 = vmatpush1.bf16.msra.mxu0 %v10400_v48  ;;  %v3100_v19 = vsub.f32 %v11721_v12, %v13352_v7 }
 0x1cf   : > { %17781 = vst [vmem:[#allocation14_spill] sm:$0xff] %v13422_v31  ;;  %v13426_v36 = vand.u32 2147483647, %v3099_v27  ;;  %v2623_v38 = vsub.f32 1.0, %v2495_v17  ;;  %v2370_v46 = vsub.f32 %v11721_v12, %v13344_v37  ;;  %10402 = vmatprep.subr.bf16.mxu0 %v17506_v42  ;;  %v1201_v3 = vand.u32 2147483647, %v1073_v58 }
 0x1d0   : > { %v13413_v5 = vpop.permute.xlu1 %1684  ;;  %2918 = vperm.xlu1 %10788, %v17780_v39   ;;  %v3103_v39 = vsub.f32 %v11719_v11, %v13377_v47  ;;  %v3648_v34 = vmul.f32 %v2752_v55, %v13422_v31  ;;  %v2369_v1 = vsub.f32 %v11719_v11, %v13344_v37  ;;  %v13438_v7 = vmax.f32 %v1325_v18, 0.0  ;;  %v17784_v27 = vld [vmem:[#allocation17_spill] sm:$0xff]  ;;  %v2923_v37 = vpop.permute.xlu0 %2922 }
 0x1d1   : > { %17778 = vst [vmem:[#allocation169_spill] sm:$0xff] %v13413_v5  ;;  %v1202_v45 = vand.u32 2147483647, %v1074_v54  ;;  %v2751_v17 = vmax.f32 %v2623_v38, 0.0  ;;  %v2498_v28 = vand.u32 2147483647, %v2370_v46  ;;  %v3104_v63 = vsub.f32 %v11721_v12, %v13377_v47 }
 0x1d2   : > { %17783 = vst [vmem:[#allocation172_spill] sm:$0xff] %v13438_v7  ;;  %v3351_v59 = vsub.f32 1.0, %v3223_v57  ;;  %v3352_v48 = vsub.f32 1.0, %v3224_v51  ;;  %4679 = vmatprep.mubr.f32.mxu0 %v3648_v34  ;;  %v2497_v58 = vand.u32 2147483647, %v2369_v1  ;;  %v3355_v31 = vsub.f32 1.0, %v13426_v36 }
 0x1d3   : > { %v3228_v55 = vand.u32 2147483647, %v3100_v19  ;;  %v3647_v15 = vmul.f32 %v2751_v17, %v13438_v7  ;;  %v2626_v18 = vsub.f32 1.0, %v2498_v28  ;;  %v3231_v32 = vand.u32 2147483647, %v3103_v39  ;;  %v17785_v36 = vld [vmem:[#allocation48_spill] sm:$0xff] }
 0x1d4   : > { %v13436_v56 = vpop.permute.xlu1 %1688  ;;  %2926 = vperm.xlu1 %10788, %v17784_v27   ;;  %v3107_v54 = vsub.f32 %v11719_v11, %v13417_v49  ;;  %v1329_v38 = vsub.f32 1.0, %v1201_v3  ;;  %v2625_v46 = vsub.f32 1.0, %v2497_v58  ;;  %v1330_v57 = vsub.f32 1.0, %v1202_v45 }
 0x1d5   : > { %17782 = vst [vmem:[#allocation171_spill] sm:$0xff] %v13436_v56  ;;  %4680 = vmatmul.mubr.f32.gmra.mrb[90].mxu0 %v3647_v15  ;;  %v2754_v51 = vmax.f32 %v2626_v18, 0.0  ;;  %v2372_v47 = vsub.f32 %v11721_v12, %v12940_v22  ;;  %v2371_v19 = vsub.f32 %v11719_v11, %v12940_v22  ;;  %v3232_v1 = vand.u32 2147483647, %v3104_v63 }
 0x1d6   : > { %v3108_v39 = vsub.f32 %v11721_v12, %v13417_v49  ;;  %v3111_v3 = vsub.f32 %v11719_v11, %v2923_v37  ;;  %v2753_v17 = vmax.f32 %v2625_v46, 0.0  ;;  %v3112_v15 = vsub.f32 %v11721_v12, %v2923_v37 }
 0x1d7   : > { %v3650_v45 = vmul.f32 %v2754_v51, %v13288_v14  ;;  %v2500_v28 = vand.u32 2147483647, %v2372_v47  ;;  %v2499_v27 = vand.u32 2147483647, %v2371_v19  ;;  %v3235_v58 = vand.u32 2147483647, %v3107_v54 }
 0x1d8   : > { %2934 = vperm.xlu1 %10788, %v17785_v36   ;;  %v13459_v18 = vmax.f32 %v1329_v38, 0.0  ;;  %v1076_v36 = vsub.f32 %v11717_v10, %v13379_v2  ;;  %v3649_v63 = vmul.f32 %v2753_v17, %v13237_v60  ;;  %v13464_v22 = vmax.f32 %v1330_v57, 0.0  ;;  %v4795_v51 = vld [vmem:[%s17003_s2 + $0x2a0] sm:$0xff] }
 0x1d9   : > { %v13452_v34 = vpop.permute.xlu1 %911  ;;  %v1075_v49 = vsub.f32 %v11715_v9, %v13379_v2  ;;  %4684 = vmatprep.mubr.f32.mxu0 %v3650_v45  ;;  %v2628_v46 = vsub.f32 1.0, %v2500_v28  ;;  %v2627_v37 = vsub.f32 1.0, %v2499_v27  ;;  %v17788_v54 = vld [vmem:[#allocation18_spill] sm:$0xff]  ;;  %v13474_v47 = vmax.f32 %v3351_v59, 0.0  ;;  %v4796_v2 = vld [vmem:[%s17003_s2 + $0x2a8] sm:$0xff] }
 0x1da   : > { %17786 = vst [vmem:[#allocation17_spill] sm:$0xff] %v13459_v18  ;;  %17787 = vst [vmem:[#allocation48_spill] sm:$0xff] %v13464_v22  ;;  %v13476_v19 = vmax.f32 %v3352_v48, 0.0  ;;  %v3356_v57 = vsub.f32 1.0, %v3228_v55  ;;  %v3236_v17 = vand.u32 2147483647, %v3108_v39  ;;  %4685 = vmatmul.mubr.f32.gmra.mrb[92].mxu0 %v3649_v63 }
 0x1db   : > { %17789 = vst [vmem:[#allocation18_spill] sm:$0xff] %v13474_v47  ;;  %v3239_v45 = vand.u32 2147483647, %v3111_v3  ;;  %v3240_v28 = vand.u32 2147483647, %v3112_v15  ;;  %v2756_v27 = vmax.f32 %v2628_v46, 0.0  ;;  %v1080_v3 = vsub.f32 %v11717_v10, %v13452_v34 }
 0x1dc   : > { %2942 = vperm.xlu1 %10788, %v17788_v54   ;;  %17790 = vst [vmem:[#allocation173_spill] sm:$0xff] %v13476_v19  ;;  %v2755_v60 = vmax.f32 %v2627_v37, 0.0  ;;  %v13481_v14 = vmax.f32 %v3355_v31, 0.0  ;;  %v3359_v54 = vsub.f32 1.0, %v3231_v32  ;;  %v3360_v7 = vsub.f32 1.0, %v3232_v1  ;;  %v17791_v39 = vld [vmem:[#allocation22_spill] sm:$0xff] }
 0x1dd   : > { %v13472_v38 = vpop.permute.xlu1 %916  ;;  %v1204_v50 = vand.u32 2147483647, %v1076_v36  ;;  %v3363_v59 = vsub.f32 1.0, %v3235_v58  ;;  %v1203_v47 = vand.u32 2147483647, %v1075_v49  ;;  %v3652_v48 = vmul.f32 %v2756_v27, %v13464_v22  ;;  %v13494_v36 = vpop.permute.xlu0 %2930  ;;  %v17795_v27 = vld [vmem:[#allocation73_spill] sm:$0xff] }
 0x1de   : > { %v3651_v55 = vmul.f32 %v2755_v60, %v13459_v18  ;;  %v3364_v63 = vsub.f32 1.0, %v3236_v17  ;;  %v10403_v15 = vpack.c.bf16 %v4796_v2, %v4795_v51  ;;  %v2374_v31 = vsub.f32 %v11721_v12, %v13413_v5 }
 0x1df   : > { %v13492_v32 = vmax.f32 %v3356_v57, 0.0  ;;  %v3367_v1 = vsub.f32 1.0, %v3239_v45  ;;  %v3368_v58 = vsub.f32 1.0, %v3240_v28  ;;  %4689 = vmatprep.mubr.f32.mxu0 %v3652_v48  ;;  %v2373_v60 = vsub.f32 %v11719_v11, %v13413_v5 }
 0x1e0   : > { %2950 = vperm.xlu1 %10788, %v17791_v39   ;;  %v13498_v49 = vmax.f32 %v3359_v54, 0.0  ;;  %v1332_v37 = vsub.f32 1.0, %v1204_v50  ;;  %4690 = vmatmul.mubr.f32.gmra.mrb[94].mxu0 %v3651_v55  ;;  %v1079_v51 = vsub.f32 %v11715_v9, %v13452_v34  ;;  %v2502_v17 = vand.u32 2147483647, %v2374_v31 }
 0x1e1   : > { %v13502_v2 = vmax.f32 %v3360_v7, 0.0  ;;  %v13504_v57 = vmax.f32 %v3363_v59, 0.0  ;;  %v1331_v45 = vsub.f32 1.0, %v1203_v47  ;;  %10404 = vmatpush1.bf16.msra.mxu0 %v10403_v15  ;;  %v2501_v28 = vand.u32 2147483647, %v2373_v60 }
 0x1e2   : > { %v13490_v46 = vpop.permute.xlu1 %1696  ;;  %17793 = vst [vmem:[#allocation174_spill] sm:$0xff] %v13498_v49  ;;  %v13507_v48 = vmax.f32 %v3364_v63, 0.0  ;;  %v3115_v54 = vsub.f32 %v11719_v11, %v13494_v36  ;;  %v1208_v50 = vand.u32 2147483647, %v1080_v3  ;;  %v2630_v55 = vsub.f32 1.0, %v2502_v17  ;;  %10405 = vmatprep.subr.bf16.mxu0 %v17506_v42 }
 0x1e3   : > { %17792 = vst [vmem:[#allocation22_spill] sm:$0xff] %v13490_v46  ;;  %17794 = vst [vmem:[#allocation175_spill] sm:$0xff] %v13502_v2  ;;  %v13514_v7 = vmax.f32 %v3367_v1, 0.0  ;;  %v13516_v34 = vmax.f32 %v3368_v58, 0.0  ;;  %v2629_v47 = vsub.f32 1.0, %v2501_v28  ;;  %v2376_v59 = vsub.f32 %v11721_v12, %v13436_v56  ;;  %v17802_v58 = vld [vmem:[#allocation28_spill] sm:$0xff] }
 0x1e4   : > { %2958 = vperm.xlu1 %10788, %v17795_v27   ;;  %17796 = vst [vmem:[#allocation73_spill] sm:$0xff] %v13507_v48  ;;  %v13520_v15 = vmax.f32 %v1332_v37, 0.0  ;;  %v1207_v63 = vand.u32 2147483647, %v1079_v51  ;;  %v2758_v31 = vmax.f32 %v2630_v55, 0.0  ;;  %v2375_v3 = vsub.f32 %v11719_v11, %v13436_v56  ;;  %v4797_v28 = vld [vmem:[%s17003_s2 + $0x2b0] sm:$0xff]  ;;  %v13538_v56 = vpop.permute.xlu0 %2938 }
 0x1e5   : > { %17798 = vst [vmem:[#allocation177_spill] sm:$0xff] %v13514_v7  ;;  %17799 = vst [vmem:[#allocation178_spill] sm:$0xff] %v13516_v34  ;;  %v13524_v60 = vmax.f32 %v1331_v45, 0.0  ;;  %v2757_v17 = vmax.f32 %v2629_v47, 0.0  ;;  %v1081_v1 = vsub.f32 %v11715_v9, %v13472_v38  ;;  %v2504_v27 = vand.u32 2147483647, %v2376_v59 }
 0x1e6   : > { %v13511_v39 = vpop.permute.xlu1 %1700  ;;  %17800 = vst [vmem:[#allocation179_spill] sm:$0xff] %v13520_v15  ;;  %v4798_v37 = vld [vmem:[%s17003_s2 + $0x2b8] sm:$0xff]  ;;  %v13535_v51 = vand.u32 2147483647, %v3115_v54  ;;  %v1336_v55 = vsub.f32 1.0, %v1208_v50  ;;  %v3654_v45 = vmul.f32 %v2758_v31, %v13520_v15  ;;  %v2378_v18 = vsub.f32 %v11721_v12, %v12959_v16 }
 0x1e7   : > { %17797 = vst [vmem:[#allocation176_spill] sm:$0xff] %v13511_v39  ;;  %17801 = vst [vmem:[#allocation180_spill] sm:$0xff] %v13524_v60  ;;  %v2503_v47 = vand.u32 2147483647, %v2375_v3  ;;  %v3653_v59 = vmul.f32 %v2757_v17, %v13524_v60  ;;  %v2632_v5 = vsub.f32 1.0, %v2504_v27  ;;  %v1335_v7 = vsub.f32 1.0, %v1207_v63 }
 0x1e8   : > { %2966 = vperm.xlu1 %10788, %v17802_v58   ;;  %v1082_v58 = vsub.f32 %v11717_v10, %v13472_v38  ;;  %4694 = vmatprep.mubr.f32.mxu0 %v3654_v45  ;;  %v2377_v50 = vsub.f32 %v11719_v11, %v12959_v16  ;;  %v10406_v31 = vpack.c.bf16 %v4798_v37, %v4797_v28  ;;  %v1209_v17 = vand.u32 2147483647, %v1081_v1 }
 0x1e9   : > { %v2631_v54 = vsub.f32 1.0, %v2503_v47  ;;  %v3116_v3 = vsub.f32 %v11721_v12, %v13494_v36  ;;  %4695 = vmatmul.mubr.f32.gmra.mrb[96].mxu0 %v3653_v59  ;;  %v2760_v60 = vmax.f32 %v2632_v5, 0.0  ;;  %v2506_v15 = vand.u32 2147483647, %v2378_v18 }
 0x1ea   : > { %v3119_v38 = vsub.f32 %v11719_v11, %v13538_v56  ;;  %v13552_v27 = vmax.f32 %v1336_v55, 0.0  ;;  %v2505_v45 = vand.u32 2147483647, %v2377_v50  ;;  %10407 = vmatpush1.bf16.msra.mxu0 %v10406_v31  ;;  %v1210_v47 = vand.u32 2147483647, %v1082_v58 }
 0x1eb   : > { %v927_v22 = vpop.permute.xlu1 %926  ;;  %v2759_v63 = vmax.f32 %v2631_v54, 0.0  ;;  %v3656_v28 = vmul.f32 %v2760_v60, %v13296_v44  ;;  %v2634_v37 = vsub.f32 1.0, %v2506_v15  ;;  %10408 = vmatprep.subr.bf16.mxu0 %v17506_v42  ;;  %v13557_v5 = vmax.f32 %v1335_v7, 0.0  ;;  %v17867_v44 = vld [vmem:[#allocation167_spill] sm:$0xff] }
 0x1ec   : > { %2974 = vperm.xlu1 %10788, %v17664_v33   ;;  %17803 = vst [vmem:[#allocation28_spill] sm:$0xff] %v13552_v27  ;;  %v1086_v36 = vsub.f32 %v11717_v10, %v927_v22  ;;  %v2633_v18 = vsub.f32 1.0, %v2505_v45  ;;  %v1085_v1 = vsub.f32 %v11715_v9, %v927_v22  ;;  %v13563_v59 = vand.u32 2147483647, %v3116_v3 }
 0x1ed   : > { %17804 = vst [vmem:[#allocation181_spill] sm:$0xff] %v13557_v5  ;;  %v3655_v33 = vmul.f32 %v2759_v63, %v13294_v62  ;;  %v1337_v54 = vsub.f32 1.0, %v1209_v17  ;;  %4699 = vmatprep.mubr.f32.mxu0 %v3656_v28  ;;  %v2762_v58 = vmax.f32 %v2634_v37, 0.0  ;;  %v2380_v15 = vsub.f32 %v11721_v12, %v13490_v46 }
 0x1ee   : > { %v3371_v7 = vsub.f32 1.0, %v13535_v51  ;;  %v3120_v60 = vsub.f32 %v11721_v12, %v13538_v56  ;;  %v2761_v50 = vmax.f32 %v2633_v18, 0.0  ;;  %v2379_v22 = vsub.f32 %v11719_v11, %v13490_v46 }
 0x1ef   : > { %v13561_v55 = vpop.permute.xlu1 %931  ;;  %4700 = vmatmul.mubr.f32.gmra.mrb[98].mxu0 %v3655_v33  ;;  %v1338_v31 = vsub.f32 1.0, %v1210_v47  ;;  %v3658_v3 = vmul.f32 %v2762_v58, %v13552_v27  ;;  %v1214_v17 = vand.u32 2147483647, %v1086_v36  ;;  %v2508_v63 = vand.u32 2147483647, %v2380_v15  ;;  %v17865_v27 = vld [vmem:[#allocation19_spill] sm:$0xff] }
 0x1f0   : > { %2982 = vperm.xlu1 %10788, %v12791_v4   ;;  %v13574_v45 = vand.u32 2147483647, %v3119_v38  ;;  %v3657_v28 = vmul.f32 %v2761_v50, %v13557_v5  ;;  %v1213_v4 = vand.u32 2147483647, %v1085_v1  ;;  %v2507_v37 = vand.u32 2147483647, %v2379_v22 }
 0x1f1   : > { %v3372_v51 = vsub.f32 1.0, %v13563_v59  ;;  %v13578_v16 = vmax.f32 %v1337_v54, 0.0  ;;  %4704 = vmatprep.mubr.f32.mxu0 %v3658_v3  ;;  %v2636_v56 = vsub.f32 1.0, %v2508_v63  ;;  %v2382_v33 = vsub.f32 %v11721_v12, %v13511_v39 }
 0x1f2   : > { %v2635_v38 = vsub.f32 1.0, %v2507_v37  ;;  %v2381_v36 = vsub.f32 %v11719_v11, %v13511_v39  ;;  %v2384_v18 = vsub.f32 %v11721_v12, %v13026_v30  ;;  %v2383_v1 = vsub.f32 %v11719_v11, %v13026_v30 }
 0x1f3   : > { %17805 = vst [vmem:[#allocation182_spill] sm:$0xff] %v13578_v16  ;;  %4705 = vmatmul.mubr.f32.gmra.mrb[100].mxu0 %v3657_v28  ;;  %v13591_v59 = vmax.f32 %v1338_v31, 0.0  ;;  %v1342_v54 = vsub.f32 1.0, %v1214_v17  ;;  %v2764_v58 = vmax.f32 %v2636_v56, 0.0  ;;  %v1341_v15 = vsub.f32 1.0, %v1213_v4 }
 0x1f4   : > { %2990 = vperm.xlu1 %10788, %v17680_v40   ;;  %v13583_v47 = vpop.permute.xlu1 %1708  ;;  %v1088_v40 = vsub.f32 %v11717_v10, %v13561_v55  ;;  %v2763_v50 = vmax.f32 %v2635_v38, 0.0  ;;  %v2510_v22 = vand.u32 2147483647, %v2382_v33  ;;  %v2509_v3 = vand.u32 2147483647, %v2381_v36  ;;  %v4800_v33 = vld [vmem:[%s17003_s2 + $0x2c8] sm:$0xff] }
 0x1f5   : > { %17806 = vst [vmem:[#allocation183_spill] sm:$0xff] %v13583_v47  ;;  %17807 = vst [vmem:[#allocation184_spill] sm:$0xff] %v13591_v59  ;;  %v13595_v63 = vand.u32 2147483647, %v3120_v60  ;;  %v3660_v28 = vmul.f32 %v2764_v58, %v13591_v59  ;;  %v1087_v37 = vsub.f32 %v11715_v9, %v13561_v55  ;;  %v2512_v39 = vand.u32 2147483647, %v2384_v18  ;;  %v2947_v18 = vpop.permute.xlu0 %2946 }
 0x1f6   : > { %v3659_v17 = vmul.f32 %v2763_v50, %v13578_v16  ;;  %v2638_v56 = vsub.f32 1.0, %v2510_v22  ;;  %v2637_v30 = vsub.f32 1.0, %v2509_v3  ;;  %v2511_v4 = vand.u32 2147483647, %v2383_v1  ;;  %v4799_v60 = vld [vmem:[%s17003_s2 + $0x2c0] sm:$0xff] }
 0x1f7   : > { %v3375_v55 = vsub.f32 1.0, %v13574_v45  ;;  %v13611_v38 = vmax.f32 %v1342_v54, 0.0  ;;  %4709 = vmatprep.mubr.f32.mxu0 %v3660_v28  ;;  %v2640_v36 = vsub.f32 1.0, %v2512_v39  ;;  %v13613_v58 = vmax.f32 %v1341_v15, 0.0 }
 0x1f8   : > { %2998 = vperm.xlu1 %10788, %v17694_v21   ;;  %v13601_v31 = vpop.permute.xlu1 %1712  ;;  %v1216_v21 = vand.u32 2147483647, %v1088_v40  ;;  %4710 = vmatmul.mubr.f32.gmra.mrb[102].mxu0 %v3659_v17  ;;  %v2766_v1 = vmax.f32 %v2638_v56, 0.0  ;;  %v2765_v50 = vmax.f32 %v2637_v30, 0.0  ;;  %v2639_v22 = vsub.f32 1.0, %v2511_v4 }
 0x1f9   : > { %17808 = vst [vmem:[#allocation185_spill] sm:$0xff] %v13601_v31  ;;  %17809 = vst [vmem:[#allocation186_spill] sm:$0xff] %v13611_v38  ;;  %v1215_v3 = vand.u32 2147483647, %v1087_v37  ;;  %v2768_v46 = vmax.f32 %v2640_v36, 0.0  ;;  %v10409_v16 = vpack.c.bf16 %v4800_v33, %v4799_v60  ;;  %v2386_v45 = vsub.f32 %v11721_v12, %v13583_v47 }
 0x1fa   : > { %17810 = vst [vmem:[#allocation187_spill] sm:$0xff] %v13613_v58  ;;  %v13618_v54 = vmax.f32 %v3371_v7, 0.0  ;;  %v3662_v40 = vmul.f32 %v2766_v1, %v13305_v0  ;;  %v3661_v39 = vmul.f32 %v2765_v50, %v13298_v20  ;;  %v2767_v15 = vmax.f32 %v2639_v22, 0.0 }
 0x1fb   : > { %v3123_v17 = vsub.f32 %v11719_v11, %v2947_v18  ;;  %v1344_v30 = vsub.f32 1.0, %v1216_v21  ;;  %v3664_v37 = vmul.f32 %v2768_v46, %v13611_v38  ;;  %10410 = vmatpush1.bf16.msra.mxu0 %v10409_v16  ;;  %v2514_v4 = vand.u32 2147483647, %v2386_v45 }
 0x1fc   : > { %3006 = vperm.xlu1 %10788, %v12983_v24   ;;  %v13625_v24 = vmax.f32 %v3372_v51, 0.0  ;;  %4714 = vmatprep.mubr.f32.mxu0 %v3662_v40  ;;  %v2385_v60 = vsub.f32 %v11719_v11, %v13583_v47  ;;  %v3376_v33 = vsub.f32 1.0, %v13595_v63  ;;  %v13632_v36 = vmax.f32 %v3375_v55, 0.0 }
 0x1fd   : > { %v942_v28 = vpop.permute.xlu1 %941  ;;  %10411 = vmatprep.subr.bf16.mxu0 %v17506_v42  ;;  %v1343_v21 = vsub.f32 1.0, %v1215_v3  ;;  %4715 = vmatmul.mubr.f32.gmra.mrb[104].mxu0 %v3661_v39  ;;  %v3663_v16 = vmul.f32 %v2767_v15, %v13613_v58  ;;  %v3124_v46 = vsub.f32 %v11721_v12, %v2947_v18  ;;  %v2642_v1 = vsub.f32 1.0, %v2514_v4  ;;  %v2955_v3 = vpop.permute.xlu0 %2954 }
 0x1fe   : > { %v1092_v56 = vsub.f32 %v11717_v10, %v942_v28  ;;  %v1091_v7 = vsub.f32 %v11715_v9, %v942_v28  ;;  %4719 = vmatprep.mubr.f32.mxu0 %v3664_v37  ;;  %v2513_v50 = vand.u32 2147483647, %v2385_v60  ;;  %v13637_v45 = vand.u32 2147483647, %v3123_v17 }
 0x1ff   : > { %v13639_v40 = vmax.f32 %v1344_v30, 0.0  ;;  %v2388_v63 = vsub.f32 %v11721_v12, %v13601_v31  ;;  %v2387_v55 = vsub.f32 %v11719_v11, %v13601_v31  ;;  %v2390_v18 = vsub.f32 %v11721_v12, %v13049_v6 }
 0x200   : > { %3014 = vperm.xlu1 %10788, %v17713_v26   ;;  %v1220_v51 = vand.u32 2147483647, %v1092_v56  ;;  %v1219_v39 = vand.u32 2147483647, %v1091_v7  ;;  %v2770_v26 = vmax.f32 %v2642_v1, 0.0  ;;  %v2641_v15 = vsub.f32 1.0, %v2513_v50 }
 0x201   : > { %v947_v22 = vpop.permute.xlu1 %946  ;;  %17811 = vst [vmem:[#allocation188_spill] sm:$0xff] %v13639_v40  ;;  %v13647_v28 = vmax.f32 %v3376_v33, 0.0  ;;  %v13649_v37 = vmax.f32 %v1343_v21, 0.0  ;;  %4720 = vmatmul.mubr.f32.gmra.mrb[106].mxu0 %v3663_v16  ;;  %v2389_v30 = vsub.f32 %v11719_v11, %v13049_v6  ;;  %v13657_v1 = vand.u32 2147483647, %v3124_v46  ;;  %v4802_v46 = vld [vmem:[%s17003_s2 + $0x2d8] sm:$0xff] }
 0x202   : > { %v1093_v17 = vsub.f32 %v11715_v9, %v947_v22  ;;  %v1348_v56 = vsub.f32 1.0, %v1220_v51  ;;  %v3666_v7 = vmul.f32 %v2770_v26, %v13639_v40  ;;  %v2769_v4 = vmax.f32 %v2641_v15, 0.0  ;;  %v4801_v26 = vld [vmem:[%s17003_s2 + $0x2d0] sm:$0xff] }
 0x203   : > { %17812 = vst [vmem:[#allocation189_spill] sm:$0xff] %v13649_v37  ;;  %v1094_v60 = vsub.f32 %v11717_v10, %v947_v22  ;;  %v3127_v33 = vsub.f32 %v11719_v11, %v2955_v3  ;;  %v2516_v21 = vand.u32 2147483647, %v2388_v63  ;;  %v2515_v50 = vand.u32 2147483647, %v2387_v55 }
 0x204   : > { %3022 = vperm.xlu1 %10788, %v17721_v41   ;;  %v1347_v41 = vsub.f32 1.0, %v1219_v39  ;;  %4724 = vmatprep.mubr.f32.mxu0 %v3666_v7  ;;  %v3665_v6 = vmul.f32 %v2769_v4, %v13649_v37  ;;  %v2518_v51 = vand.u32 2147483647, %v2390_v18  ;;  %v3128_v22 = vsub.f32 %v11721_v12, %v2955_v3 }
 0x205   : > { %v1221_v63 = vand.u32 2147483647, %v1093_v17  ;;  %v2644_v55 = vsub.f32 1.0, %v2516_v21  ;;  %v2643_v15 = vsub.f32 1.0, %v2515_v50  ;;  %v13672_v39 = vmax.f32 %v1348_v56, 0.0 }
 0x206   : > { %v13660_v16 = vpop.permute.xlu1 %1720  ;;  %4725 = vmatmul.mubr.f32.gmra.mrb[108].mxu0 %v3665_v6  ;;  %v1222_v7 = vand.u32 2147483647, %v1094_v60  ;;  %v2646_v18 = vsub.f32 1.0, %v2518_v51  ;;  %v2517_v4 = vand.u32 2147483647, %v2389_v30  ;;  %v10412_v58 = vpack.c.bf16 %v4802_v46, %v4801_v26 }
 0x207   : > { %17813 = vst [vmem:[#allocation190_spill] sm:$0xff] %v13660_v16  ;;  %17814 = vst [vmem:[#allocation191_spill] sm:$0xff] %v13672_v39  ;;  %v2772_v47 = vmax.f32 %v2644_v55, 0.0  ;;  %v2771_v37 = vmax.f32 %v2643_v15, 0.0  ;;  %v13677_v38 = vmax.f32 %v1347_v41, 0.0  ;;  %v1349_v56 = vsub.f32 1.0, %v1221_v63 }
 0x208   : > { %3030 = vperm.xlu1 %10788, %v13134_v8   ;;  %v2774_v3 = vmax.f32 %v2646_v18, 0.0  ;;  %v2645_v17 = vsub.f32 1.0, %v2517_v4  ;;  %v2392_v8 = vsub.f32 %v11721_v12, %v13660_v16  ;;  %10413 = vmatpush1.bf16.msra.mxu0 %v10412_v58  ;;  %v2391_v30 = vsub.f32 %v11719_v11, %v13660_v16 }
 0x209   : > { %17816 = vst [vmem:[#allocation193_spill] sm:$0xff] %v13677_v38  ;;  %v3668_v6 = vmul.f32 %v2772_v47, %v13313_v61  ;;  %v3667_v60 = vmul.f32 %v2771_v37, %v13311_v29  ;;  %v1350_v21 = vsub.f32 1.0, %v1222_v7  ;;  %10414 = vmatprep.subr.bf16.mxu0 %v17506_v42  ;;  %v13688_v26 = vand.u32 2147483647, %v3127_v33  ;;  %v4803_v33 = vld [vmem:[%s17003_s2 + $0x2e0] sm:$0xff]  ;;  %v4804_v7 = vld [vmem:[%s17003_s2 + $0x2e8] sm:$0xff] }
 0x20a   : > { %v13675_v40 = vpop.permute.xlu1 %1724  ;;  %v3670_v50 = vmul.f32 %v2774_v3, %v13672_v39  ;;  %v2773_v41 = vmax.f32 %v2645_v17, 0.0  ;;  %v2520_v51 = vand.u32 2147483647, %v2392_v8  ;;  %v2519_v46 = vand.u32 2147483647, %v2391_v30 }
 0x20b   : > { %17815 = vst [vmem:[#allocation192_spill] sm:$0xff] %v13675_v40  ;;  %4729 = vmatprep.mubr.f32.mxu0 %v3668_v6  ;;  %v2394_v47 = vsub.f32 %v11721_v12, %v13675_v40  ;;  %v13694_v58 = vand.u32 2147483647, %v3128_v22  ;;  %v2396_v15 = vsub.f32 %v11721_v12, %v13097_v23  ;;  %v13705_v18 = vmax.f32 %v1349_v56, 0.0 }
 0x20c   : > { %3038 = vperm.xlu1 %10788, %v17737_v43   ;;  %v2393_v43 = vsub.f32 %v11719_v11, %v13675_v40  ;;  %4730 = vmatmul.mubr.f32.gmra.mrb[110].mxu0 %v3667_v60  ;;  %v3669_v37 = vmul.f32 %v2773_v41, %v13677_v38  ;;  %v2648_v55 = vsub.f32 1.0, %v2520_v51  ;;  %v2647_v3 = vsub.f32 1.0, %v2519_v46 }
 0x20d   : > { %17817 = vst [vmem:[#allocation194_spill] sm:$0xff] %v13705_v18  ;;  %4734 = vmatprep.mubr.f32.mxu0 %v3670_v50  ;;  %v17818_v17 = vmov 0   ;;  %v13710_v8 = vmax.f32 %v1350_v21, 0.0  ;;  %v2522_v60 = vand.u32 2147483647, %v2394_v47  ;;  %v10415_v40 = vpack.c.bf16 %v4804_v7, %v4803_v33  ;;  %v2963_v47 = vpop.permute.xlu0 %2962 }
 0x20e   : > { %v2776_v6 = vmax.f32 %v2648_v55, 0.0  ;;  %v2521_v30 = vand.u32 2147483647, %v2393_v43  ;;  %v2775_v31 = vmax.f32 %v2647_v3, 0.0  ;;  %v2524_v39 = vand.u32 2147483647, %v2396_v15 }
 0x20f   : > { %v957_v63 = vpop.permute.xlu1 %956  ;;  %17819 = vst [vmem:[#allocation195_spill] sm:$0xff] %v13710_v8  ;;  %v2650_v16 = vsub.f32 1.0, %v2522_v60  ;;  %v3383_v46 = vsub.f32 1.0, %v13688_v26  ;;  %10416 = vmatpush1.bf16.msra.mxu0 %v10415_v40  ;;  %v2395_v26 = vsub.f32 %v11719_v11, %v13097_v23 }
 0x210   : > { %v1097_v22 = vsub.f32 %v11715_v9, %v957_v63  ;;  %v1098_v4 = vsub.f32 %v11717_v10, %v957_v63  ;;  %10789 = vset.pattern.permute.xlu1 %v17818_v17  ;;  %4735 = vmatmul.mubr.f32.gmra.mrb[112].mxu0 %v3669_v37  ;;  %v3672_v56 = vmul.f32 %v2776_v6, %v13710_v8  ;;  %v2649_v38 = vsub.f32 1.0, %v2521_v30 }
 0x211   : > { %v3671_v21 = vmul.f32 %v2775_v31, %v13705_v18  ;;  %v2778_v33 = vmax.f32 %v2650_v16, 0.0  ;;  %v2652_v7 = vsub.f32 1.0, %v2524_v39  ;;  %10417 = vmatprep.subr.bf16.mxu0 %v17506_v42  ;;  %v17821_v16 = vsub.f32 1.0, %v13637_v45 }
 0x212   : > { %v1225_v41 = vand.u32 2147483647, %v1097_v22  ;;  %v1226_v51 = vand.u32 2147483647, %v1098_v4  ;;  %4739 = vmatprep.mubr.f32.mxu0 %v3672_v56  ;;  %v2777_v37 = vmax.f32 %v2649_v38, 0.0  ;;  %v17822_v42 = vsub.f32 1.0, %v13657_v1 }
 0x213   : > { %v962_v50 = vpop.permute.xlu1 %961  ;;  %v3674_v40 = vmul.f32 %v2778_v33, %v13372_v52  ;;  %v2780_v17 = vmax.f32 %v2652_v7, 0.0  ;;  %v13726_v38 = vmax.f32 %v17821_v16, 0.0  ;;  %v3131_v6 = vsub.f32 %v11719_v11, %v2963_v47 }
 0x214   : > { %v1354_v63 = vsub.f32 1.0, %v1226_v51  ;;  %v1099_v55 = vsub.f32 %v11715_v9, %v962_v50  ;;  %v1100_v43 = vsub.f32 %v11717_v10, %v962_v50  ;;  %v1353_v22 = vsub.f32 1.0, %v1225_v41  ;;  %4740 = vmatmul.mubr.f32.gmra.mrb[114].mxu0 %v3671_v21  ;;  %v4805_v41 = vld [vmem:[%s17003_s2 + $0x2f0] sm:$0xff]  ;;  %v4806_v51 = vld [vmem:[%s17003_s2 + $0x2f8] sm:$0xff] }
 0x215   : > { %v3673_v3 = vmul.f32 %v2777_v37, %v13370_v53  ;;  %v13730_v39 = vmax.f32 %v17822_v42, 0.0  ;;  %v2523_v30 = vand.u32 2147483647, %v2395_v26  ;;  %v3384_v45 = vsub.f32 1.0, %v13694_v58  ;;  %4744 = vmatprep.mubr.f32.mxu0 %v3674_v40  ;;  %v17826_v42 = vld [vmem:[#allocation138_spill] sm:$0xff]  ;;  %v17840_v53 = vld [vmem:[#allocation51_spill] sm:$0xff] }
 0x216   : > { %v13718_v4 = vmax.f32 %v1354_v63, 0.0  ;;  %v1227_v15 = vand.u32 2147483647, %v1099_v55  ;;  %v1228_v31 = vand.u32 2147483647, %v1100_v43  ;;  %v13747_v63 = vmax.f32 %v1353_v22, 0.0 }
 0x217   : > { %v2651_v43 = vsub.f32 1.0, %v2523_v30  ;;  %v13749_v33 = vmax.f32 %v3383_v46, 0.0  ;;  %v10418_v58 = vpack.c.bf16 %v4806_v51, %v4805_v41  ;;  %v3132_v26 = vsub.f32 %v11721_v12, %v2963_v47  ;;  %v2971_v41 = vpop.permute.xlu0 %2970 }
 0x218   : > { %17820 = vst [vmem:[#allocation196_spill] sm:$0xff] %v13718_v4  ;;  %v13733_v60 = vpop.permute.xlu1 %1732  ;;  %v3676_v1 = vmul.f32 %v2780_v17, %v13718_v4  ;;  %17824 = vst [vmem:[#allocation198_spill] sm:$0xff] %v13747_v63  ;;  %v1355_v21 = vsub.f32 1.0, %v1227_v15  ;;  %v1356_v55 = vsub.f32 1.0, %v1228_v31  ;;  %4745 = vmatmul.mubr.f32.gmra.mrb[116].mxu0 %v3673_v3  ;;  %v3259_v40 = vand.u32 2147483647, %v3131_v6 }
 0x219   : > { %17823 = vst [vmem:[#allocation197_spill] sm:$0xff] %v13733_v60  ;;  %v2398_v56 = vsub.f32 %v11721_v12, %v13733_v60  ;;  %v2397_v50 = vsub.f32 %v11719_v11, %v13733_v60  ;;  %v2779_v17 = vmax.f32 %v2651_v43, 0.0  ;;  %v2402_v22 = vsub.f32 %v11721_v12, %v17826_v42  ;;  %10419 = vmatpush1.bf16.msra.mxu0 %v10418_v58  ;;  %v17838_v4 = vld [vmem:[#allocation86_spill] sm:$0xff] }
 0x21a   : > { %4749 = vmatprep.mubr.f32.mxu0 %v3676_v1  ;;  %v13760_v3 = vmax.f32 %v1355_v21, 0.0  ;;  %v13762_v47 = vmax.f32 %v1356_v55, 0.0  ;;  %v13765_v43 = vmax.f32 %v3384_v45, 0.0  ;;  %v2401_v58 = vsub.f32 %v11719_v11, %v17826_v42 }
 0x21b   : > { %v2526_v37 = vand.u32 2147483647, %v2398_v56  ;;  %v2525_v7 = vand.u32 2147483647, %v2397_v50  ;;  %v3675_v6 = vmul.f32 %v2779_v17, %v13747_v63  ;;  %v2530_v30 = vand.u32 2147483647, %v2402_v22 }
 0x21c   : > { %v13752_v16 = vpop.permute.xlu1 %1736  ;;  %17827 = vst [vmem:[#allocation200_spill] sm:$0xff] %v13760_v3  ;;  %17828 = vst [vmem:[#allocation201_spill] sm:$0xff] %v13762_v47  ;;  %v3387_v23 = vsub.f32 1.0, %v3259_v40 }
 0x21d   : > { %17825 = vst [vmem:[#allocation199_spill] sm:$0xff] %v13752_v16  ;;  %v2654_v60 = vsub.f32 1.0, %v2526_v37  ;;  %v2653_v15 = vsub.f32 1.0, %v2525_v7  ;;  %v2400_v46 = vsub.f32 %v11721_v12, %v13752_v16  ;;  %v2399_v31 = vsub.f32 %v11719_v11, %v13752_v16  ;;  %4750 = vmatmul.mubr.f32.gmra.mrb[118].mxu0 %v3675_v6  ;;  %v17829_v6 = vld [vmem:[#allocation79_spill] sm:$0xff] }
 0x21e   : > { %v3260_v37 = vand.u32 2147483647, %v3132_v26  ;;  %v2658_v7 = vsub.f32 1.0, %v2530_v30  ;;  %v1748_v30 = vsub.f32 %v11717_v10, %v17829_v6 }
 0x21f   : > { %v2782_v51 = vmax.f32 %v2654_v60, 0.0  ;;  %v2781_v1 = vmax.f32 %v2653_v15, 0.0  ;;  %v2528_v56 = vand.u32 2147483647, %v2400_v46  ;;  %v2527_v50 = vand.u32 2147483647, %v2399_v31 }
 0x220   : > { %v3135_v60 = vsub.f32 %v11719_v11, %v2971_v41  ;;  %v2529_v31 = vand.u32 2147483647, %v2401_v58 }
 0x221   : > { %v972_v21 = vpop.permute.xlu1 %971  ;;  %v3678_v55 = vmul.f32 %v2782_v51, %v13762_v47  ;;  %v3677_v16 = vmul.f32 %v2781_v1, %v13760_v3  ;;  %v2656_v17 = vsub.f32 1.0, %v2528_v56  ;;  %v2655_v22 = vsub.f32 1.0, %v2527_v50 }
 0x222   : > { %v1103_v15 = vsub.f32 %v11715_v9, %v972_v21  ;;  %v1104_v45 = vsub.f32 %v11717_v10, %v972_v21  ;;  %v3136_v51 = vsub.f32 %v11721_v12, %v2971_v41  ;;  %v2786_v56 = vmax.f32 %v2658_v7, 0.0  ;;  %v17830_v21 = vld [vmem:[#allocation26_spill] sm:$0xff] }
 0x223   : > { %4754 = vmatprep.mubr.f32.mxu0 %v3678_v55  ;;  %v2784_v26 = vmax.f32 %v2656_v17, 0.0  ;;  %v2783_v46 = vmax.f32 %v2655_v22, 0.0  ;;  %v2657_v47 = vsub.f32 1.0, %v2529_v31  ;;  %v1750_v55 = vsub.f32 %v11717_v10, %v17830_v21 }
 0x224   : > { %v1231_v42 = vand.u32 2147483647, %v1103_v15  ;;  %v1232_v1 = vand.u32 2147483647, %v1104_v45  ;;  %4755 = vmatmul.mubr.f32.gmra.mrb[120].mxu0 %v3677_v16  ;;  %v3388_v41 = vsub.f32 1.0, %v3260_v37  ;;  %v13783_v15 = vmax.f32 %v3387_v23, 0.0  ;;  %v13785_v45 = vpop.permute.xlu0 %2978 }
 0x225   : > { %v977_v40 = vpop.permute.xlu1 %976  ;;  %v3680_v50 = vmul.f32 %v2784_v26, %v13381_v13  ;;  %v3679_v3 = vmul.f32 %v2783_v46, %v13375_v25  ;;  %v2785_v16 = vmax.f32 %v2657_v47, 0.0  ;;  %v1876_v7 = vand.u32 2147483647, %v1748_v30 }
 0x226   : > { %v1359_v17 = vsub.f32 1.0, %v1231_v42  ;;  %v1360_v58 = vsub.f32 1.0, %v1232_v1  ;;  %v1105_v22 = vsub.f32 %v11715_v9, %v977_v40  ;;  %v1106_v6 = vsub.f32 %v11717_v10, %v977_v40  ;;  %17831 = vst [vmem:[#allocation79_spill] sm:$0xff] %v13783_v15 }
 0x227   : > { %4759 = vmatprep.mubr.f32.mxu0 %v3680_v50  ;;  %v13791_v42 = vand.u32 2147483647, %v3135_v60  ;;  %v13793_v1 = vand.u32 2147483647, %v3136_v51  ;;  %v1878_v40 = vand.u32 2147483647, %v1750_v55 }
 0x228   : > { %v13787_v26 = vmax.f32 %v1359_v17, 0.0  ;;  %v13789_v46 = vmax.f32 %v1360_v58, 0.0  ;;  %v1233_v31 = vand.u32 2147483647, %v1105_v22  ;;  %v1234_v25 = vand.u32 2147483647, %v1106_v6  ;;  %4760 = vmatmul.mubr.f32.gmra.mrb[122].mxu0 %v3679_v3 }
 0x229   : > { %v2004_v50 = vsub.f32 1.0, %v1876_v7  ;;  %v13799_v17 = vmax.f32 %v3388_v41, 0.0  ;;  %v3139_v58 = vsub.f32 %v11719_v11, %v13785_v45  ;;  %v2006_v55 = vsub.f32 1.0, %v1878_v40  ;;  %v17835_v22 = vld [vmem:[#allocation82_spill] sm:$0xff] }
 0x22a   : > { %17832 = vst [vmem:[#allocation26_spill] sm:$0xff] %v13787_v26  ;;  %17833 = vst [vmem:[#allocation202_spill] sm:$0xff] %v13789_v46  ;;  %v1361_v37 = vsub.f32 1.0, %v1233_v31  ;;  %v13795_v23 = vpop.permute.xlu1 %1744  ;;  %v3682_v47 = vmul.f32 %v2786_v56, %v13789_v46  ;;  %v3681_v30 = vmul.f32 %v2785_v16, %v13787_v26  ;;  %v1362_v51 = vsub.f32 1.0, %v1234_v25 }
 0x22b   : > { %17834 = vst [vmem:[#allocation203_spill] sm:$0xff] %v13795_v23  ;;  %v2404_v3 = vsub.f32 %v11721_v12, %v13795_v23  ;;  %v2403_v60 = vsub.f32 %v11719_v11, %v13795_v23  ;;  %v1749_v56 = vsub.f32 %v11715_v9, %v17830_v21  ;;  %v1752_v6 = vsub.f32 %v11717_v10, %v17835_v22 }
 0x22c   : > { %4764 = vmatprep.mubr.f32.mxu0 %v3682_v47  ;;  %v13815_v23 = vmax.f32 %v1361_v37, 0.0  ;;  %v2132_v25 = vmax.f32 %v2004_v50, 0.0  ;;  %v1751_v63 = vsub.f32 %v11715_v9, %v17835_v22  ;;  %v13819_v41 = vmax.f32 %v1362_v51, 0.0 }
 0x22d   : > { %4765 = vmatmul.mubr.f32.gmra.mrb[124].mxu0 %v3681_v30  ;;  %v2532_v7 = vand.u32 2147483647, %v2404_v3  ;;  %v2531_v31 = vand.u32 2147483647, %v2403_v60  ;;  %v1877_v40 = vand.u32 2147483647, %v1749_v56  ;;  %v1754_v50 = vsub.f32 %v11717_v10, %v17838_v4 }
 0x22e   : > { %17836 = vst [vmem:[#allocation82_spill] sm:$0xff] %v13815_v23  ;;  %v1880_v13 = vand.u32 2147483647, %v1752_v6  ;;  %17837 = vst [vmem:[#allocation204_spill] sm:$0xff] %v13819_v41  ;;  %v2134_v3 = vmax.f32 %v2006_v55, 0.0 }
 0x22f   : > { %v2859_v47 = vpop.permute.xlu1 %2858  ;;  %v2660_v46 = vsub.f32 1.0, %v2532_v7  ;;  %v2659_v21 = vsub.f32 1.0, %v2531_v31  ;;  %v2005_v37 = vsub.f32 1.0, %v1877_v40  ;;  %v13825_v56 = vand.u32 2147483647, %v3139_v58  ;;  %v17839_v31 = vld [vmem:[#allocation147_spill] sm:$0xff] }
 0x230   : > { %v3079_v16 = vsub.f32 %v11719_v11, %v2859_v47  ;;  %v3080_v30 = vsub.f32 %v11721_v12, %v2859_v47  ;;  %v3813_v22 = vmul.f32 %v17840_v53, %v17839_v31  ;;  %v2008_v47 = vsub.f32 1.0, %v1880_v13  ;;  %v17841_v58 = vld [vmem:[#allocation52_spill] sm:$0xff] }
 0x231   : > { %v2788_v60 = vmax.f32 %v2660_v46, 0.0  ;;  %v2787_v26 = vmax.f32 %v2659_v21, 0.0  ;;  %v1879_v55 = vand.u32 2147483647, %v1751_v63  ;;  %v2133_v61 = vmax.f32 %v2005_v37, 0.0 }
 0x232   : > { %v3207_v7 = vand.u32 2147483647, %v3079_v16  ;;  %v3208_v6 = vand.u32 2147483647, %v3080_v30  ;;  %v3814_v16 = vmul.f32 %v17841_v58, %v2132_v25  ;;  %v17842_v30 = vld [vmem:[#allocation50_spill] sm:$0xff] }
 0x233   : > { %v2863_v51 = vpop.permute.xlu1 %2862  ;;  %v3684_v52 = vmul.f32 %v2788_v60, %v13819_v41  ;;  %v3683_v18 = vmul.f32 %v2787_v26, %v13815_v23  ;;  %v3816_v29 = vmul.f32 %v17842_v30, %v2134_v3  ;;  %v1882_v53 = vand.u32 2147483647, %v1754_v50  ;;  %v17847_v23 = vld [vmem:[#allocation55_spill] sm:$0xff] }
 0x234   : > { %v3335_v46 = vsub.f32 1.0, %v3207_v7  ;;  %v3336_v21 = vsub.f32 1.0, %v3208_v6  ;;  %v3081_v40 = vsub.f32 %v11719_v11, %v2863_v51  ;;  %v3082_v8 = vsub.f32 %v11721_v12, %v2863_v51  ;;  %v17843_v51 = vld [vmem:[#allocation31_spill] sm:$0xff] }
 0x235   : > { %4769 = vmatprep.mubr.f32.mxu0 %v3684_v52  ;;  %v2136_v7 = vmax.f32 %v2008_v47, 0.0  ;;  %v2007_v6 = vsub.f32 1.0, %v1879_v55  ;;  %v1753_v52 = vsub.f32 %v11715_v9, %v17838_v4  ;;  %v1756_v25 = vsub.f32 %v11717_v10, %v17843_v51 }
 0x236   : > { %v13835_v31 = vmax.f32 %v3335_v46, 0.0  ;;  %v13837_v60 = vmax.f32 %v3336_v21, 0.0  ;;  %v3209_v26 = vand.u32 2147483647, %v3081_v40  ;;  %v3210_v13 = vand.u32 2147483647, %v3082_v8  ;;  %4770 = vmatmul.mubr.f32.gmra.mrb[126].mxu0 %v3683_v18 }
 0x237   : > { %v2871_v63 = vpop.permute.xlu1 %2870  ;;  %4871 = vmatprep.mubr.f32.mxu0 %v3814_v16  ;;  %v17844_v21 = vld [vmem:[#allocation20_spill] sm:$0xff]  ;;  %v17845_v18 = vld [vmem:[#allocation5_spill] sm:$0xff]  ;;  %v2010_v47 = vsub.f32 1.0, %v1882_v53  ;;  %v1881_v55 = vand.u32 2147483647, %v1753_v52  ;;  %v3818_v41 = vmul.f32 %v17847_v23, %v2136_v7  ;;  %v17850_v7 = vsub.f32 %v11721_v12, %v13785_v45 }
 0x238   : > { %v3337_v3 = vsub.f32 1.0, %v3209_v26  ;;  %v3338_v37 = vsub.f32 1.0, %v3210_v13  ;;  %v3085_v50 = vsub.f32 %v11719_v11, %v2871_v63  ;;  %v3086_v46 = vsub.f32 %v11721_v12, %v2871_v63  ;;  %v17846_v13 = vld [vmem:[#allocation53_spill] sm:$0xff] }
 0x239   : > { %v3720_v8 = vmul.f32 %v13837_v60, %v17844_v21  ;;  %v3719_v40 = vmul.f32 %v13835_v31, %v17845_v18  ;;  %v3815_v63 = vmul.f32 %v17846_v13, %v2133_v61  ;;  %v1884_v21 = vand.u32 2147483647, %v1756_v25 }
 0x23a   : > { %v13849_v58 = vmax.f32 %v3337_v3, 0.0  ;;  %v13851_v4 = vmax.f32 %v3338_v37, 0.0  ;;  %v3213_v16 = vand.u32 2147483647, %v3085_v50  ;;  %v3214_v30 = vand.u32 2147483647, %v3086_v46  ;;  %4872 = vmatmul.mubr.f32.vlgmr.msra.gmra.mrb[0].mxu0 %v3813_v22  ;;  %v13858_v50 = vpop.permute.xlu0 %2986 }
 0x23b   : > { %4154 = vmatprep.mubr.f32.mxu1 %v3720_v8  ;;  %v2879_v26 = vpop.permute.xlu1 %2878  ;;  %4876 = vmatprep.mubr.f32.mxu0 %v3816_v29  ;;  %v1755_v18 = vsub.f32 %v11715_v9, %v17843_v51  ;;  %v2135_v3 = vmax.f32 %v2007_v6, 0.0  ;;  %v2009_v37 = vsub.f32 1.0, %v1881_v55  ;;  %v17848_v22 = vld [vmem:[#allocation8_spill] sm:$0xff]  ;;  %v2138_v8 = vmax.f32 %v2010_v47, 0.0  ;;  %v17853_v47 = vld [vmem:[#allocation23_spill] sm:$0xff] }
 0x23c   : > { %v3342_v53 = vsub.f32 1.0, %v3214_v30  ;;  %v3090_v52 = vsub.f32 %v11721_v12, %v2879_v26  ;;  %4155 = vmatmul.mubr.f32.gmra.mrb[2].mxu1 %v3719_v40  ;;  %v3722_v46 = vmul.f32 %v13851_v4, %v17848_v22  ;;  %v17849_v29 = vld [vmem:[#allocation24_spill] sm:$0xff]  ;;  %v2012_v23 = vsub.f32 1.0, %v1884_v21 }
 0x23d   : > { %v3721_v61 = vmul.f32 %v13849_v58, %v17849_v29  ;;  %v13867_v51 = vand.u32 2147483647, %v17850_v7  ;;  %v3341_v25 = vsub.f32 1.0, %v3213_v16  ;;  %v3089_v40 = vsub.f32 %v11719_v11, %v2879_v26 }
 0x23e   : > { %v3218_v6 = vand.u32 2147483647, %v3090_v52  ;;  %4877 = vmatmul.mubr.f32.gmra.mrb[2].mxu0 %v3815_v63  ;;  %v17851_v55 = vsub.f32 1.0, %v13791_v42  ;;  %v13874_v13 = vmax.f32 %v3342_v53, 0.0  ;;  %4159 = vmatprep.mubr.f32.mxu1 %v3722_v46  ;;  %v3724_v21 = vmul.f32 %v13387_v35, %v17853_v47  ;;  %v17856_v42 = vld [vmem:[#allocation56_spill] sm:$0xff]  ;;  %v17857_v53 = vld [vmem:[#allocation11_spill] sm:$0xff] }
 0x23f   : > { %v2887_v22 = vpop.permute.xlu1 %2886  ;;  %4881 = vmatprep.mubr.f32.mxu0 %v3818_v41  ;;  %v1883_v45 = vand.u32 2147483647, %v1755_v18  ;;  %v17854_v29 = vsub.f32 1.0, %v13793_v1  ;;  %v3143_v26 = vsub.f32 %v11719_v11, %v13858_v50  ;;  %v3817_v63 = vmul.f32 %v17856_v42, %v2135_v3  ;;  %v17858_v46 = vld [vmem:[#allocation166_spill] sm:$0xff] }
 0x240   : > { %v13872_v30 = vmax.f32 %v17851_v55, 0.0  ;;  %4160 = vmatmul.mubr.f32.gmra.mrb[4].mxu1 %v3721_v61  ;;  %v2137_v52 = vmax.f32 %v2009_v37, 0.0  ;;  %v3723_v7 = vmul.f32 %v17858_v46, %v17857_v53  ;;  %v17859_v41 = vld [vmem:[#allocation58_spill] sm:$0xff]  ;;  %v2140_v20 = vmax.f32 %v2012_v23, 0.0  ;;  %v17860_v61 = vld [vmem:[#allocation84_spill] sm:$0xff] }
 0x241   : > { %v13880_v16 = vmax.f32 %v17854_v29, 0.0  ;;  %4164 = vmatprep.mubr.f32.mxu1 %v3724_v21  ;;  %v3820_v55 = vmul.f32 %v17859_v41, %v2138_v8  ;;  %v2011_v47 = vsub.f32 1.0, %v1883_v45  ;;  %v13888_v18 = vmax.f32 %v3341_v25, 0.0  ;;  %v17861_v37 = vld [vmem:[#allocation36_spill] sm:$0xff]  ;;  %v17862_v8 = vld [vmem:[#allocation35_spill] sm:$0xff] }
 0x242   : > { %17852 = vst [vmem:[#allocation86_spill] sm:$0xff] %v13872_v30  ;;  %v3217_v1 = vand.u32 2147483647, %v3089_v40  ;;  %v3346_v29 = vsub.f32 1.0, %v3218_v6  ;;  %v3094_v0 = vsub.f32 %v11721_v12, %v2887_v22  ;;  %4882 = vmatmul.mubr.f32.gmra.mrb[4].mxu0 %v3817_v63  ;;  %v3726_v3 = vmul.f32 %v13874_v13, %v17860_v61  ;;  %v17863_v6 = vld [vmem:[#allocation57_spill] sm:$0xff]  ;;  %v17864_v41 = vld [vmem:[#allocation60_spill] sm:$0xff] }
 0x243   : > { %17855 = vst [vmem:[#allocation147_spill] sm:$0xff] %v13880_v16  ;;  %4886 = vmatprep.mubr.f32.mxu0 %v3820_v55  ;;  %v1758_v21 = vsub.f32 %v11717_v10, %v17861_v37  ;;  %v1757_v42 = vsub.f32 %v11715_v9, %v17861_v37  ;;  %v1760_v23 = vsub.f32 %v11717_v10, %v17862_v8  ;;  %v3395_v25 = vsub.f32 1.0, %v13825_v56  ;;  %v17866_v56 = vld [vmem:[#allocation33_spill] sm:$0xff]  ;;  %v17884_v16 = vld [vmem:[#allocation106_spill] sm:$0xff] }
 0x244   : > { %v3396_v40 = vsub.f32 1.0, %v13867_v51  ;;  %4165 = vmatmul.mubr.f32.gmra.mrb[6].mxu1 %v3723_v7  ;;  %v3819_v45 = vmul.f32 %v17863_v6, %v2137_v52  ;;  %v2139_v63 = vmax.f32 %v2011_v47, 0.0  ;;  %v3093_v53 = vsub.f32 %v11719_v11, %v2887_v22  ;;  %v2895_v52 = vpop.permute.xlu1 %2894 }
 0x245   : > { %4169 = vmatprep.mubr.f32.mxu1 %v3726_v3  ;;  %v3822_v55 = vmul.f32 %v17864_v41, %v2140_v20  ;;  %v1886_v61 = vand.u32 2147483647, %v1758_v21  ;;  %v1885_v59 = vand.u32 2147483647, %v1757_v42  ;;  %v3345_v5 = vsub.f32 1.0, %v3217_v1  ;;  %v17869_v1 = vld [vmem:[#allocation59_spill] sm:$0xff] }
 0x246   : > { %v3222_v37 = vand.u32 2147483647, %v3094_v0  ;;  %4887 = vmatmul.mubr.f32.gmra.mrb[6].mxu0 %v3819_v45  ;;  %v3725_v62 = vmul.f32 %v13888_v18, %v17865_v27  ;;  %v3728_v51 = vmul.f32 %v17867_v44, %v17866_v56  ;;  %v13908_v7 = vmax.f32 %v3346_v29, 0.0  ;;  %v2995_v27 = vpop.permute.xlu0 %2994 }
 0x247   : > { %4891 = vmatprep.mubr.f32.mxu0 %v3822_v55  ;;  %v2014_v47 = vsub.f32 1.0, %v1886_v61  ;;  %v2013_v22 = vsub.f32 1.0, %v1885_v59  ;;  %v1888_v3 = vand.u32 2147483647, %v1760_v23  ;;  %v13910_v6 = vmax.f32 %v3395_v25, 0.0  ;;  %v17870_v23 = vld [vmem:[#allocation87_spill] sm:$0xff] }
 0x248   : > { %v3144_v20 = vsub.f32 %v11721_v12, %v13858_v50  ;;  %v3271_v0 = vand.u32 2147483647, %v3143_v26  ;;  %4170 = vmatmul.mubr.f32.gmra.mrb[8].mxu1 %v3725_v62  ;;  %v3821_v21 = vmul.f32 %v17869_v1, %v2139_v63  ;;  %v3221_v42 = vand.u32 2147483647, %v3093_v53  ;;  %v17871_v25 = vld [vmem:[#allocation32_spill] sm:$0xff]  ;;  %v17872_v50 = vld [vmem:[#allocation62_spill] sm:$0xff] }
 0x249   : > { %17868 = vst [vmem:[#allocation51_spill] sm:$0xff] %v13910_v6  ;;  %4174 = vmatprep.mubr.f32.mxu1 %v3728_v51  ;;  %v2142_v45 = vmax.f32 %v2014_v47, 0.0  ;;  %v2141_v29 = vmax.f32 %v2013_v22, 0.0  ;;  %v2016_v41 = vsub.f32 1.0, %v1888_v3  ;;  %v13915_v56 = vmax.f32 %v3345_v5, 0.0  ;;  %v17873_v62 = vld [vmem:[#allocation81_spill] sm:$0xff] }
 0x24a   : > { %v3350_v55 = vsub.f32 1.0, %v3222_v37  ;;  %v3098_v59 = vsub.f32 %v11721_v12, %v2895_v52  ;;  %4892 = vmatmul.mubr.f32.gmra.mrb[8].mxu0 %v3821_v21  ;;  %v3727_v61 = vmul.f32 %v17871_v25, %v17870_v23  ;;  %v3730_v63 = vmul.f32 %v13908_v7, %v17873_v62  ;;  %v17875_v47 = vld [vmem:[#allocation61_spill] sm:$0xff]  ;;  %v17876_v21 = vld [vmem:[#allocation64_spill] sm:$0xff] }
 0x24b   : > { %v3824_v26 = vmul.f32 %v17872_v50, %v2142_v45  ;;  %v2144_v1 = vmax.f32 %v2016_v41, 0.0  ;;  %v1759_v53 = vsub.f32 %v11715_v9, %v17862_v8  ;;  %v13925_v51 = vmax.f32 %v3396_v40, 0.0  ;;  %v17877_v50 = vld [vmem:[#allocation47_spill] sm:$0xff] }
 0x24c   : > { %v3272_v5 = vand.u32 2147483647, %v3144_v20  ;;  %v3147_v37 = vsub.f32 %v11719_v11, %v2995_v27  ;;  %4175 = vmatmul.mubr.f32.gmra.mrb[10].mxu1 %v3727_v61  ;;  %v3823_v22 = vmul.f32 %v17875_v47, %v2141_v29  ;;  %v3349_v3 = vsub.f32 1.0, %v3221_v42  ;;  %v17878_v20 = vld [vmem:[#allocation101_spill] sm:$0xff]  ;;  %v17879_v29 = vld [vmem:[#allocation38_spill] sm:$0xff] }
 0x24d   : > { %17874 = vst [vmem:[#allocation52_spill] sm:$0xff] %v13925_v51  ;;  %4896 = vmatprep.mubr.f32.mxu0 %v3824_v26  ;;  %4179 = vmatprep.mubr.f32.mxu1 %v3730_v63  ;;  %v3826_v45 = vmul.f32 %v17876_v21, %v2144_v1  ;;  %v1887_v23 = vand.u32 2147483647, %v1759_v53  ;;  %v1762_v41 = vsub.f32 %v11717_v10, %v17877_v50  ;;  %v13932_v62 = vmax.f32 %v3350_v55, 0.0  ;;  %v17880_v42 = vld [vmem:[#allocation170_spill] sm:$0xff] }
 0x24e   : > { %v3097_v8 = vsub.f32 %v11719_v11, %v2895_v52  ;;  %v3226_v40 = vand.u32 2147483647, %v3098_v59  ;;  %4897 = vmatmul.mubr.f32.gmra.mrb[10].mxu0 %v3823_v22  ;;  %v3729_v61 = vmul.f32 %v13915_v56, %v17878_v20  ;;  %v3732_v26 = vmul.f32 %v17880_v42, %v17879_v29  ;;  %v2903_v59 = vpop.permute.xlu1 %2902 }
 0x24f   : > { %4901 = vmatprep.mubr.f32.mxu0 %v3826_v45  ;;  %v2015_v63 = vsub.f32 1.0, %v1887_v23  ;;  %v1890_v47 = vand.u32 2147483647, %v1762_v41  ;;  %v1761_v1 = vsub.f32 %v11715_v9, %v17877_v50  ;;  %v3399_v53 = vsub.f32 1.0, %v3271_v0  ;;  %v17882_v23 = vld [vmem:[#allocation103_spill] sm:$0xff]  ;;  %v17883_v41 = vld [vmem:[#allocation168_spill] sm:$0xff] }
 0x250   : > { %v3400_v21 = vsub.f32 1.0, %v3272_v5  ;;  %v3148_v55 = vsub.f32 %v11721_v12, %v2995_v27  ;;  %v3275_v6 = vand.u32 2147483647, %v3147_v37  ;;  %4180 = vmatmul.mubr.f32.gmra.mrb[12].mxu1 %v3729_v61  ;;  %v13942_v52 = vmax.f32 %v3349_v3, 0.0  ;;  %v3003_v5 = vpop.permute.xlu0 %3002  ;;  %v17885_v50 = vld [vmem:[#allocation63_spill] sm:$0xff]  ;;  %v17886_v3 = vld [vmem:[#allocation37_spill] sm:$0xff] }
 0x251   : > { %4184 = vmatprep.mubr.f32.mxu1 %v3732_v26  ;;  %v2143_v22 = vmax.f32 %v2015_v63, 0.0  ;;  %v2018_v45 = vsub.f32 1.0, %v1890_v47  ;;  %v1889_v20 = vand.u32 2147483647, %v1761_v1  ;;  %v3225_v51 = vand.u32 2147483647, %v3097_v8 }
 0x252   : > { %17881 = vst [vmem:[#allocation50_spill] sm:$0xff] %v13942_v52  ;;  %v3354_v29 = vsub.f32 1.0, %v3226_v40  ;;  %v3731_v30 = vmul.f32 %v17883_v41, %v17882_v23  ;;  %v3734_v0 = vmul.f32 %v13932_v62, %v17884_v16  ;;  %v1764_v15 = vsub.f32 %v11717_v10, %v17886_v3  ;;  %v17889_v1 = vld [vmem:[#allocation66_spill] sm:$0xff] }
 0x253   : > { %v3825_v27 = vmul.f32 %v17885_v50, %v2143_v22  ;;  %v2146_v37 = vmax.f32 %v2018_v45, 0.0  ;;  %v2017_v61 = vsub.f32 1.0, %v1889_v20  ;;  %v13951_v26 = vmax.f32 %v3399_v53, 0.0  ;;  %v17891_v53 = vld [vmem:[#allocation104_spill] sm:$0xff] }
 0x254   : > { %v3276_v63 = vand.u32 2147483647, %v3148_v55  ;;  %v3403_v47 = vsub.f32 1.0, %v3275_v6  ;;  %v3102_v8 = vsub.f32 %v11721_v12, %v2903_v59  ;;  %4185 = vmatmul.mubr.f32.gmra.mrb[14].mxu1 %v3731_v30  ;;  %v13954_v40 = vmax.f32 %v3400_v21, 0.0  ;;  %v3011_v6 = vpop.permute.xlu0 %3010 }
 0x255   : > { %17887 = vst [vmem:[#allocation31_spill] sm:$0xff] %v13951_v26  ;;  %4902 = vmatmul.mubr.f32.gmra.mrb[12].mxu0 %v3825_v27  ;;  %v3828_v16 = vmul.f32 %v17889_v1, %v2146_v37  ;;  %4189 = vmatprep.mubr.f32.mxu1 %v3734_v0  ;;  %v2145_v23 = vmax.f32 %v2017_v61, 0.0  ;;  %v1892_v22 = vand.u32 2147483647, %v1764_v15  ;;  %v3151_v45 = vsub.f32 %v11719_v11, %v3003_v5  ;;  %v17892_v26 = vld [vmem:[#allocation65_spill] sm:$0xff] }
 0x256   : > { %17888 = vst [vmem:[#allocation20_spill] sm:$0xff] %v13954_v40  ;;  %v3353_v20 = vsub.f32 1.0, %v3225_v51  ;;  %v13958_v50 = vmax.f32 %v3354_v29, 0.0  ;;  %v3733_v55 = vmul.f32 %v13942_v52, %v17891_v53  ;;  %v17893_v40 = vld [vmem:[#allocation29_spill] sm:$0xff]  ;;  %v1763_v0 = vsub.f32 %v11715_v9, %v17886_v3  ;;  %v17897_v3 = vld [vmem:[#allocation34_spill] sm:$0xff] }
 0x257   : > { %4906 = vmatprep.mubr.f32.mxu0 %v3828_v16  ;;  %v3827_v30 = vmul.f32 %v17892_v26, %v2145_v23  ;;  %v2020_v21 = vsub.f32 1.0, %v1892_v22  ;;  %v3736_v27 = vmul.f32 %v13476_v19, %v17893_v40  ;;  %v3404_v15 = vsub.f32 1.0, %v3276_v63  ;;  %v17895_v16 = vld [vmem:[#allocation49_spill] sm:$0xff]  ;;  %v17898_v63 = vld [vmem:[#allocation18_spill] sm:$0xff] }
 0x258   : > { %17890 = vst [vmem:[#allocation5_spill] sm:$0xff] %v13958_v50  ;;  %v13967_v37 = vmax.f32 %v3403_v47, 0.0  ;;  %v3101_v51 = vsub.f32 %v11719_v11, %v2903_v59  ;;  %v3230_v29 = vand.u32 2147483647, %v3102_v8  ;;  %4190 = vmatmul.mubr.f32.gmra.mrb[16].mxu1 %v3733_v55  ;;  %v3152_v61 = vsub.f32 %v11721_v12, %v3003_v5  ;;  %v17899_v53 = vld [vmem:[#allocation109_spill] sm:$0xff]  ;;  %v3019_v8 = vpop.permute.xlu0 %3018  ;;  %v17900_v55 = vld [vmem:[#allocation68_spill] sm:$0xff] }
 0x259   : > { %4907 = vmatmul.mubr.f32.gmra.mrb[14].mxu0 %v3827_v30  ;;  %v2148_v1 = vmax.f32 %v2020_v21, 0.0  ;;  %4194 = vmatprep.mubr.f32.mxu1 %v3736_v27  ;;  %v1891_v26 = vand.u32 2147483647, %v1763_v0  ;;  %v1766_v23 = vsub.f32 %v11717_v10, %v17895_v16  ;;  %v3279_v40 = vand.u32 2147483647, %v3151_v45 }
 0x25a   : > { %17894 = vst [vmem:[#allocation53_spill] sm:$0xff] %v13967_v37  ;;  %v13973_v22 = vmax.f32 %v3353_v20, 0.0  ;;  %v3735_v47 = vmul.f32 %v17898_v63, %v17897_v3  ;;  %v3738_v59 = vmul.f32 %v13958_v50, %v17899_v53  ;;  %v1765_v21 = vsub.f32 %v11715_v9, %v17895_v16  ;;  %v2911_v3 = vpop.permute.xlu1 %2910  ;;  %v17902_v16 = vld [vmem:[#allocation39_spill] sm:$0xff] }
 0x25b   : > { %v3830_v37 = vmul.f32 %v17900_v55, %v2148_v1  ;;  %v2019_v5 = vsub.f32 1.0, %v1891_v26  ;;  %v1894_v30 = vand.u32 2147483647, %v1766_v23  ;;  %v13982_v27 = vmax.f32 %v3404_v15, 0.0  ;;  %v17903_v55 = vld [vmem:[#allocation67_spill] sm:$0xff] }
 0x25c   : > { %17896 = vst [vmem:[#allocation55_spill] sm:$0xff] %v13973_v22  ;;  %v3155_v45 = vsub.f32 %v11719_v11, %v3011_v6  ;;  %v3229_v20 = vand.u32 2147483647, %v3101_v51  ;;  %v3358_v0 = vsub.f32 1.0, %v3230_v29  ;;  %4195 = vmatmul.mubr.f32.gmra.mrb[18].mxu1 %v3735_v47  ;;  %v3280_v19 = vand.u32 2147483647, %v3152_v61 }
 0x25d   : > { %17901 = vst [vmem:[#allocation8_spill] sm:$0xff] %v13982_v27  ;;  %4911 = vmatprep.mubr.f32.mxu0 %v3830_v37  ;;  %v2147_v63 = vmax.f32 %v2019_v5, 0.0  ;;  %v2022_v53 = vsub.f32 1.0, %v1894_v30  ;;  %4199 = vmatprep.mubr.f32.mxu1 %v3738_v59  ;;  %v1893_v50 = vand.u32 2147483647, %v1765_v21  ;;  %v3407_v1 = vsub.f32 1.0, %v3279_v40 }
 0x25e   : > { %v3156_v26 = vsub.f32 %v11721_v12, %v3011_v6  ;;  %v3159_v23 = vsub.f32 %v11719_v11, %v3019_v8  ;;  %v3737_v15 = vmul.f32 %v13973_v22, %v17902_v16  ;;  %v17904_v47 = vld [vmem:[#allocation46_spill] sm:$0xff]  ;;  %v3283_v37 = vand.u32 2147483647, %v3155_v45  ;;  %v17906_v16 = vld [vmem:[#allocation112_spill] sm:$0xff]  ;;  %v17907_v45 = vld [vmem:[#allocation69_spill] sm:$0xff] }
 0x25f   : > { %v3829_v27 = vmul.f32 %v17903_v55, %v2147_v63  ;;  %v2150_v51 = vmax.f32 %v2022_v53, 0.0  ;;  %v2021_v29 = vsub.f32 1.0, %v1893_v50  ;;  %v1768_v61 = vsub.f32 %v11717_v10, %v17904_v47  ;;  %v17905_v6 = vld [vmem:[#allocation70_spill] sm:$0xff] }
 0x260   : > { %v3357_v5 = vsub.f32 1.0, %v3229_v20  ;;  %v13992_v30 = vmax.f32 %v3358_v0, 0.0  ;;  %v3106_v40 = vsub.f32 %v11721_v12, %v2911_v3  ;;  %4200 = vmatmul.mubr.f32.gmra.mrb[20].mxu1 %v3737_v15  ;;  %v3740_v63 = vmul.f32 %v13492_v32, %v17906_v16  ;;  %v17908_v15 = vld [vmem:[#allocation114_spill] sm:$0xff] }
 0x261   : > { %4912 = vmatmul.mubr.f32.gmra.mrb[16].mxu0 %v3829_v27  ;;  %v3832_v59 = vmul.f32 %v17905_v6, %v2150_v51  ;;  %v2149_v21 = vmax.f32 %v2021_v29, 0.0  ;;  %v1896_v52 = vand.u32 2147483647, %v1768_v61  ;;  %v3408_v53 = vsub.f32 1.0, %v3280_v19  ;;  %v17909_v6 = vld [vmem:[#allocation91_spill] sm:$0xff] }
 0x262   : > { %v3284_v50 = vand.u32 2147483647, %v3156_v26  ;;  %v3160_v55 = vsub.f32 %v11721_v12, %v3019_v8  ;;  %v3287_v22 = vand.u32 2147483647, %v3159_v23  ;;  %4204 = vmatprep.mubr.f32.mxu1 %v3740_v63  ;;  %v1767_v27 = vsub.f32 %v11715_v9, %v17904_v47 }
 0x263   : > { %4916 = vmatprep.mubr.f32.mxu0 %v3832_v59  ;;  %v3831_v20 = vmul.f32 %v17907_v45, %v2149_v21  ;;  %v2024_v0 = vsub.f32 1.0, %v1896_v52  ;;  %v3739_v51 = vmul.f32 %v13481_v14, %v17908_v15  ;;  %v3411_v29 = vsub.f32 1.0, %v3283_v37  ;;  %v17910_v59 = vld [vmem:[#allocation111_spill] sm:$0xff]  ;;  %v17912_v45 = vld [vmem:[#allocation72_spill] sm:$0xff] }
 0x264   : > { %v14004_v61 = vmax.f32 %v3357_v5, 0.0  ;;  %v3105_v19 = vsub.f32 %v11719_v11, %v2911_v3  ;;  %v3234_v26 = vand.u32 2147483647, %v3106_v40  ;;  %v1895_v23 = vand.u32 2147483647, %v1767_v27  ;;  %v2919_v5 = vpop.permute.xlu1 %2918 }
 0x265   : > { %4917 = vmatmul.mubr.f32.gmra.mrb[18].mxu0 %v3831_v20  ;;  %v2152_v8 = vmax.f32 %v2024_v0, 0.0  ;;  %4205 = vmatmul.mubr.f32.gmra.mrb[22].mxu1 %v3739_v51  ;;  %v1770_v52 = vsub.f32 %v11717_v10, %v17909_v6  ;;  %v3742_v21 = vmul.f32 %v13992_v30, %v17910_v59  ;;  %v14011_v47 = vmax.f32 %v3407_v1, 0.0  ;;  %v3027_v1 = vpop.permute.xlu0 %3026 }
 0x266   : > { %v3412_v16 = vsub.f32 1.0, %v3284_v50  ;;  %v3288_v63 = vand.u32 2147483647, %v3160_v55  ;;  %v3415_v37 = vsub.f32 1.0, %v3287_v22  ;;  %v2023_v3 = vsub.f32 1.0, %v1895_v23 }
 0x267   : > { %17911 = vst [vmem:[#allocation24_spill] sm:$0xff] %v14011_v47  ;;  %v3834_v15 = vmul.f32 %v17912_v45, %v2152_v8  ;;  %v1898_v40 = vand.u32 2147483647, %v1770_v52  ;;  %4209 = vmatprep.mubr.f32.mxu1 %v3742_v21  ;;  %v1769_v20 = vsub.f32 %v11715_v9, %v17909_v6  ;;  %v14016_v0 = vmax.f32 %v3408_v53, 0.0  ;;  %v17915_v47 = vld [vmem:[#allocation110_spill] sm:$0xff]  ;;  %v17918_v6 = vld [vmem:[#allocation21_spill] sm:$0xff] }
 0x268   : > { %v14018_v27 = vmax.f32 %v3411_v29, 0.0  ;;  %v3233_v51 = vand.u32 2147483647, %v3105_v19  ;;  %v3362_v59 = vsub.f32 1.0, %v3234_v26  ;;  %v2151_v50 = vmax.f32 %v2023_v3, 0.0  ;;  %v17919_v26 = vld [vmem:[#allocation42_spill] sm:$0xff] }
 0x269   : > { %17913 = vst [vmem:[#allocation23_spill] sm:$0xff] %v14016_v0  ;;  %4921 = vmatprep.mubr.f32.mxu0 %v3834_v15  ;;  %v2026_v55 = vsub.f32 1.0, %v1898_v40  ;;  %v1897_v22 = vand.u32 2147483647, %v1769_v20  ;;  %v3741_v8 = vmul.f32 %v14004_v61, %v17915_v47  ;;  %v14022_v23 = vmax.f32 %v3412_v16, 0.0  ;;  %v17921_v47 = vld [vmem:[#allocation44_spill] sm:$0xff] }
 0x26a   : > { %17914 = vst [vmem:[#allocation56_spill] sm:$0xff] %v14018_v27  ;;  %v3416_v52 = vsub.f32 1.0, %v3288_v63  ;;  %v14024_v21 = vmax.f32 %v3415_v37, 0.0  ;;  %v3110_v53 = vsub.f32 %v11721_v12, %v2919_v5  ;;  %v3833_v29 = vmul.f32 %v17918_v6, %v2151_v50  ;;  %v17922_v20 = vld [vmem:[#allocation75_spill] sm:$0xff] }
 0x26b   : > { %17916 = vst [vmem:[#allocation11_spill] sm:$0xff] %v14022_v23  ;;  %v2154_v45 = vmax.f32 %v2026_v55, 0.0  ;;  %v2025_v19 = vsub.f32 1.0, %v1897_v22  ;;  %4210 = vmatmul.mubr.f32.gmra.mrb[24].mxu1 %v3741_v8  ;;  %v1772_v15 = vsub.f32 %v11717_v10, %v17919_v26  ;;  %v3163_v3 = vsub.f32 %v11719_v11, %v3027_v1 }
 0x26c   : > { %17917 = vst [vmem:[#allocation166_spill] sm:$0xff] %v14024_v21  ;;  %v14031_v40 = vmax.f32 %v3362_v59, 0.0  ;;  %v3744_v16 = vmul.f32 %v13502_v2, %v17921_v47  ;;  %v1771_v63 = vsub.f32 %v11715_v9, %v17919_v26  ;;  %v3361_v37 = vsub.f32 1.0, %v3233_v51  ;;  %4922 = vmatmul.mubr.f32.gmra.mrb[20].mxu0 %v3833_v29  ;;  %v3035_v21 = vpop.permute.xlu0 %3034  ;;  %v17924_v47 = vld [vmem:[#allocation74_spill] sm:$0xff]  ;;  %v17925_v51 = vld [vmem:[#allocation116_spill] sm:$0xff] }
 0x26d   : > { %v3836_v50 = vmul.f32 %v17922_v20, %v2154_v45  ;;  %v2153_v55 = vmax.f32 %v2025_v19, 0.0  ;;  %v1900_v22 = vand.u32 2147483647, %v1772_v15  ;;  %v14038_v8 = vmax.f32 %v3416_v52, 0.0  ;;  %v17926_v15 = vld [vmem:[#allocation92_spill] sm:$0xff]  ;;  %v17927_v20 = vld [vmem:[#allocation118_spill] sm:$0xff] }
 0x26e   : > { %17920 = vst [vmem:[#allocation58_spill] sm:$0xff] %v14031_v40  ;;  %v3164_v6 = vsub.f32 %v11721_v12, %v3027_v1  ;;  %v3238_v27 = vand.u32 2147483647, %v3110_v53  ;;  %4214 = vmatprep.mubr.f32.mxu1 %v3744_v16  ;;  %v1899_v59 = vand.u32 2147483647, %v1771_v63  ;;  %v3109_v23 = vsub.f32 %v11719_v11, %v2919_v5  ;;  %v2927_v5 = vpop.permute.xlu1 %2926 }
 0x26f   : > { %17923 = vst [vmem:[#allocation84_spill] sm:$0xff] %v14038_v8  ;;  %4926 = vmatprep.mubr.f32.mxu0 %v3836_v50  ;;  %v3835_v0 = vmul.f32 %v17924_v47, %v2153_v55  ;;  %v2028_v26 = vsub.f32 1.0, %v1900_v22  ;;  %v3743_v29 = vmul.f32 %v13498_v49, %v17925_v51  ;;  %v3291_v45 = vand.u32 2147483647, %v3163_v3 }
 0x270   : > { %v2027_v19 = vsub.f32 1.0, %v1899_v59  ;;  %v1774_v52 = vsub.f32 %v11717_v10, %v17926_v15  ;;  %v3746_v1 = vmul.f32 %v14031_v40, %v17927_v20  ;;  %v3167_v53 = vsub.f32 %v11719_v11, %v3035_v21  ;;  %v17928_v20 = vld [vmem:[#allocation77_spill] sm:$0xff] }
 0x271   : > { %v14050_v16 = vmax.f32 %v3361_v37, 0.0  ;;  %4927 = vmatmul.mubr.f32.gmra.mrb[22].mxu0 %v3835_v0  ;;  %v2156_v63 = vmax.f32 %v2028_v26, 0.0  ;;  %4215 = vmatmul.mubr.f32.gmra.mrb[26].mxu1 %v3743_v29  ;;  %v1773_v50 = vsub.f32 %v11715_v9, %v17926_v15  ;;  %v3292_v55 = vand.u32 2147483647, %v3164_v6  ;;  %v17929_v0 = vld [vmem:[#allocation76_spill] sm:$0xff] }
 0x272   : > { %v3366_v3 = vsub.f32 1.0, %v3238_v27  ;;  %v2155_v22 = vmax.f32 %v2027_v19, 0.0  ;;  %v1902_v59 = vand.u32 2147483647, %v1774_v52  ;;  %4219 = vmatprep.mubr.f32.mxu1 %v3746_v1  ;;  %v3168_v47 = vsub.f32 %v11721_v12, %v3035_v21  ;;  %v17930_v6 = vld [vmem:[#allocation120_spill] sm:$0xff]  ;;  %v17931_v19 = vld [vmem:[#allocation90_spill] sm:$0xff] }
 0x273   : > { %v3237_v51 = vand.u32 2147483647, %v3109_v23  ;;  %v3838_v8 = vmul.f32 %v17928_v20, %v2156_v63  ;;  %v1901_v40 = vand.u32 2147483647, %v1773_v50  ;;  %v3419_v37 = vsub.f32 1.0, %v3291_v45  ;;  %v17932_v1 = vld [vmem:[#allocation119_spill] sm:$0xff]  ;;  %v14068_v20 = vpop.permute.xlu1 %2934 }
 0x274   : > { %v3114_v49 = vsub.f32 %v11721_v12, %v2927_v5  ;;  %v3837_v26 = vmul.f32 %v17929_v0, %v2155_v22  ;;  %v2030_v29 = vsub.f32 1.0, %v1902_v59  ;;  %v3295_v2 = vand.u32 2147483647, %v3167_v53  ;;  %v17933_v0 = vld [vmem:[#allocation80_spill] sm:$0xff] }
 0x275   : > { %4931 = vmatprep.mubr.f32.mxu0 %v3838_v8  ;;  %v2029_v15 = vsub.f32 1.0, %v1901_v40  ;;  %v3745_v27 = vmul.f32 %v14050_v16, %v17930_v6  ;;  %v1776_v52 = vsub.f32 %v11717_v10, %v17931_v19  ;;  %v14062_v21 = vmax.f32 %v3366_v3, 0.0 }
 0x276   : > { %4932 = vmatmul.mubr.f32.gmra.mrb[24].mxu0 %v3837_v26  ;;  %v2158_v23 = vmax.f32 %v2030_v29, 0.0  ;;  %v3748_v45 = vmul.f32 %v13507_v48, %v17932_v1  ;;  %v1775_v63 = vsub.f32 %v11715_v9, %v17931_v19  ;;  %v3296_v50 = vand.u32 2147483647, %v3168_v47  ;;  %v17935_v1 = vld [vmem:[#allocation30_spill] sm:$0xff]  ;;  %v17936_v47 = vld [vmem:[#allocation121_spill] sm:$0xff] }
 0x277   : > { %v3365_v53 = vsub.f32 1.0, %v3237_v51  ;;  %v2157_v8 = vmax.f32 %v2029_v15, 0.0  ;;  %4220 = vmatmul.mubr.f32.gmra.mrb[28].mxu1 %v3745_v27  ;;  %v1904_v40 = vand.u32 2147483647, %v1776_v52  ;;  %v3420_v22 = vsub.f32 1.0, %v3292_v55  ;;  %v14071_v29 = vpop.f32.mrb[0].mxu1 }
 0x278   : > { %v3242_v59 = vand.u32 2147483647, %v3114_v49  ;;  %v3840_v3 = vmul.f32 %v17933_v0, %v2158_v23  ;;  %4224 = vmatprep.mubr.f32.mxu1 %v3748_v45  ;;  %v1903_v26 = vand.u32 2147483647, %v1775_v63  ;;  %17934 = vst [vmem:[#allocation36_spill] sm:$0xff] %v14071_v29  ;;  %v3113_v6 = vsub.f32 %v11719_v11, %v2927_v5  ;;  %v4153_v15 = vpop.f32.mrb[1].mxu1 }
 0x279   : > { %v3839_v48 = vmul.f32 %v17935_v1, %v2157_v8  ;;  %v2032_v19 = vsub.f32 1.0, %v1904_v40  ;;  %v3747_v51 = vmul.f32 %v13504_v57, %v17936_v47  ;;  %v3423_v27 = vsub.f32 1.0, %v3295_v2  ;;  %v17937_v55 = vld [vmem:[#allocation93_spill] sm:$0xff]  ;;  %v17938_v23 = vld [vmem:[#allocation124_spill] sm:$0xff]  ;;  %v17942_v15 = vld [vmem:[#allocation83_spill] sm:$0xff] }
 0x27a   : > { %4936 = vmatprep.mubr.f32.mxu0 %v3840_v3  ;;  %v2031_v49 = vsub.f32 1.0, %v1903_v26  ;;  %v1778_v52 = vsub.f32 %v11717_v10, %v17937_v55  ;;  %v3750_v45 = vmul.f32 %v14062_v21, %v17938_v23  ;;  %v3424_v63 = vsub.f32 1.0, %v3296_v50 }
 0x27b   : > { %v14081_v0 = vmax.f32 %v3365_v53, 0.0  ;;  %4937 = vmatmul.mubr.f32.gmra.mrb[26].mxu0 %v3839_v48  ;;  %v2160_v5 = vmax.f32 %v2032_v19, 0.0  ;;  %4225 = vmatmul.mubr.f32.gmra.mrb[30].mxu1 %v3747_v51  ;;  %v1777_v8 = vsub.f32 %v11715_v9, %v17937_v55  ;;  %v14085_v40 = vmax.f32 %v3419_v37, 0.0  ;;  %v2943_v19 = vpop.permute.xlu1 %2942  ;;  %v17944_v51 = vld [vmem:[#allocation85_spill] sm:$0xff] }
 0x27c   : > { %v3370_v2 = vsub.f32 1.0, %v3242_v59  ;;  %v2159_v3 = vmax.f32 %v2031_v49, 0.0  ;;  %v1906_v26 = vand.u32 2147483647, %v1778_v52  ;;  %4229 = vmatprep.mubr.f32.mxu1 %v3750_v45  ;;  %v14087_v1 = vmax.f32 %v3420_v22, 0.0  ;;  %v17946_v49 = vld [vmem:[#allocation125_spill] sm:$0xff] }
 0x27d   : > { %17939 = vst [vmem:[#allocation35_spill] sm:$0xff] %v14081_v0  ;;  %17940 = vst [vmem:[#allocation57_spill] sm:$0xff] %v14085_v40  ;;  %v3241_v47 = vand.u32 2147483647, %v3113_v6  ;;  %v3842_v23 = vmul.f32 %v17942_v15, %v2160_v5  ;;  %v1905_v50 = vand.u32 2147483647, %v1777_v8  ;;  %v3118_v48 = vsub.f32 %v11721_v12, %v14068_v20 }
 0x27e   : > { %17941 = vst [vmem:[#allocation60_spill] sm:$0xff] %v14087_v1  ;;  %v14090_v53 = vmax.f32 %v3423_v27, 0.0  ;;  %v3841_v55 = vmul.f32 %v17944_v51, %v2159_v3  ;;  %v2034_v37 = vsub.f32 1.0, %v1906_v26  ;;  %v14095_v29 = vmax.f32 %v3424_v63, 0.0  ;;  %v17947_v6 = vld [vmem:[#allocation96_spill] sm:$0xff]  ;;  %v17949_v5 = vld [vmem:[#allocation129_spill] sm:$0xff]  ;;  %v14107_v63 = vpop.permute.xlu0 %3042 }
 0x27f   : > { %4941 = vmatprep.mubr.f32.mxu0 %v3842_v23  ;;  %v2033_v59 = vsub.f32 1.0, %v1905_v50  ;;  %v3749_v22 = vmul.f32 %v14081_v0, %v17946_v49  ;;  %v1780_v52 = vsub.f32 %v11717_v10, %v17947_v6  ;;  %v14101_v45 = vmax.f32 %v3370_v2, 0.0  ;;  %v17952_v40 = vld [vmem:[#allocation128_spill] sm:$0xff] }
 0x280   : > { %17943 = vst [vmem:[#allocation19_spill] sm:$0xff] %v14090_v53  ;;  %17945 = vst [vmem:[#allocation33_spill] sm:$0xff] %v14095_v29  ;;  %4942 = vmatmul.mubr.f32.gmra.mrb[28].mxu0 %v3841_v55  ;;  %v2162_v27 = vmax.f32 %v2034_v37, 0.0  ;;  %v3752_v8 = vmul.f32 %v13516_v34, %v17949_v5  ;;  %v1779_v3 = vsub.f32 %v11715_v9, %v17947_v6  ;;  %v3369_v26 = vsub.f32 1.0, %v3241_v47  ;;  %v17950_v55 = vld [vmem:[#allocation89_spill] sm:$0xff]  ;;  %v17951_v53 = vld [vmem:[#allocation88_spill] sm:$0xff] }
 0x281   : > { %17948 = vst [vmem:[#allocation167_spill] sm:$0xff] %v14101_v45  ;;  %v3117_v15 = vsub.f32 %v11719_v11, %v14068_v20  ;;  %v2161_v23 = vmax.f32 %v2033_v59, 0.0  ;;  %4230 = vmatmul.mubr.f32.gmra.mrb[32].mxu1 %v3749_v22  ;;  %v1908_v50 = vand.u32 2147483647, %v1780_v52  ;;  %v3246_v51 = vand.u32 2147483647, %v3118_v48  ;;  %v2951_v59 = vpop.permute.xlu1 %2950 }
 0x282   : > { %v3121_v2 = vsub.f32 %v11719_v11, %v2943_v19  ;;  %v3844_v37 = vmul.f32 %v17950_v55, %v2162_v27  ;;  %4234 = vmatprep.mubr.f32.mxu1 %v3752_v8  ;;  %v1907_v49 = vand.u32 2147483647, %v1779_v3  ;;  %v3122_v5 = vsub.f32 %v11721_v12, %v2943_v19  ;;  %v17953_v47 = vld [vmem:[#allocation177_spill] sm:$0xff]  ;;  %v17954_v22 = vld [vmem:[#allocation94_spill] sm:$0xff]  ;;  %v17955_v27 = vld [vmem:[#allocation123_spill] sm:$0xff] }
 0x283   : > { %v3843_v6 = vmul.f32 %v17951_v53, %v2161_v23  ;;  %v2036_v29 = vsub.f32 1.0, %v1908_v50  ;;  %v3751_v1 = vmul.f32 %v17953_v47, %v17952_v40  ;;  %v3171_v20 = vsub.f32 %v11719_v11, %v14107_v63  ;;  %v17956_v34 = vld [vmem:[#allocation145_spill] sm:$0xff] }
 0x284   : > { %4946 = vmatprep.mubr.f32.mxu0 %v3844_v37  ;;  %v2035_v48 = vsub.f32 1.0, %v1907_v49  ;;  %v1782_v52 = vsub.f32 %v11717_v10, %v17954_v22  ;;  %v3754_v8 = vmul.f32 %v14101_v45, %v17955_v27  ;;  %v14123_v3 = vmax.f32 %v3369_v26, 0.0 }
 0x285   : > { %v3245_v19 = vand.u32 2147483647, %v3117_v15  ;;  %4947 = vmatmul.mubr.f32.gmra.mrb[30].mxu0 %v3843_v6  ;;  %v2164_v53 = vmax.f32 %v2036_v29, 0.0  ;;  %4235 = vmatmul.mubr.f32.gmra.mrb[34].mxu1 %v3751_v1  ;;  %v1781_v40 = vsub.f32 %v11715_v9, %v17954_v22  ;;  %v3172_v23 = vsub.f32 %v11721_v12, %v14107_v63  ;;  %v17957_v1 = vld [vmem:[#allocation144_spill] sm:$0xff]  ;;  %v17958_v63 = vld [vmem:[#allocation43_spill] sm:$0xff] }
 0x286   : > { %v3374_v50 = vsub.f32 1.0, %v3246_v51  ;;  %v2163_v55 = vmax.f32 %v2035_v48, 0.0  ;;  %v1910_v37 = vand.u32 2147483647, %v1782_v52  ;;  %4239 = vmatprep.mubr.f32.mxu1 %v3754_v8  ;;  %v3249_v49 = vand.u32 2147483647, %v3121_v2 }
 0x287   : > { %v3250_v47 = vand.u32 2147483647, %v3122_v5  ;;  %v3846_v27 = vmul.f32 %v17956_v34, %v2164_v53  ;;  %v1909_v26 = vand.u32 2147483647, %v1781_v40  ;;  %v14130_v45 = vand.u32 2147483647, %v3171_v20  ;;  %v2959_v34 = vpop.permute.xlu1 %2958 }
 0x288   : > { %v3125_v29 = vsub.f32 %v11719_v11, %v2951_v59  ;;  %v3845_v15 = vmul.f32 %v17957_v1, %v2163_v55  ;;  %v2038_v6 = vsub.f32 1.0, %v1910_v37  ;;  %v3373_v22 = vsub.f32 1.0, %v3245_v19  ;;  %v17959_v48 = vld [vmem:[#allocation99_spill] sm:$0xff] }
 0x289   : > { %4951 = vmatprep.mubr.f32.mxu0 %v3846_v27  ;;  %v2037_v0 = vsub.f32 1.0, %v1909_v26  ;;  %v3753_v51 = vmul.f32 %v14123_v3, %v17958_v63  ;;  %v1784_v2 = vsub.f32 %v11717_v10, %v17959_v48  ;;  %v14138_v5 = vmax.f32 %v3374_v50, 0.0  ;;  %v17960_v52 = vld [vmem:[#allocation131_spill] sm:$0xff] }
 0x28a   : > { %4952 = vmatmul.mubr.f32.gmra.mrb[32].mxu0 %v3845_v15  ;;  %v2166_v20 = vmax.f32 %v2038_v6, 0.0  ;;  %v3756_v8 = vmul.f32 %v13625_v24, %v17960_v52  ;;  %v1783_v53 = vsub.f32 %v11715_v9, %v17959_v48  ;;  %v3377_v19 = vsub.f32 1.0, %v3249_v49  ;;  %v17961_v52 = vld [vmem:[#allocation134_spill] sm:$0xff] }
 0x28b   : > { %v3378_v40 = vsub.f32 1.0, %v3250_v47  ;;  %v2165_v55 = vmax.f32 %v2037_v0, 0.0  ;;  %4240 = vmatmul.mubr.f32.gmra.mrb[36].mxu1 %v3753_v51  ;;  %v1912_v37 = vand.u32 2147483647, %v1784_v2  ;;  %v3126_v27 = vsub.f32 %v11721_v12, %v2951_v59  ;;  %v17962_v49 = vld [vmem:[#allocation2_spill] sm:$0xff] }
 0x28c   : > { %v3253_v26 = vand.u32 2147483647, %v3125_v29  ;;  %v3848_v50 = vmul.f32 %v13837_v60, %v2166_v20  ;;  %4244 = vmatprep.mubr.f32.mxu1 %v3756_v8  ;;  %v1911_v1 = vand.u32 2147483647, %v1783_v53  ;;  %v3129_v15 = vsub.f32 %v11719_v11, %v2959_v34  ;;  %v17963_v29 = vld [vmem:[#allocation136_spill] sm:$0xff]  ;;  %v2967_v53 = vpop.permute.xlu1 %2966 }
 0x28d   : > { %v3847_v6 = vmul.f32 %v13835_v31, %v2165_v55  ;;  %v2040_v63 = vsub.f32 1.0, %v1912_v37  ;;  %v3755_v48 = vmul.f32 %v13618_v54, %v17961_v52  ;;  %v3130_v47 = vsub.f32 %v11721_v12, %v2959_v34 }
 0x28e   : > { %4956 = vmatprep.mubr.f32.mxu0 %v3848_v50  ;;  %v2039_v0 = vsub.f32 1.0, %v1911_v1  ;;  %v1786_v59 = vsub.f32 %v11717_v10, %v17962_v49  ;;  %v3758_v60 = vmul.f32 %v14138_v5, %v17963_v29  ;;  %v14155_v51 = vand.u32 2147483647, %v3172_v23 }
 0x28f   : > { %v14157_v2 = vmax.f32 %v3373_v22, 0.0  ;;  %4957 = vmatmul.mubr.f32.gmra.mrb[34].mxu0 %v3847_v6  ;;  %v2168_v31 = vmax.f32 %v2040_v63, 0.0  ;;  %4245 = vmatmul.mubr.f32.gmra.mrb[38].mxu1 %v3755_v48  ;;  %v1785_v20 = vsub.f32 %v11715_v9, %v17962_v49  ;;  %v14161_v8 = vmax.f32 %v3377_v19, 0.0 }
 0x290   : > { %v3254_v34 = vand.u32 2147483647, %v3126_v27  ;;  %v2167_v55 = vmax.f32 %v2039_v0, 0.0  ;;  %v1914_v37 = vand.u32 2147483647, %v1786_v59  ;;  %4249 = vmatprep.mubr.f32.mxu1 %v3758_v60  ;;  %v14163_v50 = vmax.f32 %v3378_v40, 0.0 }
 0x291   : > { %v3257_v1 = vand.u32 2147483647, %v3129_v15  ;;  %v3850_v23 = vmul.f32 %v13851_v4, %v2168_v31  ;;  %v1913_v22 = vand.u32 2147483647, %v1785_v20  ;;  %v3381_v52 = vsub.f32 1.0, %v3253_v26  ;;  %v17964_v27 = vld [vmem:[#allocation95_spill] sm:$0xff] }
 0x292   : > { %v3258_v6 = vand.u32 2147483647, %v3130_v47  ;;  %v3849_v63 = vmul.f32 %v13849_v58, %v2167_v55  ;;  %v2042_v48 = vsub.f32 1.0, %v1914_v37  ;;  %v3133_v49 = vsub.f32 %v11719_v11, %v2967_v53  ;;  %v17965_v59 = vld [vmem:[#allocation97_spill] sm:$0xff]  ;;  %v17966_v4 = vld [vmem:[#allocation54_spill] sm:$0xff] }
 0x293   : > { %4961 = vmatprep.mubr.f32.mxu0 %v3850_v23  ;;  %v2041_v19 = vsub.f32 1.0, %v1913_v22  ;;  %v3757_v0 = vmul.f32 %v14157_v2, %v17964_v27  ;;  %v1788_v40 = vsub.f32 %v11717_v10, %v17965_v59  ;;  %v3382_v29 = vsub.f32 1.0, %v3254_v34  ;;  %v17967_v27 = vld [vmem:[#allocation137_spill] sm:$0xff] }
 0x294   : > { %4962 = vmatmul.mubr.f32.gmra.mrb[36].mxu0 %v3849_v63  ;;  %v2170_v15 = vmax.f32 %v2042_v48, 0.0  ;;  %v3760_v26 = vmul.f32 %v13647_v28, %v17966_v4  ;;  %v1787_v58 = vsub.f32 %v11715_v9, %v17965_v59  ;;  %v3385_v47 = vsub.f32 1.0, %v3257_v1 }
 0x295   : > { %v3134_v60 = vsub.f32 %v11721_v12, %v2967_v53  ;;  %v2169_v31 = vmax.f32 %v2041_v19, 0.0  ;;  %4250 = vmatmul.mubr.f32.gmra.mrb[40].mxu1 %v3757_v0  ;;  %v1916_v20 = vand.u32 2147483647, %v1788_v40  ;;  %v14177_v55 = vmax.f32 %v3381_v52, 0.0  ;;  %v17968_v19 = vld [vmem:[#allocation25_spill] sm:$0xff]  ;;  %v17969_v0 = vld [vmem:[#allocation140_spill] sm:$0xff] }
 0x296   : > { %v3386_v37 = vsub.f32 1.0, %v3258_v6  ;;  %v3852_v23 = vmul.f32 %v13387_v35, %v2170_v15  ;;  %4254 = vmatprep.mubr.f32.mxu1 %v3760_v26  ;;  %v1915_v34 = vand.u32 2147483647, %v1787_v58  ;;  %v3261_v22 = vand.u32 2147483647, %v3133_v49  ;;  %v17970_v26 = vld [vmem:[#allocation78_spill] sm:$0xff] }
 0x297   : > { %v3851_v63 = vmul.f32 %v17858_v46, %v2169_v31  ;;  %v2044_v48 = vsub.f32 1.0, %v1916_v20  ;;  %v3759_v59 = vmul.f32 %v13632_v36, %v17967_v27  ;;  %v14183_v1 = vmax.f32 %v3382_v29, 0.0  ;;  %v17972_v27 = vld [vmem:[#allocation143_spill] sm:$0xff] }
 0x298   : > { %4966 = vmatprep.mubr.f32.mxu0 %v3852_v23  ;;  %v2043_v53 = vsub.f32 1.0, %v1915_v34  ;;  %v1790_v52 = vsub.f32 %v11717_v10, %v17968_v19  ;;  %v3762_v6 = vmul.f32 %v14163_v50, %v17969_v0  ;;  %v14189_v35 = vmax.f32 %v3385_v47, 0.0 }
 0x299   : > { %v14191_v40 = vand.u32 2147483647, %v3134_v60  ;;  %4967 = vmatmul.mubr.f32.gmra.mrb[38].mxu0 %v3851_v63  ;;  %v2172_v46 = vmax.f32 %v2044_v48, 0.0  ;;  %4255 = vmatmul.mubr.f32.gmra.mrb[42].mxu1 %v3759_v59  ;;  %v1789_v49 = vsub.f32 %v11715_v9, %v17968_v19  ;;  %v14195_v29 = vmax.f32 %v3386_v37, 0.0  ;;  %v17971_v60 = vld [vmem:[#allocation139_spill] sm:$0xff] }
 0x29a   : > { %v2171_v15 = vmax.f32 %v2043_v53, 0.0  ;;  %v1918_v4 = vand.u32 2147483647, %v1790_v52  ;;  %4259 = vmatprep.mubr.f32.mxu1 %v3762_v6  ;;  %v1792_v58 = vsub.f32 %v11717_v10, %v17970_v26  ;;  %v3389_v31 = vsub.f32 1.0, %v3261_v22  ;;  %v2975_v52 = vpop.permute.xlu1 %2974  ;;  %v17974_v6 = vld [vmem:[#allocation146_spill] sm:$0xff] }
 0x29b   : > { %v3854_v47 = vmul.f32 %v13874_v13, %v2172_v46  ;;  %v1917_v20 = vand.u32 2147483647, %v1789_v49  ;;  %v3761_v23 = vmul.f32 %v14161_v8, %v17971_v60  ;;  %v3764_v37 = vmul.f32 %v13730_v39, %v17972_v27  ;;  %v17973_v13 = vld [vmem:[#allocation100_spill] sm:$0xff] }
 0x29c   : > { %v3853_v34 = vmul.f32 %v13888_v18, %v2171_v15  ;;  %v2046_v63 = vsub.f32 1.0, %v1918_v4  ;;  %v1920_v48 = vand.u32 2147483647, %v1792_v58  ;;  %v3390_v59 = vsub.f32 1.0, %v14191_v40  ;;  %v17975_v58 = vld [vmem:[#allocation98_spill] sm:$0xff] }
 0x29d   : > { %4971 = vmatprep.mubr.f32.mxu0 %v3854_v47  ;;  %v2045_v53 = vsub.f32 1.0, %v1917_v20  ;;  %4260 = vmatmul.mubr.f32.gmra.mrb[44].mxu1 %v3761_v23  ;;  %v1791_v22 = vsub.f32 %v11715_v9, %v17970_v26  ;;  %v1794_v19 = vsub.f32 %v11717_v10, %v17973_v13  ;;  %v3763_v46 = vmul.f32 %v13726_v38, %v17974_v6  ;;  %v17976_v23 = vld [vmem:[#allocation13_spill] sm:$0xff] }
 0x29e   : > { %4972 = vmatmul.mubr.f32.gmra.mrb[40].mxu0 %v3853_v34  ;;  %v2174_v0 = vmax.f32 %v2046_v63, 0.0  ;;  %v2048_v18 = vsub.f32 1.0, %v1920_v48  ;;  %4264 = vmatprep.mubr.f32.mxu1 %v3764_v37  ;;  %v1793_v40 = vsub.f32 %v11715_v9, %v17973_v13  ;;  %v3766_v26 = vmul.f32 %v14183_v1, %v17975_v58 }
 0x29f   : > { %v2173_v49 = vmax.f32 %v2045_v53, 0.0  ;;  %v1919_v15 = vand.u32 2147483647, %v1791_v22  ;;  %v1922_v4 = vand.u32 2147483647, %v1794_v19  ;;  %v1796_v34 = vsub.f32 %v11717_v10, %v17976_v23 }
 0x2a0   : > { %v3856_v47 = vmul.f32 %v17867_v44, %v2174_v0  ;;  %v2176_v20 = vmax.f32 %v2048_v18, 0.0  ;;  %v1921_v60 = vand.u32 2147483647, %v1793_v40  ;;  %v3137_v63 = vsub.f32 %v11719_v11, %v2975_v52  ;;  %v17977_v18 = vld [vmem:[#allocation148_spill] sm:$0xff] }
 0x2a1   : > { %v3855_v48 = vmul.f32 %v17871_v25, %v2173_v49  ;;  %v2047_v27 = vsub.f32 1.0, %v1919_v15  ;;  %4265 = vmatmul.mubr.f32.gmra.mrb[46].mxu1 %v3763_v46  ;;  %v2050_v37 = vsub.f32 1.0, %v1922_v4  ;;  %v14221_v53 = vmax.f32 %v3389_v31, 0.0  ;;  %v17978_v25 = vld [vmem:[#allocation41_spill] sm:$0xff] }
 0x2a2   : > { %4976 = vmatprep.mubr.f32.mxu0 %v3856_v47  ;;  %v3858_v22 = vmul.f32 %v13908_v7, %v2176_v20  ;;  %4269 = vmatprep.mubr.f32.mxu1 %v3766_v26  ;;  %v1924_v13 = vand.u32 2147483647, %v1796_v34  ;;  %v1795_v44 = vsub.f32 %v11715_v9, %v17976_v23  ;;  %v2049_v0 = vsub.f32 1.0, %v1921_v60  ;;  %v17979_v49 = vld [vmem:[#allocation153_spill] sm:$0xff]  ;;  %v17981_v34 = vld [vmem:[#allocation3_spill] sm:$0xff] }
 0x2a3   : > { %4977 = vmatmul.mubr.f32.gmra.mrb[42].mxu0 %v3855_v48  ;;  %v2175_v19 = vmax.f32 %v2047_v27, 0.0  ;;  %v3765_v6 = vmul.f32 %v14177_v55, %v17977_v18  ;;  %v1798_v46 = vsub.f32 %v11717_v10, %v17978_v25  ;;  %v2178_v31 = vmax.f32 %v2050_v37, 0.0  ;;  %v2983_v18 = vpop.permute.xlu1 %2982 }
 0x2a4   : > { %4981 = vmatprep.mubr.f32.mxu0 %v3858_v22  ;;  %v2052_v40 = vsub.f32 1.0, %v1924_v13  ;;  %v3768_v7 = vmul.f32 %v13765_v43, %v17979_v49  ;;  %v1923_v15 = vand.u32 2147483647, %v1795_v44  ;;  %v3138_v4 = vsub.f32 %v11721_v12, %v2975_v52  ;;  %v17982_v22 = vld [vmem:[#allocation71_spill] sm:$0xff] }
 0x2a5   : > { %v3857_v58 = vmul.f32 %v13915_v56, %v2175_v19  ;;  %4270 = vmatmul.mubr.f32.gmra.mrb[48].mxu1 %v3765_v6  ;;  %v1926_v26 = vand.u32 2147483647, %v1798_v46  ;;  %v1797_v47 = vsub.f32 %v11715_v9, %v17978_v25  ;;  %v14236_v20 = vmax.f32 %v3390_v59, 0.0  ;;  %v17983_v19 = vld [vmem:[#allocation6_spill] sm:$0xff]  ;;  %v17984_v25 = vld [vmem:[#allocation105_spill] sm:$0xff] }
 0x2a6   : > { %v3265_v60 = vand.u32 2147483647, %v3137_v63  ;;  %v3860_v23 = vmul.f32 %v17880_v42, %v2178_v31  ;;  %4274 = vmatprep.mubr.f32.mxu1 %v3768_v7  ;;  %v3767_v48 = vmul.f32 %v13749_v33, %v17981_v34  ;;  %v2177_v27 = vmax.f32 %v2049_v0, 0.0 }
 0x2a7   : > { %17980 = vst [vmem:[#allocation59_spill] sm:$0xff] %v14236_v20  ;;  %4982 = vmatmul.mubr.f32.gmra.mrb[44].mxu0 %v3857_v58  ;;  %v2051_v37 = vsub.f32 1.0, %v1923_v15  ;;  %v1925_v52 = vand.u32 2147483647, %v1797_v47  ;;  %v1800_v56 = vsub.f32 %v11717_v10, %v17982_v22  ;;  %v2180_v13 = vmax.f32 %v2052_v40, 0.0  ;;  %v17985_v40 = vld [vmem:[#allocation7_spill] sm:$0xff] }
 0x2a8   : > { %4986 = vmatprep.mubr.f32.mxu0 %v3860_v23  ;;  %v2054_v44 = vsub.f32 1.0, %v1926_v26  ;;  %v3770_v59 = vmul.f32 %v14195_v29, %v17983_v19  ;;  %v1799_v42 = vsub.f32 %v11715_v9, %v17982_v22  ;;  %v3266_v63 = vand.u32 2147483647, %v3138_v4  ;;  %v17986_v26 = vld [vmem:[#allocation151_spill] sm:$0xff] }
 0x2a9   : > { %v3859_v6 = vmul.f32 %v17883_v41, %v2177_v27  ;;  %4275 = vmatmul.mubr.f32.gmra.mrb[50].mxu1 %v3767_v48  ;;  %v1928_v0 = vand.u32 2147483647, %v1800_v56  ;;  %v1802_v46 = vsub.f32 %v11717_v10, %v17984_v25  ;;  %v3393_v31 = vsub.f32 1.0, %v3265_v60  ;;  %v17987_v48 = vld [vmem:[#allocation108_spill] sm:$0xff] }
 0x2aa   : > { %v3862_v49 = vmul.f32 %v13932_v62, %v2180_v13  ;;  %4279 = vmatprep.mubr.f32.mxu1 %v3770_v59  ;;  %v3769_v7 = vmul.f32 %v14189_v35, %v17985_v40  ;;  %v1801_v15 = vsub.f32 %v11715_v9, %v17984_v25  ;;  %v2179_v4 = vmax.f32 %v2051_v37, 0.0  ;;  %v17988_v13 = vld [vmem:[#allocation50_spill] sm:$0xff]  ;;  %v2991_v25 = vpop.permute.xlu1 %2990 }
 0x2ab   : > { %4987 = vmatmul.mubr.f32.gmra.mrb[46].mxu0 %v3859_v6  ;;  %v2053_v58 = vsub.f32 1.0, %v1925_v52  ;;  %v3772_v41 = vmul.f32 %v13799_v17, %v17986_v26  ;;  %v1927_v47 = vand.u32 2147483647, %v1799_v42  ;;  %v2182_v23 = vmax.f32 %v2054_v44, 0.0  ;;  %v17989_v52 = vld [vmem:[#allocation173_spill] sm:$0xff]  ;;  %v17991_v44 = vld [vmem:[#allocation79_spill] sm:$0xff] }
 0x2ac   : > { %4991 = vmatprep.mubr.f32.mxu0 %v3862_v49  ;;  %v2056_v34 = vsub.f32 1.0, %v1928_v0  ;;  %v1930_v60 = vand.u32 2147483647, %v1802_v46  ;;  %v1804_v62 = vsub.f32 %v11717_v10, %v17987_v48  ;;  %v3394_v27 = vsub.f32 1.0, %v3266_v63  ;;  %v17990_v42 = vld [vmem:[#allocation149_spill] sm:$0xff]  ;;  %v17993_v26 = vld [vmem:[#allocation10_spill] sm:$0xff] }
 0x2ad   : > { %v3141_v22 = vsub.f32 %v11719_v11, %v2983_v18  ;;  %v3142_v56 = vsub.f32 %v11721_v12, %v2983_v18  ;;  %v3861_v19 = vmul.f32 %v17988_v13, %v2179_v4  ;;  %4280 = vmatmul.mubr.f32.gmra.mrb[52].mxu1 %v3769_v7  ;;  %v14262_v37 = vmax.f32 %v3393_v31, 0.0  ;;  %v17992_v49 = vld [vmem:[#allocation9_spill] sm:$0xff] }
 0x2ae   : > { %v3864_v59 = vmul.f32 %v17989_v52, %v2182_v23  ;;  %4284 = vmatprep.mubr.f32.mxu1 %v3772_v41  ;;  %v3771_v6 = vmul.f32 %v17991_v44, %v17990_v42  ;;  %v1929_v0 = vand.u32 2147483647, %v1801_v15  ;;  %v2181_v46 = vmax.f32 %v2053_v58, 0.0  ;;  %v17995_v52 = vld [vmem:[#allocation5_spill] sm:$0xff] }
 0x2af   : > { %4992 = vmatmul.mubr.f32.gmra.mrb[48].mxu0 %v3861_v19  ;;  %v2055_v63 = vsub.f32 1.0, %v1927_v47  ;;  %v3774_v40 = vmul.f32 %v14236_v20, %v17992_v49  ;;  %v1803_v18 = vsub.f32 %v11715_v9, %v17987_v48  ;;  %v2184_v31 = vmax.f32 %v2056_v34, 0.0  ;;  %v17994_v19 = vld [vmem:[#allocation18_spill] sm:$0xff]  ;;  %v17998_v49 = vld [vmem:[#allocation147_spill] sm:$0xff] }
 0x2b0   : > { %4996 = vmatprep.mubr.f32.mxu0 %v3864_v59  ;;  %v2058_v7 = vsub.f32 1.0, %v1930_v60  ;;  %v1932_v4 = vand.u32 2147483647, %v1804_v62  ;;  %v1806_v41 = vsub.f32 %v11717_v10, %v17993_v26  ;;  %v14273_v23 = vmax.f32 %v3394_v27, 0.0  ;;  %v17996_v59 = vld [vmem:[#allocation162_spill] sm:$0xff] }
 0x2b1   : > { %v3269_v15 = vand.u32 2147483647, %v3141_v22  ;;  %v3270_v13 = vand.u32 2147483647, %v3142_v56  ;;  %v3863_v58 = vmul.f32 %v17994_v19, %v2181_v46  ;;  %4285 = vmatmul.mubr.f32.gmra.mrb[54].mxu1 %v3771_v6  ;;  %v3145_v47 = vsub.f32 %v11719_v11, %v2991_v25  ;;  %v17997_v62 = vld [vmem:[#allocation14_spill] sm:$0xff]  ;;  %v17999_v19 = vld [vmem:[#allocation113_spill] sm:$0xff] }
 0x2b2   : > { %v3866_v42 = vmul.f32 %v17995_v52, %v2184_v31  ;;  %4289 = vmatprep.mubr.f32.mxu1 %v3774_v40  ;;  %v2057_v48 = vsub.f32 1.0, %v1929_v0  ;;  %v3773_v34 = vmul.f32 %v14221_v53, %v17996_v59  ;;  %v2183_v60 = vmax.f32 %v2055_v63, 0.0 }
 0x2b3   : > { %4997 = vmatmul.mubr.f32.gmra.mrb[50].mxu0 %v3863_v58  ;;  %v3776_v27 = vmul.f32 %v17998_v49, %v17997_v62  ;;  %v1931_v20 = vand.u32 2147483647, %v1803_v18  ;;  %v1805_v22 = vsub.f32 %v11715_v9, %v17993_v26  ;;  %v2186_v56 = vmax.f32 %v2058_v7, 0.0  ;;  %v18000_v58 = vld [vmem:[#allocation55_spill] sm:$0xff]  ;;  %v18001_v26 = vld [vmem:[#allocation172_spill] sm:$0xff] }
 0x2b4   : > { %5001 = vmatprep.mubr.f32.mxu0 %v3866_v42  ;;  %v2060_v6 = vsub.f32 1.0, %v1932_v4  ;;  %v1934_v46 = vand.u32 2147483647, %v1806_v41  ;;  %v1808_v40 = vsub.f32 %v11717_v10, %v17999_v19  ;;  %v3397_v0 = vsub.f32 1.0, %v3269_v15  ;;  %v18002_v42 = vld [vmem:[#allocation86_spill] sm:$0xff]  ;;  %v18003_v41 = vld [vmem:[#allocation4_spill] sm:$0xff] }
 0x2b5   : > { %v3398_v31 = vsub.f32 1.0, %v3270_v13  ;;  %v3146_v52 = vsub.f32 %v11721_v12, %v2991_v25  ;;  %v3865_v63 = vmul.f32 %v18000_v58, %v2183_v60  ;;  %4290 = vmatmul.mubr.f32.gmra.mrb[56].mxu1 %v3773_v34  ;;  %v3273_v59 = vand.u32 2147483647, %v3145_v47  ;;  %v2999_v13 = vpop.permute.xlu1 %2998 }
 0x2b6   : > { %v3868_v18 = vmul.f32 %v13492_v32, %v2186_v56  ;;  %v2185_v62 = vmax.f32 %v2057_v48, 0.0  ;;  %4294 = vmatprep.mubr.f32.mxu1 %v3776_v27  ;;  %v3775_v7 = vmul.f32 %v18002_v42, %v18001_v26  ;;  %v2059_v4 = vsub.f32 1.0, %v1931_v20  ;;  %v18004_v32 = vld [vmem:[#allocation115_spill] sm:$0xff] }
 0x2b7   : > { %5002 = vmatmul.mubr.f32.gmra.mrb[52].mxu0 %v3865_v63  ;;  %v3778_v49 = vmul.f32 %v14273_v23, %v18003_v41  ;;  %v1933_v15 = vand.u32 2147483647, %v1805_v22  ;;  %v1807_v25 = vsub.f32 %v11715_v9, %v17999_v19  ;;  %v2188_v34 = vmax.f32 %v2060_v6, 0.0  ;;  %v18006_v19 = vld [vmem:[#allocation152_spill] sm:$0xff] }
 0x2b8   : > { %5006 = vmatprep.mubr.f32.mxu0 %v3868_v18  ;;  %v2062_v47 = vsub.f32 1.0, %v1934_v46  ;;  %v1936_v60 = vand.u32 2147483647, %v1808_v40  ;;  %v1810_v48 = vsub.f32 %v11717_v10, %v18004_v32  ;;  %v14297_v27 = vmax.f32 %v3397_v0, 0.0  ;;  %v18007_v46 = vld [vmem:[#allocation48_spill] sm:$0xff] }
 0x2b9   : > { %v14299_v56 = vmax.f32 %v3398_v31, 0.0  ;;  %v3274_v20 = vand.u32 2147483647, %v3146_v52  ;;  %v3867_v58 = vmul.f32 %v13481_v14, %v2185_v62  ;;  %4295 = vmatmul.mubr.f32.gmra.mrb[58].mxu1 %v3775_v7  ;;  %v3401_v22 = vsub.f32 1.0, %v3273_v59  ;;  %v18008_v40 = vld [vmem:[#allocation52_spill] sm:$0xff]  ;;  %v18009_v62 = vld [vmem:[#allocation27_spill] sm:$0xff] }
 0x2ba   : > { %v3870_v63 = vmul.f32 %v13992_v30, %v2188_v34  ;;  %4299 = vmatprep.mubr.f32.mxu1 %v3778_v49  ;;  %v3777_v6 = vmul.f32 %v14262_v37, %v18006_v19  ;;  %v3780_v18 = vmul.f32 %v18008_v40, %v18007_v46  ;;  %v2187_v26 = vmax.f32 %v2059_v4, 0.0  ;;  %v18013_v46 = vld [vmem:[#allocation179_spill] sm:$0xff]  ;;  %v18014_v40 = vld [vmem:[#allocation122_spill] sm:$0xff] }
 0x2bb   : > { %18005 = vst [vmem:[#allocation87_spill] sm:$0xff] %v14299_v56  ;;  %5007 = vmatmul.mubr.f32.gmra.mrb[54].mxu0 %v3867_v58  ;;  %v2061_v0 = vsub.f32 1.0, %v1933_v15  ;;  %v1935_v41 = vand.u32 2147483647, %v1807_v25  ;;  %v1809_v31 = vsub.f32 %v11715_v9, %v18004_v32  ;;  %v2190_v14 = vmax.f32 %v2062_v47, 0.0  ;;  %v3007_v15 = vpop.permute.xlu1 %3006  ;;  %v18010_v25 = vld [vmem:[#allocation175_spill] sm:$0xff] }
 0x2bc   : > { %5011 = vmatprep.mubr.f32.mxu0 %v3870_v63  ;;  %v2064_v52 = vsub.f32 1.0, %v1936_v60  ;;  %v1938_v59 = vand.u32 2147483647, %v1810_v48  ;;  %v1812_v30 = vsub.f32 %v11717_v10, %v18009_v62  ;;  %v3402_v49 = vsub.f32 1.0, %v3274_v20  ;;  %v18011_v47 = vld [vmem:[#allocation17_spill] sm:$0xff]  ;;  %v18012_v60 = vld [vmem:[#allocation51_spill] sm:$0xff] }
 0x2bd   : > { %v3149_v7 = vsub.f32 %v11719_v11, %v2999_v13  ;;  %v3150_v34 = vsub.f32 %v11721_v12, %v2999_v13  ;;  %v3869_v58 = vmul.f32 %v14004_v61, %v2187_v26  ;;  %4300 = vmatmul.mubr.f32.gmra.mrb[60].mxu1 %v3777_v6  ;;  %v14314_v4 = vmax.f32 %v3401_v22, 0.0 }
 0x2be   : > { %v3872_v32 = vmul.f32 %v18010_v25, %v2190_v14  ;;  %4304 = vmatprep.mubr.f32.mxu1 %v3780_v18  ;;  %v3779_v48 = vmul.f32 %v18012_v60, %v18011_v47  ;;  %v1811_v63 = vsub.f32 %v11715_v9, %v18009_v62  ;;  %v2189_v20 = vmax.f32 %v2061_v0, 0.0  ;;  %v18015_v62 = vld [vmem:[#allocation174_spill] sm:$0xff] }
 0x2bf   : > { %5012 = vmatmul.mubr.f32.gmra.mrb[56].mxu0 %v3869_v58  ;;  %v2063_v19 = vsub.f32 1.0, %v1935_v41  ;;  %v3782_v13 = vmul.f32 %v14299_v56, %v18013_v46  ;;  %v1937_v61 = vand.u32 2147483647, %v1809_v31  ;;  %v2192_v22 = vmax.f32 %v2064_v52, 0.0  ;;  %v18017_v41 = vld [vmem:[#allocation58_spill] sm:$0xff]  ;;  %v18018_v31 = vld [vmem:[#allocation180_spill] sm:$0xff] }
 0x2c0   : > { %5016 = vmatprep.mubr.f32.mxu0 %v3872_v32  ;;  %v2066_v6 = vsub.f32 1.0, %v1938_v59  ;;  %v1940_v26 = vand.u32 2147483647, %v1812_v30  ;;  %v1814_v18 = vsub.f32 %v11717_v10, %v18014_v40  ;;  %v14325_v14 = vand.u32 2147483647, %v3149_v7  ;;  %v18019_v7 = vld [vmem:[#allocation156_spill] sm:$0xff] }
 0x2c1   : > { %v3278_v25 = vand.u32 2147483647, %v3150_v34  ;;  %v3153_v47 = vsub.f32 %v11719_v11, %v3007_v15  ;;  %v3871_v58 = vmul.f32 %v18015_v62, %v2189_v20  ;;  %4305 = vmatmul.mubr.f32.gmra.mrb[62].mxu1 %v3779_v48  ;;  %v14329_v0 = vmax.f32 %v3402_v49, 0.0  ;;  %v18020_v56 = vld [vmem:[#allocation20_spill] sm:$0xff]  ;;  %v18021_v62 = vld [vmem:[#allocation127_spill] sm:$0xff] }
 0x2c2   : > { %v3874_v46 = vmul.f32 %v18017_v41, %v2192_v22  ;;  %4309 = vmatprep.mubr.f32.mxu1 %v3782_v13  ;;  %v3781_v52 = vmul.f32 %v14297_v27, %v18018_v31  ;;  %v1939_v59 = vand.u32 2147483647, %v1811_v63  ;;  %v2191_v30 = vmax.f32 %v2063_v19, 0.0 }
 0x2c3   : > { %18016 = vst [vmem:[#allocation32_spill] sm:$0xff] %v14329_v0  ;;  %5017 = vmatmul.mubr.f32.gmra.mrb[58].mxu0 %v3871_v58  ;;  %v2065_v32 = vsub.f32 1.0, %v1937_v61  ;;  %v3784_v34 = vmul.f32 %v18020_v56, %v18019_v7  ;;  %v1813_v60 = vsub.f32 %v11715_v9, %v18014_v40  ;;  %v2194_v48 = vmax.f32 %v2066_v6, 0.0  ;;  %v18022_v58 = vld [vmem:[#allocation73_spill] sm:$0xff]  ;;  %v18023_v6 = vld [vmem:[#allocation155_spill] sm:$0xff]  ;;  %v18025_v7 = vld [vmem:[#allocation28_spill] sm:$0xff] }
 0x2c4   : > { %5021 = vmatprep.mubr.f32.mxu0 %v3874_v46  ;;  %v2068_v49 = vsub.f32 1.0, %v1940_v26  ;;  %v1942_v20 = vand.u32 2147483647, %v1814_v18  ;;  %v1816_v13 = vsub.f32 %v11717_v10, %v18021_v62  ;;  %v3406_v22 = vsub.f32 1.0, %v3278_v25  ;;  %v18024_v26 = vld [vmem:[#allocation31_spill] sm:$0xff] }
 0x2c5   : > { %v3154_v41 = vsub.f32 %v11721_v12, %v3007_v15  ;;  %v14341_v63 = vand.u32 2147483647, %v3153_v47  ;;  %v3873_v19 = vmul.f32 %v14050_v16, %v2191_v30  ;;  %4310 = vmatmul.mubr.f32.gmra.mrb[64].mxu1 %v3781_v52  ;;  %v3405_v61 = vsub.f32 1.0, %v14325_v14  ;;  %v18026_v30 = vld [vmem:[#allocation15_spill] sm:$0xff] }
 0x2c6   : > { %v3876_v31 = vmul.f32 %v18022_v58, %v2194_v48  ;;  %4314 = vmatprep.mubr.f32.mxu1 %v3784_v34  ;;  %v2067_v40 = vsub.f32 1.0, %v1939_v59  ;;  %v3783_v18 = vmul.f32 %v18024_v26, %v18023_v6  ;;  %v2193_v46 = vmax.f32 %v2065_v32, 0.0  ;;  %v5256_v59 = vld [vmem:[%s17004_s3] sm:$0xff]  ;;  %v5257_v32 = vld [vmem:[%s17004_s3 + $0x8] sm:$0xff]  ;;  %v18028_v58 = vld [vmem:[#allocation181_spill] sm:$0xff] }
 0x2c7   : > { %5022 = vmatmul.mubr.f32.gmra.mrb[60].mxu0 %v3873_v19  ;;  %v3786_v25 = vmul.f32 %v14329_v0, %v18025_v7  ;;  %v1941_v15 = vand.u32 2147483647, %v1813_v60  ;;  %v1815_v47 = vsub.f32 %v11715_v9, %v18021_v62  ;;  %v2196_v16 = vmax.f32 %v2068_v49, 0.0  ;;  %v18029_v6 = vld [vmem:[#allocation184_spill] sm:$0xff] }
 0x2c8   : > { %5026 = vmatprep.mubr.f32.mxu0 %v3876_v31  ;;  %v2070_v52 = vsub.f32 1.0, %v1942_v20  ;;  %v1944_v14 = vand.u32 2147483647, %v1816_v13  ;;  %v1818_v34 = vsub.f32 %v11717_v10, %v18026_v30  ;;  %v14360_v48 = vmax.f32 %v3406_v22, 0.0  ;;  %v3015_v20 = vpop.permute.xlu1 %3014  ;;  %v18030_v7 = vld [vmem:[#allocation8_spill] sm:$0xff] }
 0x2c9   : > { %v3282_v60 = vand.u32 2147483647, %v3154_v41  ;;  %v3409_v62 = vsub.f32 1.0, %v14341_v63  ;;  %v3875_v49 = vmul.f32 %v13504_v57, %v2193_v46  ;;  %4315 = vmatmul.mubr.f32.gmra.mrb[66].mxu1 %v3783_v18  ;;  %v3878_v13 = vmul.f32 %v14062_v21, %v2196_v16  ;;  %v18031_v21 = vld [vmem:[#allocation132_spill] sm:$0xff] }
 0x2ca   : > { %18027 = vst [vmem:[#allocation62_spill] sm:$0xff] %v14360_v48  ;;  %v2195_v19 = vmax.f32 %v2067_v40, 0.0  ;;  %4319 = vmatprep.mubr.f32.mxu1 %v3786_v25  ;;  %v3785_v31 = vmul.f32 %v14314_v4, %v18028_v58  ;;  %v3788_v0 = vmul.f32 %v18030_v7, %v18029_v6  ;;  %v2069_v22 = vsub.f32 1.0, %v1941_v15  ;;  %v18032_v6 = vld [vmem:[#allocation35_spill] sm:$0xff] }
 0x2cb   : > { %5027 = vmatmul.mubr.f32.gmra.mrb[62].mxu0 %v3875_v49  ;;  %v1943_v26 = vand.u32 2147483647, %v1815_v47  ;;  %v1817_v41 = vsub.f32 %v11715_v9, %v18026_v30  ;;  %v10420_v63 = vpack.c.bf16 %v5257_v32, %v5256_v59  ;;  %v2198_v57 = vmax.f32 %v2070_v52, 0.0  ;;  %v18033_v47 = vld [vmem:[#allocation178_spill] sm:$0xff] }
 0x2cc   : > { %5031 = vmatprep.mubr.f32.mxu0 %v3878_v13  ;;  %v2072_v18 = vsub.f32 1.0, %v1944_v14  ;;  %v1946_v46 = vand.u32 2147483647, %v1818_v34  ;;  %v1820_v40 = vsub.f32 %v11717_v10, %v18031_v21  ;;  %v3410_v25 = vsub.f32 1.0, %v3282_v60  ;;  %v18034_v52 = vld [vmem:[#allocation182_spill] sm:$0xff]  ;;  %v18035_v14 = vld [vmem:[#allocation53_spill] sm:$0xff] }
 0x2cd   : > { %v3157_v16 = vsub.f32 %v11719_v11, %v3015_v20  ;;  %v3158_v58 = vsub.f32 %v11721_v12, %v3015_v20  ;;  %v3877_v49 = vmul.f32 %v18032_v6, %v2195_v19  ;;  %4320 = vmatmul.mubr.f32.gmra.mrb[68].mxu1 %v3785_v31  ;;  %10421 = vmatprep.subr.bf16.mxu1 %v10420_v63  ;;  %v14376_v15 = vmax.f32 %v3405_v61, 0.0  ;;  %v18036_v20 = vld [vmem:[#allocation158_spill] sm:$0xff] }
 0x2ce   : > { %v3880_v30 = vmul.f32 %v18033_v47, %v2198_v57  ;;  %4324 = vmatprep.mubr.f32.mxu1 %v3788_v0  ;;  %v3787_v34 = vmul.f32 %v18035_v14, %v18034_v52  ;;  %v1819_v59 = vsub.f32 %v11715_v9, %v18031_v21  ;;  %10423 = vmatpush3.bf16.msra.mxu1 %v10420_v63  ;;  %v2197_v32 = vmax.f32 %v2069_v22, 0.0  ;;  %v18037_v57 = vld [vmem:[#allocation135_spill] sm:$0xff]  ;;  %v18038_v63 = vld [vmem:[#allocation177_spill] sm:$0xff]  ;;  %v3023_v22 = vpop.permute.xlu1 %3022 }
 0x2cf   : > { %5032 = vmatmul.mubr.f32.gmra.mrb[64].mxu0 %v3877_v49  ;;  %v2071_v60 = vsub.f32 1.0, %v1943_v26  ;;  %v3790_v13 = vmul.f32 %v14360_v48, %v18036_v20  ;;  %v1945_v19 = vand.u32 2147483647, %v1817_v41  ;;  %v2200_v61 = vmax.f32 %v2072_v18, 0.0  ;;  %v18039_v14 = vld [vmem:[#allocation167_spill] sm:$0xff]  ;;  %v18040_v41 = vld [vmem:[#allocation157_spill] sm:$0xff] }
 0x2d0   : > { %5036 = vmatprep.mubr.f32.mxu0 %v3880_v30  ;;  %v2074_v31 = vsub.f32 1.0, %v1946_v46  ;;  %v1948_v6 = vand.u32 2147483647, %v1820_v40  ;;  %v1822_v0 = vsub.f32 %v11717_v10, %v18037_v57  ;;  %v14387_v47 = vmax.f32 %v3409_v62, 0.0  ;;  %v18041_v62 = vld [vmem:[#allocation186_spill] sm:$0xff]  ;;  %v18042_v48 = vld [vmem:[#allocation23_spill] sm:$0xff] }
 0x2d1   : > { %v14389_v52 = vmax.f32 %v3410_v25, 0.0  ;;  %v3285_v21 = vand.u32 2147483647, %v3157_v16  ;;  %v3879_v49 = vmul.f32 %v18038_v63, %v2197_v32  ;;  %4325 = vmatmul.mubr.f32.gmra.mrb[70].mxu1 %v3787_v34  ;;  %v3286_v26 = vand.u32 2147483647, %v3158_v58  ;;  %v18043_v63 = vld [vmem:[#allocation102_spill] sm:$0xff] }
 0x2d2   : > { %v3882_v20 = vmul.f32 %v18039_v14, %v2200_v61  ;;  %4329 = vmatprep.mubr.f32.mxu1 %v3790_v13  ;;  %v3789_v18 = vmul.f32 %v14376_v15, %v18040_v41  ;;  %v1947_v46 = vand.u32 2147483647, %v1819_v59  ;;  %v2199_v40 = vmax.f32 %v2071_v60, 0.0  ;;  %v18046_v41 = vld [vmem:[#allocation188_spill] sm:$0xff] }
 0x2d3   : > { %5037 = vmatmul.mubr.f32.gmra.mrb[66].mxu0 %v3879_v49  ;;  %v2073_v30 = vsub.f32 1.0, %v1945_v19  ;;  %v3792_v25 = vmul.f32 %v18042_v48, %v18041_v62  ;;  %v1821_v16 = vsub.f32 %v11715_v9, %v18037_v57  ;;  %v2202_v34 = vmax.f32 %v2074_v31, 0.0  ;;  %v18045_v31 = vld [vmem:[#allocation24_spill] sm:$0xff] }
 0x2d4   : > { %5041 = vmatprep.mubr.f32.mxu0 %v3882_v20  ;;  %v2076_v58 = vsub.f32 1.0, %v1948_v6  ;;  %v1950_v32 = vand.u32 2147483647, %v1822_v0  ;;  %v1824_v14 = vsub.f32 %v11717_v10, %v18043_v63  ;;  %v3413_v13 = vsub.f32 1.0, %v3285_v21  ;;  %v18044_v20 = vld [vmem:[#allocation187_spill] sm:$0xff] }
 0x2d5   : > { %v3161_v61 = vsub.f32 %v11719_v11, %v3023_v22  ;;  %v3162_v59 = vsub.f32 %v11721_v12, %v3023_v22  ;;  %v3881_v60 = vmul.f32 %v14123_v3, %v2199_v40  ;;  %4330 = vmatmul.mubr.f32.gmra.mrb[72].mxu1 %v3789_v18  ;;  %v3414_v19 = vsub.f32 1.0, %v3286_v26  ;;  %v18047_v40 = vld [vmem:[#allocation141_spill] sm:$0xff] }
 0x2d6   : > { %v3884_v49 = vmul.f32 %v13625_v24, %v2202_v34  ;;  %4334 = vmatprep.mubr.f32.mxu1 %v3792_v25  ;;  %v2075_v57 = vsub.f32 1.0, %v1947_v46  ;;  %v3791_v6 = vmul.f32 %v18045_v31, %v18044_v20  ;;  %v2201_v0 = vmax.f32 %v2073_v30, 0.0  ;;  %v18051_v20 = vld [vmem:[#allocation11_spill] sm:$0xff] }
 0x2d7   : > { %5042 = vmatmul.mubr.f32.gmra.mrb[68].mxu0 %v3881_v60  ;;  %v3794_v21 = vmul.f32 %v14389_v52, %v18046_v41  ;;  %v1949_v62 = vand.u32 2147483647, %v1821_v16  ;;  %v1823_v22 = vsub.f32 %v11715_v9, %v18043_v63  ;;  %v2204_v3 = vmax.f32 %v2076_v58, 0.0  ;;  %v3031_v16 = vpop.permute.xlu1 %3030  ;;  %v18049_v58 = vld [vmem:[#allocation189_spill] sm:$0xff] }
 0x2d8   : > { %5046 = vmatprep.mubr.f32.mxu0 %v3884_v49  ;;  %v2078_v18 = vsub.f32 1.0, %v1950_v32  ;;  %v1952_v26 = vand.u32 2147483647, %v1824_v14  ;;  %v1826_v24 = vsub.f32 %v11717_v10, %v18047_v40  ;;  %v14413_v46 = vmax.f32 %v3413_v13, 0.0  ;;  %v18050_v13 = vld [vmem:[#allocation160_spill] sm:$0xff] }
 0x2d9   : > { %v14415_v25 = vand.u32 2147483647, %v3161_v61  ;;  %v3290_v34 = vand.u32 2147483647, %v3162_v59  ;;  %v3883_v30 = vmul.f32 %v13618_v54, %v2201_v0  ;;  %4335 = vmatmul.mubr.f32.gmra.mrb[74].mxu1 %v3791_v6  ;;  %v14418_v60 = vmax.f32 %v3414_v19, 0.0  ;;  %v18052_v0 = vld [vmem:[#allocation142_spill] sm:$0xff] }
 0x2da   : > { %v3886_v63 = vmul.f32 %v14138_v5, %v2204_v3  ;;  %v2203_v49 = vmax.f32 %v2075_v57, 0.0  ;;  %4339 = vmatprep.mubr.f32.mxu1 %v3794_v21  ;;  %v3793_v32 = vmul.f32 %v14387_v47, %v18049_v58  ;;  %v2077_v14 = vsub.f32 1.0, %v1949_v62 }
 0x2db   : > { %18048 = vst [vmem:[#allocation81_spill] sm:$0xff] %v14418_v60  ;;  %5047 = vmatmul.mubr.f32.gmra.mrb[70].mxu0 %v3883_v30  ;;  %v3796_v61 = vmul.f32 %v18051_v20, %v18050_v13  ;;  %v1951_v41 = vand.u32 2147483647, %v1823_v22  ;;  %v1825_v54 = vsub.f32 %v11715_v9, %v18047_v40  ;;  %v2206_v59 = vmax.f32 %v2078_v18, 0.0  ;;  %v18053_v40 = vld [vmem:[#allocation159_spill] sm:$0xff]  ;;  %v18054_v18 = vld [vmem:[#allocation56_spill] sm:$0xff] }
 0x2dc   : > { %5051 = vmatprep.mubr.f32.mxu0 %v3886_v63  ;;  %v2080_v19 = vsub.f32 1.0, %v1952_v26  ;;  %v1954_v6 = vand.u32 2147483647, %v1826_v24  ;;  %v1828_v5 = vsub.f32 %v11717_v10, %v18052_v0  ;;  %v3417_v57 = vsub.f32 1.0, %v14415_v25  ;;  %v18055_v24 = vld [vmem:[#allocation107_spill] sm:$0xff] }
 0x2dd   : > { %v3418_v21 = vsub.f32 1.0, %v3290_v34  ;;  %v3165_v3 = vsub.f32 %v11719_v11, %v3031_v16  ;;  %v3885_v62 = vmul.f32 %v14157_v2, %v2203_v49  ;;  %4340 = vmatmul.mubr.f32.gmra.mrb[76].mxu1 %v3793_v32  ;;  %v3166_v22 = vsub.f32 %v11721_v12, %v3031_v16  ;;  %v18056_v16 = vld [vmem:[#allocation191_spill] sm:$0xff] }
 0x2de   : > { %v3888_v30 = vmul.f32 %v13647_v28, %v2206_v59  ;;  %4344 = vmatprep.mubr.f32.mxu1 %v3796_v61  ;;  %v3795_v26 = vmul.f32 %v18054_v18, %v18053_v40  ;;  %v1830_v63 = vsub.f32 %v11717_v10, %v18055_v24  ;;  %v2205_v58 = vmax.f32 %v2077_v14, 0.0  ;;  %v18060_v18 = vld [vmem:[#allocation150_spill] sm:$0xff] }
 0x2df   : > { %5052 = vmatmul.mubr.f32.gmra.mrb[72].mxu0 %v3885_v62  ;;  %v2079_v25 = vsub.f32 1.0, %v1951_v41  ;;  %v1953_v34 = vand.u32 2147483647, %v1825_v54  ;;  %v1827_v13 = vsub.f32 %v11715_v9, %v18052_v0  ;;  %v2208_v2 = vmax.f32 %v2080_v19, 0.0  ;;  %v5258_v41 = vld [vmem:[%s17004_s3 + $0x10] sm:$0xff]  ;;  %v5259_v54 = vld [vmem:[%s17004_s3 + $0x18] sm:$0xff] }
 0x2e0   : > { %5056 = vmatprep.mubr.f32.mxu0 %v3888_v30  ;;  %v2082_v49 = vsub.f32 1.0, %v1954_v6  ;;  %v3798_v28 = vmul.f32 %v14418_v60, %v18056_v16  ;;  %v1956_v32 = vand.u32 2147483647, %v1828_v5  ;;  %v14442_v61 = vmax.f32 %v3418_v21, 0.0  ;;  %v3039_v6 = vpop.permute.xlu1 %3038  ;;  %v18057_v5 = vld [vmem:[#allocation193_spill] sm:$0xff]  ;;  %v18058_v30 = vld [vmem:[#allocation195_spill] sm:$0xff] }
 0x2e1   : > { %v3293_v59 = vand.u32 2147483647, %v3165_v3  ;;  %v3887_v40 = vmul.f32 %v13632_v36, %v2205_v58  ;;  %4345 = vmatmul.mubr.f32.gmra.mrb[78].mxu1 %v3795_v26  ;;  %v1829_v14 = vsub.f32 %v11715_v9, %v18055_v24  ;;  %v3294_v19 = vand.u32 2147483647, %v3166_v22  ;;  %v18059_v26 = vld [vmem:[#allocation84_spill] sm:$0xff] }
 0x2e2   : > { %v3890_v0 = vmul.f32 %v14163_v50, %v2208_v2  ;;  %4349 = vmatprep.mubr.f32.mxu1 %v3798_v28  ;;  %v3797_v36 = vmul.f32 %v14413_v46, %v18057_v5  ;;  %v1958_v21 = vand.u32 2147483647, %v1830_v63  ;;  %v2207_v3 = vmax.f32 %v2079_v25, 0.0 }
 0x2e3   : > { %5057 = vmatmul.mubr.f32.gmra.mrb[74].mxu0 %v3887_v40  ;;  %v2081_v62 = vsub.f32 1.0, %v1953_v34  ;;  %v3800_v24 = vmul.f32 %v18059_v26, %v18058_v30  ;;  %v1955_v58 = vand.u32 2147483647, %v1827_v13  ;;  %v2210_v16 = vmax.f32 %v2082_v49, 0.0 }
 0x2e4   : > { %5061 = vmatprep.mubr.f32.mxu0 %v3890_v0  ;;  %v2084_v60 = vsub.f32 1.0, %v1956_v32  ;;  %v1832_v22 = vsub.f32 %v11717_v10, %v18060_v18  ;;  %v10424_v20 = vpack.c.bf16 %v5259_v54, %v5258_v41  ;;  %v14460_v50 = vmax.f32 %v3417_v57, 0.0  ;;  %v18061_v57 = vld [vmem:[#allocation194_spill] sm:$0xff] }
 0x2e5   : > { %v3170_v2 = vsub.f32 %v11721_v12, %v3039_v6  ;;  %v3889_v63 = vmul.f32 %v14161_v8, %v2207_v3  ;;  %4350 = vmatmul.mubr.f32.gmra.mrb[80].mxu1 %v3797_v36  ;;  %v1957_v25 = vand.u32 2147483647, %v1829_v14  ;;  %v3422_v34 = vsub.f32 1.0, %v3294_v19  ;;  %v18062_v41 = vld [vmem:[#allocation166_spill] sm:$0xff] }
 0x2e6   : > { %v3892_v28 = vmul.f32 %v13730_v39, %v2210_v16  ;;  %4354 = vmatprep.mubr.f32.mxu1 %v3800_v24  ;;  %v2086_v13 = vsub.f32 1.0, %v1958_v21  ;;  %v1831_v49 = vsub.f32 %v11715_v9, %v18060_v18  ;;  %10425 = vmatprep.subr.bf16.mxu1 %v10424_v20  ;;  %v2209_v32 = vmax.f32 %v2081_v62, 0.0  ;;  %v18063_v12 = vld [vmem:[#allocation154_spill] sm:$0xff]  ;;  %v18064_v39 = vld [vmem:[#allocation163_spill] sm:$0xff] }
 0x2e7   : > { %5062 = vmatmul.mubr.f32.gmra.mrb[76].mxu0 %v3889_v63  ;;  %v2083_v40 = vsub.f32 1.0, %v1955_v58  ;;  %v3799_v54 = vmul.f32 %v18062_v41, %v18061_v57  ;;  %v1834_v8 = vsub.f32 %v11717_v10, %v18063_v12  ;;  %10427 = vmatpush3.bf16.msra.mxu1 %v10424_v20  ;;  %v3421_v14 = vsub.f32 1.0, %v3293_v59  ;;  %v18065_v58 = vld [vmem:[#allocation12_spill] sm:$0xff] }
 0x2e8   : > { %5066 = vmatprep.mubr.f32.mxu0 %v3892_v28  ;;  %v2212_v19 = vmax.f32 %v2084_v60, 0.0  ;;  %v3802_v0 = vmul.f32 %v14442_v61, %v18064_v39  ;;  %v1960_v5 = vand.u32 2147483647, %v1832_v22  ;;  %v3169_v18 = vsub.f32 %v11719_v11, %v3039_v6  ;;  %v18066_v22 = vld [vmem:[#allocation196_spill] sm:$0xff] }
 0x2e9   : > { %v3298_v36 = vand.u32 2147483647, %v3170_v2  ;;  %v3891_v21 = vmul.f32 %v13726_v38, %v2209_v32  ;;  %4355 = vmatmul.mubr.f32.gmra.mrb[82].mxu1 %v3799_v54  ;;  %v2085_v3 = vsub.f32 1.0, %v1957_v25  ;;  %v2214_v30 = vmax.f32 %v2086_v13, 0.0  ;;  %v18068_v63 = vld [vmem:[#allocation40_spill] sm:$0xff]  ;;  %v5260_v32 = vld [vmem:[%s17004_s3 + $0x20] sm:$0xff] }
 0x2ea   : > { %v3894_v62 = vmul.f32 %v14183_v1, %v2212_v19  ;;  %4359 = vmatprep.mubr.f32.mxu1 %v3802_v0  ;;  %v1959_v24 = vand.u32 2147483647, %v1831_v49  ;;  %v1833_v20 = vsub.f32 %v11715_v9, %v18063_v12  ;;  %v14478_v60 = vmax.f32 %v3422_v34, 0.0  ;;  %v18067_v1 = vld [vmem:[#allocation60_spill] sm:$0xff]  ;;  %v18071_v0 = vld [vmem:[#allocation201_spill] sm:$0xff] }
 0x2eb   : > { %5067 = vmatmul.mubr.f32.gmra.mrb[78].mxu0 %v3891_v21  ;;  %v2211_v59 = vmax.f32 %v2083_v40, 0.0  ;;  %v3801_v11 = vmul.f32 %v14460_v50, %v18065_v58  ;;  %v1962_v6 = vand.u32 2147483647, %v1834_v8  ;;  %v14482_v16 = vmax.f32 %v3421_v14, 0.0  ;;  %v5261_v40 = vld [vmem:[%s17004_s3 + $0x28] sm:$0xff]  ;;  %v18069_v14 = vld [vmem:[#allocation198_spill] sm:$0xff] }
 0x2ec   : > { %5071 = vmatprep.mubr.f32.mxu0 %v3894_v62  ;;  %v2088_v38 = vsub.f32 1.0, %v1960_v5  ;;  %v3804_v2 = vmul.f32 %v18067_v1, %v18066_v22  ;;  %v1836_v25 = vsub.f32 %v11717_v10, %v18068_v63  ;;  %v3297_v28 = vand.u32 2147483647, %v3169_v18  ;;  %v5262_v62 = vld [vmem:[%s17004_s3 + $0x30] sm:$0xff] }
 0x2ed   : > { %v3426_v13 = vsub.f32 1.0, %v3298_v36  ;;  %v3893_v34 = vmul.f32 %v14177_v55, %v2211_v59  ;;  %v2213_v49 = vmax.f32 %v2085_v3, 0.0  ;;  %4360 = vmatmul.mubr.f32.gmra.mrb[84].mxu1 %v3801_v11  ;;  %v3428_v57 = vsub.f32 1.0, %v14155_v51  ;;  %v18070_v55 = vld [vmem:[#allocation57_spill] sm:$0xff]  ;;  %v18073_v58 = vld [vmem:[#allocation200_spill] sm:$0xff] }
 0x2ee   : > { %v3896_v54 = vmul.f32 %v13765_v43, %v2214_v30  ;;  %4364 = vmatprep.mubr.f32.mxu1 %v3804_v2  ;;  %v2087_v12 = vsub.f32 1.0, %v1959_v24  ;;  %v1961_v8 = vand.u32 2147483647, %v1833_v20  ;;  %v3803_v19 = vmul.f32 %v18070_v55, %v18069_v14  ;;  %v18072_v51 = vld [vmem:[#allocation161_spill] sm:$0xff]  ;;  %v18076_v14 = vld [vmem:[#allocation16_spill] sm:$0xff] }
 0x2ef   : > { %5072 = vmatmul.mubr.f32.gmra.mrb[80].mxu0 %v3893_v34  ;;  %v2090_v39 = vsub.f32 1.0, %v1962_v6  ;;  %v3806_v5 = vmul.f32 %v14478_v60, %v18071_v0  ;;  %v1835_v18 = vsub.f32 %v11715_v9, %v18068_v63  ;;  %v2216_v36 = vmax.f32 %v2088_v38, 0.0  ;;  %v5263_v30 = vld [vmem:[%s17004_s3 + $0x38] sm:$0xff]  ;;  %v5264_v6 = vld [vmem:[%s17004_s3 + $0x40] sm:$0xff]  ;;  %v5265_v38 = vld [vmem:[%s17004_s3 + $0x48] sm:$0xff] }
 0x2f0   : > { %5076 = vmatprep.mubr.f32.mxu0 %v3896_v54  ;;  %v1964_v21 = vand.u32 2147483647, %v1836_v25  ;;  %v1838_v43 = vsub.f32 %v11717_v10, %v18072_v51  ;;  %v10428_v3 = vpack.c.bf16 %v5261_v40, %v5260_v32  ;;  %v3425_v24 = vsub.f32 1.0, %v3297_v28  ;;  %v18074_v25 = vld [vmem:[#allocation165_spill] sm:$0xff] }
 0x2f1   : > { %v14511_v20 = vmax.f32 %v3426_v13, 0.0  ;;  %v3895_v59 = vmul.f32 %v13749_v33, %v2213_v49  ;;  %4365 = vmatmul.mubr.f32.gmra.mrb[86].mxu1 %v3803_v19  ;;  %v3805_v11 = vmul.f32 %v14482_v16, %v18073_v58  ;;  %v3898_v22 = vmul.f32 %v14195_v29, %v2216_v36  ;;  %v18075_v28 = vld [vmem:[#allocation33_spill] sm:$0xff] }
 0x2f2   : > { %v2215_v2 = vmax.f32 %v2087_v12, 0.0  ;;  %4369 = vmatprep.mubr.f32.mxu1 %v3806_v5  ;;  %v2089_v63 = vsub.f32 1.0, %v1961_v8  ;;  %v3808_v33 = vmul.f32 %v18075_v28, %v18074_v25  ;;  %10429 = vmatprep.subr.bf16.mxu1 %v10428_v3  ;;  %v2218_v13 = vmax.f32 %v2090_v39, 0.0  ;;  %v5266_v5 = vld [vmem:[%s17004_s3 + $0x50] sm:$0xff] }
 0x2f3   : > { %5077 = vmatmul.mubr.f32.gmra.mrb[82].mxu0 %v3895_v59  ;;  %v1963_v34 = vand.u32 2147483647, %v1835_v18  ;;  %v1837_v49 = vsub.f32 %v11715_v9, %v18072_v51  ;;  %10431 = vmatpush3.bf16.msra.mxu1 %v10428_v3  ;;  %v10432_v32 = vpack.c.bf16 %v5263_v30, %v5262_v62  ;;  %v2092_v40 = vsub.f32 1.0, %v1964_v21  ;;  %v5267_v18 = vld [vmem:[%s17004_s3 + $0x58] sm:$0xff]  ;;  %v18080_v62 = vld [vmem:[#allocation202_spill] sm:$0xff] }
 0x2f4   : > { %5081 = vmatprep.mubr.f32.mxu0 %v3898_v22  ;;  %v1966_v54 = vand.u32 2147483647, %v1838_v43  ;;  %v1840_v29 = vsub.f32 %v11717_v10, %v18076_v14  ;;  %v10436_v12 = vpack.c.bf16 %v5265_v38, %v5264_v6  ;;  %v3427_v8 = vsub.f32 1.0, %v14130_v45  ;;  %v18077_v45 = vld [vmem:[#allocation164_spill] sm:$0xff]  ;;  %v18079_v43 = vld [vmem:[#allocation45_spill] sm:$0xff] }
 0x2f5   : > { %v14530_v19 = vmax.f32 %v3428_v57, 0.0  ;;  %v14532_v0 = vmax.f32 %v3425_v24, 0.0  ;;  %v3897_v39 = vmul.f32 %v14189_v35, %v2215_v2  ;;  %4370 = vmatmul.mubr.f32.gmra.mrb[88].mxu1 %v3805_v11  ;;  %10433 = vmatprep.subr.bf16.mxu1 %v10432_v32  ;;  %v3900_v36 = vmul.f32 %v13799_v17, %v2218_v13  ;;  %v18078_v57 = vld [vmem:[#allocation19_spill] sm:$0xff] }
 0x2f6   : > { %v2217_v21 = vmax.f32 %v2089_v63, 0.0  ;;  %4374 = vmatprep.mubr.f32.mxu1 %v3808_v33  ;;  %v3807_v51 = vmul.f32 %v18078_v57, %v18077_v45  ;;  %v1842_v35 = vsub.f32 %v11717_v10, %v18079_v43  ;;  %v2091_v3 = vsub.f32 1.0, %v1963_v34  ;;  %v18081_v63 = vld [vmem:[#allocation59_spill] sm:$0xff] }
 0x2f7   : > { %5082 = vmatmul.mubr.f32.gmra.mrb[84].mxu0 %v3897_v39  ;;  %v3810_v30 = vmul.f32 %v14511_v20, %v18080_v62  ;;  %v1965_v24 = vand.u32 2147483647, %v1837_v49  ;;  %v1839_v59 = vsub.f32 %v11715_v9, %v18076_v14  ;;  %10435 = vmatpush3.bf16.msra.mxu1 %v10432_v32  ;;  %v2220_v17 = vmax.f32 %v2092_v40, 0.0  ;;  %v18082_v49 = vld [vmem:[#allocation26_spill] sm:$0xff]  ;;  %v18083_v14 = vld [vmem:[#allocation204_spill] sm:$0xff] }
 0x2f8   : > { %5086 = vmatprep.mubr.f32.mxu0 %v3900_v36  ;;  %v2094_v58 = vsub.f32 1.0, %v1966_v54  ;;  %v1968_v11 = vand.u32 2147483647, %v1840_v29  ;;  %10437 = vmatprep.subr.bf16.mxu1 %v10436_v12  ;;  %v10440_v6 = vpack.c.bf16 %v5267_v18, %v5266_v5  ;;  %v3899_v38 = vmul.f32 %v17991_v44, %v2217_v21  ;;  %v18085_v36 = vld [vmem:[#allocation147_spill] sm:$0xff] }
 0x2f9   : > { %4375 = vmatmul.mubr.f32.gmra.mrb[90].mxu1 %v3807_v51  ;;  %v1841_v22 = vsub.f32 %v11715_v9, %v18079_v43  ;;  %v14553_v2 = vmax.f32 %v3427_v8, 0.0  ;;  %v3902_v25 = vmul.f32 %v18081_v63, %v2220_v17  ;;  %v1970_v33 = vand.u32 2147483647, %v1842_v35  ;;  %v18084_v8 = vld [vmem:[#allocation169_spill] sm:$0xff]  ;;  %v18086_v43 = vld [vmem:[#allocation82_spill] sm:$0xff] }
 0x2fa   : > { %4379 = vmatprep.mubr.f32.mxu1 %v3810_v30  ;;  %v2219_v13 = vmax.f32 %v2091_v3, 0.0  ;;  %v2093_v34 = vsub.f32 1.0, %v1965_v24  ;;  %v3809_v32 = vmul.f32 %v14532_v0, %v18082_v49  ;;  %v1967_v40 = vand.u32 2147483647, %v1839_v59  ;;  %v18089_v49 = vld [vmem:[#allocation52_spill] sm:$0xff] }
 0x2fb   : > { %5087 = vmatmul.mubr.f32.gmra.mrb[86].mxu0 %v3899_v38  ;;  %10439 = vmatpush3.bf16.msra.mxu1 %v10436_v12  ;;  %v2222_v44 = vmax.f32 %v2094_v58, 0.0  ;;  %v2096_v54 = vsub.f32 1.0, %v1968_v11  ;;  %v3812_v29 = vmul.f32 %v14530_v19, %v18083_v14  ;;  %v1844_v39 = vsub.f32 %v11717_v10, %v18084_v8 }
 0x2fc   : > { %5091 = vmatprep.mubr.f32.mxu0 %v3902_v25  ;;  %10441 = vmatprep.subr.bf16.mxu1 %v10440_v6  ;;  %v3901_v5 = vmul.f32 %v14221_v53, %v2219_v13  ;;  %v1969_v18 = vand.u32 2147483647, %v1841_v22  ;;  %v2098_v45 = vsub.f32 1.0, %v1970_v33  ;;  %v2221_v12 = vmax.f32 %v2093_v34, 0.0  ;;  %v18087_v53 = vld [vmem:[#allocation171_spill] sm:$0xff]  ;;  %v18088_v33 = vld [vmem:[#allocation117_spill] sm:$0xff] }
 0x2fd   : > { %4380 = vmatmul.mubr.f32.gmra.mrb[92].mxu1 %v3809_v32  ;;  %v3904_v21 = vmul.f32 %v18085_v36, %v2222_v44  ;;  %v2095_v51 = vsub.f32 1.0, %v1967_v40  ;;  %v3811_v35 = vmul.f32 %v14553_v2, %v18086_v43  ;;  %v1843_v3 = vsub.f32 %v11715_v9, %v18084_v8  ;;  %v18090_v40 = vld [vmem:[#allocation22_spill] sm:$0xff]  ;;  %v18092_v36 = vld [vmem:[#allocation87_spill] sm:$0xff] }
 0x2fe   : > { %4384 = vmatprep.mubr.f32.mxu1 %v3812_v29  ;;  %v2224_v62 = vmax.f32 %v2096_v54, 0.0  ;;  %v1972_v30 = vand.u32 2147483647, %v1844_v39  ;;  %v1846_v24 = vsub.f32 %v11717_v10, %v18087_v53  ;;  %v3903_v59 = vmul.f32 %v18002_v42, %v2221_v12 }
 0x2ff   : > { %5092 = vmatmul.mubr.f32.gmra.mrb[88].mxu0 %v3901_v5  ;;  %10443 = vmatpush3.bf16.msra.mxu1 %v10440_v6  ;;  %v2097_v17 = vsub.f32 1.0, %v1969_v18  ;;  %v2226_v11 = vmax.f32 %v2098_v45, 0.0  ;;  %v2223_v38 = vmax.f32 %v2095_v51, 0.0  ;;  %v1971_v22 = vand.u32 2147483647, %v1843_v3  ;;  %v18091_v5 = vld [vmem:[#allocation51_spill] sm:$0xff] }
 0x300   : > { %5096 = vmatprep.mubr.f32.mxu0 %v3904_v21  ;;  %v3906_v58 = vmul.f32 %v14273_v23, %v2224_v62  ;;  %v1845_v63 = vsub.f32 %v11715_v9, %v18087_v53  ;;  %v2100_v6 = vsub.f32 1.0, %v1972_v30  ;;  %v1974_v25 = vand.u32 2147483647, %v1846_v24  ;;  %v18093_v62 = vld [vmem:[#allocation176_spill] sm:$0xff] }
 0x301   : > { %4385 = vmatmul.mubr.f32.gmra.mrb[94].mxu1 %v3811_v35  ;;  %v1848_v13 = vsub.f32 %v11717_v10, %v18088_v33  ;;  %v3905_v34 = vmul.f32 %v14262_v37, %v2223_v38  ;;  %v2225_v42 = vmax.f32 %v2097_v17, 0.0  ;;  %v3908_v32 = vmul.f32 %v18089_v49, %v2226_v11  ;;  %v18094_v11 = vld [vmem:[#allocation126_spill] sm:$0xff] }
 0x302   : > { %v1850_v23 = vsub.f32 %v11717_v10, %v18090_v40  ;;  %v2099_v44 = vsub.f32 1.0, %v1971_v22  ;;  %v1973_v54 = vand.u32 2147483647, %v1845_v63  ;;  %v1847_v14 = vsub.f32 %v11715_v9, %v18088_v33 }
 0x303   : > { %5097 = vmatmul.mubr.f32.gmra.mrb[90].mxu0 %v3903_v59  ;;  %v2228_v29 = vmax.f32 %v2100_v6, 0.0  ;;  %v2102_v8 = vsub.f32 1.0, %v1974_v25  ;;  %v1976_v39 = vand.u32 2147483647, %v1848_v13  ;;  %v3907_v18 = vmul.f32 %v18091_v5, %v2225_v42 }
 0x304   : > { %5101 = vmatprep.mubr.f32.mxu0 %v3906_v58  ;;  %v1849_v37 = vsub.f32 %v11715_v9, %v18090_v40  ;;  %v1978_v45 = vand.u32 2147483647, %v1850_v23  ;;  %v2227_v12 = vmax.f32 %v2099_v44, 0.0  ;;  %v2101_v51 = vsub.f32 1.0, %v1973_v54  ;;  %v18096_v23 = vld [vmem:[#allocation32_spill] sm:$0xff] }
 0x305   : > { %v3910_v21 = vmul.f32 %v18092_v36, %v2228_v29  ;;  %v1975_v43 = vand.u32 2147483647, %v1847_v14  ;;  %v2230_v35 = vmax.f32 %v2102_v8, 0.0  ;;  %v2104_v3 = vsub.f32 1.0, %v1976_v39 }
 0x306   : > { %v1852_v30 = vsub.f32 %v11717_v10, %v18093_v62  ;;  %v3909_v53 = vmul.f32 %v14297_v27, %v2227_v12  ;;  %v1977_v24 = vand.u32 2147483647, %v1849_v37  ;;  %v2106_v58 = vsub.f32 1.0, %v1978_v45  ;;  %v18097_v37 = vld [vmem:[#allocation183_spill] sm:$0xff] }
 0x307   : > { %5102 = vmatmul.mubr.f32.gmra.mrb[92].mxu0 %v3905_v34  ;;  %v3912_v17 = vmul.f32 %v18020_v56, %v2230_v35  ;;  %v1854_v38 = vsub.f32 %v11717_v10, %v18094_v11  ;;  %v2229_v63 = vmax.f32 %v2101_v51, 0.0  ;;  %v2103_v6 = vsub.f32 1.0, %v1975_v43  ;;  %v18095_v56 = vld [vmem:[#allocation31_spill] sm:$0xff] }
 0x308   : > { %5106 = vmatprep.mubr.f32.mxu0 %v3908_v32  ;;  %v1851_v25 = vsub.f32 %v11715_v9, %v18093_v62  ;;  %v2232_v27 = vmax.f32 %v2104_v3, 0.0  ;;  %v1980_v13 = vand.u32 2147483647, %v1852_v30  ;;  %v2105_v49 = vsub.f32 1.0, %v1977_v24  ;;  %v18098_v62 = vld [vmem:[#allocation185_spill] sm:$0xff] }
 0x309   : > { %v3911_v42 = vmul.f32 %v18095_v56, %v2229_v63  ;;  %v1853_v32 = vsub.f32 %v11715_v9, %v18094_v11  ;;  %v2234_v54 = vmax.f32 %v2106_v58, 0.0  ;;  %v1982_v14 = vand.u32 2147483647, %v1854_v38  ;;  %v18099_v38 = vld [vmem:[#allocation53_spill] sm:$0xff] }
 0x30a   : > { %v3914_v44 = vmul.f32 %v18096_v23, %v2232_v27  ;;  %v2231_v8 = vmax.f32 %v2103_v6, 0.0  ;;  %v1979_v39 = vand.u32 2147483647, %v1851_v25  ;;  %v1856_v36 = vsub.f32 %v11717_v10, %v18097_v37  ;;  %v18100_v25 = vld [vmem:[#allocation62_spill] sm:$0xff] }
 0x30b   : > { %5107 = vmatmul.mubr.f32.gmra.mrb[94].mxu0 %v3907_v18  ;;  %v2108_v18 = vsub.f32 1.0, %v1980_v13  ;;  %v2233_v12 = vmax.f32 %v2105_v49, 0.0  ;;  %v1981_v51 = vand.u32 2147483647, %v1853_v32  ;;  %v3916_v35 = vmul.f32 %v18030_v7, %v2234_v54  ;;  %v18101_v23 = vld [vmem:[#allocation130_spill] sm:$0xff] }
 0x30c   : > { %5111 = vmatprep.mubr.f32.mxu0 %v3910_v21  ;;  %v3913_v45 = vmul.f32 %v14314_v4, %v2231_v8  ;;  %v2110_v3 = vsub.f32 1.0, %v1982_v14  ;;  %v1858_v30 = vsub.f32 %v11717_v10, %v18098_v62  ;;  %v2107_v24 = vsub.f32 1.0, %v1979_v39 }
 0x30d   : > { %v4873_v59 = vpop.f32.mrb[0].mxu0  ;;  %v2236_v4 = vmax.f32 %v2108_v18, 0.0  ;;  %v1984_v58 = vand.u32 2147483647, %v1856_v36  ;;  %v3915_v7 = vmul.f32 %v18099_v38, %v2233_v12  ;;  %v1857_v63 = vsub.f32 %v11715_v9, %v18098_v62  ;;  %v18102_v36 = vld [vmem:[#allocation190_spill] sm:$0xff] }
 0x30e   : > { %v4875_v22 = vpop.f32.mrb[1].mxu0  ;;  %9956 = vmatprep.mubr.msk.f32.mxu1 %vm5268_vm0, %v4873_v59  ;;  %v1855_v59 = vsub.f32 %v11715_v9, %v18097_v37  ;;  %v2238_v13 = vmax.f32 %v2110_v3, 0.0 }
 0x30f   : > { %5112 = vmatmul.mubr.f32.gmra.mrb[96].mxu0 %v3909_v53  ;;  %v14595_v33 = vpop.f32.mrb[2].mxu1  ;;  %v2109_v22 = vsub.f32 1.0, %v1981_v51  ;;  %v3918_v27 = vmul.f32 %v18100_v25, %v2236_v4  ;;  %v1985_v8 = vand.u32 2147483647, %v1857_v63  ;;  %v1859_v51 = vsub.f32 %v11715_v9, %v18101_v23 }
 0x310   : > { %5116 = vmatprep.mubr.f32.mxu0 %v3912_v17  ;;  %v4158_v34 = vpop.f32.mrb[3].mxu1  ;;  %v1983_v49 = vand.u32 2147483647, %v1855_v59  ;;  %v3920_v18 = vmul.f32 %v18042_v48, %v2238_v13  ;;  %v18104_v13 = vld [vmem:[#allocation11_spill] sm:$0xff] }
 0x311   : > { %v4878_v40 = vpop.f32.mrb[2].mxu0  ;;  %v1986_v34 = vand.u32 2147483647, %v1858_v30  ;;  %v2113_v62 = vsub.f32 1.0, %v1985_v8  ;;  %v1861_v30 = vsub.f32 %v11715_v9, %v18102_v36  ;;  %v1987_v38 = vand.u32 2147483647, %v1859_v51 }
 0x312   : > { %v4880_v29 = vpop.f32.mrb[3].mxu0  ;;  %9957 = vmatmul.mubr.msk.f32.vlgmr.msra.gmra.mrb[96].mxu1 %vm5268_vm0, %v4878_v40  ;;  %v2112_v40 = vsub.f32 1.0, %v1984_v58  ;;  %v2111_v12 = vsub.f32 1.0, %v1983_v49  ;;  %v18106_v8 = vld [vmem:[#allocation56_spill] sm:$0xff] }
 0x313   : > { %5117 = vmatmul.mubr.f32.gmra.mrb[98].mxu0 %v3911_v42  ;;  %v14602_v5 = vpop.f32.mrb[4].mxu1  ;;  %v2235_v42 = vmax.f32 %v2107_v24, 0.0  ;;  %v2237_v29 = vmax.f32 %v2109_v22, 0.0  ;;  %v2114_v37 = vsub.f32 1.0, %v1986_v34 }
 0x314   : > { %5121 = vmatprep.mubr.f32.mxu0 %v3914_v44  ;;  %v4163_v21 = vpop.f32.mrb[5].mxu1  ;;  %v1860_v44 = vsub.f32 %v11717_v10, %v18101_v23 }
 0x315   : > { %v4883_v43 = vpop.f32.mrb[4].mxu0  ;;  %v3917_v14 = vmul.f32 %v14376_v15, %v2235_v42  ;;  %v1862_v21 = vsub.f32 %v11717_v10, %v18102_v36  ;;  %v2240_v15 = vmax.f32 %v2112_v40, 0.0  ;;  %v3919_v48 = vmul.f32 %v18045_v31, %v2237_v29  ;;  %v18103_v31 = vld [vmem:[#allocation192_spill] sm:$0xff]  ;;  %v18105_v42 = vld [vmem:[#allocation133_spill] sm:$0xff] }
 0x316   : > { %v4885_v53 = vpop.f32.mrb[5].mxu0  ;;  %9959 = vmatprep.mubr.msk.f32.mxu1 %vm5268_vm0, %v4883_v43  ;;  %v2242_v59 = vmax.f32 %v2114_v37, 0.0  ;;  %v1864_v63 = vsub.f32 %v11717_v10, %v18103_v31  ;;  %v1866_v49 = vsub.f32 %v11717_v10, %v18105_v42  ;;  %v2115_v40 = vsub.f32 1.0, %v1987_v38 }
 0x317   : > { %5122 = vmatmul.mubr.f32.gmra.mrb[100].mxu0 %v3913_v45  ;;  %v14613_v17 = vpop.f32.mrb[6].mxu1  ;;  %v3922_v24 = vmul.f32 %v14389_v52, %v2240_v15  ;;  %v1990_v4 = vand.u32 2147483647, %v1862_v21  ;;  %v1989_v52 = vand.u32 2147483647, %v1861_v30  ;;  %v1863_v23 = vsub.f32 %v11715_v9, %v18103_v31  ;;  %v18107_v21 = vld [vmem:[#allocation81_spill] sm:$0xff] }
 0x318   : > { %5126 = vmatprep.mubr.f32.mxu0 %v3916_v35  ;;  %v4168_v11 = vpop.f32.mrb[7].mxu1  ;;  %v1988_v35 = vand.u32 2147483647, %v1860_v44  ;;  %v3924_v34 = vmul.f32 %v18104_v13, %v2242_v59  ;;  %v1865_v36 = vsub.f32 %v11715_v9, %v18105_v42  ;;  %v1994_v51 = vand.u32 2147483647, %v1866_v49  ;;  %v18109_v31 = vld [vmem:[#allocation199_spill] sm:$0xff] }
 0x319   : > { %v4888_v6 = vpop.f32.mrb[6].mxu0  ;;  %v2239_v11 = vmax.f32 %v2111_v12, 0.0  ;;  %v2243_v15 = vmax.f32 %v2115_v40, 0.0 }
 0x31a   : > { %v4890_v56 = vpop.f32.mrb[7].mxu0  ;;  %9960 = vmatmul.mubr.msk.f32.gmra.mrb[98].mxu1 %vm5268_vm0, %v4888_v6  ;;  %v2116_v22 = vsub.f32 1.0, %v1988_v35  ;;  %v1991_v35 = vand.u32 2147483647, %v1863_v23 }
 0x31b   : > { %5127 = vmatmul.mubr.f32.gmra.mrb[102].mxu0 %v3915_v7  ;;  %v14620_v32 = vpop.f32.mrb[8].mxu1  ;;  %v3921_v25 = vmul.f32 %v14387_v47, %v2239_v11  ;;  %v2118_v56 = vsub.f32 1.0, %v1990_v4  ;;  %v3925_v59 = vmul.f32 %v14413_v46, %v2243_v15 }
 0x31c   : > { %5131 = vmatprep.mubr.f32.mxu0 %v3918_v27  ;;  %v4173_v54 = vpop.f32.mrb[9].mxu1  ;;  %v2241_v27 = vmax.f32 %v2113_v62, 0.0  ;;  %v18108_v62 = vld [vmem:[#allocation197_spill] sm:$0xff] }
 0x31d   : > { %v4893_v39 = vpop.f32.mrb[8].mxu0  ;;  %v2244_v54 = vmax.f32 %v2116_v22, 0.0  ;;  %v2246_v12 = vmax.f32 %v2118_v56, 0.0  ;;  %v1868_v30 = vsub.f32 %v11717_v10, %v18108_v62  ;;  %v2122_v22 = vsub.f32 1.0, %v1994_v51 }
 0x31e   : > { %v4895_v45 = vpop.f32.mrb[9].mxu0  ;;  %9962 = vmatprep.mubr.msk.f32.mxu1 %vm5268_vm0, %v4893_v39  ;;  %v3923_v39 = vmul.f32 %v18106_v8, %v2241_v27  ;;  %v18110_v8 = vld [vmem:[#allocation138_spill] sm:$0xff] }
 0x31f   : > { %5132 = vmatmul.mubr.f32.gmra.mrb[104].mxu0 %v3917_v14  ;;  %v14631_v43 = vpop.f32.mrb[10].mxu1  ;;  %v1992_v14 = vand.u32 2147483647, %v1864_v63  ;;  %v3926_v45 = vmul.f32 %v18107_v21, %v2244_v54  ;;  %v3928_v38 = vmul.f32 %v18059_v26, %v2246_v12  ;;  %v1870_v63 = vsub.f32 %v11717_v10, %v18109_v31  ;;  %v18111_v12 = vld [vmem:[#allocation203_spill] sm:$0xff] }
 0x320   : > { %5136 = vmatprep.mubr.f32.mxu0 %v3920_v18  ;;  %v4178_v3 = vpop.f32.mrb[11].mxu1  ;;  %v2117_v18 = vsub.f32 1.0, %v1989_v52  ;;  %v1996_v52 = vand.u32 2147483647, %v1868_v30  ;;  %v1869_v26 = vsub.f32 %v11715_v9, %v18109_v31  ;;  %v2250_v49 = vmax.f32 %v2122_v22, 0.0 }
 0x321   : > { %v4898_v53 = vpop.f32.mrb[10].mxu0  ;;  %v1998_v40 = vand.u32 2147483647, %v1870_v63  ;;  %v1874_v51 = vsub.f32 %v11717_v10, %v18111_v12 }
 0x322   : > { %v4900_v58 = vpop.f32.mrb[11].mxu0  ;;  %9963 = vmatmul.mubr.msk.f32.gmra.mrb[100].mxu1 %vm5268_vm0, %v4898_v53  ;;  %v2245_v4 = vmax.f32 %v2117_v18, 0.0  ;;  %v1997_v21 = vand.u32 2147483647, %v1869_v26 }
 0x323   : > { %5137 = vmatmul.mubr.f32.gmra.mrb[106].mxu0 %v3919_v48  ;;  %v14638_v7 = vpop.f32.mrb[12].mxu1  ;;  %v2120_v48 = vsub.f32 1.0, %v1992_v14  ;;  %v1993_v58 = vand.u32 2147483647, %v1865_v36 }
 0x324   : > { %5141 = vmatprep.mubr.f32.mxu0 %v3922_v24  ;;  %v4183_v6 = vpop.f32.mrb[13].mxu1 }
 0x325   : > { %v2119_v6 = vsub.f32 1.0, %v1991_v35  ;;  %v2248_v46 = vmax.f32 %v2120_v48, 0.0  ;;  %v2121_v56 = vsub.f32 1.0, %v1993_v58  ;;  %v1871_v35 = vsub.f32 %v11715_v9, %v18110_v8 }
 0x327   : > { %5142 = vmatmul.mubr.f32.gmra.mrb[108].mxu0 %v3921_v25  ;;  %v14648_v44 = vpop.f32.mrb[14].mxu1  ;;  %v1867_v25 = vsub.f32 %v11715_v9, %v18108_v62  ;;  %v3930_v42 = vmul.f32 %v14442_v61, %v2248_v46  ;;  %v2247_v23 = vmax.f32 %v2119_v6, 0.0  ;;  %v3932_v61 = vmul.f32 %v18067_v1, %v2250_v49 }
 0x328   : > { %5146 = vmatprep.mubr.f32.mxu0 %v3924_v34  ;;  %v4903_v29 = vpop.f32.mrb[12].mxu0  ;;  %v4188_v47 = vpop.f32.mrb[15].mxu1  ;;  %v3927_v34 = vmul.f32 %v18062_v41, %v2245_v4  ;;  %v1999_v22 = vand.u32 2147483647, %v1871_v35 }
 0x329   : > { %v4905_v37 = vpop.f32.mrb[13].mxu0  ;;  %9965 = vmatprep.mubr.msk.f32.mxu1 %vm5268_vm0, %v4903_v29  ;;  %v1995_v54 = vand.u32 2147483647, %v1867_v25  ;;  %v2124_v29 = vsub.f32 1.0, %v1996_v52  ;;  %v3929_v18 = vmul.f32 %v14460_v50, %v2247_v23 }
 0x32a   : > { %v2249_v37 = vmax.f32 %v2121_v56, 0.0 }
 0x32b   : > { %5147 = vmatmul.mubr.f32.gmra.mrb[110].mxu0 %v3923_v39  ;;  %v14655_v3 = vpop.f32.mrb[16].mxu1  ;;  %v1872_v39 = vsub.f32 %v11717_v10, %v18110_v8  ;;  %v2123_v15 = vsub.f32 1.0, %v1995_v54  ;;  %v2252_v48 = vmax.f32 %v2124_v29, 0.0  ;;  %v1873_v10 = vsub.f32 %v11715_v9, %v18111_v12 }
 0x32c   : > { %5151 = vmatprep.mubr.f32.mxu0 %v3926_v45  ;;  %v4908_v53 = vpop.f32.mrb[14].mxu0  ;;  %v4193_v24 = vpop.f32.mrb[17].mxu1  ;;  %v2126_v45 = vsub.f32 1.0, %v1998_v40  ;;  %v2127_v9 = vsub.f32 1.0, %v1999_v22 }
 0x32d   : > { %v4910_v11 = vpop.f32.mrb[15].mxu0  ;;  %9966 = vmatmul.mubr.msk.f32.gmra.mrb[102].mxu1 %vm5268_vm0, %v4908_v53  ;;  %v2000_v62 = vand.u32 2147483647, %v1872_v39  ;;  %v3931_v53 = vmul.f32 %v18070_v55, %v2249_v37  ;;  %v2125_v24 = vsub.f32 1.0, %v1997_v21  ;;  %v3934_v4 = vmul.f32 %v14478_v60, %v2252_v48 }
 0x32e   : > { %v2254_v58 = vmax.f32 %v2126_v45, 0.0  ;;  %v2002_v11 = vand.u32 2147483647, %v1874_v51  ;;  %v2001_v6 = vand.u32 2147483647, %v1873_v10 }
 0x32f   : > { %5152 = vmatmul.mubr.f32.gmra.mrb[112].mxu0 %v3925_v59  ;;  %v14666_v27 = vpop.f32.mrb[18].mxu1  ;;  %v2128_v31 = vsub.f32 1.0, %v2000_v62  ;;  %v2253_v55 = vmax.f32 %v2125_v24, 0.0 }
 0x330   : > { %5156 = vmatprep.mubr.f32.mxu0 %v3928_v38  ;;  %v4198_v13 = vpop.f32.mrb[19].mxu1  ;;  %v2251_v38 = vmax.f32 %v2123_v15, 0.0  ;;  %v3936_v25 = vmul.f32 %v18075_v28, %v2254_v58  ;;  %v2130_v46 = vsub.f32 1.0, %v2002_v11  ;;  %v2255_v28 = vmax.f32 %v2127_v9, 0.0 }
 0x331   : > { %v2256_v60 = vmax.f32 %v2128_v31, 0.0  ;;  %v3935_v56 = vmul.f32 %v18078_v57, %v2253_v55 }
 0x332   : > { %v3933_v63 = vmul.f32 %v14482_v16, %v2251_v38  ;;  %v2258_v49 = vmax.f32 %v2130_v46, 0.0  ;;  %v3937_v54 = vmul.f32 %v14532_v0, %v2255_v28 }
 0x333   : > { %5157 = vmatmul.mubr.f32.gmra.mrb[114].mxu0 %v3927_v34  ;;  %v14672_v14 = vpop.f32.mrb[20].mxu1  ;;  %v3938_v16 = vmul.f32 %v14511_v20, %v2256_v60 }
 0x334   : > { %5161 = vmatprep.mubr.f32.mxu0 %v3930_v42  ;;  %v4913_v47 = vpop.f32.mrb[16].mxu0  ;;  %v4203_v41 = vpop.f32.mrb[21].mxu1  ;;  %v2129_v42 = vsub.f32 1.0, %v2001_v6  ;;  %v3940_v8 = vmul.f32 %v14530_v19, %v2258_v49 }
 0x335   : > { %v4915_v36 = vpop.f32.mrb[17].mxu0  ;;  %9968 = vmatprep.mubr.msk.f32.mxu1 %vm5268_vm0, %v4913_v47 }
 0x336   : > { %v2257_v29 = vmax.f32 %v2129_v42, 0.0 }
 0x337   : > { %5162 = vmatmul.mubr.f32.gmra.mrb[116].mxu0 %v3929_v18 }
 0x338   : > { %5166 = vmatprep.mubr.f32.mxu0 %v3932_v61  ;;  %v4918_v50 = vpop.f32.mrb[18].mxu0  ;;  %v14683_v30 = vpop.f32.mrb[22].mxu1  ;;  %v3939_v20 = vmul.f32 %v14553_v2, %v2257_v29 }
 0x339   : > { %v4920_v59 = vpop.f32.mrb[19].mxu0  ;;  %9969 = vmatmul.mubr.msk.f32.gmra.mrb[104].mxu1 %vm5268_vm0, %v4918_v50  ;;  %v4208_v1 = vpop.f32.mrb[23].mxu1  ;;  %v18112_v50 = vld [vmem:[#allocation36_spill] sm:$0xff] }
 0x33b   : > { %5167 = vmatmul.mubr.f32.gmra.mrb[118].mxu0 %v3931_v53 }
 0x33c   : > { %5171 = vmatprep.mubr.f32.mxu0 %v3934_v4 }
 0x33e   : > { %v14692_v52 = vpop.f32.mrb[24].mxu1 }
 0x33f   : > { %5172 = vmatmul.mubr.f32.gmra.mrb[120].mxu0 %v3933_v63  ;;  %v4213_v13 = vpop.f32.mrb[25].mxu1  ;;  %v4923_v34 = vpop.f32.mrb[20].mxu0 }
 0x340   : > { %5176 = vmatprep.mubr.f32.mxu0 %v3936_v25  ;;  %v4925_v26 = vpop.f32.mrb[21].mxu0  ;;  %9971 = vmatprep.mubr.msk.f32.mxu1 %vm5268_vm0, %v4923_v34 }
 0x343   : > { %5177 = vmatmul.mubr.f32.gmra.mrb[122].mxu0 %v3935_v56 }
 0x344   : > { %5181 = vmatprep.mubr.f32.mxu0 %v3938_v16  ;;  %v4928_v40 = vpop.f32.mrb[22].mxu0  ;;  %v14697_v23 = vpop.f32.mrb[26].mxu1 }
 0x345   : > { %v4930_v47 = vpop.f32.mrb[23].mxu0  ;;  %9972 = vmatmul.mubr.msk.f32.gmra.mrb[106].mxu1 %vm5268_vm0, %v4928_v40  ;;  %v4218_v57 = vpop.f32.mrb[27].mxu1 }
 0x347   : > { %5182 = vmatmul.mubr.f32.gmra.mrb[124].mxu0 %v3937_v54 }
 0x348   : > { %5186 = vmatprep.mubr.f32.mxu0 %v3940_v8  ;;  %v5911_v8 = vld [vmem:[%s17005_s4 + $0x8] sm:$0xff] }
 0x349   : > { %v4933_v39 = vpop.f32.mrb[24].mxu0 }
 0x34a   : > { %v4935_v41 = vpop.f32.mrb[25].mxu0  ;;  %9974 = vmatprep.mubr.msk.f32.mxu1 %vm5268_vm0, %v4933_v39  ;;  %v14704_v18 = vpop.f32.mrb[28].mxu1 }
 0x34b   : > { %5187 = vmatmul.mubr.f32.gmra.mrb[126].mxu0 %v3939_v20  ;;  %v4223_v37 = vpop.f32.mrb[29].mxu1 }
 0x34e   : > { %v4938_v0 = vpop.f32.mrb[26].mxu0  ;;  %v14706_v36 = vpop.f32.mrb[30].mxu1 }
 0x34f   : > { %v4940_v21 = vpop.f32.mrb[27].mxu0  ;;  %9975 = vmatmul.mubr.msk.f32.gmra.mrb[108].mxu1 %vm5268_vm0, %v4938_v0  ;;  %v4228_v61 = vpop.f32.mrb[31].mxu1 }
 0x353   : > { %v4943_v19 = vpop.f32.mrb[28].mxu0 }
 0x354   : > { %v4945_v45 = vpop.f32.mrb[29].mxu0  ;;  %9977 = vmatprep.mubr.msk.f32.mxu1 %vm5268_vm0, %v4943_v19  ;;  %v14710_v2 = vpop.f32.mrb[32].mxu1 }
 0x355   : > { %v4233_v12 = vpop.f32.mrb[33].mxu1 }
 0x358   : > { %v4948_v51 = vpop.f32.mrb[30].mxu0  ;;  %v14712_v15 = vpop.f32.mrb[34].mxu1 }
 0x359   : > { %v4950_v35 = vpop.f32.mrb[31].mxu0  ;;  %9978 = vmatmul.mubr.msk.f32.gmra.mrb[110].mxu1 %vm5268_vm0, %v4948_v51  ;;  %v4238_v48 = vpop.f32.mrb[35].mxu1 }
 0x35d   : > { %v4953_v62 = vpop.f32.mrb[32].mxu0 }
 0x35e   : > { %v10508_v53 = vadd.f32 %v4953_v62, %v18112_v50  ;;  %v4955_v24 = vpop.f32.mrb[33].mxu0  ;;  %v14716_v59 = vpop.f32.mrb[36].mxu1 }
 0x35f   : > { %v4243_v10 = vpop.f32.mrb[37].mxu1 }
 0x360   : > { %9980 = vmatprep.mubr.msk.f32.mxu1 %vm5268_vm0, %v10508_v53 }
 0x362   : > { %v4958_v1 = vpop.f32.mrb[34].mxu0  ;;  %v14719_v4 = vpop.f32.mrb[38].mxu1 }
 0x363   : > { %v10509_v58 = vadd.f32 %v4958_v1, %v14595_v33  ;;  %v4960_v11 = vpop.f32.mrb[35].mxu0  ;;  %v4248_v38 = vpop.f32.mrb[39].mxu1 }
 0x365   : > { %9981 = vmatmul.mubr.msk.f32.gmra.mrb[112].mxu1 %vm5268_vm0, %v10509_v58 }
 0x367   : > { %v4963_v22 = vpop.f32.mrb[36].mxu0 }
 0x368   : > { %v10510_v31 = vadd.f32 %v4963_v22, %v14602_v5  ;;  %v4965_v63 = vpop.f32.mrb[37].mxu0  ;;  %v14724_v55 = vpop.f32.mrb[40].mxu1 }
 0x369   : > { %v4253_v6 = vpop.f32.mrb[41].mxu1 }
 0x36a   : > { %9983 = vmatprep.mubr.msk.f32.mxu1 %vm5268_vm0, %v10510_v31 }
 0x36c   : > { %v4968_v25 = vpop.f32.mrb[38].mxu0  ;;  %v14727_v46 = vpop.f32.mrb[42].mxu1 }
 0x36d   : > { %v10511_v9 = vadd.f32 %v4968_v25, %v14613_v17  ;;  %v4970_v13 = vpop.f32.mrb[39].mxu0  ;;  %v4258_v33 = vpop.f32.mrb[43].mxu1 }
 0x36f   : > { %9984 = vmatmul.mubr.msk.f32.gmra.mrb[114].mxu1 %vm5268_vm0, %v10511_v9 }
 0x370   : > { %v14731_v60 = vpop.f32.mrb[44].mxu1 }
 0x371   : > { %v4973_v34 = vpop.f32.mrb[40].mxu0  ;;  %v4263_v56 = vpop.f32.mrb[45].mxu1 }
 0x372   : > { %v10512_v5 = vadd.f32 %v4973_v34, %v14620_v32  ;;  %v4975_v26 = vpop.f32.mrb[41].mxu0  ;;  %v5910_v32 = vld [vmem:[%s17005_s4] sm:$0xff]  ;;  %v5912_v56 = vld [vmem:[%s17005_s4 + $0x10] sm:$0xff] }
 0x374   : > { %9986 = vmatprep.mubr.msk.f32.mxu1 %vm5268_vm0, %v10512_v5  ;;  %v14735_v42 = vpop.f32.mrb[46].mxu1 }
 0x375   : > { %v4268_v16 = vpop.f32.mrb[47].mxu1 }
 0x376   : > { %v4978_v49 = vpop.f32.mrb[42].mxu0 }
 0x377   : > { %v10513_v28 = vadd.f32 %v4978_v49, %v14631_v43  ;;  %v4980_v17 = vpop.f32.mrb[43].mxu0  ;;  %v10444_v43 = vpack.c.bf16 %v5911_v8, %v5910_v32 }
 0x378   : > { %v14738_v40 = vpop.f32.mrb[48].mxu1  ;;  %v5914_v17 = vld [vmem:[%s17005_s4 + $0x20] sm:$0xff] }
 0x379   : > { %9987 = vmatmul.mubr.msk.f32.gmra.mrb[116].mxu1 %vm5268_vm0, %v10513_v28  ;;  %v4273_v54 = vpop.f32.mrb[49].mxu1  ;;  %10445 = vmatprep.subr.bf16.mxu1 %v10444_v43 }
 0x37a   : > { %v4983_v29 = vpop.f32.mrb[44].mxu0  ;;  %10447 = vmatpush3.bf16.msra.mxu1 %v10444_v43  ;;  %v5915_v54 = vld [vmem:[%s17005_s4 + $0x28] sm:$0xff]  ;;  %v5916_v43 = vld [vmem:[%s17005_s4 + $0x30] sm:$0xff] }
 0x37b   : > { %v10514_v47 = vadd.f32 %v4983_v29, %v14638_v7  ;;  %v4985_v57 = vpop.f32.mrb[45].mxu0 }
 0x37c   : > { %v14748_v20 = vpop.f32.mrb[50].mxu1 }
 0x37d   : > { %9989 = vmatprep.mubr.msk.f32.mxu1 %vm5268_vm0, %v10514_v47  ;;  %v4278_v39 = vpop.f32.mrb[51].mxu1  ;;  %v10452_v47 = vpack.c.bf16 %v5915_v54, %v5914_v17 }
 0x37e   : > { %v4988_v41 = vpop.f32.mrb[46].mxu0  ;;  %v5917_v39 = vld [vmem:[%s17005_s4 + $0x38] sm:$0xff] }
 0x37f   : > { %v10515_v37 = vadd.f32 %v4988_v41, %v14648_v44  ;;  %v4990_v7 = vpop.f32.mrb[47].mxu0 }
 0x380   : > { %v14752_v0 = vpop.f32.mrb[52].mxu1 }
 0x381   : > { %9990 = vmatmul.mubr.msk.f32.gmra.mrb[118].mxu1 %vm5268_vm0, %v10515_v37  ;;  %v4283_v21 = vpop.f32.mrb[53].mxu1  ;;  %v10456_v37 = vpack.c.bf16 %v5917_v39, %v5916_v43  ;;  %v11311_v43 = vld [vmem:[%s11456_s15 + $0x38] sm:$0xff] }
 0x382   : > { %v4993_v61 = vpop.f32.mrb[48].mxu0 }
 0x383   : > { %v10516_v19 = vadd.f32 %v4993_v61, %v14655_v3  ;;  %v4995_v45 = vpop.f32.mrb[49].mxu0 }
 0x384   : > { %v14756_v12 = vpop.f32.mrb[54].mxu1 }
 0x385   : > { %9992 = vmatprep.mubr.msk.f32.mxu1 %vm5268_vm0, %v10516_v19  ;;  %v4288_v51 = vpop.f32.mrb[55].mxu1 }
 0x386   : > { %v4998_v35 = vpop.f32.mrb[50].mxu0 }
 0x387   : > { %v10517_v48 = vadd.f32 %v4998_v35, %v14666_v27  ;;  %v5000_v44 = vpop.f32.mrb[51].mxu0 }
 0x388   : > { %v14760_v62 = vpop.f32.mrb[56].mxu1  ;;  %v11303_v44 = vld [vmem:[%s11456_s15] sm:$0xff] }
 0x389   : > { %9993 = vmatmul.mubr.msk.f32.gmra.mrb[120].mxu1 %vm5268_vm0, %v10517_v48  ;;  %v4293_v50 = vpop.f32.mrb[57].mxu1 }
 0x38a   : > { %v5003_v53 = vpop.f32.mrb[52].mxu0  ;;  %v14814_v50 = vmul.f32 %v11303_v44, %v11303_v44 }
 0x38b   : > { %v10518_v24 = vadd.f32 %v5003_v53, %v14672_v14  ;;  %v5005_v10 = vpop.f32.mrb[53].mxu0 }
 0x38c   : > { %v14764_v3 = vpop.f32.mrb[58].mxu1  ;;  %7273 = vrot.lane.b32.xlu1 %v14814_v50, %s11379_s18 }
 0x38d   : > { %9995 = vmatprep.mubr.msk.f32.mxu1 %vm5268_vm0, %v10518_v24  ;;  %v4298_v1 = vpop.f32.mrb[59].mxu1 }
 0x38e   : > { %v5008_v58 = vpop.f32.mrb[54].mxu0 }
 0x38f   : > { %v10519_v11 = vadd.f32 %v5008_v58, %v14683_v30  ;;  %v5010_v38 = vpop.f32.mrb[55].mxu0  ;;  %v11304_v58 = vld [vmem:[%s11456_s15 + $0x10] sm:$0xff] }
 0x390   : > { %v14768_v27 = vpop.f32.mrb[60].mxu1  ;;  %v11305_v38 = vld [vmem:[%s11456_s15 + $0x8] sm:$0xff] }
 0x391   : > { %9996 = vmatmul.mubr.msk.f32.gmra.mrb[122].mxu1 %vm5268_vm0, %v10519_v11  ;;  %v4303_v22 = vpop.f32.mrb[61].mxu1  ;;  %v14823_v11 = vmul.f32 %v11304_v58, %v11304_v58  ;;  %v11315_v58 = vld [vmem:[%s11456_s15 + $0x58] sm:$0xff] }
 0x392   : > { %v5013_v31 = vpop.f32.mrb[56].mxu0  ;;  %v14826_v22 = vmul.f32 %v11305_v38, %v11305_v38  ;;  %v14897_v38 = vmul.f32 %v11315_v58, %v11315_v58 }
 0x393   : > { %v10520_v63 = vadd.f32 %v5013_v31, %v14692_v52  ;;  %v5015_v6 = vpop.f32.mrb[57].mxu0  ;;  %v5913_v52 = vld [vmem:[%s17005_s4 + $0x18] sm:$0xff]  ;;  %7277 = vrot.lane.b32.xlu1 %v14823_v11, %s11379_s18 }
 0x394   : > { %v14772_v14 = vpop.f32.mrb[62].mxu1  ;;  %v10448_v26 = vpack.c.bf16 %v5913_v52, %v5912_v56  ;;  %7275 = vrot.lane.b32.xlu0 %v14826_v22, %s11379_s18 }
 0x395   : > { %9998 = vmatprep.mubr.msk.f32.mxu1 %vm5268_vm0, %v10520_v63  ;;  %v4308_v25 = vpop.f32.mrb[63].mxu1 }
 0x396   : > { %v5018_v9 = vpop.f32.mrb[58].mxu0  ;;  %10449 = vmatprep.subr.bf16.mxu1 %v10448_v26 }
 0x397   : > { %v10521_v13 = vadd.f32 %v5018_v9, %v14697_v23  ;;  %v5020_v33 = vpop.f32.mrb[59].mxu0  ;;  %10451 = vmatpush3.bf16.msra.mxu1 %v10448_v26  ;;  %v11306_v9 = vld [vmem:[%s11456_s15 + $0x20] sm:$0xff] }
 0x398   : > { %v14776_v30 = vpop.f32.mrb[64].mxu1  ;;  %10453 = vmatprep.subr.bf16.mxu1 %v10452_v47  ;;  %v11307_v33 = vld [vmem:[%s11456_s15 + $0x18] sm:$0xff] }
 0x399   : > { %9999 = vmatmul.mubr.msk.f32.gmra.mrb[124].mxu1 %vm5268_vm0, %v10521_v13  ;;  %v4313_v34 = vpop.f32.mrb[65].mxu1  ;;  %v14837_v13 = vmul.f32 %v11306_v9, %v11306_v9  ;;  %v11317_v9 = vld [vmem:[%s11456_s15 + $0x68] sm:$0xff] }
 0x39a   : > { %v5023_v5 = vpop.f32.mrb[60].mxu0 }
 0x39b   : > { %v10522_v16 = vadd.f32 %v5023_v5, %v14704_v18  ;;  %v5025_v49 = vpop.f32.mrb[61].mxu0  ;;  %10455 = vmatpush3.bf16.msra.mxu1 %v10452_v47  ;;  %7281 = vrot.lane.b32.xlu1 %v14837_v13, %s11379_s18 }
 0x39c   : > { %v14786_v23 = vpop.f32.mrb[66].mxu1  ;;  %10457 = vmatprep.subr.bf16.mxu1 %v10456_v37 }
 0x39d   : > { %10001 = vmatprep.mubr.msk.f32.mxu1 %vm5268_vm0, %v10522_v16  ;;  %v4318_v28 = vpop.f32.mrb[67].mxu1  ;;  %v11308_v16 = vld [vmem:[%s11456_s15 + $0x30] sm:$0xff] }
 0x39e   : > { %v5028_v29 = vpop.f32.mrb[62].mxu0  ;;  %v14851_v49 = vmul.f32 %v11308_v16, %v11308_v16  ;;  %v11309_v28 = vld [vmem:[%s11456_s15 + $0x28] sm:$0xff] }
 0x39f   : > { %v10523_v18 = vadd.f32 %v5028_v29, %v14706_v36  ;;  %v5030_v57 = vpop.f32.mrb[63].mxu0  ;;  %10459 = vmatpush3.bf16.msra.mxu1 %v10456_v37 }
 0x3a0   : > { %v14796_v32 = vpop.f32.mrb[68].mxu1  ;;  %7285 = vrot.lane.b32.xlu1 %v14851_v49, %s11379_s18  ;;  %v11310_v57 = vld [vmem:[%s11456_s15 + $0x40] sm:$0xff] }
 0x3a1   : > { %10002 = vmatmul.mubr.msk.f32.gmra.mrb[126].mxu1 %vm5268_vm0, %v10523_v18  ;;  %v4323_v8 = vpop.f32.mrb[69].mxu1 }
 0x3a2   : > { %v5033_v41 = vpop.f32.mrb[64].mxu0  ;;  %v14865_v8 = vmul.f32 %v11310_v57, %v11310_v57  ;;  %v11319_v57 = vld [vmem:[%s11456_s15 + $0x78] sm:$0xff] }
 0x3a3   : > { %v10524_v36 = vadd.f32 %v5033_v41, %v14710_v2  ;;  %v5035_v7 = vpop.f32.mrb[65].mxu0 }
 0x3a4   : > { %v14806_v21 = vpop.f32.mrb[70].mxu1  ;;  %7289 = vrot.lane.b32.xlu1 %v14865_v8, %s11379_s18 }
 0x3a5   : > { %10004 = vmatprep.mubr.msk.f32.mxu1 %vm5268_vm0, %v10524_v36  ;;  %v4328_v61 = vpop.f32.mrb[71].mxu1 }
 0x3a6   : > { %v5038_v19 = vpop.f32.mrb[66].mxu0  ;;  %v11312_v61 = vld [vmem:[%s11456_s15 + $0x50] sm:$0xff] }
 0x3a7   : > { %v10525_v45 = vadd.f32 %v5038_v19, %v14712_v15  ;;  %v5040_v51 = vpop.f32.mrb[67].mxu0  ;;  %v14879_v19 = vmul.f32 %v11312_v61, %v11312_v61 }
 0x3a8   : > { %v14810_v35 = vpop.f32.mrb[72].mxu1 }
 0x3a9   : > { %10005 = vmatmul.mubr.msk.f32.gmra.mrb[128].mxu1 %vm5268_vm0, %v10525_v45  ;;  %v4333_v48 = vpop.f32.mrb[73].mxu1  ;;  %v11313_v45 = vld [vmem:[%s11456_s15 + $0x48] sm:$0xff]  ;;  %7293 = vrot.lane.b32.xlu1 %v14879_v19, %s11379_s18 }
 0x3aa   : > { %v5043_v2 = vpop.f32.mrb[68].mxu0 }
 0x3ab   : > { %v10526_v53 = vadd.f32 %v5043_v2, %v14716_v59  ;;  %v5045_v24 = vpop.f32.mrb[69].mxu0 }
 0x3ac   : > { %v14817_v10 = vpop.f32.mrb[74].mxu1 }
 0x3ad   : > { %10007 = vmatprep.mubr.msk.f32.mxu1 %vm5268_vm0, %v10526_v53  ;;  %v4338_v15 = vpop.f32.mrb[75].mxu1 }
 0x3ae   : > { %v5048_v1 = vpop.f32.mrb[70].mxu0 }
 0x3af   : > { %v10527_v59 = vadd.f32 %v5048_v1, %v14719_v4  ;;  %v5050_v31 = vpop.f32.mrb[71].mxu0  ;;  %v14840_v4 = vmul.f32 %v11307_v33, %v11307_v33  ;;  %v11314_v1 = vld [vmem:[%s11456_s15 + $0x60] sm:$0xff]  ;;  %v14910_v33 = vmul.f32 %v11317_v9, %v11317_v9 }
 0x3b0   : > { %v14829_v63 = vpop.f32.mrb[76].mxu1 }
 0x3b1   : > { %10008 = vmatmul.mubr.msk.f32.gmra.mrb[130].mxu1 %vm5268_vm0, %v10527_v59  ;;  %v4343_v6 = vpop.f32.mrb[77].mxu1  ;;  %7279 = vrot.lane.b32.xlu0 %v14840_v4, %s11379_s18 }
 0x3b2   : > { %v5053_v25 = vpop.f32.mrb[72].mxu0 }
 0x3b3   : > { %v10528_v34 = vadd.f32 %v5053_v25, %v14724_v55  ;;  %v5055_v56 = vpop.f32.mrb[73].mxu0  ;;  %v14854_v55 = vmul.f32 %v11309_v28, %v11309_v28 }
 0x3b4   : > { %v14843_v52 = vpop.f32.mrb[78].mxu1 }
 0x3b5   : > { %10010 = vmatprep.mubr.msk.f32.mxu1 %vm5268_vm0, %v10528_v34  ;;  %v4348_v5 = vpop.f32.mrb[79].mxu1  ;;  %7283 = vrot.lane.b32.xlu0 %v14854_v55, %s11379_s18 }
 0x3b6   : > { %v5058_v26 = vpop.f32.mrb[74].mxu0 }
 0x3b7   : > { %v10529_v17 = vadd.f32 %v5058_v26, %v14727_v46  ;;  %v5060_v54 = vpop.f32.mrb[75].mxu0  ;;  %v14868_v46 = vmul.f32 %v11311_v43, %v11311_v43  ;;  %v14928_v43 = vmul.f32 %v11319_v57, %v11319_v57  ;;  %v11327_v57 = vld [vmem:[%s11456_s15 + $0xb8] sm:$0xff] }
 0x3b8   : > { %v14857_v29 = vpop.f32.mrb[80].mxu1 }
 0x3b9   : > { %10011 = vmatmul.mubr.msk.f32.gmra.mrb[132].mxu1 %vm5268_vm0, %v10529_v17  ;;  %v4353_v47 = vpop.f32.mrb[81].mxu1  ;;  %7287 = vrot.lane.b32.xlu0 %v14868_v46, %s11379_s18 }
 0x3ba   : > { %v5063_v18 = vpop.f32.mrb[76].mxu0  ;;  %v11318_v47 = vld [vmem:[%s11456_s15 + $0x80] sm:$0xff] }
 0x3bb   : > { %v10530_v39 = vadd.f32 %v5063_v18, %v14731_v60  ;;  %v5065_v41 = vpop.f32.mrb[77].mxu0  ;;  %v14882_v60 = vmul.f32 %v11313_v45, %v11313_v45  ;;  %v14925_v18 = vmul.f32 %v11318_v47, %v11318_v47  ;;  %v11321_v45 = vld [vmem:[%s11456_s15 + $0x88] sm:$0xff] }
 0x3bc   : > { %v14871_v37 = vpop.f32.mrb[82].mxu1 }
 0x3bd   : > { %10013 = vmatprep.mubr.msk.f32.mxu1 %vm5268_vm0, %v10530_v39  ;;  %v4358_v36 = vpop.f32.mrb[83].mxu1  ;;  %7291 = vrot.lane.b32.xlu0 %v14882_v60, %s11379_s18 }
 0x3be   : > { %v5068_v7 = vpop.f32.mrb[78].mxu0 }
 0x3bf   : > { %v10531_v51 = vadd.f32 %v5068_v7, %v14735_v42  ;;  %v5070_v48 = vpop.f32.mrb[79].mxu0  ;;  %v14894_v42 = vmul.f32 %v11314_v1, %v11314_v1  ;;  %v11320_v7 = vld [vmem:[%s11456_s15 + $0x90] sm:$0xff]  ;;  %v11322_v1 = vld [vmem:[%s11456_s15 + $0xa0] sm:$0xff] }
 0x3c0   : > { %v14885_v2 = vpop.f32.mrb[84].mxu1  ;;  %v14938_v61 = vmul.f32 %v11320_v7, %v11320_v7  ;;  %v14953_v58 = vmul.f32 %v11322_v1, %v11322_v1  ;;  %v11328_v7 = vld [vmem:[%s11456_s15 + $0xd0] sm:$0xff]  ;;  %v11330_v1 = vld [vmem:[%s11456_s15 + $0xe0] sm:$0xff] }
 0x3c1   : > { %10014 = vmatmul.mubr.msk.f32.gmra.mrb[134].mxu1 %vm5268_vm0, %v10531_v51  ;;  %v4363_v44 = vpop.f32.mrb[85].mxu1  ;;  %7297 = vrot.lane.b32.xlu1 %v14894_v42, %s11379_s18  ;;  %v14941_v51 = vmul.f32 %v11321_v45, %v11321_v45  ;;  %v14988_v45 = vmul.f32 %v11328_v7, %v11328_v7 }
 0x3c2   : > { %v5073_v53 = vpop.f32.mrb[80].mxu0  ;;  %7295 = vrot.lane.b32.xlu0 %v14897_v38, %s11379_s18 }
 0x3c3   : > { %v10532_v24 = vadd.f32 %v5073_v53, %v14738_v40  ;;  %v5075_v15 = vpop.f32.mrb[81].mxu0  ;;  %v11316_v40 = vld [vmem:[%s11456_s15 + $0x70] sm:$0xff]  ;;  %18113 = vst [vmem:[#allocation61_spill] sm:$0xff] %v14941_v51 }
 0x3c4   : > { %v14899_v59 = vpop.f32.mrb[86].mxu1  ;;  %v14907_v25 = vmul.f32 %v11316_v40, %v11316_v40 }
 0x3c5   : > { %10016 = vmatprep.mubr.msk.f32.mxu1 %vm5268_vm0, %v10532_v24  ;;  %v4368_v31 = vpop.f32.mrb[87].mxu1 }
 0x3c6   : > { %v5078_v6 = vpop.f32.mrb[82].mxu0  ;;  %7301 = vrot.lane.b32.xlu1 %v14907_v25, %s11379_s18  ;;  %7299 = vrot.lane.b32.xlu0 %v14910_v33, %s11379_s18  ;;  %v11323_v31 = vld [vmem:[%s11456_s15 + $0x98] sm:$0xff] }
 0x3c7   : > { %v10533_v34 = vadd.f32 %v5078_v6, %v14748_v20  ;;  %v5080_v56 = vpop.f32.mrb[83].mxu0  ;;  %v14956_v6 = vmul.f32 %v11323_v31, %v11323_v31  ;;  %v15003_v31 = vmul.f32 %v11330_v1, %v11330_v1 }
 0x3c8   : > { %v14913_v5 = vpop.f32.mrb[88].mxu1 }
 0x3c9   : > { %10017 = vmatmul.mubr.msk.f32.gmra.mrb[136].mxu1 %vm5268_vm0, %v10533_v34  ;;  %v4373_v26 = vpop.f32.mrb[89].mxu1  ;;  %v11324_v34 = vld [vmem:[%s11456_s15 + $0xb0] sm:$0xff] }
 0x3ca   : > { %v5083_v16 = vpop.f32.mrb[84].mxu0  ;;  %7305 = vrot.lane.b32.xlu1 %v14925_v18, %s11379_s18  ;;  %7303 = vrot.lane.b32.xlu0 %v14928_v43, %s11379_s18  ;;  %v14964_v56 = vmul.f32 %v11324_v34, %v11324_v34  ;;  %v11325_v26 = vld [vmem:[%s11456_s15 + $0xa8] sm:$0xff] }
 0x3cb   : > { %v10534_v28 = vadd.f32 %v5083_v16, %v14752_v0  ;;  %v5085_v17 = vpop.f32.mrb[85].mxu0  ;;  %v14967_v16 = vmul.f32 %v11325_v26, %v11325_v26 }
 0x3cc   : > { %v14921_v54 = vpop.f32.mrb[90].mxu1 }
 0x3cd   : > { %10019 = vmatprep.mubr.msk.f32.mxu1 %vm5268_vm0, %v10534_v28  ;;  %v4378_v20 = vpop.f32.mrb[91].mxu1 }
 0x3ce   : > { %v5088_v39 = vpop.f32.mrb[86].mxu0  ;;  %7309 = vrot.lane.b32.xlu1 %v14938_v61, %s11379_s18  ;;  %7307 = vrot.lane.b32.xlu0 %v14941_v51, %s11379_s18  ;;  %v11326_v20 = vld [vmem:[%s11456_s15 + $0xc0] sm:$0xff] }
 0x3cf   : > { %v10535_v41 = vadd.f32 %v5088_v39, %v14756_v12  ;;  %v5090_v36 = vpop.f32.mrb[87].mxu0  ;;  %v14977_v47 = vmul.f32 %v11326_v20, %v11326_v20  ;;  %v14980_v39 = vmul.f32 %v11327_v57, %v11327_v57 }
 0x3d0   : > { %v14935_v0 = vpop.f32.mrb[92].mxu1 }
 0x3d1   : > { %10020 = vmatmul.mubr.msk.f32.gmra.mrb[138].mxu1 %vm5268_vm0, %v10535_v41  ;;  %v4383_v12 = vpop.f32.mrb[93].mxu1 }
 0x3d2   : > { %v5093_v48 = vpop.f32.mrb[88].mxu0  ;;  %7313 = vrot.lane.b32.xlu1 %v14953_v58, %s11379_s18  ;;  %7311 = vrot.lane.b32.xlu0 %v14956_v6, %s11379_s18  ;;  %v11329_v12 = vld [vmem:[%s11456_s15 + $0xc8] sm:$0xff] }
 0x3d3   : > { %v10536_v44 = vadd.f32 %v5093_v48, %v14760_v62  ;;  %v5095_v53 = vpop.f32.mrb[89].mxu0  ;;  %v14991_v48 = vmul.f32 %v11329_v12, %v11329_v12  ;;  %v11335_v12 = vld [vmem:[%s11456_s15 + $0xf8] sm:$0xff] }
 0x3d4   : > { %v14949_v24 = vpop.f32.mrb[94].mxu1 }
 0x3d5   : > { %10022 = vmatprep.mubr.msk.f32.mxu1 %vm5268_vm0, %v10536_v44  ;;  %v4388_v15 = vpop.f32.mrb[95].mxu1 }
 0x3d6   : > { %v5098_v62 = vpop.f32.mrb[90].mxu0  ;;  %7317 = vrot.lane.b32.xlu1 %v14964_v56, %s11379_s18  ;;  %7315 = vrot.lane.b32.xlu0 %v14967_v16, %s11379_s18 }
 0x3d7   : > { %v10537_v40 = vadd.f32 %v5098_v62, %v14764_v3  ;;  %v5100_v9 = vpop.f32.mrb[91].mxu0  ;;  %v11331_v62 = vld [vmem:[%s11456_s15 + $0xd8] sm:$0xff] }
 0x3d9   : > { %10023 = vmatmul.mubr.msk.f32.gmra.mrb[140].mxu1 %vm5268_vm0, %v10537_v40  ;;  %v15006_v40 = vmul.f32 %v11331_v62, %v11331_v62  ;;  %v11336_v62 = vld [vmem:[%s11456_s15 + $0x110] sm:$0xff] }
 0x3da   : > { %v5103_v28 = vpop.f32.mrb[92].mxu0  ;;  %7321 = vrot.lane.b32.xlu1 %v14977_v47, %s11379_s18  ;;  %7319 = vrot.lane.b32.xlu0 %v14980_v39, %s11379_s18 }
 0x3db   : > { %v10538_v3 = vadd.f32 %v5103_v28, %v14768_v27  ;;  %v5105_v17 = vpop.f32.mrb[93].mxu0  ;;  %v11332_v28 = vld [vmem:[%s11456_s15 + $0xf0] sm:$0xff] }
 0x3dc   : > { %v11333_v17 = vld [vmem:[%s11456_s15 + $0xe8] sm:$0xff] }
 0x3dd   : > { %10025 = vmatprep.mubr.msk.f32.mxu1 %vm5268_vm0, %v10538_v3  ;;  %v15016_v3 = vmul.f32 %v11332_v28, %v11332_v28  ;;  %v15019_v20 = vmul.f32 %v11333_v17, %v11333_v17 }
 0x3de   : > { %v5108_v41 = vpop.f32.mrb[94].mxu0  ;;  %7325 = vrot.lane.b32.xlu1 %v14988_v45, %s11379_s18  ;;  %7323 = vrot.lane.b32.xlu0 %v14991_v48, %s11379_s18 }
 0x3df   : > { %v10539_v36 = vadd.f32 %v5108_v41, %v14772_v14  ;;  %v5110_v27 = vpop.f32.mrb[95].mxu0 }
 0x3e0   : > { %v11334_v27 = vld [vmem:[%s11456_s15 + $0x100] sm:$0xff] }
 0x3e1   : > { %10026 = vmatmul.mubr.msk.f32.gmra.mrb[142].mxu1 %vm5268_vm0, %v10539_v36  ;;  %v15031_v7 = vmul.f32 %v11334_v27, %v11334_v27  ;;  %v11339_v27 = vld [vmem:[%s11456_s15 + $0x118] sm:$0xff] }
 0x3e2   : > { %v5113_v44 = vpop.f32.mrb[96].mxu0  ;;  %7329 = vrot.lane.b32.xlu1 %v15003_v31, %s11379_s18  ;;  %7327 = vrot.lane.b32.xlu0 %v15006_v40, %s11379_s18 }
 0x3e3   : > { %v10540_v14 = vadd.f32 %v5113_v44, %v14776_v30  ;;  %v5115_v53 = vpop.f32.mrb[97].mxu0  ;;  %v15034_v44 = vmul.f32 %v11335_v12, %v11335_v12  ;;  %v15062_v12 = vmul.f32 %v11339_v27, %v11339_v27  ;;  %v11342_v27 = vld [vmem:[%s11456_s15 + $0x140] sm:$0xff] }
 0x3e5   : > { %10028 = vmatprep.mubr.msk.f32.mxu1 %vm5268_vm0, %v10540_v14  ;;  %v15000_v15 = vpop.f32.mrb[96].mxu1  ;;  %18117 = vst [vmem:[#allocation38_spill] sm:$0xff] %v15062_v12 }
 0x3e6   : > { %v5118_v30 = vpop.f32.mrb[98].mxu0  ;;  %v15008_v9 = vpop.f32.mrb[97].mxu1  ;;  %7333 = vrot.lane.b32.xlu1 %v15016_v3, %s11379_s18  ;;  %7331 = vrot.lane.b32.xlu0 %v15019_v20, %s11379_s18 }
 0x3e7   : > { %v10541_v34 = vadd.f32 %v5118_v30, %v14786_v23  ;;  %v5120_v26 = vpop.f32.mrb[99].mxu0  ;;  %v15044_v30 = vmul.f32 %v11336_v62, %v11336_v62  ;;  %v11340_v62 = vld [vmem:[%s11456_s15 + $0x130] sm:$0xff] }
 0x3e9   : > { %10029 = vmatmul.mubr.msk.f32.gmra.mrb[144].mxu1 %vm5268_vm0, %v10541_v34  ;;  %18114 = vst [vmem:[#allocation64_spill] sm:$0xff] %v15044_v30  ;;  %v11337_v34 = vld [vmem:[%s11456_s15 + $0x108] sm:$0xff] }
 0x3ea   : > { %v5123_v57 = vpop.f32.mrb[100].mxu0  ;;  %7337 = vrot.lane.b32.xlu1 %v15031_v7, %s11379_s18  ;;  %7335 = vrot.lane.b32.xlu0 %v15034_v44, %s11379_s18  ;;  %v15047_v26 = vmul.f32 %v11337_v34, %v11337_v34  ;;  %v15072_v34 = vmul.f32 %v11340_v62, %v11340_v62 }
 0x3eb   : > { %v10542_v23 = vadd.f32 %v5123_v57, %v14796_v32  ;;  %v5125_v41 = vpop.f32.mrb[101].mxu0 }
 0x3ec   : > { %18115 = vst [vmem:[#allocation47_spill] sm:$0xff] %v15047_v26  ;;  %18118 = vst [vmem:[#allocation170_spill] sm:$0xff] %v15072_v34 }
 0x3ed   : > { %10031 = vmatprep.mubr.msk.f32.mxu1 %vm5268_vm0, %v10542_v23  ;;  %v15028_v36 = vpop.f32.mrb[98].mxu1  ;;  %v11338_v23 = vld [vmem:[%s11456_s15 + $0x120] sm:$0xff] }
 0x3ee   : > { %v5128_v32 = vpop.f32.mrb[102].mxu0  ;;  %v15036_v14 = vpop.f32.mrb[99].mxu1  ;;  %7341 = vrot.lane.b32.xlu1 %v15044_v30, %s11379_s18  ;;  %7339 = vrot.lane.b32.xlu0 %v15047_v26, %s11379_s18  ;;  %v15059_v41 = vmul.f32 %v11338_v23, %v11338_v23 }
 0x3ef   : > { %v10543_v53 = vadd.f32 %v5128_v32, %v14806_v21  ;;  %v5130_v1 = vpop.f32.mrb[103].mxu0 }
 0x3f0   : > { %18116 = vst [vmem:[#allocation101_spill] sm:$0xff] %v15059_v41 }
 0x3f1   : > { %10032 = vmatmul.mubr.msk.f32.gmra.mrb[146].mxu1 %vm5268_vm0, %v10543_v53 }
 0x3f2   : > { %v5133_v28 = vpop.f32.mrb[104].mxu0  ;;  %7345 = vrot.lane.b32.xlu1 %v15059_v41, %s11379_s18  ;;  %7343 = vrot.lane.b32.xlu0 %v15062_v12, %s11379_s18 }
 0x3f3   : > { %v10544_v21 = vadd.f32 %v5133_v28, %v14810_v35  ;;  %v5135_v17 = vpop.f32.mrb[105].mxu0  ;;  %v11341_v28 = vld [vmem:[%s11456_s15 + $0x128] sm:$0xff] }
 0x3f5   : > { %10034 = vmatprep.mubr.msk.f32.mxu1 %vm5268_vm0, %v10544_v21  ;;  %v15056_v57 = vpop.f32.mrb[100].mxu1  ;;  %v15075_v21 = vmul.f32 %v11341_v28, %v11341_v28 }
 0x3f6   : > { %v5138_v35 = vpop.f32.mrb[106].mxu0  ;;  %v15064_v32 = vpop.f32.mrb[101].mxu1  ;;  %7349 = vrot.lane.b32.xlu1 %v15072_v34, %s11379_s18 }
 0x3f7   : > { %v10545_v53 = vadd.f32 %v5138_v35, %v14817_v10  ;;  %v5140_v1 = vpop.f32.mrb[107].mxu0  ;;  %18119 = vst [vmem:[#allocation103_spill] sm:$0xff] %v15075_v21  ;;  %7347 = vrot.lane.b32.xlu0 %v15075_v21, %s11379_s18  ;;  %v15085_v35 = vmul.f32 %v11342_v27, %v11342_v27  ;;  %v11345_v27 = vld [vmem:[%s11456_s15 + $0x148] sm:$0xff] }
 0x3f8   : > { %v11343_v1 = vld [vmem:[%s11456_s15 + $0x138] sm:$0xff] }
 0x3f9   : > { %10035 = vmatmul.mubr.msk.f32.gmra.mrb[148].mxu1 %vm5268_vm0, %v10545_v53  ;;  %18120 = vst [vmem:[#allocation168_spill] sm:$0xff] %v15085_v35  ;;  %v15088_v62 = vmul.f32 %v11343_v1, %v11343_v1  ;;  %v15101_v1 = vmul.f32 %v11345_v27, %v11345_v27 }
 0x3fa   : > { %v5143_v17 = vpop.f32.mrb[108].mxu0  ;;  %7353 = vrot.lane.b32.xlu1 %v15085_v35, %s11379_s18 }
 0x3fb   : > { %v10546_v10 = vadd.f32 %v5143_v17, %v14829_v63  ;;  %v5145_v23 = vpop.f32.mrb[109].mxu0  ;;  %18121 = vst [vmem:[#allocation106_spill] sm:$0xff] %v15088_v62  ;;  %7351 = vrot.lane.b32.xlu0 %v15088_v62, %s11379_s18  ;;  %18123 = vst [vmem:[#allocation37_spill] sm:$0xff] %v15101_v1 }
 0x3fd   : > { %10037 = vmatprep.mubr.msk.f32.mxu1 %vm5268_vm0, %v10546_v10  ;;  %v11344_v10 = vld [vmem:[%s11456_s15 + $0x150] sm:$0xff] }
 0x3fe   : > { %v5148_v53 = vpop.f32.mrb[110].mxu0  ;;  %v15098_v23 = vmul.f32 %v11344_v10, %v11344_v10  ;;  %v11346_v10 = vld [vmem:[%s11456_s15 + $0x160] sm:$0xff] }
 0x3ff   : > { %v10547_v28 = vadd.f32 %v5148_v53, %v14843_v52  ;;  %v5150_v63 = vpop.f32.mrb[111].mxu0  ;;  %7355 = vrot.lane.b32.xlu0 %v15101_v1, %s11379_s18  ;;  %v15113_v27 = vmul.f32 %v11346_v10, %v11346_v10 }
 0x400   : > { %v15095_v17 = vpop.f32.mrb[102].mxu1  ;;  %18122 = vst [vmem:[#allocation63_spill] sm:$0xff] %v15098_v23  ;;  %7357 = vrot.lane.b32.xlu1 %v15098_v23, %s11379_s18 }
 0x401   : > { %10038 = vmatmul.mubr.msk.f32.gmra.mrb[150].mxu1 %vm5268_vm0, %v10547_v28  ;;  %v15104_v52 = vpop.f32.mrb[103].mxu1  ;;  %18124 = vst [vmem:[#allocation66_spill] sm:$0xff] %v15113_v27  ;;  %v11347_v28 = vld [vmem:[%s11456_s15 + $0x158] sm:$0xff] }
 0x402   : > { %v5153_v53 = vpop.f32.mrb[112].mxu0  ;;  %v15116_v62 = vmul.f32 %v11347_v28, %v11347_v28 }
 0x403   : > { %v10548_v63 = vadd.f32 %v5153_v53, %v14857_v29  ;;  %v5155_v35 = vpop.f32.mrb[113].mxu0 }
 0x404   : > { %18125 = vst [vmem:[#allocation104_spill] sm:$0xff] %v15116_v62  ;;  %7361 = vrot.lane.b32.xlu1 %v15113_v27, %s11379_s18  ;;  %7359 = vrot.lane.b32.xlu0 %v15116_v62, %s11379_s18  ;;  %v11348_v35 = vld [vmem:[%s11456_s15 + $0x170] sm:$0xff]  ;;  %v11351_v62 = vld [vmem:[%s11456_s15 + $0x178] sm:$0xff] }
 0x405   : > { %10040 = vmatprep.mubr.msk.f32.mxu1 %vm5268_vm0, %v10548_v63  ;;  %v15124_v53 = vmul.f32 %v11348_v35, %v11348_v35  ;;  %v11349_v63 = vld [vmem:[%s11456_s15 + $0x168] sm:$0xff] }
 0x406   : > { %v5158_v21 = vpop.f32.mrb[114].mxu0  ;;  %v15127_v10 = vmul.f32 %v11349_v63, %v11349_v63  ;;  %v11350_v63 = vld [vmem:[%s11456_s15 + $0x180] sm:$0xff] }
 0x407   : > { %v10549_v34 = vadd.f32 %v5158_v21, %v14871_v37  ;;  %v5160_v29 = vpop.f32.mrb[115].mxu0  ;;  %18126 = vst [vmem:[#allocation65_spill] sm:$0xff] %v15124_v53 }
 0x408   : > { %18127 = vst [vmem:[#allocation29_spill] sm:$0xff] %v15127_v10  ;;  %7365 = vrot.lane.b32.xlu1 %v15124_v53, %s11379_s18  ;;  %7363 = vrot.lane.b32.xlu0 %v15127_v10, %s11379_s18 }
 0x409   : > { %10041 = vmatmul.mubr.msk.f32.gmra.mrb[152].mxu1 %vm5268_vm0, %v10549_v34  ;;  %v15141_v34 = vmul.f32 %v11350_v63, %v11350_v63  ;;  %v11353_v63 = vld [vmem:[%s11456_s15 + $0x188] sm:$0xff] }
 0x40a   : > { %v5163_v28 = vpop.f32.mrb[116].mxu0  ;;  %v15155_v27 = vmul.f32 %v11353_v63, %v11353_v63  ;;  %v11355_v63 = vld [vmem:[%s11456_s15 + $0x198] sm:$0xff] }
 0x40b   : > { %v10550_v37 = vadd.f32 %v5163_v28, %v14885_v2  ;;  %v5165_v21 = vpop.f32.mrb[117].mxu0  ;;  %18128 = vst [vmem:[#allocation49_spill] sm:$0xff] %v15141_v34  ;;  %v15144_v2 = vmul.f32 %v11351_v62, %v11351_v62 }
 0x40c   : > { %v15135_v29 = vpop.f32.mrb[104].mxu1  ;;  %7369 = vrot.lane.b32.xlu1 %v15141_v34, %s11379_s18  ;;  %18131 = vst [vmem:[#allocation68_spill] sm:$0xff] %v15155_v27 }
 0x40d   : > { %10043 = vmatprep.mubr.msk.f32.mxu1 %vm5268_vm0, %v10550_v37  ;;  %v15138_v35 = vpop.f32.mrb[105].mxu1  ;;  %18129 = vst [vmem:[#allocation34_spill] sm:$0xff] %v15144_v2  ;;  %7367 = vrot.lane.b32.xlu0 %v15144_v2, %s11379_s18  ;;  %v11352_v37 = vld [vmem:[%s11456_s15 + $0x190] sm:$0xff]  ;;  %v15168_v2 = vmul.f32 %v11355_v63, %v11355_v63 }
 0x40e   : > { %v5168_v28 = vpop.f32.mrb[118].mxu0  ;;  %v15152_v10 = vmul.f32 %v11352_v37, %v11352_v37 }
 0x40f   : > { %v10551_v21 = vadd.f32 %v5168_v28, %v14899_v59  ;;  %v5170_v53 = vpop.f32.mrb[119].mxu0  ;;  %v11354_v28 = vld [vmem:[%s11456_s15 + $0x1a0] sm:$0xff]  ;;  %18133 = vst [vmem:[#allocation67_spill] sm:$0xff] %v15168_v2 }
 0x410   : > { %18130 = vst [vmem:[#allocation109_spill] sm:$0xff] %v15152_v10  ;;  %7373 = vrot.lane.b32.xlu1 %v15152_v10, %s11379_s18  ;;  %v15165_v37 = vmul.f32 %v11354_v28, %v11354_v28  ;;  %v11357_v28 = vld [vmem:[%s11456_s15 + $0x1a8] sm:$0xff]  ;;  %v15198_v10 = vpop.permute.xlu1 %7273 }
 0x411   : > { %10044 = vmatmul.mubr.msk.f32.gmra.mrb[154].mxu1 %vm5268_vm0, %v10551_v21  ;;  %7371 = vrot.lane.b32.xlu0 %v15155_v27, %s11379_s18  ;;  %v15181_v63 = vmul.f32 %v11357_v28, %v11357_v28 }
 0x412   : > { %v5173_v62 = vpop.f32.mrb[120].mxu0  ;;  %18132 = vst [vmem:[#allocation39_spill] sm:$0xff] %v15165_v37 }
 0x413   : > { %v10552_v59 = vadd.f32 %v5173_v62, %v14913_v5  ;;  %v5175_v53 = vpop.f32.mrb[121].mxu0  ;;  %18135 = vst [vmem:[#allocation70_spill] sm:$0xff] %v15181_v63 }
 0x414   : > { %7377 = vrot.lane.b32.xlu1 %v15165_v37, %s11379_s18 }
 0x415   : > { %10046 = vmatprep.mubr.msk.f32.mxu1 %vm5268_vm0, %v10552_v59  ;;  %7375 = vrot.lane.b32.xlu0 %v15168_v2, %s11379_s18  ;;  %v11356_v59 = vld [vmem:[%s11456_s15 + $0x1b0] sm:$0xff] }
 0x416   : > { %v5178_v21 = vpop.f32.mrb[122].mxu0  ;;  %v15178_v53 = vmul.f32 %v11356_v59, %v11356_v59  ;;  %v11358_v59 = vld [vmem:[%s11456_s15 + $0x1c0] sm:$0xff] }
 0x417   : > { %v10553_v34 = vadd.f32 %v5178_v21, %v14921_v54  ;;  %v5180_v5 = vpop.f32.mrb[123].mxu0  ;;  %v15193_v28 = vmul.f32 %v11358_v59, %v11358_v59 }
 0x418   : > { %v15175_v62 = vpop.f32.mrb[106].mxu1  ;;  %18134 = vst [vmem:[#allocation46_spill] sm:$0xff] %v15178_v53  ;;  %7381 = vrot.lane.b32.xlu1 %v15178_v53, %s11379_s18 }
 0x419   : > { %10047 = vmatmul.mubr.msk.f32.gmra.mrb[156].mxu1 %vm5268_vm0, %v10553_v34  ;;  %v15184_v54 = vpop.f32.mrb[107].mxu1  ;;  %7379 = vrot.lane.b32.xlu0 %v15181_v63, %s11379_s18  ;;  %18136 = vst [vmem:[#allocation112_spill] sm:$0xff] %v15193_v28  ;;  %v11359_v34 = vld [vmem:[%s11456_s15 + $0x1b8] sm:$0xff] }
 0x41a   : > { %v5183_v21 = vpop.f32.mrb[124].mxu0  ;;  %v15196_v2 = vmul.f32 %v11359_v34, %v11359_v34  ;;  %v11361_v34 = vld [vmem:[%s11456_s15 + $0x1c8] sm:$0xff] }
 0x41b   : > { %v10554_v5 = vadd.f32 %v5183_v21, %v14935_v0  ;;  %v5185_v37 = vpop.f32.mrb[125].mxu0  ;;  %v5846_v21 = vmax.f32 %v15008_v9, 0.0  ;;  %v15210_v63 = vmul.f32 %v11361_v34, %v11361_v34  ;;  %v15223_v9 = vpop.permute.xlu0 %7275  ;;  %v11363_v34 = vld [vmem:[%s11456_s15 + $0x1d8] sm:$0xff] }
 0x41c   : > { %18137 = vst [vmem:[#allocation69_spill] sm:$0xff] %v15196_v2  ;;  %7385 = vrot.lane.b32.xlu1 %v15193_v28, %s11379_s18  ;;  %v5849_v28 = vmax.f32 %v15028_v36, 0.0 }
 0x41d   : > { %10049 = vmatprep.mubr.msk.f32.mxu1 %vm5268_vm0, %v10554_v5  ;;  %7383 = vrot.lane.b32.xlu0 %v15196_v2, %s11379_s18  ;;  %v11360_v5 = vld [vmem:[%s11456_s15 + $0x1d0] sm:$0xff]  ;;  %18139 = vst [vmem:[#allocation91_spill] sm:$0xff] %v15210_v63 }
 0x41e   : > { %v5188_v27 = vpop.f32.mrb[126].mxu0  ;;  %v15207_v59 = vmul.f32 %v11360_v5, %v11360_v5 }
 0x41f   : > { %v10555_v0 = vadd.f32 %v5188_v27, %v14949_v24  ;;  %v5190_v37 = vpop.f32.mrb[127].mxu0  ;;  %v15216_v27 = vpop.permute.xlu1 %7277 }
 0x420   : > { %18138 = vst [vmem:[#allocation114_spill] sm:$0xff] %v15207_v59  ;;  %v5847_v37 = vmax.f32 %v15000_v15, 0.0  ;;  %7389 = vrot.lane.b32.xlu1 %v15207_v59, %s11379_s18  ;;  %v15231_v15 = vmul.f32 %v11363_v34, %v11363_v34 }
 0x421   : > { %10050 = vmatmul.mubr.msk.f32.gmra.mrb[158].mxu1 %vm5268_vm0, %v10555_v0  ;;  %7387 = vrot.lane.b32.xlu0 %v15210_v63, %s11379_s18  ;;  %v5848_v0 = vmax.f32 %v15036_v14, 0.0  ;;  %v11365_v63 = vld [vmem:[%s11456_s15 + $0x1e8] sm:$0xff] }
 0x422   : > { %10068 = vmatprep.mubr.msk.f32.mxu1 %vm5918_vm1, %v5846_v21  ;;  %v15214_v24 = vpop.f32.mrb[108].mxu1  ;;  %v11362_v21 = vld [vmem:[%s11456_s15 + $0x1e0] sm:$0xff]  ;;  %18141 = vst [vmem:[#allocation72_spill] sm:$0xff] %v15231_v15 }
 0x423   : > { %v5587_v2 = vpop.f32.mrb[109].mxu1  ;;  %v15228_v5 = vmul.f32 %v11362_v21, %v11362_v21  ;;  %v15234_v59 = vpop.permute.xlu1 %7281  ;;  %v11364_v21 = vld [vmem:[%s11456_s15 + $0x1f0] sm:$0xff] }
 0x424   : > { %v15241_v14 = vpop.permute.xlu0 %7279  ;;  %v15245_v34 = vmul.f32 %v11364_v21, %v11364_v21  ;;  %v5852_v21 = vmax.f32 %v15104_v52, 0.0 }
 0x425   : > { %10069 = vmatmul.mubr.msk.f32.vlgmr.msra.gmra.mrb[160].mxu1 %vm5918_vm1, %v5847_v37  ;;  %18140 = vst [vmem:[#allocation111_spill] sm:$0xff] %v15228_v5  ;;  %7393 = vrot.lane.b32.xlu1 %v15228_v5, %s11379_s18  ;;  %v5850_v37 = vmax.f32 %v15064_v32, 0.0  ;;  %v5851_v5 = vmax.f32 %v15056_v57, 0.0 }
 0x426   : > { %10071 = vmatprep.mubr.msk.f32.mxu1 %vm5918_vm1, %v5848_v0  ;;  %7391 = vrot.lane.b32.xlu0 %v15231_v15, %s11379_s18  ;;  %18142 = vst [vmem:[#allocation110_spill] sm:$0xff] %v15245_v34  ;;  %v15248_v0 = vmul.f32 %v11365_v63, %v11365_v63  ;;  %v11366_v15 = vld [vmem:[%s11456_s15 + $0x1f8] sm:$0xff] }
 0x427   : > { %v15252_v36 = vpop.permute.xlu1 %7285 }
 0x428   : > { %18143 = vst [vmem:[#allocation21_spill] sm:$0xff] %v15248_v0  ;;  %v15259_v32 = vpop.permute.xlu0 %7283 }
 0x429   : > { %10072 = vmatmul.mubr.msk.f32.gmra.mrb[162].mxu1 %vm5918_vm1, %v5849_v28  ;;  %7397 = vrot.lane.b32.xlu1 %v15245_v34, %s11379_s18  ;;  %v5853_v34 = vmax.f32 %v15095_v17, 0.0 }
 0x42a   : > { %10074 = vmatprep.mubr.msk.f32.mxu1 %vm5918_vm1, %v5850_v37  ;;  %7395 = vrot.lane.b32.xlu0 %v15248_v0, %s11379_s18  ;;  %v15264_v37 = vmul.f32 %v11366_v15, %v11366_v15 }
 0x42b   : > { %v15267_v57 = vpop.permute.xlu1 %7289 }
 0x42c   : > { %v9979_v63 = vpop.f32.mrb[110].mxu1  ;;  %18144 = vst [vmem:[#allocation42_spill] sm:$0xff] %v15264_v37  ;;  %v15274_v52 = vpop.permute.xlu0 %7287 }
 0x42d   : > { %10075 = vmatmul.mubr.msk.f32.gmra.mrb[164].mxu1 %vm5918_vm1, %v5851_v5  ;;  %v5597_v28 = vpop.f32.mrb[111].mxu1  ;;  %7529 = vrot.lane.b32.xlu1 %v14814_v50, %s11380_s19  ;;  %v5854_v5 = vmax.f32 %v15138_v35, 0.0  ;;  %v5857_v35 = vmax.f32 %v15175_v62, 0.0 }
 0x42e   : > { %10077 = vmatprep.mubr.msk.f32.mxu1 %vm5918_vm1, %v5852_v21  ;;  %7399 = vrot.lane.b32.xlu0 %v15264_v37, %s11379_s18  ;;  %v5855_v21 = vmax.f32 %v15135_v29, 0.0  ;;  %v5856_v37 = vmax.f32 %v15184_v54, 0.0 }
 0x42f   : > { %v15279_v15 = vpop.permute.xlu1 %7293 }
 0x430   : > { %v15286_v17 = vpop.permute.xlu0 %7291 }
 0x431   : > { %10078 = vmatmul.mubr.msk.f32.gmra.mrb[166].mxu1 %vm5918_vm1, %v5853_v34  ;;  %7533 = vrot.lane.b32.xlu1 %v14823_v11, %s11380_s19  ;;  %v5858_v34 = vmax.f32 %v5587_v2, 0.0 }
 0x432   : > { %10080 = vmatprep.mubr.msk.f32.mxu1 %vm5918_vm1, %v5854_v5  ;;  %7531 = vrot.lane.b32.xlu0 %v14826_v22, %s11380_s19 }
 0x433   : > { %v15296_v29 = vpop.permute.xlu1 %7297 }
 0x434   : > { %v15298_v0 = vpop.permute.xlu0 %7295 }
 0x435   : > { %10081 = vmatmul.mubr.msk.f32.gmra.mrb[168].mxu1 %vm5918_vm1, %v5855_v21  ;;  %7537 = vrot.lane.b32.xlu1 %v14837_v13, %s11380_s19  ;;  %v5860_v21 = vmax.f32 %v5597_v28, 0.0 }
 0x436   : > { %10083 = vmatprep.mubr.msk.f32.mxu1 %vm5918_vm1, %v5856_v37  ;;  %7535 = vrot.lane.b32.xlu0 %v14840_v4, %s11380_s19  ;;  %v5859_v37 = vmax.f32 %v15214_v24, 0.0 }
 0x438   : > { %v9982_v5 = vpop.f32.mrb[112].mxu1  ;;  %v15307_v62 = vpop.permute.xlu1 %7301 }
 0x439   : > { %10084 = vmatmul.mubr.msk.f32.gmra.mrb[170].mxu1 %vm5918_vm1, %v5857_v35  ;;  %v5607_v54 = vpop.f32.mrb[113].mxu1  ;;  %7541 = vrot.lane.b32.xlu1 %v14851_v49, %s11380_s19  ;;  %18145 = vst [vmem:[#allocation44_spill] sm:$0xff] %v15307_v62  ;;  %v15309_v2 = vpop.permute.xlu0 %7299  ;;  %v5861_v35 = vmax.f32 %v9979_v63, 0.0 }
 0x43a   : > { %10086 = vmatprep.mubr.msk.f32.mxu1 %vm5918_vm1, %v5858_v34  ;;  %7539 = vrot.lane.b32.xlu0 %v14854_v55, %s11380_s19  ;;  %18146 = vst [vmem:[#allocation75_spill] sm:$0xff] %v15309_v2  ;;  %v5862_v24 = vmax.f32 %v5607_v54, 0.0 }
 0x43c   : > { %v15318_v34 = vpop.permute.xlu1 %7305 }
 0x43d   : > { %10087 = vmatmul.mubr.msk.f32.gmra.mrb[172].mxu1 %vm5918_vm1, %v5859_v37  ;;  %7545 = vrot.lane.b32.xlu1 %v14865_v8, %s11380_s19  ;;  %v15320_v62 = vpop.permute.xlu0 %7303  ;;  %v5863_v37 = vmax.f32 %v9982_v5, 0.0 }
 0x43e   : > { %10089 = vmatprep.mubr.msk.f32.mxu1 %vm5918_vm1, %v5860_v21  ;;  %7543 = vrot.lane.b32.xlu0 %v14868_v46, %s11380_s19 }
 0x440   : > { %v15328_v54 = vpop.permute.xlu1 %7309 }
 0x441   : > { %10090 = vmatmul.mubr.msk.f32.gmra.mrb[174].mxu1 %vm5918_vm1, %v5861_v35  ;;  %7549 = vrot.lane.b32.xlu1 %v14879_v19, %s11380_s19  ;;  %18147 = vst [vmem:[#allocation74_spill] sm:$0xff] %v15328_v54  ;;  %v15330_v21 = vpop.permute.xlu0 %7307 }
 0x442   : > { %10092 = vmatprep.mubr.msk.f32.mxu1 %vm5918_vm1, %v5862_v24  ;;  %v9985_v28 = vpop.f32.mrb[114].mxu1  ;;  %7547 = vrot.lane.b32.xlu0 %v14882_v60, %s11380_s19  ;;  %18148 = vst [vmem:[#allocation116_spill] sm:$0xff] %v15330_v21 }
 0x443   : > { %v5617_v2 = vpop.f32.mrb[115].mxu1  ;;  %v5865_v35 = vmax.f32 %v9985_v28, 0.0 }
 0x444   : > { %v5864_v63 = vmax.f32 %v5617_v2, 0.0  ;;  %v15338_v5 = vpop.permute.xlu1 %7313 }
 0x445   : > { %10093 = vmatmul.mubr.msk.f32.gmra.mrb[176].mxu1 %vm5918_vm1, %v5863_v37  ;;  %7553 = vrot.lane.b32.xlu1 %v14894_v42, %s11380_s19  ;;  %18149 = vst [vmem:[#allocation92_spill] sm:$0xff] %v15338_v5  ;;  %v15340_v2 = vpop.permute.xlu0 %7311 }
 0x446   : > { %10095 = vmatprep.mubr.msk.f32.mxu1 %vm5918_vm1, %v5864_v63  ;;  %7551 = vrot.lane.b32.xlu0 %v14897_v38, %s11380_s19  ;;  %18150 = vst [vmem:[#allocation118_spill] sm:$0xff] %v15340_v2 }
 0x448   : > { %v15346_v37 = vpop.permute.xlu1 %7317 }
 0x449   : > { %10096 = vmatmul.mubr.msk.f32.gmra.mrb[178].mxu1 %vm5918_vm1, %v5865_v35  ;;  %7557 = vrot.lane.b32.xlu1 %v14907_v25, %s11380_s19  ;;  %18151 = vst [vmem:[#allocation77_spill] sm:$0xff] %v15346_v37  ;;  %v15348_v21 = vpop.permute.xlu0 %7315 }
 0x44a   : > { %7555 = vrot.lane.b32.xlu0 %v14910_v33, %s11380_s19  ;;  %18152 = vst [vmem:[#allocation76_spill] sm:$0xff] %v15348_v21 }
 0x44c   : > { %v9988_v24 = vpop.f32.mrb[116].mxu1  ;;  %v15356_v35 = vpop.permute.xlu1 %7321 }
 0x44d   : > { %v5627_v28 = vpop.f32.mrb[117].mxu1  ;;  %v5867_v54 = vmax.f32 %v9988_v24, 0.0  ;;  %7561 = vrot.lane.b32.xlu1 %v14925_v18, %s11380_s19  ;;  %18153 = vst [vmem:[#allocation120_spill] sm:$0xff] %v15356_v35  ;;  %v15358_v2 = vpop.permute.xlu0 %7319 }
 0x44e   : > { %v5866_v63 = vmax.f32 %v5627_v28, 0.0  ;;  %7559 = vrot.lane.b32.xlu0 %v14928_v43, %s11380_s19  ;;  %18154 = vst [vmem:[#allocation90_spill] sm:$0xff] %v15358_v2 }
 0x450   : > { %10098 = vmatprep.mubr.msk.f32.mxu1 %vm5918_vm1, %v5866_v63  ;;  %v15364_v21 = vpop.permute.xlu1 %7325  ;;  %v6560_v63 = vld [vmem:[%s17006_s5] sm:$0xff] }
 0x451   : > { %10099 = vmatmul.mubr.msk.f32.gmra.mrb[180].mxu1 %vm5918_vm1, %v5867_v54  ;;  %7565 = vrot.lane.b32.xlu1 %v14938_v61, %s11380_s19  ;;  %18155 = vst [vmem:[#allocation119_spill] sm:$0xff] %v15364_v21  ;;  %v6561_v54 = vld [vmem:[%s17006_s5 + $0x8] sm:$0xff]  ;;  %v15372_v2 = vpop.permute.xlu0 %7323 }
 0x452   : > { %7563 = vrot.lane.b32.xlu0 %v14941_v51, %s11380_s19  ;;  %18156 = vst [vmem:[#allocation80_spill] sm:$0xff] %v15372_v2  ;;  %v10460_v37 = vpack.c.bf16 %v6561_v54, %v6560_v63 }
 0x454   : > { %v9991_v24 = vpop.f32.mrb[118].mxu1  ;;  %10461 = vmatprep.subr.bf16.mxu1 %v10460_v37  ;;  %v15380_v21 = vpop.permute.xlu1 %7329 }
 0x455   : > { %v5637_v28 = vpop.f32.mrb[119].mxu1  ;;  %v5869_v5 = vmax.f32 %v9991_v24, 0.0  ;;  %7569 = vrot.lane.b32.xlu1 %v14953_v58, %s11380_s19  ;;  %10463 = vmatpush3.bf16.msra.mxu1 %v10460_v37  ;;  %v15382_v51 = vpop.permute.xlu0 %7327 }
 0x456   : > { %v5868_v35 = vmax.f32 %v5637_v28, 0.0  ;;  %7567 = vrot.lane.b32.xlu0 %v14956_v6, %s11380_s19  ;;  %18157 = vst [vmem:[#allocation30_spill] sm:$0xff] %v15382_v51 }
 0x458   : > { %10101 = vmatprep.mubr.msk.f32.mxu1 %vm5918_vm1, %v5868_v35  ;;  %v15388_v63 = vpop.permute.xlu1 %7333 }
 0x459   : > { %10102 = vmatmul.mubr.msk.f32.gmra.mrb[182].mxu1 %vm5918_vm1, %v5869_v5  ;;  %7573 = vrot.lane.b32.xlu1 %v14964_v56, %s11380_s19  ;;  %18158 = vst [vmem:[#allocation121_spill] sm:$0xff] %v15388_v63  ;;  %v15390_v35 = vpop.permute.xlu0 %7331 }
 0x45a   : > { %7571 = vrot.lane.b32.xlu0 %v14967_v16, %s11380_s19  ;;  %18159 = vst [vmem:[#allocation93_spill] sm:$0xff] %v15390_v35 }
 0x45c   : > { %v9994_v24 = vpop.f32.mrb[120].mxu1  ;;  %v15398_v5 = vpop.permute.xlu1 %7337 }
 0x45d   : > { %v5647_v28 = vpop.f32.mrb[121].mxu1  ;;  %v5871_v2 = vmax.f32 %v9994_v24, 0.0  ;;  %7577 = vrot.lane.b32.xlu1 %v14977_v47, %s11380_s19  ;;  %18160 = vst [vmem:[#allocation124_spill] sm:$0xff] %v15398_v5  ;;  %v15400_v37 = vpop.permute.xlu0 %7335 }
 0x45e   : > { %v5870_v54 = vmax.f32 %v5647_v28, 0.0  ;;  %7575 = vrot.lane.b32.xlu0 %v14980_v39, %s11380_s19  ;;  %18161 = vst [vmem:[#allocation83_spill] sm:$0xff] %v15400_v37 }
 0x460   : > { %10104 = vmatprep.mubr.msk.f32.mxu1 %vm5918_vm1, %v5870_v54  ;;  %v15406_v35 = vpop.permute.xlu1 %7341 }
 0x461   : > { %10105 = vmatmul.mubr.msk.f32.gmra.mrb[184].mxu1 %vm5918_vm1, %v5871_v2  ;;  %7581 = vrot.lane.b32.xlu1 %v14988_v45, %s11380_s19  ;;  %18162 = vst [vmem:[#allocation85_spill] sm:$0xff] %v15406_v35  ;;  %v15408_v51 = vpop.permute.xlu0 %7339 }
 0x462   : > { %7579 = vrot.lane.b32.xlu0 %v14991_v48, %s11380_s19  ;;  %18163 = vst [vmem:[#allocation125_spill] sm:$0xff] %v15408_v51 }
 0x464   : > { %v9997_v24 = vpop.f32.mrb[122].mxu1  ;;  %v15416_v2 = vpop.permute.xlu1 %7345 }
 0x465   : > { %v5657_v28 = vpop.f32.mrb[123].mxu1  ;;  %v5873_v54 = vmax.f32 %v9997_v24, 0.0  ;;  %7585 = vrot.lane.b32.xlu1 %v15003_v31, %s11380_s19  ;;  %18164 = vst [vmem:[#allocation96_spill] sm:$0xff] %v15416_v2  ;;  %v15418_v37 = vpop.permute.xlu0 %7343 }
 0x466   : > { %v5872_v63 = vmax.f32 %v5657_v28, 0.0  ;;  %7583 = vrot.lane.b32.xlu0 %v15006_v40, %s11380_s19  ;;  %18165 = vst [vmem:[#allocation129_spill] sm:$0xff] %v15418_v37 }
 0x468   : > { %10107 = vmatprep.mubr.msk.f32.mxu1 %vm5918_vm1, %v5872_v63  ;;  %v15424_v51 = vpop.permute.xlu1 %7349 }
 0x469   : > { %10108 = vmatmul.mubr.msk.f32.gmra.mrb[186].mxu1 %vm5918_vm1, %v5873_v54  ;;  %7589 = vrot.lane.b32.xlu1 %v15016_v3, %s11380_s19  ;;  %18166 = vst [vmem:[#allocation89_spill] sm:$0xff] %v15424_v51  ;;  %v15426_v5 = vpop.permute.xlu0 %7347  ;;  %v6562_v51 = vld [vmem:[%s17006_s5 + $0x10] sm:$0xff] }
 0x46a   : > { %7587 = vrot.lane.b32.xlu0 %v15019_v20, %s11380_s19  ;;  %18167 = vst [vmem:[#allocation88_spill] sm:$0xff] %v15426_v5 }
 0x46c   : > { %v10000_v24 = vpop.f32.mrb[124].mxu1  ;;  %v15434_v54 = vpop.permute.xlu1 %7353 }
 0x46d   : > { %v5667_v28 = vpop.f32.mrb[125].mxu1  ;;  %v5875_v63 = vmax.f32 %v10000_v24, 0.0  ;;  %7593 = vrot.lane.b32.xlu1 %v15031_v7, %s11380_s19  ;;  %18168 = vst [vmem:[#allocation128_spill] sm:$0xff] %v15434_v54  ;;  %v6563_v24 = vld [vmem:[%s17006_s5 + $0x18] sm:$0xff] }
 0x46e   : > { %v5874_v35 = vmax.f32 %v5667_v28, 0.0  ;;  %7591 = vrot.lane.b32.xlu0 %v15034_v44, %s11380_s19  ;;  %v15442_v28 = vpop.permute.xlu0 %7351  ;;  %v10464_v5 = vpack.c.bf16 %v6563_v24, %v6562_v51  ;;  %v6565_v51 = vld [vmem:[%s17006_s5 + $0x28] sm:$0xff] }
 0x46f   : > { %18169 = vst [vmem:[#allocation94_spill] sm:$0xff] %v15442_v28  ;;  %v6564_v28 = vld [vmem:[%s17006_s5 + $0x20] sm:$0xff] }
 0x470   : > { %10110 = vmatprep.mubr.msk.f32.mxu1 %vm5918_vm1, %v5874_v35  ;;  %10465 = vmatprep.subr.bf16.mxu1 %v10464_v5 }
 0x471   : > { %10111 = vmatmul.mubr.msk.f32.gmra.mrb[188].mxu1 %vm5918_vm1, %v5875_v63  ;;  %7597 = vrot.lane.b32.xlu1 %v15044_v30, %s11380_s19  ;;  %v18179_v30 = vld [vmem:[#allocation106_spill] sm:$0xff] }
 0x472   : > { %7595 = vrot.lane.b32.xlu0 %v15047_v26, %s11380_s19  ;;  %10467 = vmatpush3.bf16.msra.mxu1 %v10464_v5  ;;  %v15448_v54 = vpop.permute.xlu1 %7357  ;;  %v15450_v2 = vpop.permute.xlu0 %7355  ;;  %v10468_v26 = vpack.c.bf16 %v6565_v51, %v6564_v28  ;;  %v6567_v28 = vld [vmem:[%s17006_s5 + $0x38] sm:$0xff]  ;;  %v18174_v51 = vld [vmem:[#allocation170_spill] sm:$0xff] }
 0x473   : > { %18170 = vst [vmem:[#allocation123_spill] sm:$0xff] %v15448_v54  ;;  %18171 = vst [vmem:[#allocation145_spill] sm:$0xff] %v15450_v2 }
 0x474   : > { %v10003_v35 = vpop.f32.mrb[126].mxu1  ;;  %10469 = vmatprep.subr.bf16.mxu1 %v10468_v26 }
 0x475   : > { %v5677_v63 = vpop.f32.mrb[127].mxu1  ;;  %v5877_v24 = vmax.f32 %v10003_v35, 0.0  ;;  %7601 = vrot.lane.b32.xlu1 %v15059_v41, %s11380_s19  ;;  %v6566_v35 = vld [vmem:[%s17006_s5 + $0x30] sm:$0xff] }
 0x476   : > { %v5876_v37 = vmax.f32 %v5677_v63, 0.0  ;;  %7599 = vrot.lane.b32.xlu0 %v15062_v12, %s11380_s19  ;;  %v15464_v5 = vpop.permute.xlu1 %7361  ;;  %10471 = vmatpush3.bf16.msra.mxu1 %v10468_v26  ;;  %v15466_v63 = vpop.permute.xlu0 %7359  ;;  %v18178_v41 = vld [vmem:[#allocation168_spill] sm:$0xff] }
 0x477   : > { %18172 = vst [vmem:[#allocation144_spill] sm:$0xff] %v15464_v5  ;;  %18173 = vst [vmem:[#allocation43_spill] sm:$0xff] %v15466_v63 }
 0x478   : > { %10113 = vmatprep.mubr.msk.f32.mxu1 %vm5918_vm1, %v5876_v37  ;;  %v10472_v37 = vpack.c.bf16 %v6567_v28, %v6566_v35 }
 0x479   : > { %10114 = vmatmul.mubr.msk.f32.gmra.mrb[190].mxu1 %vm5918_vm1, %v5877_v24  ;;  %7605 = vrot.lane.b32.xlu1 %v18174_v51, %s11380_s19  ;;  %v18175_v24 = vld [vmem:[#allocation103_spill] sm:$0xff] }
 0x47a   : > { %7603 = vrot.lane.b32.xlu0 %v18175_v24, %s11380_s19  ;;  %10473 = vmatprep.subr.bf16.mxu1 %v10472_v37  ;;  %v15478_v26 = vpop.permute.xlu1 %7365  ;;  %v15480_v54 = vpop.permute.xlu0 %7363 }
 0x47b   : > { %18176 = vst [vmem:[#allocation99_spill] sm:$0xff] %v15478_v26  ;;  %10475 = vmatpush3.bf16.msra.mxu1 %v10472_v37  ;;  %18177 = vst [vmem:[#allocation131_spill] sm:$0xff] %v15480_v54 }
 0x47c   : > { %v10006_v2 = vpop.f32.mrb[128].mxu1 }
 0x47d   : > { %v5687_v5 = vpop.f32.mrb[129].mxu1  ;;  %v5879_v12 = vmax.f32 %v10006_v2, 0.0  ;;  %7609 = vrot.lane.b32.xlu1 %v18178_v41, %s11380_s19 }
 0x47e   : > { %v5878_v63 = vmax.f32 %v5687_v5, 0.0  ;;  %7607 = vrot.lane.b32.xlu0 %v18179_v30, %s11380_s19  ;;  %v15488_v35 = vpop.permute.xlu1 %7369 }
 0x47f   : > { %18180 = vst [vmem:[#allocation134_spill] sm:$0xff] %v15488_v35  ;;  %v15490_v28 = vpop.permute.xlu0 %7367  ;;  %v18185_v35 = vld [vmem:[#allocation104_spill] sm:$0xff] }
 0x480   : > { %10116 = vmatprep.mubr.msk.f32.mxu1 %vm5918_vm1, %v5878_v63  ;;  %18181 = vst [vmem:[#allocation2_spill] sm:$0xff] %v15490_v28 }
 0x481   : > { %10117 = vmatmul.mubr.msk.f32.gmra.mrb[192].mxu1 %vm5918_vm1, %v5879_v12  ;;  %7613 = vrot.lane.b32.xlu1 %v15098_v23, %s11380_s19  ;;  %v18184_v12 = vld [vmem:[#allocation66_spill] sm:$0xff] }
 0x482   : > { %7611 = vrot.lane.b32.xlu0 %v15101_v1, %s11380_s19  ;;  %v15496_v37 = vpop.permute.xlu1 %7373 }
 0x483   : > { %18182 = vst [vmem:[#allocation136_spill] sm:$0xff] %v15496_v37  ;;  %v15498_v26 = vpop.permute.xlu0 %7371  ;;  %v18188_v37 = vld [vmem:[#allocation65_spill] sm:$0xff] }
 0x484   : > { %v10009_v2 = vpop.f32.mrb[130].mxu1  ;;  %18183 = vst [vmem:[#allocation95_spill] sm:$0xff] %v15498_v26 }
 0x485   : > { %v5697_v5 = vpop.f32.mrb[131].mxu1  ;;  %v5881_v63 = vmax.f32 %v10009_v2, 0.0  ;;  %7617 = vrot.lane.b32.xlu1 %v18184_v12, %s11380_s19 }
 0x486   : > { %v5880_v54 = vmax.f32 %v5697_v5, 0.0  ;;  %7615 = vrot.lane.b32.xlu0 %v18185_v35, %s11380_s19  ;;  %v15506_v28 = vpop.permute.xlu1 %7377  ;;  %v18189_v5 = vld [vmem:[#allocation29_spill] sm:$0xff] }
 0x487   : > { %18186 = vst [vmem:[#allocation97_spill] sm:$0xff] %v15506_v28  ;;  %v15508_v1 = vpop.permute.xlu0 %7375  ;;  %v18193_v28 = vld [vmem:[#allocation34_spill] sm:$0xff] }
 0x488   : > { %10119 = vmatprep.mubr.msk.f32.mxu1 %vm5918_vm1, %v5880_v54  ;;  %18187 = vst [vmem:[#allocation54_spill] sm:$0xff] %v15508_v1 }
 0x489   : > { %10120 = vmatmul.mubr.msk.f32.gmra.mrb[194].mxu1 %vm5918_vm1, %v5881_v63  ;;  %7621 = vrot.lane.b32.xlu1 %v18188_v37, %s11380_s19  ;;  %v18192_v63 = vld [vmem:[#allocation49_spill] sm:$0xff] }
 0x48a   : > { %7619 = vrot.lane.b32.xlu0 %v18189_v5, %s11380_s19  ;;  %v15514_v12 = vpop.permute.xlu1 %7381 }
 0x48b   : > { %18190 = vst [vmem:[#allocation137_spill] sm:$0xff] %v15514_v12  ;;  %v15516_v35 = vpop.permute.xlu0 %7379  ;;  %v18196_v12 = vld [vmem:[#allocation109_spill] sm:$0xff] }
 0x48c   : > { %v10012_v2 = vpop.f32.mrb[132].mxu1  ;;  %18191 = vst [vmem:[#allocation25_spill] sm:$0xff] %v15516_v35 }
 0x48d   : > { %v5707_v26 = vpop.f32.mrb[133].mxu1  ;;  %v5883_v54 = vmax.f32 %v10012_v2, 0.0  ;;  %7625 = vrot.lane.b32.xlu1 %v18192_v63, %s11380_s19 }
 0x48e   : > { %v5882_v23 = vmax.f32 %v5707_v26, 0.0  ;;  %7623 = vrot.lane.b32.xlu0 %v18193_v28, %s11380_s19  ;;  %v15524_v1 = vpop.permute.xlu1 %7385  ;;  %v18197_v26 = vld [vmem:[#allocation68_spill] sm:$0xff] }
 0x48f   : > { %18194 = vst [vmem:[#allocation140_spill] sm:$0xff] %v15524_v1  ;;  %v15526_v5 = vpop.permute.xlu0 %7383  ;;  %v18201_v1 = vld [vmem:[#allocation67_spill] sm:$0xff] }
 0x490   : > { %10122 = vmatprep.mubr.msk.f32.mxu1 %vm5918_vm1, %v5882_v23  ;;  %18195 = vst [vmem:[#allocation78_spill] sm:$0xff] %v15526_v5 }
 0x491   : > { %10123 = vmatmul.mubr.msk.f32.gmra.mrb[196].mxu1 %vm5918_vm1, %v5883_v54  ;;  %7629 = vrot.lane.b32.xlu1 %v18196_v12, %s11380_s19  ;;  %v18200_v54 = vld [vmem:[#allocation39_spill] sm:$0xff] }
 0x492   : > { %7627 = vrot.lane.b32.xlu0 %v18197_v26, %s11380_s19  ;;  %v15532_v63 = vpop.permute.xlu1 %7389 }
 0x493   : > { %18198 = vst [vmem:[#allocation139_spill] sm:$0xff] %v15532_v63  ;;  %v15534_v28 = vpop.permute.xlu0 %7387  ;;  %v7465_v63 = vadd.f32 %v15198_v10, %v14814_v50  ;;  %v15574_v10 = vadd.f32 %v15259_v32, %v14854_v55  ;;  %v15591_v55 = vadd.f32 %v15279_v15, %v14879_v19  ;;  %v18208_v19 = vld [vmem:[#allocation75_spill] sm:$0xff]  ;;  %v18210_v32 = vld [vmem:[#allocation61_spill] sm:$0xff] }
 0x494   : > { %v10015_v2 = vpop.f32.mrb[134].mxu1  ;;  %18199 = vst [vmem:[#allocation143_spill] sm:$0xff] %v15534_v28 }
 0x495   : > { %v5717_v35 = vpop.f32.mrb[135].mxu1  ;;  %v5885_v23 = vmax.f32 %v10015_v2, 0.0  ;;  %7633 = vrot.lane.b32.xlu1 %v18200_v54, %s11380_s19 }
 0x496   : > { %v5884_v37 = vmax.f32 %v5717_v35, 0.0  ;;  %7631 = vrot.lane.b32.xlu0 %v18201_v1, %s11380_s19  ;;  %v18204_v35 = vld [vmem:[#allocation70_spill] sm:$0xff] }
 0x497   : > { %v15542_v5 = vpop.permute.xlu1 %7393 }
 0x498   : > { %10125 = vmatprep.mubr.msk.f32.mxu1 %vm5918_vm1, %v5884_v37  ;;  %18202 = vst [vmem:[#allocation100_spill] sm:$0xff] %v15542_v5  ;;  %v15544_v26 = vpop.permute.xlu0 %7391  ;;  %v7467_v37 = vadd.f32 %v15216_v27, %v14823_v11  ;;  %v15560_v5 = vadd.f32 %v15234_v59, %v14837_v13  ;;  %v15570_v11 = vadd.f32 %v15252_v36, %v14851_v49  ;;  %v18205_v13 = vld [vmem:[#allocation112_spill] sm:$0xff] }
 0x499   : > { %10126 = vmatmul.mubr.msk.f32.gmra.mrb[198].mxu1 %vm5918_vm1, %v5885_v23  ;;  %18203 = vst [vmem:[#allocation146_spill] sm:$0xff] %v15544_v26  ;;  %7637 = vrot.lane.b32.xlu1 %v15178_v53, %s11380_s19  ;;  %v7466_v26 = vadd.f32 %v15223_v9, %v14826_v22  ;;  %v15578_v22 = vadd.f32 %v15267_v57, %v14865_v8 }
 0x49a   : > { %7635 = vrot.lane.b32.xlu0 %v18204_v35, %s11380_s19  ;;  %v15564_v35 = vadd.f32 %v15241_v14, %v14840_v4  ;;  %v18206_v4 = vld [vmem:[#allocation69_spill] sm:$0xff]  ;;  %v15587_v49 = vadd.f32 %v15274_v52, %v14868_v46  ;;  %v15595_v8 = vadd.f32 %v15286_v17, %v14882_v60  ;;  %v15599_v59 = vadd.f32 %v15296_v29, %v14894_v42  ;;  %v18207_v46 = vld [vmem:[#allocation44_spill] sm:$0xff]  ;;  %v18213_v17 = vld [vmem:[#allocation118_spill] sm:$0xff] }
 0x49b   : > { %v15554_v1 = vpop.permute.xlu1 %7397  ;;  %v15604_v27 = vadd.f32 %v15298_v0, %v14897_v38  ;;  %v15608_v9 = vadd.f32 %v18207_v46, %v14907_v25  ;;  %v15612_v14 = vadd.f32 %v18208_v19, %v14910_v33  ;;  %v15616_v60 = vadd.f32 %v15318_v34, %v14925_v18  ;;  %v18209_v38 = vld [vmem:[#allocation74_spill] sm:$0xff]  ;;  %v18211_v25 = vld [vmem:[#allocation116_spill] sm:$0xff]  ;;  %v18214_v29 = vld [vmem:[#allocation77_spill] sm:$0xff] }
 0x49c   : > { %v10018_v2 = vpop.f32.mrb[136].mxu1  ;;  %v15566_v53 = vpop.permute.xlu0 %7395  ;;  %v15620_v36 = vadd.f32 %v15320_v62, %v14928_v43  ;;  %v15624_v0 = vadd.f32 %v18209_v38, %v14938_v61  ;;  %v15628_v57 = vadd.f32 %v18211_v25, %v18210_v32  ;;  %v18212_v18 = vld [vmem:[#allocation92_spill] sm:$0xff]  ;;  %v15640_v43 = vadd.f32 %v18213_v17, %v14956_v6  ;;  %v18215_v62 = vld [vmem:[#allocation114_spill] sm:$0xff]  ;;  %v18216_v34 = vld [vmem:[#allocation91_spill] sm:$0xff] }
 0x49d   : > { %v5727_v28 = vpop.f32.mrb[137].mxu1  ;;  %v5887_v50 = vmax.f32 %v10018_v2, 0.0  ;;  %7641 = vrot.lane.b32.xlu1 %v18205_v13, %s11380_s19  ;;  %v15636_v15 = vadd.f32 %v18212_v18, %v14953_v58  ;;  %v15644_v61 = vadd.f32 %v18214_v29, %v14964_v56  ;;  %v18218_v58 = vld [vmem:[#allocation120_spill] sm:$0xff]  ;;  %v18219_v6 = vld [vmem:[#allocation90_spill] sm:$0xff]  ;;  %v18220_v46 = vld [vmem:[#allocation119_spill] sm:$0xff] }
 0x49e   : > { %v5886_v23 = vmax.f32 %v5727_v28, 0.0  ;;  %7639 = vrot.lane.b32.xlu0 %v18206_v4, %s11380_s19  ;;  %v15665_v19 = vadd.f32 %v18220_v46, %v14988_v45  ;;  %v18223_v18 = vld [vmem:[#allocation121_spill] sm:$0xff] }
 0x49f   : > { %v7530_v42 = vpop.permute.xlu1 %7529  ;;  %v15681_v17 = vadd.f32 %v18223_v18, %v15016_v3  ;;  %v18224_v45 = vld [vmem:[#allocation93_spill] sm:$0xff]  ;;  %v18227_v3 = vld [vmem:[#allocation111_spill] sm:$0xff]  ;;  %v18237_v18 = vld [vmem:[#allocation38_spill] sm:$0xff] }
 0x4a0   : > { %10128 = vmatprep.mubr.msk.f32.mxu1 %vm5918_vm1, %v5886_v23  ;;  %v15630_v52 = vadd.f32 %v7530_v42, %v7465_v63  ;;  %v15632_v33 = vpop.permute.xlu0 %7399  ;;  %v18217_v63 = vld [vmem:[#allocation76_spill] sm:$0xff]  ;;  %v15656_v23 = vadd.f32 %v18218_v58, %v14977_v47  ;;  %v18222_v47 = vld [vmem:[#allocation30_spill] sm:$0xff]  ;;  %v15685_v29 = vadd.f32 %v18224_v45, %v15019_v20  ;;  %v18238_v45 = vld [vmem:[#allocation129_spill] sm:$0xff] }
 0x4a1   : > { %10129 = vmatmul.mubr.msk.f32.gmra.mrb[200].mxu1 %vm5918_vm1, %v5887_v50  ;;  %7645 = vrot.lane.b32.xlu1 %v18215_v62, %s11380_s19  ;;  %v15652_v2 = vadd.f32 %v18217_v63, %v14967_v16  ;;  %v15660_v50 = vadd.f32 %v18219_v6, %v14980_v39  ;;  %v18221_v42 = vld [vmem:[#allocation80_spill] sm:$0xff]  ;;  %v15673_v16 = vadd.f32 %v15380_v21, %v15003_v31 }
 0x4a2   : > { %7643 = vrot.lane.b32.xlu0 %v18216_v34, %s11380_s19  ;;  %10791 = vrsqrt.f32 %v15630_v52  ;;  %v15669_v38 = vadd.f32 %v18221_v42, %v14991_v48  ;;  %v15677_v32 = vadd.f32 %v18222_v47, %v15006_v40  ;;  %v18225_v31 = vld [vmem:[#allocation124_spill] sm:$0xff]  ;;  %v18226_v40 = vld [vmem:[#allocation83_spill] sm:$0xff]  ;;  %v18232_v42 = vld [vmem:[#allocation125_spill] sm:$0xff]  ;;  %vm7787_vm2 = vcmp.eq.f32.partialorder %v15630_v52, inf }
 0x4a3   : > { %v7534_v39 = vpop.permute.xlu1 %7533  ;;  %v15691_v21 = vadd.f32 %v18225_v31, %v15031_v7  ;;  %v15695_v6 = vadd.f32 %v18226_v40, %v15034_v44  ;;  %v18228_v20 = vld [vmem:[#allocation72_spill] sm:$0xff]  ;;  %v18231_v7 = vld [vmem:[#allocation47_spill] sm:$0xff]  ;;  %v18234_v44 = vld [vmem:[#allocation101_spill] sm:$0xff]  ;;  %vm7789_vm3 = vcmp.eq.f32.partialorder %v15630_v52, 0.0 }
 0x4a4   : > { %v10021_v28 = vpop.f32.mrb[138].mxu1  ;;  %v15687_v48 = vadd.f32 %v7534_v39, %v7467_v37  ;;  %v7532_v63 = vpop.permute.xlu0 %7531  ;;  %v18229_v37 = vld [vmem:[#allocation64_spill] sm:$0xff]  ;;  %v15710_v47 = vadd.f32 %v18232_v42, %v18231_v7 }
 0x4a5   : > { %v5737_v56 = vpop.f32.mrb[139].mxu1  ;;  %v5889_v58 = vmax.f32 %v10021_v28, 0.0  ;;  %7649 = vrot.lane.b32.xlu1 %v18227_v3, %s11380_s19  ;;  %v18230_v28 = vld [vmem:[#allocation85_spill] sm:$0xff]  ;;  %v18235_v39 = vld [vmem:[#allocation96_spill] sm:$0xff] }
 0x4a6   : > { %v5888_v25 = vmax.f32 %v5737_v56, 0.0  ;;  %v15697_v56 = vadd.f32 %v7532_v63, %v7466_v26  ;;  %7647 = vrot.lane.b32.xlu0 %v18228_v20, %s11380_s19  ;;  %v15706_v46 = vadd.f32 %v18230_v28, %v18229_v37  ;;  %18233 = vst [vmem:[#allocation98_spill] sm:$0xff] %v15710_v47  ;;  %v15714_v26 = vadd.f32 %v18235_v39, %v18234_v44  ;;  %v18242_v40 = vld [vmem:[#allocation88_spill] sm:$0xff]  ;;  %v18246_v44 = vld [vmem:[#allocation94_spill] sm:$0xff] }
 0x4a7   : > { %v15718_v63 = vadd.f32 %v18238_v45, %v18237_v18  ;;  %v15727_v37 = vadd.f32 %v18242_v40, %v18175_v24  ;;  %v18244_v28 = vld [vmem:[#allocation128_spill] sm:$0xff]  ;;  %10793 = vrsqrt.f32 %v15687_v48  ;;  %v7538_v42 = vpop.permute.xlu1 %7537  ;;  %v15736_v39 = vadd.f32 %v18246_v44, %v18179_v30  ;;  %v18249_v18 = vld [vmem:[#allocation123_spill] sm:$0xff]  ;;  %v18257_v44 = vld [vmem:[#allocation110_spill] sm:$0xff] }
 0x4a8   : > { %10131 = vmatprep.mubr.msk.f32.mxu1 %vm5918_vm1, %v5888_v25  ;;  %18236 = vst [vmem:[#allocation13_spill] sm:$0xff] %v15714_v26  ;;  %v18240_v25 = vld [vmem:[#allocation89_spill] sm:$0xff]  ;;  %v15731_v7 = vadd.f32 %v18244_v28, %v18178_v41  ;;  %10795 = vrsqrt.f32 %v15697_v56  ;;  %v7536_v24 = vpop.permute.xlu0 %7535  ;;  %v18254_v28 = vld [vmem:[#allocation66_spill] sm:$0xff]  ;;  %vm7801_vm4 = vcmp.eq.f32.partialorder %v15687_v48, inf  ;;  %vm7803_vm5 = vcmp.eq.f32.partialorder %v15687_v48, 0.0 }
 0x4a9   : > { %18239 = vst [vmem:[#allocation148_spill] sm:$0xff] %v15718_v63  ;;  %10132 = vmatmul.mubr.msk.f32.gmra.mrb[202].mxu1 %vm5918_vm1, %v5889_v58  ;;  %v15723_v31 = vadd.f32 %v18240_v25, %v18174_v51  ;;  %18243 = vst [vmem:[#allocation153_spill] sm:$0xff] %v15727_v37  ;;  %v18248_v58 = vld [vmem:[#allocation63_spill] sm:$0xff]  ;;  %v15744_v51 = vadd.f32 %v7538_v42, %v15560_v5  ;;  %v18251_v25 = vld [vmem:[#allocation37_spill] sm:$0xff]  ;;  %v15755_v30 = vadd.f32 %v7536_v24, %v15564_v35 }
 0x4aa   : > { %18245 = vst [vmem:[#allocation3_spill] sm:$0xff] %v15731_v7  ;;  %18247 = vst [vmem:[#allocation71_spill] sm:$0xff] %v15736_v39  ;;  %v15740_v45 = vadd.f32 %v18249_v18, %v18248_v58  ;;  %v18252_v41 = vld [vmem:[#allocation145_spill] sm:$0xff]  ;;  %v18255_v7 = vld [vmem:[#allocation144_spill] sm:$0xff]  ;;  %7653 = vrot.lane.b32.xlu1 %v18257_v44, %s11380_s19  ;;  %vm7794_vm6 = vcmp.eq.f32.partialorder %v15697_v56, inf  ;;  %vm7796_vm7 = vcmp.eq.f32.partialorder %v15697_v56, 0.0 }
 0x4ab   : > { %18241 = vst [vmem:[#allocation41_spill] sm:$0xff] %v15723_v31  ;;  %v15748_v40 = vadd.f32 %v18252_v41, %v18251_v25  ;;  %v15752_v37 = vadd.f32 %v18255_v7, %v18254_v28  ;;  %v18258_v58 = vld [vmem:[#allocation21_spill] sm:$0xff]  ;;  %v18259_v42 = vld [vmem:[#allocation104_spill] sm:$0xff]  ;;  %v18260_v18 = vld [vmem:[#allocation43_spill] sm:$0xff]  ;;  %10797 = vrsqrt.f32 %v15744_v51  ;;  %vm7815_vm8 = vcmp.eq.f32.partialorder %v15744_v51, inf }
 0x4ac   : > { %18250 = vst [vmem:[#allocation6_spill] sm:$0xff] %v15740_v45  ;;  %7651 = vrot.lane.b32.xlu0 %v18258_v58, %s11380_s19  ;;  %v10024_v5 = vpop.f32.mrb[140].mxu1  ;;  %v15763_v45 = vadd.f32 %v18260_v18, %v18259_v42  ;;  %v18262_v25 = vld [vmem:[#allocation65_spill] sm:$0xff]  ;;  %v18263_v41 = vld [vmem:[#allocation99_spill] sm:$0xff]  ;;  %v18268_v24 = vld [vmem:[#allocation134_spill] sm:$0xff]  ;;  %10799 = vrsqrt.f32 %v15755_v30  ;;  %vm7817_vm9 = vcmp.eq.f32.partialorder %v15744_v51, 0.0 }
 0x4ad   : > { %18253 = vst [vmem:[#allocation105_spill] sm:$0xff] %v15748_v40  ;;  %18256 = vst [vmem:[#allocation7_spill] sm:$0xff] %v15752_v37  ;;  %v15767_v40 = vadd.f32 %v18263_v41, %v18262_v25  ;;  %v18264_v7 = vld [vmem:[#allocation29_spill] sm:$0xff]  ;;  %v18265_v28 = vld [vmem:[#allocation131_spill] sm:$0xff]  ;;  %v5747_v31 = vpop.f32.mrb[141].mxu1  ;;  %vm7808_vm10 = vcmp.eq.f32.partialorder %v15755_v30, inf }
 0x4ae   : > { %18261 = vst [vmem:[#allocation151_spill] sm:$0xff] %v15763_v45  ;;  %v15771_v37 = vadd.f32 %v18265_v28, %v18264_v7  ;;  %v18267_v35 = vld [vmem:[#allocation49_spill] sm:$0xff]  ;;  %v18270_v63 = vld [vmem:[#allocation34_spill] sm:$0xff]  ;;  %v18272_v42 = vld [vmem:[#allocation136_spill] sm:$0xff]  ;;  %v7542_v7 = vpop.permute.xlu1 %7541  ;;  %v10792_v28 = vpop.eup %10791  ;;  %vm7810_vm11 = vcmp.eq.f32.partialorder %v15755_v30, 0.0 }
 0x4af   : > { %v15775_v39 = vadd.f32 %v18268_v24, %v18267_v35  ;;  %v18271_v26 = vld [vmem:[#allocation2_spill] sm:$0xff]  ;;  %v15783_v18 = vadd.f32 %v18272_v42, %v18196_v12  ;;  %v18274_v45 = vld [vmem:[#allocation68_spill] sm:$0xff]  ;;  %v18275_v25 = vld [vmem:[#allocation95_spill] sm:$0xff]  ;;  %v15799_v12 = vadd.f32 %v7542_v7, %v15570_v11  ;;  %v7540_v42 = vpop.permute.xlu0 %7539 }
 0x4b0   : > { %18266 = vst [vmem:[#allocation108_spill] sm:$0xff] %v15771_v37  ;;  %v15779_v47 = vadd.f32 %v18271_v26, %v18270_v63  ;;  %v15787_v41 = vadd.f32 %v18275_v25, %v18274_v45  ;;  %v5890_v37 = vmax.f32 %v5747_v31, 0.0  ;;  %v18277_v35 = vld [vmem:[#allocation97_spill] sm:$0xff]  ;;  %v18279_v26 = vld [vmem:[#allocation54_spill] sm:$0xff]  ;;  %v15807_v31 = vadd.f32 %v7540_v42, %v15574_v10  ;;  %v18287_v10 = vld [vmem:[#allocation139_spill] sm:$0xff] }
 0x4b1   : > { %18269 = vst [vmem:[#allocation50_spill] sm:$0xff] %v15775_v39  ;;  %18273 = vst [vmem:[#allocation173_spill] sm:$0xff] %v15783_v18  ;;  %v15792_v24 = vadd.f32 %v18277_v35, %v18200_v54  ;;  %v18278_v39 = vld [vmem:[#allocation67_spill] sm:$0xff]  ;;  %v5891_v18 = vmax.f32 %v10024_v5, 0.0  ;;  %v18280_v45 = vld [vmem:[#allocation46_spill] sm:$0xff]  ;;  %v15826_v42 = vadd.f32 %v18287_v10, %v18215_v62  ;;  %10801 = vrsqrt.f32 %v15799_v12 }
 0x4b2   : > { %18276 = vst [vmem:[#allocation149_spill] sm:$0xff] %v15787_v41  ;;  %v15796_v63 = vadd.f32 %v18279_v26, %v18278_v39  ;;  %v18281_v25 = vld [vmem:[#allocation137_spill] sm:$0xff]  ;;  %v18282_v54 = vld [vmem:[#allocation42_spill] sm:$0xff]  ;;  %10134 = vmatprep.mubr.msk.f32.mxu1 %vm5918_vm1, %v5890_v37  ;;  %v18285_v5 = vld [vmem:[#allocation140_spill] sm:$0xff]  ;;  %10803 = vrsqrt.f32 %v15807_v31  ;;  %vm7829_vm12 = vcmp.eq.f32.partialorder %v15799_v12, inf  ;;  %vm7831_vm13 = vcmp.eq.f32.partialorder %v15799_v12, 0.0 }
 0x4b3   : > { %v15803_v41 = vadd.f32 %v18281_v25, %v18280_v45  ;;  %7655 = vrot.lane.b32.xlu0 %v18282_v54, %s11380_s19  ;;  %v18283_v39 = vld [vmem:[#allocation70_spill] sm:$0xff]  ;;  %v18284_v35 = vld [vmem:[#allocation25_spill] sm:$0xff]  ;;  %v15818_v7 = vadd.f32 %v18285_v5, %v18205_v13  ;;  %10135 = vmatmul.mubr.msk.f32.gmra.mrb[204].mxu1 %vm5918_vm1, %v5891_v18  ;;  %v18288_v37 = vld [vmem:[#allocation143_spill] sm:$0xff]  ;;  %v7544_v18 = vpop.permute.xlu0 %7543  ;;  %v10794_v5 = vpop.eup %10793  ;;  %vm7822_vm14 = vcmp.eq.f32.partialorder %v15807_v31, inf  ;;  %vm7824_vm15 = vcmp.eq.f32.partialorder %v15807_v31, 0.0 }
 0x4b4   : > { %v15814_v11 = vadd.f32 %v18284_v35, %v18283_v39  ;;  %v18286_v26 = vld [vmem:[#allocation78_spill] sm:$0xff]  ;;  %v15831_v25 = vadd.f32 %v18288_v37, %v18216_v34  ;;  %v7546_v39 = vpop.permute.xlu1 %7545  ;;  %v7786_v35 = vmul.f32 %v10792_v28, %v15630_v52  ;;  %v18289_v13 = vld [vmem:[#allocation100_spill] sm:$0xff]  ;;  %v7790_v34 = vand.u32 2147483648, %v15630_v52  ;;  %v10796_v37 = vpop.eup %10795 }
 0x4b5   : > { %v15822_v45 = vadd.f32 %v18286_v26, %v18206_v4  ;;  %v15838_v4 = vadd.f32 %v18289_v13, %v18227_v3  ;;  %v15842_v62 = vadd.f32 %v7546_v39, %v15578_v22  ;;  %v18290_v26 = vld [vmem:[#allocation146_spill] sm:$0xff]  ;;  %v15851_v10 = vadd.f32 %v7544_v18, %v15587_v49  ;;  %v10027_v13 = vpop.f32.mrb[142].mxu1 }
 0x4b6   : > { %v15847_v28 = vadd.f32 %v18290_v26, %v18228_v20  ;;  %v7788_v3 = vsel %vm7787_vm2, %v15630_v52, %v7786_v35  ;;  %v15856_v22 = vadd.f32 %v15554_v1, %v18257_v44  ;;  %v15860_v39 = vadd.f32 %v15566_v53, %v18258_v58  ;;  %v5757_v49 = vpop.f32.mrb[143].mxu1  ;;  %v10798_v52 = vpop.eup %10797 }
 0x4b7   : > { %10805 = vrsqrt.f32 %v15842_v62  ;;  %v7791_v20 = vsel %vm7789_vm3, %v7790_v34, %v7788_v3  ;;  %v5893_v26 = vmax.f32 %v10027_v13, 0.0  ;;  %v15867_v35 = vadd.f32 %v15632_v33, %v18282_v54  ;;  %v7548_v53 = vpop.permute.xlu0 %7547 }
 0x4b8   : > { %18291 = vst [vmem:[#allocation79_spill] sm:$0xff] %v15856_v22  ;;  %10807 = vrsqrt.f32 %v15851_v10  ;;  %v9582_v18 = vadd.f32 -0.05, %v7791_v20  ;;  %v7550_v1 = vpop.permute.xlu1 %7549  ;;  %v5892_v44 = vmax.f32 %v5757_v49, 0.0  ;;  %v7800_v58 = vmul.f32 %v10794_v5, %v15687_v48  ;;  %v10800_v5 = vpop.eup %10799 }
 0x4b9   : > { %v15871_v22 = vadd.f32 %v7550_v1, %v15591_v55  ;;  %v15876_v34 = vadd.f32 %v7548_v53, %v15595_v8  ;;  %v7804_v33 = vand.u32 2147483648, %v15687_v48  ;;  %v7793_v54 = vmul.f32 %v10796_v37, %v15697_v56 }
 0x4ba   : > { %8427 = vperm.xlu1 %10789, %v9582_v18   ;;  %10137 = vmatprep.mubr.msk.f32.mxu1 %vm5918_vm1, %v5892_v44  ;;  %v7802_v55 = vsel %vm7801_vm4, %v15687_v48, %v7800_v58  ;;  %v7797_v37 = vand.u32 2147483648, %v15697_v56  ;;  %v7814_v18 = vmul.f32 %v10798_v52, %v15744_v51  ;;  %v7818_v44 = vand.u32 2147483648, %v15744_v51 }
 0x4bb   : > { %10809 = vrsqrt.f32 %v15871_v22  ;;  %10138 = vmatmul.mubr.msk.f32.gmra.mrb[206].mxu1 %vm5918_vm1, %v5893_v26  ;;  %v7805_v8 = vsel %vm7803_vm5, %v7804_v33, %v7802_v55  ;;  %v7795_v13 = vsel %vm7794_vm6, %v15697_v56, %v7793_v54  ;;  %v7552_v48 = vpop.permute.xlu0 %7551  ;;  %v10802_v53 = vpop.eup %10801  ;;  %v7807_v52 = vmul.f32 %v10800_v5, %v15755_v30 }
 0x4bc   : > { %10811 = vrsqrt.f32 %v15876_v34  ;;  %v7554_v3 = vpop.permute.xlu1 %7553  ;;  %v9584_v20 = vadd.f32 -0.05, %v7805_v8  ;;  %v7798_v1 = vsel %vm7796_vm7, %v7797_v37, %v7795_v13  ;;  %v15896_v26 = vadd.f32 %v7552_v48, %v15604_v27  ;;  %v10030_v58 = vpop.f32.mrb[144].mxu1 }
 0x4bd   : > { %v15891_v49 = vadd.f32 %v7554_v3, %v15599_v59  ;;  %v9583_v59 = vadd.f32 -0.05, %v7798_v1  ;;  %v7816_v56 = vsel %vm7815_vm8, %v15744_v51, %v7814_v18  ;;  %v10804_v33 = vpop.eup %10803  ;;  %v5895_v54 = vmax.f32 %v10030_v58, 0.0  ;;  %v5767_v55 = vpop.f32.mrb[145].mxu1 }
 0x4be   : > { %8437 = vperm.xlu1 %10789, %v9584_v20   ;;  %v7819_v8 = vsel %vm7817_vm9, %v7818_v44, %v7816_v56  ;;  %v5894_v13 = vmax.f32 %v5767_v55, 0.0  ;;  %v7809_v51 = vsel %vm7808_vm10, %v15755_v30, %v7807_v52  ;;  %v7811_v18 = vand.u32 2147483648, %v15755_v30 }
 0x4bf   : > { %10813 = vrsqrt.f32 %v15891_v49  ;;  %8432 = vperm.xlu0 %10790, %v9583_v59   ;;  %v9586_v20 = vadd.f32 -0.05, %v7819_v8  ;;  %v7556_v48 = vpop.permute.xlu0 %7555  ;;  %v7828_v44 = vmul.f32 %v10802_v53, %v15799_v12  ;;  %v7821_v53 = vmul.f32 %v10804_v33, %v15807_v31 }
 0x4c0   : > { %10815 = vrsqrt.f32 %v15896_v26  ;;  %v7558_v27 = vpop.permute.xlu1 %7557  ;;  %v15912_v1 = vadd.f32 %v7556_v48, %v15612_v14  ;;  %10140 = vmatprep.mubr.msk.f32.mxu1 %vm5918_vm1, %v5894_v13  ;;  %v7812_v58 = vsel %vm7810_vm11, %v7811_v18, %v7809_v51  ;;  %vm7843_vm0 = vcmp.eq.f32.partialorder %v15842_v62, inf }
 0x4c1   : > { %v10806_v3 = vpop.eup %10805  ;;  %v15906_v37 = vadd.f32 %v7558_v27, %v15608_v9  ;;  %v7832_v9 = vand.u32 2147483648, %v15799_v12  ;;  %10141 = vmatmul.mubr.msk.f32.gmra.mrb[208].mxu1 %vm5918_vm1, %v5895_v54  ;;  %v7830_v14 = vsel %vm7829_vm12, %v15799_v12, %v7828_v44  ;;  %v9585_v56 = vadd.f32 -0.05, %v7812_v58 }
 0x4c2   : > { %v10808_v5 = vpop.eup %10807  ;;  %v7823_v13 = vsel %vm7822_vm14, %v15807_v31, %v7821_v53  ;;  %v7825_v12 = vand.u32 2147483648, %v15807_v31  ;;  %vm7845_vm2 = vcmp.eq.f32.partialorder %v15842_v62, 0.0  ;;  %vm7836_vm3 = vcmp.eq.f32.partialorder %v15851_v10, inf }
 0x4c3   : > { %10817 = vrsqrt.f32 %v15906_v37  ;;  %8447 = vperm.xlu0 %10790, %v9586_v20   ;;  %v7833_v55 = vsel %vm7831_vm13, %v7832_v9, %v7830_v14  ;;  %v7560_v27 = vpop.permute.xlu0 %7559  ;;  %8442 = vperm.xlu1 %10789, %v9585_v56   ;;  %v7846_v9 = vand.u32 2147483648, %v15842_v62  ;;  %v7835_v56 = vmul.f32 %v10808_v5, %v15851_v10 }
 0x4c4   : > { %10819 = vrsqrt.f32 %v15912_v1  ;;  %v7562_v30 = vpop.permute.xlu1 %7561  ;;  %v9588_v54 = vadd.f32 -0.05, %v7833_v55  ;;  %v10033_v51 = vpop.f32.mrb[146].mxu1  ;;  %v15933_v33 = vadd.f32 %v7560_v27, %v15620_v36  ;;  %v7826_v18 = vsel %vm7824_vm15, %v7825_v12, %v7823_v13 }
 0x4c5   : > { %v10810_v59 = vpop.eup %10809  ;;  %v15925_v52 = vadd.f32 %v7562_v30, %v15616_v60  ;;  %v7842_v60 = vmul.f32 %v10806_v3, %v15842_v62  ;;  %v5897_v20 = vmax.f32 %v10033_v51, 0.0  ;;  %v5777_v48 = vpop.f32.mrb[147].mxu1  ;;  %v9587_v30 = vadd.f32 -0.05, %v7826_v18 }
 0x4c6   : > { %v10812_v8 = vpop.eup %10811  ;;  %v5896_v58 = vmax.f32 %v5777_v48, 0.0  ;;  %vm7838_vm4 = vcmp.eq.f32.partialorder %v15851_v10, 0.0  ;;  %v7856_v12 = vmul.f32 %v10810_v59, %v15871_v22  ;;  %vm7857_vm5 = vcmp.eq.f32.partialorder %v15871_v22, inf }
 0x4c7   : > { %10821 = vrsqrt.f32 %v15925_v52  ;;  %8457 = vperm.xlu0 %10790, %v9588_v54   ;;  %v7564_v3 = vpop.permute.xlu0 %7563  ;;  %v7844_v53 = vsel %vm7843_vm0, %v15842_v62, %v7842_v60  ;;  %8452 = vperm.xlu1 %10789, %v9587_v30   ;;  %v7837_v54 = vsel %vm7836_vm3, %v15851_v10, %v7835_v56  ;;  %vm7859_vm6 = vcmp.eq.f32.partialorder %v15871_v22, 0.0 }
 0x4c8   : > { %v7566_v44 = vpop.permute.xlu1 %7565  ;;  %10823 = vrsqrt.f32 %v15933_v33  ;;  %10143 = vmatprep.mubr.msk.f32.mxu1 %vm5918_vm1, %v5896_v58  ;;  %v7847_v55 = vsel %vm7845_vm2, %v7846_v9, %v7844_v53  ;;  %v15953_v27 = vadd.f32 %v7564_v3, %v15628_v57  ;;  %v7860_v59 = vand.u32 2147483648, %v15871_v22 }
 0x4c9   : > { %v10814_v31 = vpop.eup %10813  ;;  %v15941_v36 = vadd.f32 %v7566_v44, %v15624_v0  ;;  %v7839_v0 = vand.u32 2147483648, %v15851_v10  ;;  %10144 = vmatmul.mubr.msk.f32.gmra.mrb[210].mxu1 %vm5918_vm1, %v5897_v20  ;;  %v9590_v5 = vadd.f32 -0.05, %v7847_v55  ;;  %v7858_v10 = vsel %vm7857_vm5, %v15871_v22, %v7856_v12 }
 0x4ca   : > { %v10816_v14 = vpop.eup %10815  ;;  %v7849_v18 = vmul.f32 %v10812_v8, %v15876_v34  ;;  %vm7850_vm7 = vcmp.eq.f32.partialorder %v15876_v34, inf  ;;  %vm7852_vm8 = vcmp.eq.f32.partialorder %v15876_v34, 0.0  ;;  %v7861_v30 = vsel %vm7859_vm6, %v7860_v59, %v7858_v10 }
 0x4cb   : > { %10825 = vrsqrt.f32 %v15941_v36  ;;  %v7840_v60 = vsel %vm7838_vm4, %v7839_v0, %v7837_v54  ;;  %v7568_v57 = vpop.permute.xlu0 %7567  ;;  %8467 = vperm.xlu0 %10790, %v9590_v5   ;;  %v9592_v0 = vadd.f32 -0.05, %v7861_v30  ;;  %v7870_v22 = vmul.f32 %v10814_v31, %v15891_v49 }
 0x4cc   : > { %v7570_v13 = vpop.permute.xlu1 %7569  ;;  %10827 = vrsqrt.f32 %v15953_v27  ;;  %v9589_v20 = vadd.f32 -0.05, %v7840_v60  ;;  %v10036_v44 = vpop.f32.mrb[148].mxu1  ;;  %v7851_v3 = vsel %vm7850_vm7, %v15876_v34, %v7849_v18  ;;  %v15977_v53 = vadd.f32 %v7568_v57, %v15640_v43 }
 0x4cd   : > { %v10818_v51 = vpop.eup %10817  ;;  %v15961_v62 = vadd.f32 %v7570_v13, %v15636_v15  ;;  %v7853_v15 = vand.u32 2147483648, %v15876_v34  ;;  %v5899_v9 = vmax.f32 %v10036_v44, 0.0  ;;  %v5787_v58 = vpop.f32.mrb[149].mxu1  ;;  %vm7871_vm9 = vcmp.eq.f32.partialorder %v15891_v49, inf }
 0x4ce   : > { %v15964_v48 = vpop.eup %10819  ;;  %8462 = vperm.xlu1 %10789, %v9589_v20   ;;  %v5898_v55 = vmax.f32 %v5787_v58, 0.0  ;;  %vm7873_vm10 = vcmp.eq.f32.partialorder %v15891_v49, 0.0  ;;  %v7874_v43 = vand.u32 2147483648, %v15891_v49  ;;  %v7872_v60 = vsel %vm7871_vm9, %v15891_v49, %v7870_v22 }
 0x4cf   : > { %10829 = vrsqrt.f32 %v15961_v62  ;;  %v7854_v5 = vsel %vm7852_vm8, %v7853_v15, %v7851_v3  ;;  %v7572_v13 = vpop.permute.xlu0 %7571  ;;  %8477 = vperm.xlu0 %10790, %v9592_v0   ;;  %vm7864_vm11 = vcmp.eq.f32.partialorder %v15896_v26, inf  ;;  %vm7866_vm12 = vcmp.eq.f32.partialorder %v15896_v26, 0.0 }
 0x4d0   : > { %v7574_v8 = vpop.permute.xlu1 %7573  ;;  %v9591_v12 = vadd.f32 -0.05, %v7854_v5  ;;  %10831 = vrsqrt.f32 %v15977_v53  ;;  %10146 = vmatprep.mubr.msk.f32.mxu1 %vm5918_vm1, %v5898_v55  ;;  %v7867_v31 = vand.u32 2147483648, %v15896_v26  ;;  %v7875_v10 = vsel %vm7873_vm10, %v7874_v43, %v7872_v60 }
 0x4d1   : > { %v10822_v56 = vpop.eup %10821  ;;  %v15980_v54 = vadd.f32 %v7574_v8, %v15644_v61  ;;  %v7863_v61 = vmul.f32 %v10816_v14, %v15896_v26  ;;  %10147 = vmatmul.mubr.msk.f32.gmra.mrb[212].mxu1 %vm5918_vm1, %v5899_v9  ;;  %v15997_v18 = vadd.f32 %v7572_v13, %v15652_v2  ;;  %v9594_v15 = vadd.f32 -0.05, %v7875_v10 }
 0x4d2   : > { %v10824_v34 = vpop.eup %10823  ;;  %8472 = vperm.xlu1 %10789, %v9591_v12   ;;  %v7884_v9 = vmul.f32 %v10818_v51, %v15906_v37  ;;  %vm7885_vm13 = vcmp.eq.f32.partialorder %v15906_v37, inf  ;;  %vm7887_vm14 = vcmp.eq.f32.partialorder %v15906_v37, 0.0  ;;  %v7888_v2 = vand.u32 2147483648, %v15906_v37 }
 0x4d3   : > { %10833 = vrsqrt.f32 %v15980_v54  ;;  %v7865_v59 = vsel %vm7864_vm11, %v15896_v26, %v7863_v61  ;;  %v7576_v44 = vpop.permute.xlu0 %7575  ;;  %8487 = vperm.xlu0 %10790, %v9594_v15   ;;  %v7877_v51 = vmul.f32 %v15964_v48, %v15912_v1  ;;  %vm7878_vm15 = vcmp.eq.f32.partialorder %v15912_v1, inf }
 0x4d4   : > { %v7578_v57 = vpop.permute.xlu1 %7577  ;;  %v7868_v49 = vsel %vm7866_vm12, %v7867_v31, %v7865_v59  ;;  %v10039_v30 = vpop.f32.mrb[150].mxu1  ;;  %10835 = vrsqrt.f32 %v15997_v18  ;;  %v7886_v8 = vsel %vm7885_vm13, %v15906_v37, %v7884_v9  ;;  %vm7880_vm0 = vcmp.eq.f32.partialorder %v15912_v1, 0.0 }
 0x4d5   : > { %v10826_v20 = vpop.eup %10825  ;;  %v16000_v14 = vadd.f32 %v7578_v57, %v15656_v23  ;;  %v9593_v3 = vadd.f32 -0.05, %v7868_v49  ;;  %v5901_v26 = vmax.f32 %v10039_v30, 0.0  ;;  %v5797_v23 = vpop.f32.mrb[151].mxu1  ;;  %v7889_v13 = vsel %vm7887_vm14, %v7888_v2, %v7886_v8 }
 0x4d6   : > { %v16004_v58 = vpop.eup %10827  ;;  %v5900_v5 = vmax.f32 %v5797_v23, 0.0  ;;  %v9596_v22 = vadd.f32 -0.05, %v7889_v13  ;;  %v7879_v43 = vsel %vm7878_vm15, %v15912_v1, %v7877_v51  ;;  %v7881_v61 = vand.u32 2147483648, %v15912_v1 }
 0x4d7   : > { %10837 = vrsqrt.f32 %v16000_v14  ;;  %8482 = vperm.xlu1 %10789, %v9593_v3   ;;  %v7580_v12 = vpop.permute.xlu0 %7579  ;;  %v16020_v37 = vadd.f32 %v7576_v44, %v15660_v50  ;;  %v7898_v60 = vmul.f32 %v10822_v56, %v15925_v52  ;;  %vm7899_vm2 = vcmp.eq.f32.partialorder %v15925_v52, inf }
 0x4d8   : > { %v7582_v55 = vpop.permute.xlu1 %7581  ;;  %10149 = vmatprep.mubr.msk.f32.mxu1 %vm5918_vm1, %v5900_v5  ;;  %vm7901_vm3 = vcmp.eq.f32.partialorder %v15925_v52, 0.0  ;;  %8497 = vperm.xlu0 %10790, %v9596_v22   ;;  %v7882_v1 = vsel %vm7880_vm0, %v7881_v61, %v7879_v43  ;;  %v7902_v50 = vand.u32 2147483648, %v15925_v52  ;;  %v7891_v57 = vmul.f32 %v10824_v34, %v15933_v33 }
 0x4d9   : > { %v16013_v0 = vpop.eup %10829  ;;  %v16024_v48 = vadd.f32 %v7582_v55, %v15665_v19  ;;  %10150 = vmatmul.mubr.msk.f32.gmra.mrb[214].mxu1 %vm5918_vm1, %v5901_v26  ;;  %10839 = vrsqrt.f32 %v16020_v37  ;;  %v9595_v56 = vadd.f32 -0.05, %v7882_v1  ;;  %v7900_v59 = vsel %vm7899_vm2, %v15925_v52, %v7898_v60 }
 0x4da   : > { %v16029_v31 = vpop.eup %10831  ;;  %vm7892_vm4 = vcmp.eq.f32.partialorder %v15933_v33, inf  ;;  %v7903_v15 = vsel %vm7901_vm3, %v7902_v50, %v7900_v59  ;;  %vm7894_vm5 = vcmp.eq.f32.partialorder %v15933_v33, 0.0  ;;  %v7895_v9 = vand.u32 2147483648, %v15933_v33 }
 0x4db   : > { %10841 = vrsqrt.f32 %v16024_v48  ;;  %v7584_v44 = vpop.permute.xlu0 %7583  ;;  %v7893_v49 = vsel %vm7892_vm4, %v15933_v33, %v7891_v57  ;;  %8492 = vperm.xlu1 %10789, %v9595_v56   ;;  %v9598_v34 = vadd.f32 -0.05, %v7903_v15  ;;  %v16044_v3 = vadd.f32 %v7580_v12, %v15669_v38 }
 0x4dc   : > { %v7586_v19 = vpop.permute.xlu1 %7585  ;;  %v10042_v30 = vpop.f32.mrb[152].mxu1  ;;  %v7912_v52 = vmul.f32 %v10826_v20, %v15941_v36  ;;  %v7896_v8 = vsel %vm7894_vm5, %v7895_v9, %v7893_v49  ;;  %vm7913_vm6 = vcmp.eq.f32.partialorder %v15941_v36, inf  ;;  %vm7915_vm7 = vcmp.eq.f32.partialorder %v15941_v36, 0.0 }
 0x4dd   : > { %v16035_v10 = vpop.eup %10833  ;;  %v16047_v2 = vadd.f32 %v7586_v19, %v15673_v16  ;;  %v5903_v26 = vmax.f32 %v10042_v30, 0.0  ;;  %v5807_v23 = vpop.f32.mrb[153].mxu1  ;;  %8507 = vperm.xlu0 %10790, %v9598_v34   ;;  %v9597_v5 = vadd.f32 -0.05, %v7896_v8  ;;  %10843 = vrsqrt.f32 %v16044_v3 }
 0x4de   : > { %v16052_v33 = vpop.eup %10835  ;;  %v5902_v55 = vmax.f32 %v5807_v23, 0.0  ;;  %v7914_v38 = vsel %vm7913_vm6, %v15941_v36, %v7912_v52  ;;  %v7916_v20 = vand.u32 2147483648, %v15941_v36  ;;  %v7905_v12 = vmul.f32 %v16004_v58, %v15953_v27 }
 0x4df   : > { %v7588_v16 = vpop.permute.xlu0 %7587  ;;  %10845 = vrsqrt.f32 %v16047_v2  ;;  %vm7906_vm8 = vcmp.eq.f32.partialorder %v15953_v27, inf  ;;  %8502 = vperm.xlu1 %10789, %v9597_v5   ;;  %vm7908_vm9 = vcmp.eq.f32.partialorder %v15953_v27, 0.0  ;;  %v7909_v22 = vand.u32 2147483648, %v15953_v27 }
 0x4e0   : > { %v7590_v51 = vpop.permute.xlu1 %7589  ;;  %10152 = vmatprep.mubr.msk.f32.mxu1 %vm5918_vm1, %v5902_v55  ;;  %v16067_v43 = vadd.f32 %v7584_v44, %v15677_v32  ;;  %v7917_v58 = vsel %vm7915_vm7, %v7916_v20, %v7914_v38  ;;  %v7907_v60 = vsel %vm7906_vm8, %v15953_v27, %v7905_v12  ;;  %v7926_v1 = vmul.f32 %v16013_v0, %v15961_v62 }
 0x4e1   : > { %v16056_v13 = vpop.eup %10837  ;;  %v16070_v61 = vadd.f32 %v7590_v51, %v15681_v17  ;;  %10153 = vmatmul.mubr.msk.f32.gmra.mrb[216].mxu1 %vm5918_vm1, %v5903_v26  ;;  %vm7927_vm10 = vcmp.eq.f32.partialorder %v15961_v62, inf  ;;  %v9600_v57 = vadd.f32 -0.05, %v7917_v58  ;;  %v7910_v19 = vsel %vm7908_vm9, %v7909_v22, %v7907_v60 }
 0x4e2   : > { %10847 = vrsqrt.f32 %v16067_v43  ;;  %vm7929_vm11 = vcmp.eq.f32.partialorder %v15961_v62, 0.0  ;;  %v9599_v56 = vadd.f32 -0.05, %v7910_v19  ;;  %v7928_v36 = vsel %vm7927_vm10, %v15961_v62, %v7926_v1 }
 0x4e3   : > { %v7592_v32 = vpop.permute.xlu0 %7591  ;;  %v16081_v17 = vpop.eup %10839  ;;  %10849 = vrsqrt.f32 %v16070_v61  ;;  %v7930_v27 = vand.u32 2147483648, %v15961_v62  ;;  %8517 = vperm.xlu0 %10790, %v9600_v57   ;;  %v7919_v44 = vmul.f32 %v16029_v31, %v15977_v53  ;;  %vm7920_vm12 = vcmp.eq.f32.partialorder %v15977_v53, inf }
 0x4e4   : > { %v7594_v50 = vpop.permute.xlu1 %7593  ;;  %v10045_v59 = vpop.f32.mrb[154].mxu1  ;;  %vm7922_vm13 = vcmp.eq.f32.partialorder %v15977_v53, 0.0  ;;  %v7923_v15 = vand.u32 2147483648, %v15977_v53  ;;  %8512 = vperm.xlu1 %10789, %v9599_v56   ;;  %v16096_v34 = vadd.f32 %v7588_v16, %v15685_v29  ;;  %v7940_v51 = vmul.f32 %v16035_v10, %v15980_v54 }
 0x4e5   : > { %v16086_v0 = vpop.eup %10841  ;;  %v5905_v49 = vmax.f32 %v10045_v59, 0.0  ;;  %v5817_v9 = vpop.f32.mrb[155].mxu1  ;;  %v7931_v30 = vsel %vm7929_vm11, %v7930_v27, %v7928_v36  ;;  %v16099_v52 = vadd.f32 %v7594_v50, %v15691_v21  ;;  %v7921_v8 = vsel %vm7920_vm12, %v15977_v53, %v7919_v44 }
 0x4e6   : > { %v5904_v31 = vmax.f32 %v5817_v9, 0.0  ;;  %v9602_v23 = vadd.f32 -0.05, %v7931_v30  ;;  %v7924_v5 = vsel %vm7922_vm13, %v7923_v15, %v7921_v8  ;;  %10851 = vrsqrt.f32 %v16096_v34 }
 0x4e7   : > { %v7596_v55 = vpop.permute.xlu0 %7595  ;;  %vm7941_vm14 = vcmp.eq.f32.partialorder %v15980_v54, inf  ;;  %vm7943_vm15 = vcmp.eq.f32.partialorder %v15980_v54, 0.0  ;;  %v10844_v29 = vpop.eup %10843  ;;  %v9601_v21 = vadd.f32 -0.05, %v7924_v5  ;;  %10853 = vrsqrt.f32 %v16099_v52 }
 0x4e8   : > { %v7598_v26 = vpop.permute.xlu1 %7597  ;;  %10155 = vmatprep.mubr.msk.f32.mxu1 %vm5918_vm1, %v5904_v31  ;;  %8527 = vperm.xlu0 %10790, %v9602_v23   ;;  %v7942_v62 = vsel %vm7941_vm14, %v15980_v54, %v7940_v51  ;;  %v7944_v53 = vand.u32 2147483648, %v15980_v54  ;;  %v7933_v38 = vmul.f32 %v16052_v33, %v15997_v18  ;;  %vm7934_vm0 = vcmp.eq.f32.partialorder %v15997_v18, inf }
 0x4e9   : > { %v16111_v10 = vpop.eup %10845  ;;  %10156 = vmatmul.mubr.msk.f32.gmra.mrb[218].mxu1 %vm5918_vm1, %v5905_v49  ;;  %vm7936_vm2 = vcmp.eq.f32.partialorder %v15997_v18, 0.0  ;;  %v7937_v16 = vand.u32 2147483648, %v15997_v18  ;;  %8522 = vperm.xlu1 %10789, %v9601_v21   ;;  %v16122_v22 = vadd.f32 %v7592_v32, %v15695_v6  ;;  %v16125_v58 = vadd.f32 %v7598_v26, %v15706_v46  ;;  %v18292_v26 = vld [vmem:[#allocation98_spill] sm:$0xff] }
 0x4ea   : > { %v7945_v12 = vsel %vm7943_vm15, %v7944_v53, %v7942_v62  ;;  %v7954_v33 = vmul.f32 %v16056_v13, %v16000_v14  ;;  %v7935_v50 = vsel %vm7934_vm0, %v15997_v18, %v7933_v38  ;;  %vm7955_vm3 = vcmp.eq.f32.partialorder %v16000_v14, inf }
 0x4eb   : > { %v7600_v60 = vpop.permute.xlu0 %7599  ;;  %v9604_v1 = vadd.f32 -0.05, %v7945_v12  ;;  %vm7957_vm4 = vcmp.eq.f32.partialorder %v16000_v14, 0.0  ;;  %v7938_v19 = vsel %vm7936_vm2, %v7937_v16, %v7935_v50  ;;  %10855 = vrsqrt.f32 %v16122_v22  ;;  %v18295_v50 = vld [vmem:[#allocation41_spill] sm:$0xff] }
 0x4ec   : > { %v7602_v20 = vpop.permute.xlu1 %7601  ;;  %v16132_v57 = vpop.eup %10847  ;;  %v7956_v6 = vsel %vm7955_vm3, %v16000_v14, %v7954_v33  ;;  %v7958_v46 = vand.u32 2147483648, %v16000_v14  ;;  %v9603_v18 = vadd.f32 -0.05, %v7938_v19  ;;  %10857 = vrsqrt.f32 %v16125_v58  ;;  %v18294_v33 = vld [vmem:[#allocation148_spill] sm:$0xff] }
 0x4ed   : > { %v10048_v54 = vpop.f32.mrb[156].mxu1  ;;  %v16137_v32 = vpop.eup %10849  ;;  %8537 = vperm.xlu0 %10790, %v9604_v1   ;;  %v7947_v36 = vmul.f32 %v16081_v17, %v16020_v37  ;;  %vm7948_vm5 = vcmp.eq.f32.partialorder %v16020_v37, inf  ;;  %vm7950_vm6 = vcmp.eq.f32.partialorder %v16020_v37, 0.0  ;;  %v7951_v30 = vand.u32 2147483648, %v16020_v37  ;;  %v18293_v17 = vld [vmem:[#allocation13_spill] sm:$0xff] }
 0x4ee   : > { %v5907_v13 = vmax.f32 %v10048_v54, 0.0  ;;  %v5827_v56 = vpop.f32.mrb[157].mxu1  ;;  %v7959_v44 = vsel %vm7957_vm4, %v7958_v46, %v7956_v6  ;;  %8532 = vperm.xlu1 %10789, %v9603_v18   ;;  %v16149_v31 = vadd.f32 %v7596_v55, %v18292_v26  ;;  %v16153_v23 = vadd.f32 %v7602_v20, %v18293_v17  ;;  %v18297_v26 = vld [vmem:[#allocation3_spill] sm:$0xff] }
 0x4ef   : > { %v5906_v59 = vmax.f32 %v5827_v56, 0.0  ;;  %v7604_v15 = vpop.permute.xlu0 %7603  ;;  %v9606_v49 = vadd.f32 -0.05, %v7959_v44  ;;  %v7949_v9 = vsel %vm7948_vm5, %v16020_v37, %v7947_v36  ;;  %v7968_v14 = vmul.f32 %v16086_v0, %v16024_v48 }
 0x4f0   : > { %v7606_v27 = vpop.permute.xlu1 %7605  ;;  %vm7969_vm7 = vcmp.eq.f32.partialorder %v16024_v48, inf  ;;  %vm7971_vm8 = vcmp.eq.f32.partialorder %v16024_v48, 0.0  ;;  %v16159_v8 = vpop.eup %10851  ;;  %v7952_v37 = vsel %vm7950_vm6, %v7951_v30, %v7949_v9  ;;  %10859 = vrsqrt.f32 %v16149_v31  ;;  %v18296_v9 = vld [vmem:[#allocation153_spill] sm:$0xff] }
 0x4f1   : > { %10158 = vmatprep.mubr.msk.f32.mxu1 %vm5918_vm1, %v5906_v59  ;;  %8547 = vperm.xlu0 %10790, %v9606_v49   ;;  %v7972_v51 = vand.u32 2147483648, %v16024_v48  ;;  %v7961_v55 = vmul.f32 %v10844_v29, %v16044_v3  ;;  %v16165_v21 = vpop.eup %10853  ;;  %v9605_v0 = vadd.f32 -0.05, %v7952_v37  ;;  %10861 = vrsqrt.f32 %v16153_v23 }
 0x4f2   : > { %10159 = vmatmul.mubr.msk.f32.gmra.mrb[220].mxu1 %vm5918_vm1, %v5907_v13  ;;  %v7970_v62 = vsel %vm7969_vm7, %v16024_v48, %v7968_v14  ;;  %vm7962_vm9 = vcmp.eq.f32.partialorder %v16044_v3, inf  ;;  %vm7964_vm10 = vcmp.eq.f32.partialorder %v16044_v3, 0.0  ;;  %v7965_v20 = vand.u32 2147483648, %v16044_v3 }
 0x4f3   : > { %v16170_v53 = vpop.permute.xlu0 %7607  ;;  %v7973_v38 = vsel %vm7971_vm8, %v7972_v51, %v7970_v62  ;;  %v7963_v16 = vsel %vm7962_vm9, %v16044_v3, %v7961_v55  ;;  %8542 = vperm.xlu1 %10789, %v9605_v0   ;;  %v16176_v1 = vadd.f32 %v7600_v60, %v18294_v33  ;;  %v16179_v54 = vadd.f32 %v7606_v27, %v18295_v50 }
 0x4f4   : > { %v7610_v5 = vpop.permute.xlu1 %7609  ;;  %v10051_v29 = vpop.f32.mrb[158].mxu1  ;;  %v9608_v12 = vadd.f32 -0.05, %v7973_v38  ;;  %v7982_v48 = vmul.f32 %v16111_v10, %v16047_v2  ;;  %v7966_v46 = vsel %vm7964_vm10, %v7965_v20, %v7963_v16  ;;  %vm7983_vm11 = vcmp.eq.f32.partialorder %v16047_v2, inf }
 0x4f5   : > { %v5909_v19 = vmax.f32 %v10051_v29, 0.0  ;;  %v5837_v6 = vpop.f32.mrb[159].mxu1  ;;  %vm7985_vm12 = vcmp.eq.f32.partialorder %v16047_v2, 0.0  ;;  %v16185_v13 = vpop.eup %10855  ;;  %v9607_v60 = vadd.f32 -0.05, %v7966_v46  ;;  %10863 = vrsqrt.f32 %v16176_v1 }
 0x4f6   : > { %v5908_v56 = vmax.f32 %v5837_v6, 0.0  ;;  %8557 = vperm.xlu0 %10790, %v9608_v12   ;;  %v7984_v18 = vsel %vm7983_vm11, %v16047_v2, %v7982_v48  ;;  %v16191_v10 = vpop.eup %10857  ;;  %10865 = vrsqrt.f32 %v16179_v54  ;;  %v7986_v27 = vand.u32 2147483648, %v16047_v2 }
 0x4f7   : > { %v16189_v36 = vpop.permute.xlu0 %7611  ;;  %v7975_v59 = vmul.f32 %v16132_v57, %v16067_v43  ;;  %vm7976_vm13 = vcmp.eq.f32.partialorder %v16067_v43, inf  ;;  %8552 = vperm.xlu1 %10789, %v9607_v60   ;;  %vm7978_vm14 = vcmp.eq.f32.partialorder %v16067_v43, 0.0  ;;  %v7979_v49 = vand.u32 2147483648, %v16067_v43 }
 0x4f8   : > { %v7614_v3 = vpop.permute.xlu1 %7613  ;;  %v10070_v44 = vpop.f32.mrb[160].mxu1  ;;  %10161 = vmatprep.mubr.msk.f32.mxu1 %vm5918_vm1, %v5908_v56  ;;  %v16202_v30 = vadd.f32 %v7604_v15, %v18296_v9  ;;  %v16205_v17 = vadd.f32 %v7610_v5, %v18297_v26  ;;  %v7987_v57 = vsel %vm7985_vm12, %v7986_v27, %v7984_v18  ;;  %v7996_v55 = vmul.f32 %v16137_v32, %v16070_v61  ;;  %v18299_v18 = vld [vmem:[#allocation6_spill] sm:$0xff] }
 0x4f9   : > { %v6497_v14 = vmax.f32 %v10070_v44, 0.0  ;;  %v6177_v37 = vpop.f32.mrb[161].mxu1  ;;  %10162 = vmatmul.mubr.msk.f32.gmra.mrb[222].mxu1 %vm5918_vm1, %v5909_v19  ;;  %v7977_v51 = vsel %vm7976_vm13, %v16067_v43, %v7975_v59  ;;  %v9610_v38 = vadd.f32 -0.05, %v7987_v57  ;;  %vm7997_vm15 = vcmp.eq.f32.partialorder %v16070_v61, inf  ;;  %v18298_v19 = vld [vmem:[#allocation71_spill] sm:$0xff] }
 0x4fa   : > { %v6496_v62 = vmax.f32 %v6177_v37, 0.0  ;;  %v7980_v15 = vsel %vm7978_vm14, %v7979_v49, %v7977_v51  ;;  %10867 = vrsqrt.f32 %v16202_v30  ;;  %v16216_v16 = vpop.eup %10859  ;;  %vm7999_vm0 = vcmp.eq.f32.partialorder %v16070_v61, 0.0 }
 0x4fb   : > { %v16214_v5 = vpop.permute.xlu0 %7615  ;;  %v9609_v20 = vadd.f32 -0.05, %v7980_v15  ;;  %10869 = vrsqrt.f32 %v16205_v17  ;;  %v16221_v2 = vpop.eup %10861  ;;  %8567 = vperm.xlu0 %10790, %v9610_v38   ;;  %v7998_v32 = vsel %vm7997_vm15, %v16070_v61, %v7996_v55  ;;  %v8000_v29 = vand.u32 2147483648, %v16070_v61  ;;  %v18300_v15 = vld [vmem:[#allocation105_spill] sm:$0xff] }
 0x4fc   : > { %v7618_v0 = vpop.permute.xlu1 %7617  ;;  %v10073_v43 = vpop.f32.mrb[162].mxu1  ;;  %10180 = vmatprep.mubr.msk.f32.mxu1 %vm5918_vm1, %v6496_v62  ;;  %v7989_v12 = vmul.f32 %v16159_v8, %v16096_v34  ;;  %vm7990_vm2 = vcmp.eq.f32.partialorder %v16096_v34, inf  ;;  %vm7992_vm3 = vcmp.eq.f32.partialorder %v16096_v34, 0.0  ;;  %v7993_v48 = vand.u32 2147483648, %v16096_v34 }
 0x4fd   : > { %v6499_v33 = vmax.f32 %v10073_v43, 0.0  ;;  %v6187_v50 = vpop.f32.mrb[163].mxu1  ;;  %10181 = vmatmul.mubr.msk.f32.vlgmr.msra.gmra.mrb[224].mxu1 %vm5918_vm1, %v6497_v14  ;;  %8562 = vperm.xlu1 %10789, %v9609_v20   ;;  %v16234_v6 = vadd.f32 %v16170_v53, %v18298_v19  ;;  %v8001_v8 = vsel %vm7999_vm0, %v8000_v29, %v7998_v32  ;;  %v16242_v27 = vadd.f32 %v7614_v3, %v18299_v18  ;;  %v18301_v43 = vld [vmem:[#allocation7_spill] sm:$0xff] }
 0x4fe   : > { %v6498_v56 = vmax.f32 %v6187_v50, 0.0  ;;  %v7991_v60 = vsel %vm7990_vm2, %v16096_v34, %v7989_v12  ;;  %v9612_v59 = vadd.f32 -0.05, %v8001_v8  ;;  %v8010_v49 = vmul.f32 %v16165_v21, %v16099_v52 }
 0x4ff   : > { %v7994_v44 = vsel %vm7992_vm3, %v7993_v48, %v7991_v60  ;;  %10871 = vrsqrt.f32 %v16234_v6  ;;  %v16247_v53 = vpop.eup %10863  ;;  %vm8011_vm4 = vcmp.eq.f32.partialorder %v16099_v52, inf  ;;  %vm8013_vm5 = vcmp.eq.f32.partialorder %v16099_v52, 0.0  ;;  %v16253_v61 = vpop.permute.xlu0 %7619 }
 0x500   : > { %v16236_v46 = vpop.permute.xlu1 %7621  ;;  %v10076_v9 = vpop.f32.mrb[164].mxu1  ;;  %10183 = vmatprep.mubr.msk.f32.mxu1 %vm5918_vm1, %v6498_v56  ;;  %v9611_v26 = vadd.f32 -0.05, %v7994_v44  ;;  %10873 = vrsqrt.f32 %v16242_v27  ;;  %8577 = vperm.xlu0 %10790, %v9612_v59   ;;  %v8012_v21 = vsel %vm8011_vm4, %v16099_v52, %v8010_v49  ;;  %v8014_v37 = vand.u32 2147483648, %v16099_v52  ;;  %v18302_v49 = vld [vmem:[#allocation151_spill] sm:$0xff] }
 0x501   : > { %v16255_v34 = vpop.eup %10865  ;;  %v6501_v3 = vmax.f32 %v10076_v9, 0.0  ;;  %v6197_v14 = vpop.f32.mrb[165].mxu1  ;;  %10184 = vmatmul.mubr.msk.f32.gmra.mrb[226].mxu1 %vm5918_vm1, %v6499_v33  ;;  %v8003_v57 = vmul.f32 %v16185_v13, %v16122_v22  ;;  %vm8004_vm6 = vcmp.eq.f32.partialorder %v16122_v22, inf  ;;  %vm8006_vm7 = vcmp.eq.f32.partialorder %v16122_v22, 0.0 }
 0x502   : > { %v6500_v51 = vmax.f32 %v6197_v14, 0.0  ;;  %8572 = vperm.xlu1 %10789, %v9611_v26   ;;  %v8007_v55 = vand.u32 2147483648, %v16122_v22  ;;  %v8015_v62 = vsel %vm8013_vm5, %v8014_v37, %v8012_v21  ;;  %v16268_v20 = vadd.f32 %v16189_v36, %v18300_v15 }
 0x503   : > { %v8005_v38 = vsel %vm8004_vm6, %v16122_v22, %v8003_v57  ;;  %v16271_v52 = vadd.f32 %v7618_v0, %v18301_v43  ;;  %v9614_v12 = vadd.f32 -0.05, %v8015_v62  ;;  %v8024_v50 = vmul.f32 %v16191_v10, %v16125_v58  ;;  %v16289_v8 = vpop.permute.xlu0 %7623 }
 0x504   : > { %v16273_v32 = vpop.permute.xlu1 %7625  ;;  %v16275_v13 = vpop.eup %10867  ;;  %10186 = vmatprep.mubr.msk.f32.mxu1 %vm5918_vm1, %v6500_v51  ;;  %v8008_v33 = vsel %vm8006_vm7, %v8007_v55, %v8005_v38  ;;  %vm8025_vm8 = vcmp.eq.f32.partialorder %v16125_v58, inf  ;;  %10875 = vrsqrt.f32 %v16268_v20  ;;  %vm8027_vm9 = vcmp.eq.f32.partialorder %v16125_v58, 0.0 }
 0x505   : > { %v10079_v29 = vpop.f32.mrb[166].mxu1  ;;  %v16281_v22 = vpop.eup %10869  ;;  %10187 = vmatmul.mubr.msk.f32.gmra.mrb[228].mxu1 %vm5918_vm1, %v6501_v3  ;;  %v9613_v0 = vadd.f32 -0.05, %v8008_v33  ;;  %8587 = vperm.xlu0 %10790, %v9614_v12   ;;  %10877 = vrsqrt.f32 %v16271_v52  ;;  %v8026_v56 = vsel %vm8025_vm8, %v16125_v58, %v8024_v50  ;;  %v8028_v10 = vand.u32 2147483648, %v16125_v58  ;;  %v18303_v12 = vld [vmem:[#allocation108_spill] sm:$0xff]  ;;  %v18304_v50 = vld [vmem:[#allocation50_spill] sm:$0xff] }
 0x506   : > { %v6503_v36 = vmax.f32 %v10079_v29, 0.0  ;;  %v6207_v48 = vpop.f32.mrb[167].mxu1  ;;  %v8017_v60 = vmul.f32 %v16216_v16, %v16149_v31  ;;  %vm8018_vm10 = vcmp.eq.f32.partialorder %v16149_v31, inf  ;;  %vm8020_vm11 = vcmp.eq.f32.partialorder %v16149_v31, 0.0 }
 0x507   : > { %v6502_v19 = vmax.f32 %v6207_v48, 0.0  ;;  %8582 = vperm.xlu1 %10789, %v9613_v0   ;;  %v8021_v18 = vand.u32 2147483648, %v16149_v31  ;;  %v8029_v44 = vsel %vm8027_vm9, %v8028_v10, %v8026_v56  ;;  %v16299_v9 = vadd.f32 %v16214_v5, %v18302_v49  ;;  %v16327_v15 = vpop.permute.xlu0 %7627 }
 0x508   : > { %v10082_v59 = vpop.f32.mrb[168].mxu1  ;;  %v16303_v58 = vadd.f32 %v16236_v46, %v15767_v40  ;;  %v8038_v16 = vmul.f32 %v16221_v2, %v16153_v23  ;;  %v9616_v21 = vadd.f32 -0.05, %v8029_v44  ;;  %v8019_v37 = vsel %vm8018_vm10, %v16149_v31, %v8017_v60  ;;  %v7630_v5 = vpop.permute.xlu1 %7629 }
 0x509   : > { %10189 = vmatprep.mubr.msk.f32.mxu1 %vm5918_vm1, %v6502_v19  ;;  %v16307_v26 = vpop.eup %10871  ;;  %v6505_v3 = vmax.f32 %v10082_v59, 0.0  ;;  %v6217_v14 = vpop.f32.mrb[169].mxu1  ;;  %vm8039_vm12 = vcmp.eq.f32.partialorder %v16153_v23, inf  ;;  %v8022_v40 = vsel %vm8020_vm11, %v8021_v18, %v8019_v37  ;;  %10879 = vrsqrt.f32 %v16299_v9 }
 0x50a   : > { %10190 = vmatmul.mubr.msk.f32.gmra.mrb[230].mxu1 %vm5918_vm1, %v6503_v36  ;;  %v16312_v57 = vpop.eup %10873  ;;  %v6504_v51 = vmax.f32 %v6217_v14, 0.0  ;;  %v8040_v2 = vsel %vm8039_vm12, %v16153_v23, %v8038_v16  ;;  %8597 = vperm.xlu0 %10790, %v9616_v21   ;;  %v9615_v46 = vadd.f32 -0.05, %v8022_v40  ;;  %10881 = vrsqrt.f32 %v16303_v58 }
 0x50b   : > { %vm8041_vm13 = vcmp.eq.f32.partialorder %v16153_v23, 0.0  ;;  %v8042_v55 = vand.u32 2147483648, %v16153_v23  ;;  %v8031_v38 = vmul.f32 %v16247_v53, %v16176_v1  ;;  %vm8032_vm14 = vcmp.eq.f32.partialorder %v16176_v1, inf  ;;  %v7632_v37 = vpop.permute.xlu0 %7631 }
 0x50c   : > { %v10085_v62 = vpop.f32.mrb[170].mxu1  ;;  %10192 = vmatprep.mubr.msk.f32.mxu1 %vm5918_vm1, %v6504_v51  ;;  %vm8034_vm15 = vcmp.eq.f32.partialorder %v16176_v1, 0.0  ;;  %v8035_v31 = vand.u32 2147483648, %v16176_v1  ;;  %8592 = vperm.xlu1 %10789, %v9615_v46   ;;  %v16332_v33 = vadd.f32 %v16253_v61, %v18303_v12  ;;  %v16336_v53 = vadd.f32 %v16273_v32, %v18304_v50  ;;  %v7634_v61 = vpop.permute.xlu1 %7633  ;;  %v18306_v12 = vld [vmem:[#allocation149_spill] sm:$0xff] }
 0x50d   : > { %v6507_v43 = vmax.f32 %v10085_v62, 0.0  ;;  %v6227_v29 = vpop.f32.mrb[171].mxu1  ;;  %v8043_v23 = vsel %vm8041_vm13, %v8042_v55, %v8040_v2  ;;  %v8033_v0 = vsel %vm8032_vm14, %v16176_v1, %v8031_v38  ;;  %v8052_v19 = vmul.f32 %v16255_v34, %v16179_v54 }
 0x50e   : > { %10193 = vmatmul.mubr.msk.f32.gmra.mrb[232].mxu1 %vm5918_vm1, %v6505_v3  ;;  %v6506_v36 = vmax.f32 %v6227_v29, 0.0  ;;  %v9618_v48 = vadd.f32 -0.05, %v8043_v23  ;;  %v16341_v56 = vpop.eup %10875  ;;  %v8036_v10 = vsel %vm8034_vm15, %v8035_v31, %v8033_v0  ;;  %10883 = vrsqrt.f32 %v16332_v33 }
 0x50f   : > { %vm8053_vm0 = vcmp.eq.f32.partialorder %v16179_v54, inf  ;;  %vm8055_vm2 = vcmp.eq.f32.partialorder %v16179_v54, 0.0  ;;  %v16346_v60 = vpop.eup %10877  ;;  %v9617_v1 = vadd.f32 -0.05, %v8036_v10  ;;  %10885 = vrsqrt.f32 %v16336_v53  ;;  %v7636_v10 = vpop.permute.xlu0 %7635 }
 0x510   : > { %v10088_v32 = vpop.f32.mrb[172].mxu1  ;;  %10195 = vmatprep.mubr.msk.f32.mxu1 %vm5918_vm1, %v6506_v36  ;;  %8607 = vperm.xlu0 %10790, %v9618_v48   ;;  %v8054_v34 = vsel %vm8053_vm0, %v16179_v54, %v8052_v19  ;;  %v8056_v18 = vand.u32 2147483648, %v16179_v54  ;;  %v8045_v49 = vmul.f32 %v16275_v13, %v16202_v30  ;;  %vm8046_vm3 = vcmp.eq.f32.partialorder %v16202_v30, inf  ;;  %v18305_v13 = vld [vmem:[#allocation173_spill] sm:$0xff]  ;;  %v7638_v38 = vpop.permute.xlu1 %7637 }
 0x511   : > { %v6509_v59 = vmax.f32 %v10088_v32, 0.0  ;;  %v6237_v44 = vpop.f32.mrb[173].mxu1  ;;  %vm8048_vm4 = vcmp.eq.f32.partialorder %v16202_v30, 0.0  ;;  %8602 = vperm.xlu1 %10789, %v9617_v1   ;;  %v8049_v14 = vand.u32 2147483648, %v16202_v30  ;;  %v16362_v21 = vadd.f32 %v16289_v8, %v15779_v47 }
 0x512   : > { %10196 = vmatmul.mubr.msk.f32.gmra.mrb[234].mxu1 %vm5918_vm1, %v6507_v43  ;;  %v6508_v16 = vmax.f32 %v6237_v44, 0.0  ;;  %v8057_v3 = vsel %vm8055_vm2, %v8056_v18, %v8054_v34  ;;  %v8047_v40 = vsel %vm8046_vm3, %v16202_v30, %v8045_v49  ;;  %v16366_v2 = vadd.f32 %v7630_v5, %v18305_v13 }
 0x513   : > { %v9620_v51 = vadd.f32 -0.05, %v8057_v3  ;;  %v8066_v46 = vmul.f32 %v16281_v22, %v16205_v17  ;;  %v16370_v55 = vpop.eup %10879  ;;  %v8050_v62 = vsel %vm8048_vm4, %v8049_v14, %v8047_v40  ;;  %10887 = vrsqrt.f32 %v16362_v21 }
 0x514   : > { %v10091_v54 = vpop.f32.mrb[174].mxu1  ;;  %10198 = vmatprep.mubr.msk.f32.mxu1 %vm5918_vm1, %v6508_v16  ;;  %vm8067_vm5 = vcmp.eq.f32.partialorder %v16205_v17, inf  ;;  %vm8069_vm6 = vcmp.eq.f32.partialorder %v16205_v17, 0.0  ;;  %v16376_v47 = vpop.eup %10881  ;;  %v9619_v22 = vadd.f32 -0.05, %v8050_v62  ;;  %10889 = vrsqrt.f32 %v16366_v2 }
 0x515   : > { %v6511_v30 = vmax.f32 %v10091_v54, 0.0  ;;  %v6247_v8 = vpop.f32.mrb[175].mxu1  ;;  %8617 = vperm.xlu0 %10790, %v9620_v51   ;;  %v8068_v5 = vsel %vm8067_vm5, %v16205_v17, %v8066_v46  ;;  %v8070_v43 = vand.u32 2147483648, %v16205_v17  ;;  %v8059_v29 = vmul.f32 %v16307_v26, %v16234_v6 }
 0x516   : > { %10199 = vmatmul.mubr.msk.f32.gmra.mrb[236].mxu1 %vm5918_vm1, %v6509_v59  ;;  %v6510_v31 = vmax.f32 %v6247_v8, 0.0  ;;  %vm8060_vm7 = vcmp.eq.f32.partialorder %v16234_v6, inf  ;;  %8612 = vperm.xlu1 %10789, %v9619_v22   ;;  %vm8062_vm8 = vcmp.eq.f32.partialorder %v16234_v6, 0.0  ;;  %v8063_v23 = vand.u32 2147483648, %v16234_v6 }
 0x517   : > { %v16389_v50 = vadd.f32 %v16327_v15, %v18306_v12  ;;  %v16392_v36 = vadd.f32 %v7634_v61, %v15792_v24  ;;  %v8071_v26 = vsel %vm8069_vm6, %v8070_v43, %v8068_v5  ;;  %v8061_v0 = vsel %vm8060_vm7, %v16234_v6, %v8059_v29  ;;  %v7642_v6 = vpop.permute.xlu1 %7641 }
 0x518   : > { %v10094_v48 = vpop.f32.mrb[176].mxu1  ;;  %10201 = vmatprep.mubr.msk.f32.mxu1 %vm5918_vm1, %v6510_v31  ;;  %v8080_v19 = vmul.f32 %v16312_v57, %v16242_v27  ;;  %vm8081_vm9 = vcmp.eq.f32.partialorder %v16242_v27, inf  ;;  %v16401_v32 = vpop.eup %10883  ;;  %v9622_v24 = vadd.f32 -0.05, %v8071_v26  ;;  %v8064_v61 = vsel %vm8062_vm8, %v8063_v23, %v8061_v0 }
 0x519   : > { %v6513_v15 = vmax.f32 %v10094_v48, 0.0  ;;  %v6257_v1 = vpop.f32.mrb[177].mxu1  ;;  %10891 = vrsqrt.f32 %v16389_v50  ;;  %v16407_v17 = vpop.eup %10885  ;;  %v9621_v18 = vadd.f32 -0.05, %v8064_v61  ;;  %vm8083_vm10 = vcmp.eq.f32.partialorder %v16242_v27, 0.0 }
 0x51a   : > { %10202 = vmatmul.mubr.msk.f32.gmra.mrb[238].mxu1 %vm5918_vm1, %v6511_v30  ;;  %v6512_v34 = vmax.f32 %v6257_v1, 0.0  ;;  %10893 = vrsqrt.f32 %v16392_v36  ;;  %v8082_v57 = vsel %vm8081_vm9, %v16242_v27, %v8080_v19  ;;  %8627 = vperm.xlu0 %10790, %v9622_v24   ;;  %v8084_v59 = vand.u32 2147483648, %v16242_v27 }
 0x51b   : > { %v8073_v44 = vmul.f32 %v16341_v56, %v16268_v20  ;;  %vm8074_vm11 = vcmp.eq.f32.partialorder %v16268_v20, inf  ;;  %8622 = vperm.xlu1 %10789, %v9621_v18   ;;  %vm8076_vm12 = vcmp.eq.f32.partialorder %v16268_v20, 0.0  ;;  %v8077_v16 = vand.u32 2147483648, %v16268_v20  ;;  %v7646_v31 = vpop.permute.xlu1 %7645 }
 0x51c   : > { %v10097_v49 = vpop.f32.mrb[178].mxu1  ;;  %10204 = vmatprep.mubr.msk.f32.mxu1 %vm5918_vm1, %v6512_v34  ;;  %v16420_v3 = vadd.f32 %v7632_v37, %v15796_v63  ;;  %v16423_v14 = vadd.f32 %v7638_v38, %v15803_v41  ;;  %v8085_v56 = vsel %vm8083_vm10, %v8084_v59, %v8082_v57  ;;  %v8094_v13 = vmul.f32 %v16346_v60, %v16271_v52  ;;  %v7640_v63 = vpop.permute.xlu0 %7639 }
 0x51d   : > { %v6515_v27 = vmax.f32 %v10097_v49, 0.0  ;;  %v6267_v51 = vpop.f32.mrb[179].mxu1  ;;  %v8075_v40 = vsel %vm8074_vm11, %v16268_v20, %v8073_v44  ;;  %v16429_v46 = vpop.eup %10887  ;;  %v9624_v62 = vadd.f32 -0.05, %v8085_v56  ;;  %vm8095_vm13 = vcmp.eq.f32.partialorder %v16271_v52, inf }
 0x51e   : > { %10205 = vmatmul.mubr.msk.f32.gmra.mrb[240].mxu1 %vm5918_vm1, %v6513_v15  ;;  %v6514_v54 = vmax.f32 %v6267_v51, 0.0  ;;  %v8078_v30 = vsel %vm8076_vm12, %v8077_v16, %v8075_v40  ;;  %10895 = vrsqrt.f32 %v16420_v3  ;;  %v16432_v41 = vpop.eup %10889  ;;  %vm8097_vm14 = vcmp.eq.f32.partialorder %v16271_v52, 0.0 }
 0x51f   : > { %v9623_v37 = vadd.f32 -0.05, %v8078_v30  ;;  %10897 = vrsqrt.f32 %v16423_v14  ;;  %8637 = vperm.xlu0 %10790, %v9624_v62   ;;  %v8096_v20 = vsel %vm8095_vm13, %v16271_v52, %v8094_v13  ;;  %v8098_v60 = vand.u32 2147483648, %v16271_v52  ;;  %v7650_v59 = vpop.permute.xlu1 %7649 }
 0x520   : > { %10207 = vmatprep.mubr.msk.f32.mxu1 %vm5918_vm1, %v6514_v54  ;;  %v8087_v8 = vmul.f32 %v16370_v55, %v16299_v9  ;;  %vm8088_vm15 = vcmp.eq.f32.partialorder %v16299_v9, inf  ;;  %vm8090_vm0 = vcmp.eq.f32.partialorder %v16299_v9, 0.0  ;;  %v8091_v22 = vand.u32 2147483648, %v16299_v9  ;;  %v7644_v26 = vpop.permute.xlu0 %7643 }
 0x521   : > { %8632 = vperm.xlu1 %10789, %v9623_v37   ;;  %v16447_v5 = vadd.f32 %v7636_v10, %v15814_v11  ;;  %v16450_v38 = vadd.f32 %v7642_v6, %v15818_v7  ;;  %v8099_v52 = vsel %vm8097_vm14, %v8098_v60, %v8096_v20  ;;  %v8108_v55 = vmul.f32 %v16376_v47, %v16303_v58 }
 0x522   : > { %10208 = vmatmul.mubr.msk.f32.gmra.mrb[242].mxu1 %vm5918_vm1, %v6515_v27  ;;  %v8089_v43 = vsel %vm8088_vm15, %v16299_v9, %v8087_v8  ;;  %vm8109_vm2 = vcmp.eq.f32.partialorder %v16303_v58, inf  ;;  %v9626_v23 = vadd.f32 -0.05, %v8099_v52  ;;  %vm8111_vm3 = vcmp.eq.f32.partialorder %v16303_v58, 0.0  ;;  %v18307_v52 = vld [vmem:[#allocation79_spill] sm:$0xff] }
 0x523   : > { %v16456_v29 = vpop.eup %10891  ;;  %v8092_v12 = vsel %vm8090_vm0, %v8091_v22, %v8089_v43  ;;  %10899 = vrsqrt.f32 %v16447_v5  ;;  %v8110_v9 = vsel %vm8109_vm2, %v16303_v58, %v8108_v55  ;;  %v8112_v47 = vand.u32 2147483648, %v16303_v58 }
 0x524   : > { %v16460_v11 = vpop.eup %10893  ;;  %v10100_v7 = vpop.f32.mrb[180].mxu1  ;;  %v9625_v48 = vadd.f32 -0.05, %v8092_v12  ;;  %10901 = vrsqrt.f32 %v16450_v38  ;;  %8647 = vperm.xlu0 %10790, %v9626_v23   ;;  %v8101_v10 = vmul.f32 %v16401_v32, %v16332_v33  ;;  %vm8102_vm4 = vcmp.eq.f32.partialorder %v16332_v33, inf }
 0x525   : > { %v6517_v0 = vmax.f32 %v10100_v7, 0.0  ;;  %v6277_v19 = vpop.f32.mrb[181].mxu1  ;;  %vm8104_vm5 = vcmp.eq.f32.partialorder %v16332_v33, 0.0  ;;  %v8113_v1 = vsel %vm8111_vm3, %v8112_v47, %v8110_v9  ;;  %v8105_v24 = vand.u32 2147483648, %v16332_v33  ;;  %v7648_v16 = vpop.permute.xlu0 %7647 }
 0x526   : > { %v6516_v15 = vmax.f32 %v6277_v19, 0.0  ;;  %8642 = vperm.xlu1 %10789, %v9625_v48   ;;  %v16473_v61 = vadd.f32 %v7640_v63, %v15822_v45  ;;  %v9628_v34 = vadd.f32 -0.05, %v8113_v1  ;;  %v8103_v18 = vsel %vm8102_vm4, %v16332_v33, %v8101_v10  ;;  %v7654_v63 = vpop.permute.xlu1 %7653 }
 0x527   : > { %v16477_v57 = vadd.f32 %v7646_v31, %v15826_v42  ;;  %v8122_v32 = vmul.f32 %v16407_v17, %v16336_v53  ;;  %v8106_v58 = vsel %vm8104_vm5, %v8105_v24, %v8103_v18  ;;  %vm8123_vm6 = vcmp.eq.f32.partialorder %v16336_v53, inf }
 0x528   : > { %v10896_v44 = vpop.eup %10895  ;;  %10210 = vmatprep.mubr.msk.f32.mxu1 %vm5918_vm1, %v6516_v15  ;;  %10903 = vrsqrt.f32 %v16473_v61  ;;  %vm8125_vm7 = vcmp.eq.f32.partialorder %v16336_v53, 0.0  ;;  %8657 = vperm.xlu0 %10790, %v9628_v34   ;;  %v9627_v42 = vadd.f32 -0.05, %v8106_v58  ;;  %v8126_v17 = vand.u32 2147483648, %v16336_v53 }
 0x529   : > { %v16485_v45 = vpop.eup %10897  ;;  %10211 = vmatmul.mubr.msk.f32.gmra.mrb[244].mxu1 %vm5918_vm1, %v6517_v0  ;;  %10905 = vrsqrt.f32 %v16477_v57  ;;  %v8124_v33 = vsel %vm8123_vm6, %v16336_v53, %v8122_v32  ;;  %v8115_v6 = vmul.f32 %v16429_v46, %v16362_v21  ;;  %vm8116_vm8 = vcmp.eq.f32.partialorder %v16362_v21, inf  ;;  %v7652_v55 = vpop.permute.xlu0 %7651 }
 0x52a   : > { %vm8118_vm9 = vcmp.eq.f32.partialorder %v16362_v21, 0.0  ;;  %v8119_v49 = vand.u32 2147483648, %v16362_v21  ;;  %8652 = vperm.xlu1 %10789, %v9627_v42   ;;  %v8127_v27 = vsel %vm8125_vm7, %v8126_v17, %v8124_v33  ;;  %v16497_v51 = vadd.f32 %v7644_v26, %v15831_v25 }
 0x52b   : > { %v16500_v56 = vadd.f32 %v7650_v59, %v15838_v4  ;;  %v8136_v53 = vmul.f32 %v16432_v41, %v16366_v2  ;;  %v9630_v13 = vadd.f32 -0.05, %v8127_v27  ;;  %v8117_v46 = vsel %vm8116_vm8, %v16362_v21, %v8115_v6 }
 0x52c   : > { %v10103_v40 = vpop.f32.mrb[182].mxu1  ;;  %vm8137_vm10 = vcmp.eq.f32.partialorder %v16366_v2, inf  ;;  %vm8139_vm11 = vcmp.eq.f32.partialorder %v16366_v2, 0.0  ;;  %v8120_v25 = vsel %vm8118_vm9, %v8119_v49, %v8117_v46  ;;  %10907 = vrsqrt.f32 %v16497_v51 }
 0x52d   : > { %v16507_v54 = vpop.eup %10899  ;;  %v6519_v62 = vmax.f32 %v10103_v40, 0.0  ;;  %v6287_v30 = vpop.f32.mrb[183].mxu1  ;;  %v8138_v4 = vsel %vm8137_vm10, %v16366_v2, %v8136_v53  ;;  %8667 = vperm.xlu0 %10790, %v9630_v13   ;;  %v9629_v20 = vadd.f32 -0.05, %v8120_v25  ;;  %10909 = vrsqrt.f32 %v16500_v56 }
 0x52e   : > { %v16513_v41 = vpop.eup %10901  ;;  %v6518_v37 = vmax.f32 %v6287_v30, 0.0  ;;  %v8140_v60 = vand.u32 2147483648, %v16366_v2  ;;  %v8129_v8 = vmul.f32 %v16456_v29, %v16389_v50  ;;  %vm8130_vm12 = vcmp.eq.f32.partialorder %v16389_v50, inf  ;;  %v7656_v32 = vpop.permute.xlu0 %7655 }
 0x52f   : > { %vm8132_vm13 = vcmp.eq.f32.partialorder %v16389_v50, 0.0  ;;  %v8133_v21 = vand.u32 2147483648, %v16389_v50  ;;  %8662 = vperm.xlu1 %10789, %v9629_v20   ;;  %v16526_v31 = vadd.f32 %v7648_v16, %v15847_v28  ;;  %v16529_v43 = vadd.f32 %v7654_v63, %v18307_v52 }
 0x530   : > { %10213 = vmatprep.mubr.msk.f32.mxu1 %vm5918_vm1, %v6518_v37  ;;  %v8141_v22 = vsel %vm8139_vm11, %v8140_v60, %v8138_v4  ;;  %vm8151_vm14 = vcmp.eq.f32.partialorder %v16392_v36, inf  ;;  %v8131_v23 = vsel %vm8130_vm12, %v16389_v50, %v8129_v8  ;;  %v8150_v12 = vmul.f32 %v16460_v11, %v16392_v36 }
 0x531   : > { %10214 = vmatmul.mubr.msk.f32.gmra.mrb[246].mxu1 %vm5918_vm1, %v6519_v62  ;;  %v9632_v29 = vadd.f32 -0.05, %v8141_v22  ;;  %vm8153_vm15 = vcmp.eq.f32.partialorder %v16392_v36, 0.0  ;;  %v8134_v7 = vsel %vm8132_vm13, %v8133_v21, %v8131_v23  ;;  %10911 = vrsqrt.f32 %v16526_v31 }
 0x532   : > { %v10904_v2 = vpop.eup %10903  ;;  %v8154_v28 = vand.u32 2147483648, %v16392_v36  ;;  %v8143_v48 = vmul.f32 %v10896_v44, %v16420_v3  ;;  %v9631_v47 = vadd.f32 -0.05, %v8134_v7  ;;  %10913 = vrsqrt.f32 %v16529_v43 }
 0x533   : > { %v16540_v9 = vpop.eup %10905  ;;  %8677 = vperm.xlu0 %10790, %v9632_v29   ;;  %v8152_v50 = vsel %vm8151_vm14, %v16392_v36, %v8150_v12  ;;  %vm8144_vm0 = vcmp.eq.f32.partialorder %v16420_v3, inf  ;;  %vm8146_vm2 = vcmp.eq.f32.partialorder %v16420_v3, 0.0  ;;  %v8147_v19 = vand.u32 2147483648, %v16420_v3 }
 0x534   : > { %v10106_v11 = vpop.f32.mrb[184].mxu1  ;;  %v8155_v26 = vsel %vm8153_vm15, %v8154_v28, %v8152_v50  ;;  %v8145_v0 = vsel %vm8144_vm0, %v16420_v3, %v8143_v48  ;;  %8672 = vperm.xlu1 %10789, %v9631_v47   ;;  %v16551_v24 = vadd.f32 %v7652_v55, %v15860_v39  ;;  %v8164_v36 = vmul.f32 %v16485_v45, %v16423_v14 }
 0x535   : > { %v6521_v10 = vmax.f32 %v10106_v11, 0.0  ;;  %v6297_v15 = vpop.f32.mrb[185].mxu1  ;;  %v9634_v1 = vadd.f32 -0.05, %v8155_v26  ;;  %v8148_v18 = vsel %vm8146_vm2, %v8147_v19, %v8145_v0  ;;  %vm8165_vm3 = vcmp.eq.f32.partialorder %v16423_v14, inf }
 0x536   : > { %v6520_v34 = vmax.f32 %v6297_v15, 0.0  ;;  %vm8167_vm4 = vcmp.eq.f32.partialorder %v16423_v14, 0.0  ;;  %v10908_v59 = vpop.eup %10907  ;;  %v9633_v3 = vadd.f32 -0.05, %v8148_v18  ;;  %10915 = vrsqrt.f32 %v16551_v24 }
 0x537   : > { %8687 = vperm.xlu0 %10790, %v9634_v1   ;;  %v8166_v44 = vsel %vm8165_vm3, %v16423_v14, %v8164_v36  ;;  %v8168_v39 = vand.u32 2147483648, %v16423_v14  ;;  %v10910_v58 = vpop.eup %10909  ;;  %v8157_v45 = vmul.f32 %v16507_v54, %v16447_v5  ;;  %vm8158_vm5 = vcmp.eq.f32.partialorder %v16447_v5, inf }
 0x538   : > { %10216 = vmatprep.mubr.msk.f32.mxu1 %vm5918_vm1, %v6520_v34  ;;  %vm8160_vm6 = vcmp.eq.f32.partialorder %v16447_v5, 0.0  ;;  %v8161_v42 = vand.u32 2147483648, %v16447_v5  ;;  %8682 = vperm.xlu1 %10789, %v9633_v3   ;;  %v16570_v17 = vadd.f32 %v7656_v32, %v15867_v35  ;;  %v8178_v6 = vmul.f32 %v16513_v41, %v16450_v38 }
 0x539   : > { %10217 = vmatmul.mubr.msk.f32.gmra.mrb[248].mxu1 %vm5918_vm1, %v6521_v10  ;;  %v8169_v33 = vsel %vm8167_vm4, %v8168_v39, %v8166_v44  ;;  %vm8179_vm7 = vcmp.eq.f32.partialorder %v16450_v38, inf  ;;  %v8159_v16 = vsel %vm8158_vm5, %v16447_v5, %v8157_v45  ;;  %vm8181_vm8 = vcmp.eq.f32.partialorder %v16450_v38, 0.0 }
 0x53a   : > { %v9636_v49 = vadd.f32 -0.05, %v8169_v33  ;;  %v8182_v27 = vand.u32 2147483648, %v16450_v38  ;;  %v8162_v53 = vsel %vm8160_vm6, %v8161_v42, %v8159_v16  ;;  %10917 = vrsqrt.f32 %v16570_v17 }
 0x53b   : > { %v8180_v14 = vsel %vm8179_vm7, %v16450_v38, %v8178_v6  ;;  %v8171_v35 = vmul.f32 %v10904_v2, %v16473_v61  ;;  %v10912_v40 = vpop.eup %10911  ;;  %v9635_v46 = vadd.f32 -0.05, %v8162_v53  ;;  %vm8172_vm9 = vcmp.eq.f32.partialorder %v16473_v61, inf }
 0x53c   : > { %v10109_v13 = vpop.f32.mrb[186].mxu1  ;;  %8697 = vperm.xlu0 %10790, %v9636_v49   ;;  %v8183_v54 = vsel %vm8181_vm8, %v8182_v27, %v8180_v14  ;;  %vm8174_vm10 = vcmp.eq.f32.partialorder %v16473_v61, 0.0  ;;  %v10914_v5 = vpop.eup %10913  ;;  %v8175_v63 = vand.u32 2147483648, %v16473_v61  ;;  %v8192_v41 = vmul.f32 %v16540_v9, %v16477_v57 }
 0x53d   : > { %v6523_v62 = vmax.f32 %v10109_v13, 0.0  ;;  %v6307_v30 = vpop.f32.mrb[187].mxu1  ;;  %v9638_v25 = vadd.f32 -0.05, %v8183_v54  ;;  %v8173_v4 = vsel %vm8172_vm9, %v16473_v61, %v8171_v35  ;;  %8692 = vperm.xlu1 %10789, %v9635_v46   ;;  %vm8193_vm11 = vcmp.eq.f32.partialorder %v16477_v57, inf }
 0x53e   : > { %v6522_v38 = vmax.f32 %v6307_v30, 0.0  ;;  %vm8195_vm12 = vcmp.eq.f32.partialorder %v16477_v57, 0.0  ;;  %v8176_v37 = vsel %vm8174_vm10, %v8175_v63, %v8173_v4  ;;  %v8196_v20 = vand.u32 2147483648, %v16477_v57 }
 0x53f   : > { %v8185_v60 = vmul.f32 %v10908_v59, %v16497_v51  ;;  %vm8186_vm13 = vcmp.eq.f32.partialorder %v16497_v51, inf  ;;  %v9637_v61 = vadd.f32 -0.05, %v8176_v37  ;;  %v8194_v8 = vsel %vm8193_vm11, %v16477_v57, %v8192_v41 }
 0x540   : > { %10219 = vmatprep.mubr.msk.f32.mxu1 %vm5918_vm1, %v6522_v38  ;;  %8707 = vperm.xlu0 %10790, %v9638_v25   ;;  %vm8188_vm14 = vcmp.eq.f32.partialorder %v16497_v51, 0.0  ;;  %v8189_v21 = vand.u32 2147483648, %v16497_v51  ;;  %v10916_v22 = vpop.eup %10915  ;;  %v8197_v52 = vsel %vm8195_vm12, %v8196_v20, %v8194_v8  ;;  %v8206_v29 = vmul.f32 %v10910_v58, %v16500_v56 }
 0x541   : > { %10220 = vmatmul.mubr.msk.f32.gmra.mrb[250].mxu1 %vm5918_vm1, %v6523_v62  ;;  %v8187_v55 = vsel %vm8186_vm13, %v16497_v51, %v8185_v60  ;;  %vm8207_vm15 = vcmp.eq.f32.partialorder %v16500_v56, inf  ;;  %8702 = vperm.xlu1 %10789, %v9637_v61   ;;  %v9640_v23 = vadd.f32 -0.05, %v8197_v52  ;;  %vm8209_vm0 = vcmp.eq.f32.partialorder %v16500_v56, 0.0 }
 0x542   : > { %v8190_v12 = vsel %vm8188_vm14, %v8189_v21, %v8187_v55  ;;  %v8210_v57 = vand.u32 2147483648, %v16500_v56  ;;  %v8208_v7 = vsel %vm8207_vm15, %v16500_v56, %v8206_v29  ;;  %v8199_v28 = vmul.f32 %v10912_v40, %v16526_v31 }
 0x543   : > { %v9639_v2 = vadd.f32 -0.05, %v8190_v12  ;;  %vm8200_vm2 = vcmp.eq.f32.partialorder %v16526_v31, inf  ;;  %vm8202_vm3 = vcmp.eq.f32.partialorder %v16526_v31, 0.0  ;;  %v8203_v9 = vand.u32 2147483648, %v16526_v31 }
 0x544   : > { %v10112_v48 = vpop.f32.mrb[188].mxu1  ;;  %8717 = vperm.xlu0 %10790, %v9640_v23   ;;  %v8211_v51 = vsel %vm8209_vm0, %v8210_v57, %v8208_v7  ;;  %v8220_v47 = vmul.f32 %v10914_v5, %v16529_v43  ;;  %v10918_v50 = vpop.eup %10917  ;;  %v8201_v19 = vsel %vm8200_vm2, %v16526_v31, %v8199_v28  ;;  %vm8221_vm4 = vcmp.eq.f32.partialorder %v16529_v43, inf }
 0x545   : > { %v6525_v11 = vmax.f32 %v10112_v48, 0.0  ;;  %v6317_v26 = vpop.f32.mrb[189].mxu1  ;;  %v9642_v0 = vadd.f32 -0.05, %v8211_v51  ;;  %8712 = vperm.xlu1 %10789, %v9639_v2   ;;  %v8204_v10 = vsel %vm8202_vm3, %v8203_v9, %v8201_v19  ;;  %vm8223_vm5 = vcmp.eq.f32.partialorder %v16529_v43, 0.0 }
 0x546   : > { %v6524_v56 = vmax.f32 %v6317_v26, 0.0  ;;  %v8222_v15 = vsel %vm8221_vm4, %v16529_v43, %v8220_v47  ;;  %v9641_v1 = vadd.f32 -0.05, %v8204_v10  ;;  %v8224_v36 = vand.u32 2147483648, %v16529_v43 }
 0x547   : > { %v8213_v34 = vmul.f32 %v10916_v22, %v16551_v24  ;;  %vm8214_vm6 = vcmp.eq.f32.partialorder %v16551_v24, inf  ;;  %vm8216_vm7 = vcmp.eq.f32.partialorder %v16551_v24, 0.0  ;;  %v8217_v31 = vand.u32 2147483648, %v16551_v24 }
 0x548   : > { %10222 = vmatprep.mubr.msk.f32.mxu1 %vm5918_vm1, %v6524_v56  ;;  %8727 = vperm.xlu0 %10790, %v9642_v0   ;;  %v8227_v18 = vmul.f32 %v10918_v50, %v16570_v17  ;;  %vm8228_vm8 = vcmp.eq.f32.partialorder %v16570_v17, inf  ;;  %v8225_v32 = vsel %vm8223_vm5, %v8224_v36, %v8222_v15  ;;  %vm8230_vm9 = vcmp.eq.f32.partialorder %v16570_v17, 0.0 }
 0x549   : > { %10223 = vmatmul.mubr.msk.f32.gmra.mrb[252].mxu1 %vm5918_vm1, %v6525_v11  ;;  %v8215_v43 = vsel %vm8214_vm6, %v16551_v24, %v8213_v34  ;;  %v8231_v59 = vand.u32 2147483648, %v16570_v17  ;;  %8722 = vperm.xlu1 %10789, %v9641_v1   ;;  %v9644_v3 = vadd.f32 -0.05, %v8225_v32  ;;  %vm9260_vm10 = vcmask 31744  }
 0x54a   : > { %v8218_v44 = vsel %vm8216_vm7, %v8217_v31, %v8215_v43  ;;  %v8229_v39 = vsel %vm8228_vm8, %v16570_v17, %v8227_v18 }
 0x54b   : > { %v9643_v58 = vadd.f32 -0.05, %v8218_v44  ;;  %v8232_v45 = vsel %vm8230_vm9, %v8231_v59, %v8229_v39 }
 0x54c   : > { %v10115_v42 = vpop.f32.mrb[190].mxu1  ;;  %8737 = vperm.xlu0 %10790, %v9644_v3   ;;  %v9645_v49 = vadd.f32 -0.05, %v8232_v45 }
 0x54d   : > { %v6327_v33 = vpop.f32.mrb[191].mxu1  ;;  %8732 = vperm.xlu1 %10789, %v9643_v58   ;;  %v6527_v16 = vmax.f32 %v10115_v42, 0.0 }
 0x54e   : > { %v6526_v6 = vmax.f32 %v6327_v33, 0.0 }
 0x550   : > { %10225 = vmatprep.mubr.msk.f32.mxu1 %vm5918_vm1, %v6526_v6 }
 0x551   : > { %10226 = vmatmul.mubr.msk.f32.gmra.mrb[254].mxu1 %vm5918_vm1, %v6527_v16  ;;  %8742 = vperm.xlu1 %10789, %v9645_v49  }
 0x554   : > { %v10118_v24 = vpop.f32.mrb[192].mxu1 }
 0x555   : > { %v6337_v27 = vpop.f32.mrb[193].mxu1  ;;  %v6529_v14 = vmax.f32 %v10118_v24, 0.0 }
 0x556   : > { %v6528_v53 = vmax.f32 %v6337_v27, 0.0 }
 0x558   : > { %10228 = vmatprep.mubr.msk.f32.mxu1 %vm5918_vm1, %v6528_v53 }
 0x559   : > { %10229 = vmatmul.mubr.msk.f32.gmra.mrb[0].mxu1 %vm5918_vm1, %v6529_v14 }
 0x55c   : > { %v10121_v17 = vpop.f32.mrb[194].mxu1 }
 0x55d   : > { %v6347_v35 = vpop.f32.mrb[195].mxu1  ;;  %v6531_v13 = vmax.f32 %v10121_v17, 0.0 }
 0x55e   : > { %v6530_v40 = vmax.f32 %v6347_v35, 0.0 }
 0x560   : > { %10231 = vmatprep.mubr.msk.f32.mxu1 %vm5918_vm1, %v6530_v40 }
 0x561   : > { %10232 = vmatmul.mubr.msk.f32.gmra.mrb[2].mxu1 %vm5918_vm1, %v6531_v13 }
 0x564   : > { %v10124_v46 = vpop.f32.mrb[196].mxu1 }
 0x565   : > { %v6357_v54 = vpop.f32.mrb[197].mxu1  ;;  %v6533_v62 = vmax.f32 %v10124_v46, 0.0 }
 0x566   : > { %v6532_v5 = vmax.f32 %v6357_v54, 0.0 }
 0x568   : > { %10234 = vmatprep.mubr.msk.f32.mxu1 %vm5918_vm1, %v6532_v5 }
 0x569   : > { %10235 = vmatmul.mubr.msk.f32.gmra.mrb[4].mxu1 %vm5918_vm1, %v6533_v62 }
 0x56c   : > { %v10127_v30 = vpop.f32.mrb[198].mxu1 }
 0x56d   : > { %v6367_v25 = vpop.f32.mrb[199].mxu1  ;;  %v6535_v63 = vmax.f32 %v10127_v30, 0.0  ;;  %v8428_v30 = vpop.permute.xlu1 %8427 }
 0x56e   : > { %v6534_v4 = vmax.f32 %v6367_v25, 0.0 }
 0x570   : > { %10237 = vmatprep.mubr.msk.f32.mxu1 %vm5918_vm1, %v6534_v4 }
 0x571   : > { %10238 = vmatmul.mubr.msk.f32.gmra.mrb[6].mxu1 %vm5918_vm1, %v6535_v63 }
 0x574   : > { %v10130_v38 = vpop.f32.mrb[200].mxu1 }
 0x575   : > { %v6377_v41 = vpop.f32.mrb[201].mxu1  ;;  %v6537_v20 = vmax.f32 %v10130_v38, 0.0 }
 0x576   : > { %v6536_v37 = vmax.f32 %v6377_v41, 0.0 }
 0x578   : > { %10240 = vmatprep.mubr.msk.f32.mxu1 %vm5918_vm1, %v6536_v37 }
 0x579   : > { %10241 = vmatmul.mubr.msk.f32.gmra.mrb[8].mxu1 %vm5918_vm1, %v6537_v20 }
 0x57c   : > { %v10133_v60 = vpop.f32.mrb[202].mxu1 }
 0x57d   : > { %v6387_v61 = vpop.f32.mrb[203].mxu1  ;;  %v6539_v21 = vmax.f32 %v10133_v60, 0.0 }
 0x57e   : > { %v6538_v8 = vmax.f32 %v6387_v61, 0.0 }
 0x580   : > { %10243 = vmatprep.mubr.msk.f32.mxu1 %vm5918_vm1, %v6538_v8 }
 0x581   : > { %10244 = vmatmul.mubr.msk.f32.gmra.mrb[10].mxu1 %vm5918_vm1, %v6539_v21 }
 0x586   : > { %v10136_v22 = vpop.f32.mrb[204].mxu1 }
 0x587   : > { %v6397_v52 = vpop.f32.mrb[205].mxu1  ;;  %v6541_v29 = vmax.f32 %v10136_v22, 0.0 }
 0x588   : > { %v6540_v55 = vmax.f32 %v6397_v52, 0.0 }
 0x58a   : > { %10246 = vmatprep.mubr.msk.f32.mxu1 %vm5918_vm1, %v6540_v55 }
 0x58b   : > { %10247 = vmatmul.mubr.msk.f32.gmra.mrb[12].mxu1 %vm5918_vm1, %v6541_v29  ;;  %v8438_v29 = vpop.permute.xlu1 %8437 }
 0x58e   : > { %v10139_v23 = vpop.f32.mrb[206].mxu1 }
 0x58f   : > { %v6407_v12 = vpop.f32.mrb[207].mxu1  ;;  %v6543_v2 = vmax.f32 %v10139_v23, 0.0 }
 0x590   : > { %v6542_v57 = vmax.f32 %v6407_v12, 0.0 }
 0x592   : > { %10249 = vmatprep.mubr.msk.f32.mxu1 %vm5918_vm1, %v6542_v57 }
 0x593   : > { %10250 = vmatmul.mubr.msk.f32.gmra.mrb[14].mxu1 %vm5918_vm1, %v6543_v2 }
 0x594   : > { %v10142_v7 = vpop.f32.mrb[208].mxu1 }
 0x595   : > { %v6417_v28 = vpop.f32.mrb[209].mxu1  ;;  %v6545_v51 = vmax.f32 %v10142_v7, 0.0 }
 0x596   : > { %v6544_v48 = vmax.f32 %v6417_v28, 0.0  ;;  %v18308_v28 = vlaneseq }
 0x598   : > { %10252 = vmatprep.mubr.msk.f32.mxu1 %vm5918_vm1, %v6544_v48  ;;  %v16662_v48 = vand.u32 127, %v18308_v28 }
 0x599   : > { %10253 = vmatmul.mubr.msk.f32.gmra.mrb[16].mxu1 %vm5918_vm1, %v6545_v51 }
 0x59c   : > { %v10145_v9 = vpop.f32.mrb[210].mxu1 }
 0x59d   : > { %v6427_v47 = vpop.f32.mrb[211].mxu1  ;;  %v6547_v11 = vmax.f32 %v10145_v9, 0.0 }
 0x59e   : > { %v6546_v50 = vmax.f32 %v6427_v47, 0.0 }
 0x5a0   : > { %10255 = vmatprep.mubr.msk.f32.mxu1 %vm5918_vm1, %v6546_v50 }
 0x5a1   : > { %10256 = vmatmul.mubr.msk.f32.gmra.mrb[18].mxu1 %vm5918_vm1, %v6547_v11 }
 0x5a4   : > { %v10148_v26 = vpop.f32.mrb[212].mxu1 }
 0x5a5   : > { %v6437_v0 = vpop.f32.mrb[213].mxu1  ;;  %v6549_v56 = vmax.f32 %v10148_v26, 0.0 }
 0x5a6   : > { %v6548_v19 = vmax.f32 %v6437_v0, 0.0 }
 0x5a8   : > { %10258 = vmatprep.mubr.msk.f32.mxu1 %vm5918_vm1, %v6548_v19 }
 0x5a9   : > { %10259 = vmatmul.mubr.msk.f32.gmra.mrb[20].mxu1 %vm5918_vm1, %v6549_v56 }
 0x5ac   : > { %v10151_v10 = vpop.f32.mrb[214].mxu1 }
 0x5ad   : > { %v6447_v15 = vpop.f32.mrb[215].mxu1  ;;  %v6551_v36 = vmax.f32 %v10151_v10, 0.0  ;;  %v8433_v10 = vpop.permute.xlu0 %8432 }
 0x5ae   : > { %v6550_v1 = vmax.f32 %v6447_v15, 0.0 }
 0x5b0   : > { %10261 = vmatprep.mubr.msk.f32.mxu1 %vm5918_vm1, %v6550_v1 }
 0x5b1   : > { %10262 = vmatmul.mubr.msk.f32.gmra.mrb[22].mxu1 %vm5918_vm1, %v6551_v36  ;;  %v8443_v36 = vpop.permute.xlu1 %8442 }
 0x5b4   : > { %v10154_v34 = vpop.f32.mrb[216].mxu1 }
 0x5b5   : > { %v6457_v31 = vpop.f32.mrb[217].mxu1  ;;  %v6553_v32 = vmax.f32 %v10154_v34, 0.0 }
 0x5b6   : > { %v6552_v18 = vmax.f32 %v6457_v31, 0.0 }
 0x5b8   : > { %10264 = vmatprep.mubr.msk.f32.mxu1 %vm5918_vm1, %v6552_v18 }
 0x5b9   : > { %10265 = vmatmul.mubr.msk.f32.gmra.mrb[24].mxu1 %vm5918_vm1, %v6553_v32 }
 0x5bc   : > { %v10157_v43 = vpop.f32.mrb[218].mxu1 }
 0x5bd   : > { %v6467_v59 = vpop.f32.mrb[219].mxu1  ;;  %v6555_v44 = vmax.f32 %v10157_v43, 0.0 }
 0x5be   : > { %v6554_v3 = vmax.f32 %v6467_v59, 0.0 }
 0x5c0   : > { %10267 = vmatprep.mubr.msk.f32.mxu1 %vm5918_vm1, %v6554_v3 }
 0x5c1   : > { %10268 = vmatmul.mubr.msk.f32.gmra.mrb[26].mxu1 %vm5918_vm1, %v6555_v44 }
 0x5c5   : > { %v10160_v39 = vpop.f32.mrb[220].mxu1 }
 0x5c6   : > { %v6477_v58 = vpop.f32.mrb[221].mxu1  ;;  %v6557_v42 = vmax.f32 %v10160_v39, 0.0 }
 0x5c7   : > { %v6556_v45 = vmax.f32 %v6477_v58, 0.0 }
 0x5c9   : > { %10270 = vmatprep.mubr.msk.f32.mxu1 %vm5918_vm1, %v6556_v45 }
 0x5ca   : > { %10271 = vmatmul.mubr.msk.f32.gmra.mrb[28].mxu1 %vm5918_vm1, %v6557_v42 }
 0x5cc   : > { %v10163_v33 = vpop.f32.mrb[222].mxu1 }
 0x5cd   : > { %v6487_v6 = vpop.f32.mrb[223].mxu1  ;;  %v6559_v16 = vmax.f32 %v10163_v33, 0.0 }
 0x5ce   : > { %v6558_v49 = vmax.f32 %v6487_v6, 0.0 }
 0x5d0   : > { %v10182_v24 = vpop.f32.mrb[224].mxu1  ;;  %10273 = vmatprep.mubr.msk.f32.mxu1 %vm5918_vm1, %v6558_v49 }
 0x5d1   : > { %v9647_v27 = vmul.f32 -1.442695, %v10182_v24  ;;  %v6826_v53 = vpop.f32.mrb[225].mxu1  ;;  %10274 = vmatmul.mubr.msk.f32.gmra.mrb[30].mxu1 %vm5918_vm1, %v6559_v16  ;;  %vm9195_vm1 = vcmp.eq.s32.totalorder %v16662_v48, 0 }
 0x5d2   : > { %v9646_v14 = vmul.f32 -1.442695, %v6826_v53 }
 0x5d3   : > { %10919 = vpow2.f32 %v9647_v27 }
 0x5d4   : > { %10921 = vpow2.f32 %v9646_v14  ;;  %v10185_v17 = vpop.f32.mrb[226].mxu1 }
 0x5d5   : > { %10923 = vtanh.f32 %v10182_v24  ;;  %v9649_v35 = vmul.f32 -1.442695, %v10185_v17  ;;  %v6836_v40 = vpop.f32.mrb[227].mxu1 }
 0x5d6   : > { %10925 = vtanh.f32 %v6826_v53  ;;  %v9648_v13 = vmul.f32 -1.442695, %v6836_v40 }
 0x5d7   : > { %10927 = vpow2.f32 %v9649_v35 }
 0x5d8   : > { %10929 = vpow2.f32 %v9648_v13  ;;  %v10188_v46 = vpop.f32.mrb[228].mxu1 }
 0x5d9   : > { %10931 = vtanh.f32 %v10185_v17  ;;  %v9651_v54 = vmul.f32 -1.442695, %v10188_v46  ;;  %v6846_v5 = vpop.f32.mrb[229].mxu1 }
 0x5da   : > { %10933 = vtanh.f32 %v6836_v40  ;;  %v9650_v62 = vmul.f32 -1.442695, %v6846_v5  ;;  %v8453_v40 = vpop.permute.xlu1 %8452 }
 0x5db   : > { %10935 = vpow2.f32 %v9651_v54 }
 0x5dc   : > { %10937 = vpow2.f32 %v9650_v62 }
 0x5dd   : > { %v10191_v25 = vpop.f32.mrb[230].mxu1  ;;  %v10920_v4 = vpop.eup %10919  ;;  %10939 = vtanh.f32 %v10188_v46 }
 0x5de   : > { %v9653_v63 = vmul.f32 -1.442695, %v10191_v25  ;;  %v6856_v38 = vpop.f32.mrb[231].mxu1  ;;  %v10922_v41 = vpop.eup %10921  ;;  %v9002_v37 = vadd.f32 1.0, %v10920_v4  ;;  %10941 = vtanh.f32 %v6846_v5 }
 0x5df   : > { %v9652_v20 = vmul.f32 -1.442695, %v6856_v38  ;;  %v10924_v60 = vpop.eup %10923  ;;  %v9001_v61 = vadd.f32 1.0, %v10922_v41  ;;  %v8448_v41 = vpop.permute.xlu0 %8447 }
 0x5e0   : > { %10943 = vpow2.f32 %v9653_v63  ;;  %v10926_v8 = vpop.eup %10925  ;;  %v8298_v47 = vmul.f32 1.299, %v10924_v60 }
 0x5e1   : > { %10945 = vrcp.f32 %v9002_v37  ;;  %v10194_v21 = vpop.f32.mrb[232].mxu1  ;;  %v10928_v22 = vpop.eup %10927  ;;  %v8297_v26 = vmul.f32 1.299, %v10926_v8 }
 0x5e2   : > { %10947 = vrcp.f32 %v9001_v61  ;;  %v16659_v52 = vpop.f32.mrb[233].mxu1  ;;  %v10930_v55 = vpop.eup %10929  ;;  %v9004_v23 = vadd.f32 1.0, %v10928_v22  ;;  %v9655_v12 = vmul.f32 -1.442695, %v10194_v21  ;;  %v8746_v18 = vadd.f32 %v8433_v10, %v8298_v47 }
 0x5e3   : > { %10949 = vpow2.f32 %v9652_v20  ;;  %v10932_v57 = vpop.eup %10931  ;;  %v9003_v2 = vadd.f32 1.0, %v10930_v55  ;;  %v9654_v19 = vmul.f32 -1.442695, %v16659_v52  ;;  %v8745_v44 = vadd.f32 %v8428_v30, %v8297_v26  ;;  %v8458_v26 = vpop.permute.xlu0 %8457 }
 0x5e4   : > { %10951 = vtanh.f32 %v10191_v25  ;;  %v10934_v7 = vpop.eup %10933  ;;  %v8300_v32 = vmul.f32 1.299, %v10932_v57 }
 0x5e5   : > { %10953 = vrcp.f32 %v9004_v23  ;;  %v16664_v51 = vpop.f32.mrb[234].mxu1  ;;  %v10936_v9 = vpop.eup %10935  ;;  %v8299_v39 = vmul.f32 1.299, %v10934_v7 }
 0x5e6   : > { %10955 = vrcp.f32 %v9003_v2  ;;  %v16666_v50 = vpop.f32.mrb[235].mxu1  ;;  %v10938_v11 = vpop.eup %10937  ;;  %v9006_v0 = vadd.f32 1.0, %v10936_v9  ;;  %v9657_v43 = vmul.f32 -1.442695, %v16664_v51  ;;  %v8748_v53 = vadd.f32 %v8443_v36, %v8300_v32 }
 0x5e7   : > { %10957 = vpow2.f32 %v9655_v12  ;;  %v10940_v56 = vpop.eup %10939  ;;  %v9005_v15 = vadd.f32 1.0, %v10938_v11  ;;  %v9656_v16 = vmul.f32 -1.442695, %v16666_v50  ;;  %v8747_v13 = vadd.f32 %v8438_v29, %v8299_v39  ;;  %v8463_v29 = vpop.permute.xlu1 %8462 }
 0x5e8   : > { %10959 = vtanh.f32 %v6856_v38  ;;  %v10942_v1 = vpop.eup %10941  ;;  %v8302_v49 = vmul.f32 1.299, %v10940_v56 }
 0x5e9   : > { %10961 = vrcp.f32 %v9006_v0  ;;  %v16670_v34 = vpop.f32.mrb[236].mxu1  ;;  %v8301_v46 = vmul.f32 1.299, %v10942_v1 }
 0x5ea   : > { %v10944_v31 = vpop.eup %10943  ;;  %10963 = vrcp.f32 %v9005_v15  ;;  %v16680_v59 = vpop.f32.mrb[237].mxu1  ;;  %v9659_v54 = vmul.f32 -1.442695, %v16670_v34  ;;  %v8750_v4 = vadd.f32 %v8453_v40, %v8302_v49 }
 0x5eb   : > { %v10946_v3 = vpop.eup %10945  ;;  %v9008_v58 = vadd.f32 1.0, %v10944_v31  ;;  %10965 = vpow2.f32 %v9654_v19  ;;  %v9658_v60 = vmul.f32 -1.442695, %v16680_v59  ;;  %v8473_v32 = vpop.permute.xlu1 %8472 }
 0x5ec   : > { %v10948_v45 = vpop.eup %10947  ;;  %v9197_v42 = vsel %vm9195_vm1, %v8746_v18, %v10946_v3  ;;  %10967 = vtanh.f32 %v10194_v21  ;;  %v8749_v21 = vadd.f32 %v8448_v41, %v8301_v46  ;;  %v8468_v49 = vpop.permute.xlu0 %8467 }
 0x5ed   : > { %v10950_v33 = vpop.eup %10949  ;;  %9262 = vst.msk [vmem:[%s16677_s17 + $0x8] sm:$0xff] %vm9260_vm10, %v9197_v42  ;;  %v9196_v6 = vsel %vm9195_vm1, %v8745_v44, %v10948_v45  ;;  %10969 = vrcp.f32 %v9008_v58  ;;  %v16689_v24 = vpop.f32.mrb[238].mxu1 }
 0x5ee   : > { %v10952_v27 = vpop.eup %10951  ;;  %9261 = vst.msk [vmem:[%s16677_s17] sm:$0xff] %vm9260_vm10, %v9196_v6  ;;  %v9007_v14 = vadd.f32 1.0, %v10950_v33  ;;  %10971 = vpow2.f32 %v9657_v43  ;;  %v16693_v17 = vpop.f32.mrb[239].mxu1  ;;  %v9661_v57 = vmul.f32 -1.442695, %v16689_v24 }
 0x5ef   : > { %v10954_v35 = vpop.eup %10953  ;;  %10973 = vtanh.f32 %v16659_v52  ;;  %v8304_v37 = vmul.f32 1.299, %v10952_v27  ;;  %v9660_v0 = vmul.f32 -1.442695, %v16693_v17  ;;  %v8483_v46 = vpop.permute.xlu1 %8482 }
 0x5f0   : > { %v10956_v5 = vpop.eup %10955  ;;  %v9199_v62 = vsel %vm9195_vm1, %v8748_v53, %v10954_v35  ;;  %10975 = vrcp.f32 %v9007_v14  ;;  %v8478_v41 = vpop.permute.xlu0 %8477 }
 0x5f1   : > { %v10958_v30 = vpop.eup %10957  ;;  %9264 = vst.msk [vmem:[%s16677_s17 + $0x18] sm:$0xff] %vm9260_vm10, %v9199_v62  ;;  %v9198_v25 = vsel %vm9195_vm1, %v8747_v13, %v10956_v5  ;;  %10977 = vpow2.f32 %v9656_v16  ;;  %v16703_v63 = vpop.f32.mrb[240].mxu1  ;;  %v8752_v28 = vadd.f32 %v8463_v29, %v8304_v37 }
 0x5f2   : > { %v10960_v38 = vpop.eup %10959  ;;  %9263 = vst.msk [vmem:[%s16677_s17 + $0x10] sm:$0xff] %vm9260_vm10, %v9198_v25  ;;  %v9010_v20 = vadd.f32 1.0, %v10958_v30  ;;  %10979 = vtanh.f32 %v16664_v51  ;;  %v16709_v61 = vpop.f32.mrb[241].mxu1  ;;  %v9663_v31 = vmul.f32 -1.442695, %v16703_v63 }
 0x5f3   : > { %v10962_v8 = vpop.eup %10961  ;;  %10981 = vpow2.f32 %v9659_v54  ;;  %v8303_v12 = vmul.f32 1.299, %v10960_v38  ;;  %v9662_v42 = vmul.f32 -1.442695, %v16709_v61 }
 0x5f4   : > { %v10964_v22 = vpop.eup %10963  ;;  %v9201_v52 = vsel %vm9195_vm1, %v8750_v4, %v10962_v8  ;;  %10983 = vrcp.f32 %v9010_v20 }
 0x5f5   : > { %v10966_v55 = vpop.eup %10965  ;;  %9266 = vst.msk [vmem:[%s16677_s17 + $0x28] sm:$0xff] %vm9260_vm10, %v9201_v52  ;;  %v9200_v23 = vsel %vm9195_vm1, %v8749_v21, %v10964_v22  ;;  %10985 = vtanh.f32 %v16666_v50  ;;  %v16719_v2 = vpop.f32.mrb[242].mxu1  ;;  %v8751_v56 = vadd.f32 %v8458_v26, %v8303_v12 }
 0x5f6   : > { %v10968_v7 = vpop.eup %10967  ;;  %9265 = vst.msk [vmem:[%s16677_s17 + $0x20] sm:$0xff] %vm9260_vm10, %v9200_v23  ;;  %v9009_v51 = vadd.f32 1.0, %v10966_v55  ;;  %10987 = vpow2.f32 %v9658_v60  ;;  %v16723_v9 = vpop.f32.mrb[243].mxu1  ;;  %v9665_v40 = vmul.f32 -1.442695, %v16719_v2 }
 0x5f7   : > { %v10970_v47 = vpop.eup %10969  ;;  %10989 = vtanh.f32 %v16670_v34  ;;  %v8306_v10 = vmul.f32 1.299, %v10968_v7  ;;  %v8493_v23 = vpop.permute.xlu1 %8492 }
 0x5f8   : > { %v10972_v11 = vpop.eup %10971  ;;  %v9203_v50 = vsel %vm9195_vm1, %v8752_v28, %v10970_v47  ;;  %10991 = vrcp.f32 %v9009_v51  ;;  %v8488_v26 = vpop.permute.xlu0 %8487 }
 0x5f9   : > { %v10974_v19 = vpop.eup %10973  ;;  %9268 = vst.msk [vmem:[%s16677_s17 + $0x38] sm:$0xff] %vm9260_vm10, %v9203_v50  ;;  %v9012_v15 = vadd.f32 1.0, %v10972_v11  ;;  %10993 = vpow2.f32 %v9661_v57  ;;  %v8754_v44 = vadd.f32 %v8473_v32, %v8306_v10 }
 0x5fa   : > { %v10976_v1 = vpop.eup %10975  ;;  %10995 = vtanh.f32 %v16680_v59  ;;  %v8305_v39 = vmul.f32 1.299, %v10974_v19 }
 0x5fb   : > { %v10978_v36 = vpop.eup %10977  ;;  %v9202_v34 = vsel %vm9195_vm1, %v8751_v56, %v10976_v1  ;;  %10997 = vrcp.f32 %v9012_v15 }
 0x5fc   : > { %v10980_v18 = vpop.eup %10979  ;;  %9267 = vst.msk [vmem:[%s16677_s17 + $0x30] sm:$0xff] %vm9260_vm10, %v9202_v34  ;;  %v9011_v43 = vadd.f32 1.0, %v10978_v36  ;;  %10999 = vpow2.f32 %v9660_v0  ;;  %v16738_v59 = vpop.f32.mrb[244].mxu1  ;;  %v8753_v14 = vadd.f32 %v8468_v49, %v8305_v39 }
 0x5fd   : > { %v10982_v3 = vpop.eup %10981  ;;  %11001 = vtanh.f32 %v16689_v24  ;;  %v16741_v33 = vpop.f32.mrb[245].mxu1  ;;  %v8308_v24 = vmul.f32 1.299, %v10980_v18  ;;  %v9667_v55 = vmul.f32 -1.442695, %v16738_v59 }
 0x5fe   : > { %v10984_v58 = vpop.eup %10983  ;;  %11003 = vrcp.f32 %v9011_v43  ;;  %v9014_v45 = vadd.f32 1.0, %v10982_v3  ;;  %v8503_v34 = vpop.permute.xlu1 %8502 }
 0x5ff   : > { %v10986_v6 = vpop.eup %10985  ;;  %v9205_v16 = vsel %vm9195_vm1, %v8754_v44, %v10984_v58  ;;  %11005 = vpow2.f32 %v9663_v31  ;;  %v8756_v25 = vadd.f32 %v8483_v46, %v8308_v24 }
 0x600   : > { %v10988_v27 = vpop.eup %10987  ;;  %9270 = vst.msk [vmem:[%s16677_s17 + $0x48] sm:$0xff] %vm9260_vm10, %v9205_v16  ;;  %11007 = vrcp.f32 %v9014_v45  ;;  %v8307_v62 = vmul.f32 1.299, %v10986_v6  ;;  %v8498_v45 = vpop.permute.xlu0 %8497 }
 0x601   : > { %v10990_v53 = vpop.eup %10989  ;;  %v9013_v35 = vadd.f32 1.0, %v10988_v27  ;;  %11009 = vtanh.f32 %v16693_v17  ;;  %v9664_v17 = vmul.f32 -1.442695, %v16723_v9 }
 0x602   : > { %v10992_v13 = vpop.eup %10991  ;;  %11011 = vpow2.f32 %v9662_v42  ;;  %v8310_v37 = vmul.f32 1.299, %v10990_v53 }
 0x603   : > { %v10994_v54 = vpop.eup %10993  ;;  %v9204_v5 = vsel %vm9195_vm1, %v8753_v14, %v10992_v13  ;;  %11013 = vrcp.f32 %v9013_v35  ;;  %v8513_v14 = vpop.permute.xlu1 %8512 }
 0x604   : > { %v10996_v30 = vpop.eup %10995  ;;  %9269 = vst.msk [vmem:[%s16677_s17 + $0x40] sm:$0xff] %vm9260_vm10, %v9204_v5  ;;  %v9016_v4 = vadd.f32 1.0, %v10994_v54  ;;  %11015 = vtanh.f32 %v16703_v63  ;;  %v16755_v20 = vpop.f32.mrb[246].mxu1  ;;  %v8755_v63 = vadd.f32 %v8478_v41, %v8307_v62  ;;  %v8758_v28 = vadd.f32 %v8493_v23, %v8310_v37 }
 0x605   : > { %v10998_v38 = vpop.eup %10997  ;;  %11017 = vpow2.f32 %v9665_v40  ;;  %v16759_v21 = vpop.f32.mrb[247].mxu1  ;;  %v8309_v12 = vmul.f32 1.299, %v10996_v30 }
 0x606   : > { %v11000_v60 = vpop.eup %10999  ;;  %v9207_v8 = vsel %vm9195_vm1, %v8756_v25, %v10998_v38  ;;  %11019 = vrcp.f32 %v9016_v4  ;;  %v9668_v39 = vmul.f32 -1.442695, %v16759_v21  ;;  %v8508_v4 = vpop.permute.xlu0 %8507 }
 0x607   : > { %v11002_v22 = vpop.eup %11001  ;;  %9272 = vst.msk [vmem:[%s16677_s17 + $0x58] sm:$0xff] %vm9260_vm10, %v9207_v8  ;;  %v9015_v52 = vadd.f32 1.0, %v11000_v60  ;;  %11021 = vtanh.f32 %v16709_v61  ;;  %v9666_v61 = vmul.f32 -1.442695, %v16741_v33  ;;  %v8757_v56 = vadd.f32 %v8488_v26, %v8309_v12 }
 0x608   : > { %v11004_v29 = vpop.eup %11003  ;;  %11023 = vpow2.f32 %v9664_v17  ;;  %v8312_v0 = vmul.f32 1.299, %v11002_v22 }
 0x609   : > { %v11006_v57 = vpop.eup %11005  ;;  %v9206_v7 = vsel %vm9195_vm1, %v8755_v63, %v11004_v29  ;;  %11025 = vrcp.f32 %v9015_v52  ;;  %v8523_v63 = vpop.permute.xlu1 %8522 }
 0x60a   : > { %v11008_v51 = vpop.eup %11007  ;;  %9271 = vst.msk [vmem:[%s16677_s17 + $0x50] sm:$0xff] %vm9260_vm10, %v9206_v7  ;;  %v9018_v47 = vadd.f32 1.0, %v11006_v57  ;;  %11027 = vtanh.f32 %v16719_v2  ;;  %v9669_v2 = vmul.f32 -1.442695, %v16755_v20  ;;  %v8760_v3 = vadd.f32 %v8503_v34, %v8312_v0 }
 0x60b   : > { %v11010_v11 = vpop.eup %11009  ;;  %v9209_v50 = vsel %vm9195_vm1, %v8758_v28, %v11008_v51  ;;  %11029 = vpow2.f32 %v9667_v55  ;;  %v8518_v28 = vpop.permute.xlu0 %8517 }
 0x60c   : > { %v11012_v19 = vpop.eup %11011  ;;  %9274 = vst.msk [vmem:[%s16677_s17 + $0x68] sm:$0xff] %vm9260_vm10, %v9209_v50  ;;  %11031 = vrcp.f32 %v9018_v47  ;;  %v16777_v1 = vpop.f32.mrb[248].mxu1  ;;  %v8311_v18 = vmul.f32 1.299, %v11010_v11 }
 0x60d   : > { %v11014_v10 = vpop.eup %11013  ;;  %v9017_v15 = vadd.f32 1.0, %v11012_v19  ;;  %11033 = vtanh.f32 %v16723_v9  ;;  %v16781_v32 = vpop.f32.mrb[249].mxu1 }
 0x60e   : > { %v11016_v36 = vpop.eup %11015  ;;  %v9208_v31 = vsel %vm9195_vm1, %v8757_v56, %v11014_v10  ;;  %11035 = vpow2.f32 %v9666_v61  ;;  %v8759_v16 = vadd.f32 %v8498_v45, %v8311_v18 }
 0x60f   : > { %v11018_v43 = vpop.eup %11017  ;;  %9273 = vst.msk [vmem:[%s16677_s17 + $0x60] sm:$0xff] %vm9260_vm10, %v9208_v31  ;;  %11037 = vrcp.f32 %v9017_v15  ;;  %v8314_v6 = vmul.f32 1.299, %v11016_v36  ;;  %v8533_v15 = vpop.permute.xlu1 %8532 }
 0x610   : > { %v11020_v9 = vpop.eup %11019  ;;  %v9020_v44 = vadd.f32 1.0, %v11018_v43  ;;  %11039 = vtanh.f32 %v16738_v59  ;;  %v9671_v59 = vmul.f32 -1.442695, %v16777_v1 }
 0x611   : > { %v11022_v58 = vpop.eup %11021  ;;  %v9211_v42 = vsel %vm9195_vm1, %v8760_v3, %v11020_v9  ;;  %11041 = vpow2.f32 %v9669_v2  ;;  %v8762_v46 = vadd.f32 %v8513_v14, %v8314_v6 }
 0x612   : > { %v11024_v49 = vpop.eup %11023  ;;  %9276 = vst.msk [vmem:[%s16677_s17 + $0x78] sm:$0xff] %vm9260_vm10, %v9211_v42  ;;  %11043 = vrcp.f32 %v9020_v44  ;;  %v8313_v40 = vmul.f32 1.299, %v11022_v58 }
 0x613   : > { %v11026_v27 = vpop.eup %11025  ;;  %v9019_v24 = vadd.f32 1.0, %v11024_v49  ;;  %11045 = vtanh.f32 %v16741_v33  ;;  %v9670_v33 = vmul.f32 -1.442695, %v16781_v32 }
 0x614   : > { %v11028_v53 = vpop.eup %11027  ;;  %v9210_v35 = vsel %vm9195_vm1, %v8759_v16, %v11026_v27  ;;  %11047 = vpow2.f32 %v9668_v39  ;;  %v10221_v54 = vpop.f32.mrb[250].mxu1  ;;  %v8761_v37 = vadd.f32 %v8508_v4, %v8313_v40 }
 0x615   : > { %v11030_v13 = vpop.eup %11029  ;;  %9275 = vst.msk [vmem:[%s16677_s17 + $0x70] sm:$0xff] %vm9260_vm10, %v9210_v35  ;;  %11049 = vrcp.f32 %v9019_v24  ;;  %v16799_v30 = vpop.f32.mrb[251].mxu1  ;;  %v8316_v38 = vmul.f32 1.299, %v11028_v53 }
 0x616   : > { %v11032_v5 = vpop.eup %11031  ;;  %v9022_v62 = vadd.f32 1.0, %v11030_v13  ;;  %11051 = vtanh.f32 %v16755_v20  ;;  %v9673_v20 = vmul.f32 -1.442695, %v10221_v54  ;;  %v8543_v16 = vpop.permute.xlu1 %8542 }
 0x617   : > { %v11034_v25 = vpop.eup %11033  ;;  %v9213_v17 = vsel %vm9195_vm1, %v8762_v46, %v11032_v5  ;;  %11053 = vpow2.f32 %v9671_v59  ;;  %v8764_v23 = vadd.f32 %v8523_v63, %v8316_v38 }
 0x618   : > { %v11036_v41 = vpop.eup %11035  ;;  %9278 = vst.msk [vmem:[%s16677_s17 + $0x88] sm:$0xff] %vm9260_vm10, %v9213_v17  ;;  %11055 = vrcp.f32 %v9022_v62  ;;  %v8315_v55 = vmul.f32 1.299, %v11034_v25 }
 0x619   : > { %v11038_v60 = vpop.eup %11037  ;;  %v9021_v8 = vadd.f32 1.0, %v11036_v41  ;;  %11057 = vtanh.f32 %v16759_v21  ;;  %v9672_v21 = vmul.f32 -1.442695, %v16799_v30 }
 0x61a   : > { %v11040_v22 = vpop.eup %11039  ;;  %v9212_v52 = vsel %vm9195_vm1, %v8761_v37, %v11038_v60  ;;  %11059 = vpow2.f32 %v9670_v33  ;;  %v8763_v26 = vadd.f32 %v8518_v28, %v8315_v55  ;;  %v8553_v41 = vpop.permute.xlu1 %8552 }
 0x61b   : > { %v11042_v29 = vpop.eup %11041  ;;  %9277 = vst.msk [vmem:[%s16677_s17 + $0x80] sm:$0xff] %vm9260_vm10, %v9212_v52  ;;  %11061 = vrcp.f32 %v9021_v8  ;;  %v8318_v47 = vmul.f32 1.299, %v11040_v22 }
 0x61c   : > { %v11044_v12 = vpop.eup %11043  ;;  %v9024_v57 = vadd.f32 1.0, %v11042_v29  ;;  %11063 = vtanh.f32 %v16777_v1  ;;  %v10224_v61 = vpop.f32.mrb[252].mxu1 }
 0x61d   : > { %v11046_v7 = vpop.eup %11045  ;;  %v9215_v51 = vsel %vm9195_vm1, %v8764_v23, %v11044_v12  ;;  %11065 = vpow2.f32 %v9673_v20  ;;  %v6966_v50 = vpop.f32.mrb[253].mxu1  ;;  %v9675_v56 = vmul.f32 -1.442695, %v10224_v61  ;;  %v8766_v34 = vadd.f32 %v8533_v15, %v8318_v47 }
 0x61e   : > { %v11048_v11 = vpop.eup %11047  ;;  %9280 = vst.msk [vmem:[%s16677_s17 + $0x98] sm:$0xff] %vm9260_vm10, %v9215_v51  ;;  %11067 = vrcp.f32 %v9024_v57  ;;  %v8317_v1 = vmul.f32 1.299, %v11046_v7  ;;  %v9674_v43 = vmul.f32 -1.442695, %v6966_v50 }
 0x61f   : > { %v11050_v0 = vpop.eup %11049  ;;  %v9023_v19 = vadd.f32 1.0, %v11048_v11  ;;  %11069 = vtanh.f32 %v16781_v32  ;;  %v8528_v32 = vpop.permute.xlu0 %8527 }
 0x620   : > { %v11052_v10 = vpop.eup %11051  ;;  %v9214_v2 = vsel %vm9195_vm1, %v8763_v26, %v11050_v0  ;;  %11071 = vpow2.f32 %v9672_v21  ;;  %v8765_v58 = vadd.f32 %v8528_v32, %v8317_v1  ;;  %v8563_v26 = vpop.permute.xlu1 %8562 }
 0x621   : > { %v11054_v36 = vpop.eup %11053  ;;  %9279 = vst.msk [vmem:[%s16677_s17 + $0x90] sm:$0xff] %vm9260_vm10, %v9214_v2  ;;  %11073 = vrcp.f32 %v9023_v19  ;;  %v8320_v44 = vmul.f32 1.299, %v11052_v10 }
 0x622   : > { %v11056_v31 = vpop.eup %11055  ;;  %v9026_v18 = vadd.f32 1.0, %v11054_v36  ;;  %11075 = vtanh.f32 %v10221_v54 }
 0x623   : > { %v11058_v3 = vpop.eup %11057  ;;  %v9217_v9 = vsel %vm9195_vm1, %v8766_v34, %v11056_v31  ;;  %11077 = vpow2.f32 %v9675_v56  ;;  %v8768_v35 = vadd.f32 %v8543_v16, %v8320_v44  ;;  %v8538_v5 = vpop.permute.xlu0 %8537 }
 0x624   : > { %v11060_v39 = vpop.eup %11059  ;;  %9282 = vst.msk [vmem:[%s16677_s17 + $0xa8] sm:$0xff] %vm9260_vm10, %v9217_v9  ;;  %11079 = vrcp.f32 %v9026_v18  ;;  %v10227_v6 = vpop.f32.mrb[254].mxu1  ;;  %v8319_v24 = vmul.f32 1.299, %v11058_v3 }
 0x625   : > { %v11062_v45 = vpop.eup %11061  ;;  %v9025_v42 = vadd.f32 1.0, %v11060_v39  ;;  %11081 = vtanh.f32 %v16799_v30  ;;  %v9677_v59 = vmul.f32 -1.442695, %v10227_v6  ;;  %v6976_v53 = vpop.f32.mrb[255].mxu1 }
 0x626   : > { %v11064_v49 = vpop.eup %11063  ;;  %v9216_v27 = vsel %vm9195_vm1, %v8765_v58, %v11062_v45  ;;  %11083 = vpow2.f32 %v9674_v43  ;;  %v9676_v46 = vmul.f32 -1.442695, %v6976_v53  ;;  %v8767_v25 = vadd.f32 %v8538_v5, %v8319_v24  ;;  %v8573_v45 = vpop.permute.xlu1 %8572 }
 0x627   : > { %v11066_v14 = vpop.eup %11065  ;;  %9281 = vst.msk [vmem:[%s16677_s17 + $0xa0] sm:$0xff] %vm9260_vm10, %v9216_v27  ;;  %11085 = vrcp.f32 %v9025_v42  ;;  %v8322_v33 = vmul.f32 1.299, %v11064_v49  ;;  %v8548_v12 = vpop.permute.xlu0 %8547 }
 0x628   : > { %v11068_v40 = vpop.eup %11067  ;;  %v9028_v13 = vadd.f32 1.0, %v11066_v14  ;;  %11087 = vtanh.f32 %v10224_v61 }
 0x629   : > { %v11070_v54 = vpop.eup %11069  ;;  %v9219_v62 = vsel %vm9195_vm1, %v8768_v35, %v11068_v40  ;;  %11089 = vpow2.f32 %v9677_v59  ;;  %v8770_v20 = vadd.f32 %v8553_v41, %v8322_v33 }
 0x62a   : > { %v11072_v30 = vpop.eup %11071  ;;  %9284 = vst.msk [vmem:[%s16677_s17 + $0xb8] sm:$0xff] %vm9260_vm10, %v9219_v62  ;;  %11091 = vrcp.f32 %v9028_v13  ;;  %v8321_v60 = vmul.f32 1.299, %v11070_v54  ;;  %v8583_v62 = vpop.permute.xlu1 %8582 }
 0x62b   : > { %v11074_v4 = vpop.eup %11073  ;;  %v9027_v17 = vadd.f32 1.0, %v11072_v30  ;;  %11093 = vtanh.f32 %v6966_v50  ;;  %v8558_v1 = vpop.permute.xlu0 %8557 }
 0x62c   : > { %v11076_v38 = vpop.eup %11075  ;;  %v9218_v37 = vsel %vm9195_vm1, %v8767_v25, %v11074_v4  ;;  %11095 = vpow2.f32 %v9676_v46  ;;  %v10230_v22 = vpop.f32.mrb[0].mxu1  ;;  %v8769_v51 = vadd.f32 %v8548_v12, %v8321_v60 }
 0x62d   : > { %v11078_v8 = vpop.eup %11077  ;;  %9283 = vst.msk [vmem:[%s16677_s17 + $0xb0] sm:$0xff] %vm9260_vm10, %v9218_v37  ;;  %11097 = vrcp.f32 %v9027_v17  ;;  %v9679_v55 = vmul.f32 -1.442695, %v10230_v22  ;;  %v6986_v29 = vpop.f32.mrb[1].mxu1 }
 0x62e   : > { %v11080_v63 = vpop.eup %11079  ;;  %v9030_v52 = vadd.f32 1.0, %v11078_v8  ;;  %11099 = vtanh.f32 %v10227_v6  ;;  %v8324_v21 = vmul.f32 1.299, %v11076_v38  ;;  %v9678_v7 = vmul.f32 -1.442695, %v6986_v29 }
 0x62f   : > { %v11082_v23 = vpop.eup %11081  ;;  %v9221_v57 = vsel %vm9195_vm1, %v8770_v20, %v11080_v63  ;;  %11101 = vtanh.f32 %v6976_v53  ;;  %v8568_v59 = vpop.permute.xlu0 %8567 }
 0x630   : > { %v11084_v28 = vpop.eup %11083  ;;  %9286 = vst.msk [vmem:[%s16677_s17 + $0xc8] sm:$0xff] %vm9260_vm10, %v9221_v57  ;;  %11103 = vrcp.f32 %v9030_v52  ;;  %v8323_v0 = vmul.f32 1.299, %v11082_v23  ;;  %v8772_v56 = vadd.f32 %v8563_v26, %v8324_v21 }
 0x631   : > { %v11086_v47 = vpop.eup %11085  ;;  %v9029_v61 = vadd.f32 1.0, %v11084_v28  ;;  %11105 = vpow2.f32 %v9679_v55 }
 0x632   : > { %v11088_v11 = vpop.eup %11087  ;;  %v9220_v50 = vsel %vm9195_vm1, %v8769_v51, %v11086_v47  ;;  %11107 = vpow2.f32 %v9678_v7  ;;  %v8771_v43 = vadd.f32 %v8558_v1, %v8323_v0  ;;  %v8593_v7 = vpop.permute.xlu1 %8592 }
 0x633   : > { %v11090_v19 = vpop.eup %11089  ;;  %9285 = vst.msk [vmem:[%s16677_s17 + $0xc0] sm:$0xff] %vm9260_vm10, %v9220_v50  ;;  %11109 = vrcp.f32 %v9029_v61  ;;  %v8326_v34 = vmul.f32 1.299, %v11088_v11  ;;  %v8578_v8 = vpop.permute.xlu0 %8577 }
 0x634   : > { %v11092_v10 = vpop.eup %11091  ;;  %v9032_v15 = vadd.f32 1.0, %v11090_v19  ;;  %11111 = vtanh.f32 %v10230_v22  ;;  %v10233_v31 = vpop.f32.mrb[2].mxu1 }
 0x635   : > { %v11094_v2 = vpop.eup %11093  ;;  %v9223_v36 = vsel %vm9195_vm1, %v8772_v56, %v11092_v10  ;;  %v9681_v3 = vmul.f32 -1.442695, %v10233_v31  ;;  %v6996_v32 = vpop.f32.mrb[3].mxu1  ;;  %v8774_v16 = vadd.f32 %v8573_v45, %v8326_v34 }
 0x636   : > { %v11096_v18 = vpop.eup %11095  ;;  %9288 = vst.msk [vmem:[%s16677_s17 + $0xd8] sm:$0xff] %vm9260_vm10, %v9223_v36  ;;  %11113 = vrcp.f32 %v9032_v15  ;;  %v9680_v39 = vmul.f32 -1.442695, %v6996_v32  ;;  %v8325_v6 = vmul.f32 1.299, %v11094_v2 }
 0x637   : > { %v11098_v9 = vpop.eup %11097  ;;  %v9031_v44 = vadd.f32 1.0, %v11096_v18  ;;  %11115 = vtanh.f32 %v6986_v29  ;;  %v8588_v11 = vpop.permute.xlu0 %8587 }
 0x638   : > { %v11100_v58 = vpop.eup %11099  ;;  %v9222_v42 = vsel %vm9195_vm1, %v8771_v43, %v11098_v9  ;;  %11117 = vpow2.f32 %v9681_v3  ;;  %v8773_v40 = vadd.f32 %v8568_v59, %v8325_v6  ;;  %v8603_v18 = vpop.permute.xlu1 %8602 }
 0x639   : > { %v11102_v49 = vpop.eup %11101  ;;  %9287 = vst.msk [vmem:[%s16677_s17 + $0xd0] sm:$0xff] %vm9260_vm10, %v9222_v42  ;;  %11119 = vrcp.f32 %v9031_v44  ;;  %v8328_v14 = vmul.f32 1.299, %v11100_v58 }
 0x63a   : > { %v11104_v27 = vpop.eup %11103  ;;  %11121 = vpow2.f32 %v9680_v39  ;;  %v8327_v30 = vmul.f32 1.299, %v11102_v49 }
 0x63b   : > { %v11106_v24 = vpop.eup %11105  ;;  %v9225_v53 = vsel %vm9195_vm1, %v8774_v16, %v11104_v27  ;;  %11123 = vtanh.f32 %v10233_v31  ;;  %v8776_v38 = vadd.f32 %v8583_v62, %v8328_v14  ;;  %v8598_v6 = vpop.permute.xlu0 %8597 }
 0x63c   : > { %v11108_v35 = vpop.eup %11107  ;;  %9290 = vst.msk [vmem:[%s16677_s17 + $0xe8] sm:$0xff] %vm9260_vm10, %v9225_v53  ;;  %v9034_v13 = vadd.f32 1.0, %v11106_v24  ;;  %v10236_v5 = vpop.f32.mrb[4].mxu1  ;;  %v8775_v63 = vadd.f32 %v8578_v8, %v8327_v30 }
 0x63d   : > { %v11110_v46 = vpop.eup %11109  ;;  %v9033_v54 = vadd.f32 1.0, %v11108_v35  ;;  %v9683_v25 = vmul.f32 -1.442695, %v10236_v5  ;;  %v7006_v4 = vpop.f32.mrb[5].mxu1 }
 0x63e   : > { %v9224_v33 = vsel %vm9195_vm1, %v8773_v40, %v11110_v46  ;;  %11125 = vrcp.f32 %v9034_v13  ;;  %v11112_v17 = vpop.eup %11111  ;;  %v9682_v41 = vmul.f32 -1.442695, %v7006_v4 }
 0x63f   : > { %9289 = vst.msk [vmem:[%s16677_s17 + $0xe0] sm:$0xff] %vm9260_vm10, %v9224_v33  ;;  %11127 = vrcp.f32 %v9033_v54  ;;  %v8330_v55 = vmul.f32 1.299, %v11112_v17 }
 0x640   : > { %v11114_v37 = vpop.eup %11113  ;;  %11129 = vtanh.f32 %v6996_v32 }
 0x641   : > { %v11116_v60 = vpop.eup %11115  ;;  %v9227_v20 = vsel %vm9195_vm1, %v8776_v38, %v11114_v37  ;;  %11131 = vpow2.f32 %v9683_v25  ;;  %v8778_v26 = vadd.f32 %v8593_v7, %v8330_v55  ;;  %v8608_v38 = vpop.permute.xlu0 %8607 }
 0x642   : > { %v11118_v22 = vpop.eup %11117  ;;  %9292 = vst.msk [vmem:[%s16677_s17 + $0xf8] sm:$0xff] %vm9260_vm10, %v9227_v20  ;;  %11133 = vpow2.f32 %v9682_v41  ;;  %v8329_v12 = vmul.f32 1.299, %v11116_v60 }
 0x643   : > { %v11120_v52 = vpop.eup %11119  ;;  %v9036_v29 = vadd.f32 1.0, %v11118_v22 }
 0x644   : > { %v9226_v23 = vsel %vm9195_vm1, %v8775_v63, %v11120_v52  ;;  %v11122_v57 = vpop.eup %11121  ;;  %v10239_v21 = vpop.f32.mrb[6].mxu1  ;;  %v8777_v19 = vadd.f32 %v8588_v11, %v8329_v12 }
 0x645   : > { %9291 = vst.msk [vmem:[%s16677_s17 + $0xf0] sm:$0xff] %vm9260_vm10, %v9226_v23  ;;  %11135 = vrcp.f32 %v9036_v29  ;;  %v9035_v28 = vadd.f32 1.0, %v11122_v57  ;;  %v9685_v51 = vmul.f32 -1.442695, %v10239_v21  ;;  %v7016_v47 = vpop.f32.mrb[7].mxu1  ;;  %v11124_v61 = vpop.eup %11123 }
 0x646   : > { %11137 = vtanh.f32 %v10236_v5  ;;  %v9684_v50 = vmul.f32 -1.442695, %v7016_v47  ;;  %v8332_v1 = vmul.f32 1.299, %v11124_v61  ;;  %v8613_v5 = vpop.permute.xlu1 %8612 }
 0x647   : > { %11139 = vtanh.f32 %v7006_v4 }
 0x648   : > { %v11126_v0 = vpop.eup %11125  ;;  %11141 = vrcp.f32 %v9035_v28  ;;  %v8780_v32 = vadd.f32 %v8603_v18, %v8332_v1 }
 0x649   : > { %v11128_v56 = vpop.eup %11127  ;;  %v9229_v10 = vsel %vm9195_vm1, %v8778_v26, %v11126_v0  ;;  %11143 = vpow2.f32 %v9685_v51  ;;  %v8618_v51 = vpop.permute.xlu0 %8617 }
 0x64a   : > { %v11130_v15 = vpop.eup %11129  ;;  %9294 = vst.msk [vmem:[%s16677_s17 + $0x108] sm:$0xff] %vm9260_vm10, %v9229_v10  ;;  %v9228_v2 = vsel %vm9195_vm1, %v8777_v19, %v11128_v56  ;;  %11145 = vpow2.f32 %v9684_v50  ;;  %v8623_v12 = vpop.permute.xlu1 %8622 }
 0x64b   : > { %v11132_v36 = vpop.eup %11131  ;;  %9293 = vst.msk [vmem:[%s16677_s17 + $0x100] sm:$0xff] %vm9260_vm10, %v9228_v2  ;;  %v8331_v43 = vmul.f32 1.299, %v11130_v15  ;;  %11147 = vtanh.f32 %v10239_v21 }
 0x64c   : > { %v9038_v34 = vadd.f32 1.0, %v11132_v36  ;;  %v11134_v31 = vpop.eup %11133  ;;  %v10242_v3 = vpop.f32.mrb[8].mxu1 }
 0x64d   : > { %v9037_v9 = vadd.f32 1.0, %v11134_v31  ;;  %v9687_v44 = vmul.f32 -1.442695, %v10242_v3  ;;  %v7026_v39 = vpop.f32.mrb[9].mxu1  ;;  %v8779_v27 = vadd.f32 %v8598_v6, %v8331_v43 }
 0x64e   : > { %11149 = vrcp.f32 %v9038_v34  ;;  %v9686_v45 = vmul.f32 -1.442695, %v7026_v39  ;;  %v8633_v31 = vpop.permute.xlu1 %8632 }
 0x64f   : > { %v11136_v58 = vpop.eup %11135  ;;  %11151 = vtanh.f32 %v7016_v47 }
 0x650   : > { %v11138_v42 = vpop.eup %11137  ;;  %v9231_v49 = vsel %vm9195_vm1, %v8780_v32, %v11136_v58  ;;  %11153 = vrcp.f32 %v9037_v9  ;;  %v8628_v58 = vpop.permute.xlu0 %8627 }
 0x651   : > { %v11140_v16 = vpop.eup %11139  ;;  %9296 = vst.msk [vmem:[%s16677_s17 + $0x118] sm:$0xff] %vm9260_vm10, %v9231_v49  ;;  %11155 = vpow2.f32 %v9687_v44  ;;  %v8334_v14 = vmul.f32 1.299, %v11138_v42 }
 0x652   : > { %v11142_v24 = vpop.eup %11141  ;;  %11157 = vpow2.f32 %v9686_v45  ;;  %v8333_v13 = vmul.f32 1.299, %v11140_v16 }
 0x653   : > { %v11144_v59 = vpop.eup %11143  ;;  %v9230_v53 = vsel %vm9195_vm1, %v8779_v27, %v11142_v24  ;;  %11159 = vtanh.f32 %v10242_v3  ;;  %v8782_v25 = vadd.f32 %v8613_v5, %v8334_v14 }
 0x654   : > { %v11146_v35 = vpop.eup %11145  ;;  %9295 = vst.msk [vmem:[%s16677_s17 + $0x110] sm:$0xff] %vm9260_vm10, %v9230_v53  ;;  %v9040_v40 = vadd.f32 1.0, %v11144_v59  ;;  %v10245_v54 = vpop.f32.mrb[10].mxu1  ;;  %v8781_v60 = vadd.f32 %v8608_v38, %v8333_v13 }
 0x655   : > { %v9039_v46 = vadd.f32 1.0, %v11146_v35  ;;  %v9689_v62 = vmul.f32 -1.442695, %v10245_v54  ;;  %v7036_v33 = vpop.f32.mrb[11].mxu1  ;;  %v11148_v30 = vpop.eup %11147 }
 0x656   : > { %11161 = vrcp.f32 %v9040_v40  ;;  %v9688_v4 = vmul.f32 -1.442695, %v7036_v33  ;;  %v8336_v63 = vmul.f32 1.299, %v11148_v30  ;;  %v8643_v40 = vpop.permute.xlu1 %8642 }
 0x657   : > { %11163 = vrcp.f32 %v9039_v46 }
 0x658   : > { %v11150_v17 = vpop.eup %11149  ;;  %11165 = vtanh.f32 %v7026_v39  ;;  %v8784_v47 = vadd.f32 %v8623_v12, %v8336_v63 }
 0x659   : > { %v11152_v41 = vpop.eup %11151  ;;  %v9233_v37 = vsel %vm9195_vm1, %v8782_v25, %v11150_v17  ;;  %11167 = vpow2.f32 %v9689_v62  ;;  %v8638_v25 = vpop.permute.xlu0 %8637 }
 0x65a   : > { %v11154_v8 = vpop.eup %11153  ;;  %9298 = vst.msk [vmem:[%s16677_s17 + $0x128] sm:$0xff] %vm9260_vm10, %v9233_v37  ;;  %11169 = vpow2.f32 %v9688_v4  ;;  %v8335_v52 = vmul.f32 1.299, %v11152_v41 }
 0x65b   : > { %v11156_v20 = vpop.eup %11155  ;;  %v9232_v22 = vsel %vm9195_vm1, %v8781_v60, %v11154_v8  ;;  %11171 = vtanh.f32 %v10245_v54 }
 0x65c   : > { %9297 = vst.msk [vmem:[%s16677_s17 + $0x120] sm:$0xff] %vm9260_vm10, %v9232_v22  ;;  %v9042_v55 = vadd.f32 1.0, %v11156_v20  ;;  %v11158_v29 = vpop.eup %11157  ;;  %v8783_v26 = vadd.f32 %v8618_v51, %v8335_v52 }
 0x65d   : > { %v9041_v57 = vadd.f32 1.0, %v11158_v29  ;;  %v11160_v28 = vpop.eup %11159  ;;  %v8648_v51 = vpop.permute.xlu0 %8647 }
 0x65e   : > { %v10248_v23 = vpop.f32.mrb[12].mxu1  ;;  %11173 = vrcp.f32 %v9042_v55  ;;  %v8338_v15 = vmul.f32 1.299, %v11160_v28  ;;  %v8653_v55 = vpop.permute.xlu1 %8652 }
 0x65f   : > { %v9691_v21 = vmul.f32 -1.442695, %v10248_v23  ;;  %v7046_v7 = vpop.f32.mrb[13].mxu1  ;;  %11175 = vtanh.f32 %v7036_v33 }
 0x660   : > { %v9690_v61 = vmul.f32 -1.442695, %v7046_v7  ;;  %v11162_v11 = vpop.eup %11161  ;;  %11177 = vrcp.f32 %v9041_v57  ;;  %v8786_v9 = vadd.f32 %v8633_v31, %v8338_v15 }
 0x661   : > { %v11164_v50 = vpop.eup %11163  ;;  %v9235_v0 = vsel %vm9195_vm1, %v8784_v47, %v11162_v11  ;;  %11179 = vpow2.f32 %v9691_v21 }
 0x662   : > { %v11166_v19 = vpop.eup %11165  ;;  %9300 = vst.msk [vmem:[%s16677_s17 + $0x138] sm:$0xff] %vm9260_vm10, %v9235_v0  ;;  %v9234_v56 = vsel %vm9195_vm1, %v8783_v26, %v11164_v50  ;;  %11181 = vpow2.f32 %v9690_v61 }
 0x663   : > { %v11168_v10 = vpop.eup %11167  ;;  %9299 = vst.msk [vmem:[%s16677_s17 + $0x130] sm:$0xff] %vm9260_vm10, %v9234_v56  ;;  %v8337_v36 = vmul.f32 1.299, %v11166_v19  ;;  %11183 = vtanh.f32 %v10248_v23 }
 0x664   : > { %v9044_v2 = vadd.f32 1.0, %v11168_v10  ;;  %v11170_v1 = vpop.eup %11169 }
 0x665   : > { %v9043_v18 = vadd.f32 1.0, %v11170_v1  ;;  %v11172_v32 = vpop.eup %11171  ;;  %v8785_v6 = vadd.f32 %v8628_v58, %v8337_v36  ;;  %v8663_v1 = vpop.permute.xlu1 %8662 }
 0x666   : > { %v10251_v34 = vpop.f32.mrb[14].mxu1  ;;  %11185 = vrcp.f32 %v9044_v2  ;;  %v8340_v24 = vmul.f32 1.299, %v11172_v32 }
 0x667   : > { %v9693_v43 = vmul.f32 -1.442695, %v10251_v34  ;;  %v7056_v3 = vpop.f32.mrb[15].mxu1  ;;  %11187 = vtanh.f32 %v7046_v7 }
 0x668   : > { %v9692_v44 = vmul.f32 -1.442695, %v7056_v3  ;;  %v11174_v39 = vpop.eup %11173  ;;  %11189 = vrcp.f32 %v9043_v18  ;;  %v8788_v62 = vadd.f32 %v8643_v40, %v8340_v24 }
 0x669   : > { %v11176_v45 = vpop.eup %11175  ;;  %v9237_v42 = vsel %vm9195_vm1, %v8786_v9, %v11174_v39  ;;  %11191 = vpow2.f32 %v9693_v43  ;;  %v8658_v9 = vpop.permute.xlu0 %8657 }
 0x66a   : > { %v11178_v49 = vpop.eup %11177  ;;  %9302 = vst.msk [vmem:[%s16677_s17 + $0x148] sm:$0xff] %vm9260_vm10, %v9237_v42  ;;  %11193 = vpow2.f32 %v9692_v44  ;;  %v8339_v14 = vmul.f32 1.299, %v11176_v45 }
 0x66b   : > { %v11180_v16 = vpop.eup %11179  ;;  %v9236_v27 = vsel %vm9195_vm1, %v8785_v6, %v11178_v49  ;;  %11195 = vtanh.f32 %v10251_v34 }
 0x66c   : > { %9301 = vst.msk [vmem:[%s16677_s17 + $0x140] sm:$0xff] %vm9260_vm10, %v9236_v27  ;;  %v9046_v59 = vadd.f32 1.0, %v11180_v16  ;;  %v11182_v53 = vpop.eup %11181  ;;  %v10254_v35 = vpop.f32.mrb[16].mxu1  ;;  %v8787_v38 = vadd.f32 %v8638_v25, %v8339_v14 }
 0x66d   : > { %v9045_v13 = vadd.f32 1.0, %v11182_v53  ;;  %v9695_v46 = vmul.f32 -1.442695, %v10254_v35  ;;  %v7066_v54 = vpop.f32.mrb[17].mxu1  ;;  %v11184_v5 = vpop.eup %11183 }
 0x66e   : > { %11197 = vrcp.f32 %v9046_v59  ;;  %v9694_v33 = vmul.f32 -1.442695, %v7066_v54  ;;  %v8342_v8 = vmul.f32 1.299, %v11184_v5  ;;  %v8673_v53 = vpop.permute.xlu1 %8672 }
 0x66f   : > { %11199 = vtanh.f32 %v7056_v3 }
 0x670   : > { %v11186_v30 = vpop.eup %11185  ;;  %11201 = vrcp.f32 %v9045_v13  ;;  %v8790_v21 = vadd.f32 %v8653_v55, %v8342_v8 }
 0x671   : > { %v11188_v4 = vpop.eup %11187  ;;  %v9239_v17 = vsel %vm9195_vm1, %v8788_v62, %v11186_v30  ;;  %11203 = vpow2.f32 %v9695_v46  ;;  %v8668_v62 = vpop.permute.xlu0 %8667 }
 0x672   : > { %v11190_v41 = vpop.eup %11189  ;;  %9304 = vst.msk [vmem:[%s16677_s17 + $0x158] sm:$0xff] %vm9260_vm10, %v9239_v17  ;;  %11205 = vpow2.f32 %v9694_v33  ;;  %v8341_v63 = vmul.f32 1.299, %v11188_v4 }
 0x673   : > { %v11192_v37 = vpop.eup %11191  ;;  %v9238_v60 = vsel %vm9195_vm1, %v8787_v38, %v11190_v41  ;;  %11207 = vtanh.f32 %v10254_v35 }
 0x674   : > { %9303 = vst.msk [vmem:[%s16677_s17 + $0x150] sm:$0xff] %vm9260_vm10, %v9238_v60  ;;  %v9048_v20 = vadd.f32 1.0, %v11192_v37  ;;  %v11194_v22 = vpop.eup %11193  ;;  %v10257_v52 = vpop.f32.mrb[18].mxu1  ;;  %v8789_v11 = vadd.f32 %v8648_v51, %v8341_v63 }
 0x675   : > { %v9047_v29 = vadd.f32 1.0, %v11194_v22  ;;  %v9697_v23 = vmul.f32 -1.442695, %v10257_v52  ;;  %v7076_v12 = vpop.f32.mrb[19].mxu1  ;;  %v11196_v57 = vpop.eup %11195 }
 0x676   : > { %11209 = vrcp.f32 %v9048_v20  ;;  %v9696_v7 = vmul.f32 -1.442695, %v7076_v12  ;;  %v8344_v19 = vmul.f32 1.299, %v11196_v57  ;;  %v8683_v22 = vpop.permute.xlu1 %8682 }
 0x677   : > { %11211 = vtanh.f32 %v7066_v54 }
 0x678   : > { %v11198_v28 = vpop.eup %11197  ;;  %11213 = vrcp.f32 %v9047_v29  ;;  %v8792_v43 = vadd.f32 %v8663_v1, %v8344_v19 }
 0x679   : > { %v11200_v47 = vpop.eup %11199  ;;  %v9241_v61 = vsel %vm9195_vm1, %v8790_v21, %v11198_v28  ;;  %11215 = vpow2.f32 %v9697_v23  ;;  %v8678_v21 = vpop.permute.xlu0 %8677 }
 0x67a   : > { %v11202_v26 = vpop.eup %11201  ;;  %9306 = vst.msk [vmem:[%s16677_s17 + $0x168] sm:$0xff] %vm9260_vm10, %v9241_v61  ;;  %11217 = vpow2.f32 %v9696_v7  ;;  %v8343_v15 = vmul.f32 1.299, %v11200_v47 }
 0x67b   : > { %v11204_v50 = vpop.eup %11203  ;;  %v9240_v0 = vsel %vm9195_vm1, %v8789_v11, %v11202_v26  ;;  %11219 = vtanh.f32 %v10257_v52 }
 0x67c   : > { %9305 = vst.msk [vmem:[%s16677_s17 + $0x160] sm:$0xff] %vm9260_vm10, %v9240_v0  ;;  %v9050_v56 = vadd.f32 1.0, %v11204_v50  ;;  %v11206_v10 = vpop.eup %11205  ;;  %v10260_v2 = vpop.f32.mrb[20].mxu1  ;;  %v8791_v58 = vadd.f32 %v8658_v9, %v8343_v15 }
 0x67d   : > { %v9049_v36 = vadd.f32 1.0, %v11206_v10  ;;  %v9699_v34 = vmul.f32 -1.442695, %v10260_v2  ;;  %v7086_v31 = vpop.f32.mrb[21].mxu1  ;;  %v11208_v18 = vpop.eup %11207 }
 0x67e   : > { %11221 = vrcp.f32 %v9050_v56  ;;  %v9698_v3 = vmul.f32 -1.442695, %v7086_v31  ;;  %v8346_v49 = vmul.f32 1.299, %v11208_v18  ;;  %v8693_v10 = vpop.permute.xlu1 %8692 }
 0x67f   : > { %11223 = vtanh.f32 %v7076_v12 }
 0x680   : > { %v11210_v32 = vpop.eup %11209  ;;  %11225 = vrcp.f32 %v9049_v36  ;;  %v8794_v46 = vadd.f32 %v8673_v53, %v8346_v49 }
 0x681   : > { %v11212_v44 = vpop.eup %11211  ;;  %v9243_v39 = vsel %vm9195_vm1, %v8792_v43, %v11210_v32  ;;  %11227 = vpow2.f32 %v9699_v34  ;;  %v8688_v43 = vpop.permute.xlu0 %8687 }
 0x682   : > { %v11214_v45 = vpop.eup %11213  ;;  %9308 = vst.msk [vmem:[%s16677_s17 + $0x178] sm:$0xff] %vm9260_vm10, %v9243_v39  ;;  %11229 = vpow2.f32 %v9698_v3  ;;  %v8345_v24 = vmul.f32 1.299, %v11212_v44 }
 0x683   : > { %v11216_v42 = vpop.eup %11215  ;;  %v9242_v6 = vsel %vm9195_vm1, %v8791_v58, %v11214_v45  ;;  %11231 = vtanh.f32 %v10260_v2 }
 0x684   : > { %9307 = vst.msk [vmem:[%s16677_s17 + $0x170] sm:$0xff] %vm9260_vm10, %v9242_v6  ;;  %v9052_v16 = vadd.f32 1.0, %v11216_v42  ;;  %v11218_v27 = vpop.eup %11217  ;;  %v10263_v59 = vpop.f32.mrb[22].mxu1  ;;  %v8793_v25 = vadd.f32 %v8668_v62, %v8345_v24 }
 0x685   : > { %v9051_v14 = vadd.f32 1.0, %v11218_v27  ;;  %v9701_v35 = vmul.f32 -1.442695, %v10263_v59  ;;  %v7096_v40 = vpop.f32.mrb[23].mxu1  ;;  %v11220_v13 = vpop.eup %11219 }
 0x686   : > { %11233 = vrcp.f32 %v9052_v16  ;;  %v9700_v54 = vmul.f32 -1.442695, %v7096_v40  ;;  %v8348_v41 = vmul.f32 1.299, %v11220_v13  ;;  %v8703_v27 = vpop.permute.xlu1 %8702 }
 0x687   : > { %11235 = vtanh.f32 %v7086_v31 }
 0x688   : > { %v11222_v5 = vpop.eup %11221  ;;  %11237 = vrcp.f32 %v9051_v14  ;;  %v8796_v23 = vadd.f32 %v8683_v22, %v8348_v41 }
 0x689   : > { %v11224_v33 = vpop.eup %11223  ;;  %v9245_v30 = vsel %vm9195_vm1, %v8794_v46, %v11222_v5  ;;  %11239 = vpow2.f32 %v9701_v35  ;;  %v8698_v46 = vpop.permute.xlu0 %8697 }
 0x68a   : > { %v11226_v4 = vpop.eup %11225  ;;  %9310 = vst.msk [vmem:[%s16677_s17 + $0x188] sm:$0xff] %vm9260_vm10, %v9245_v30  ;;  %11241 = vpow2.f32 %v9700_v54  ;;  %v8347_v8 = vmul.f32 1.299, %v11224_v33 }
 0x68b   : > { %v11228_v17 = vpop.eup %11227  ;;  %v9244_v38 = vsel %vm9195_vm1, %v8793_v25, %v11226_v4  ;;  %11243 = vtanh.f32 %v10263_v59 }
 0x68c   : > { %9309 = vst.msk [vmem:[%s16677_s17 + $0x180] sm:$0xff] %vm9260_vm10, %v9244_v38  ;;  %v9054_v37 = vadd.f32 1.0, %v11228_v17  ;;  %v11230_v60 = vpop.eup %11229  ;;  %v10266_v20 = vpop.f32.mrb[24].mxu1  ;;  %v8795_v51 = vadd.f32 %v8678_v21, %v8347_v8 }
 0x68d   : > { %v9053_v63 = vadd.f32 1.0, %v11230_v60  ;;  %v9703_v52 = vmul.f32 -1.442695, %v10266_v20  ;;  %v7106_v55 = vpop.f32.mrb[25].mxu1  ;;  %v11232_v29 = vpop.eup %11231 }
 0x68e   : > { %11245 = vrcp.f32 %v9054_v37  ;;  %v9702_v12 = vmul.f32 -1.442695, %v7106_v55  ;;  %v8350_v26 = vmul.f32 1.299, %v11232_v29  ;;  %v8713_v60 = vpop.permute.xlu1 %8712 }
 0x68f   : > { %11247 = vtanh.f32 %v7096_v40 }
 0x690   : > { %v11234_v57 = vpop.eup %11233  ;;  %11249 = vrcp.f32 %v9053_v63  ;;  %v8798_v34 = vadd.f32 %v8693_v10, %v8350_v26 }
 0x691   : > { %v11236_v7 = vpop.eup %11235  ;;  %v9247_v28 = vsel %vm9195_vm1, %v8796_v23, %v11234_v57  ;;  %11251 = vpow2.f32 %v9703_v52  ;;  %v8708_v23 = vpop.permute.xlu0 %8707 }
 0x692   : > { %v11238_v47 = vpop.eup %11237  ;;  %9312 = vst.msk [vmem:[%s16677_s17 + $0x198] sm:$0xff] %vm9260_vm10, %v9247_v28  ;;  %11253 = vpow2.f32 %v9702_v12  ;;  %v8349_v19 = vmul.f32 1.299, %v11236_v7 }
 0x693   : > { %v11240_v61 = vpop.eup %11239  ;;  %v9246_v11 = vsel %vm9195_vm1, %v8795_v51, %v11238_v47  ;;  %11255 = vtanh.f32 %v10266_v20 }
 0x694   : > { %9311 = vst.msk [vmem:[%s16677_s17 + $0x190] sm:$0xff] %vm9260_vm10, %v9246_v11  ;;  %v9056_v50 = vadd.f32 1.0, %v11240_v61  ;;  %v11242_v0 = vpop.eup %11241  ;;  %v10269_v56 = vpop.f32.mrb[26].mxu1  ;;  %v8797_v9 = vadd.f32 %v8688_v43, %v8349_v19 }
 0x695   : > { %v9055_v15 = vadd.f32 1.0, %v11242_v0  ;;  %v9705_v2 = vmul.f32 -1.442695, %v10269_v56  ;;  %v7116_v1 = vpop.f32.mrb[27].mxu1  ;;  %v11244_v36 = vpop.eup %11243 }
 0x696   : > { %11257 = vrcp.f32 %v9056_v50  ;;  %v9704_v31 = vmul.f32 -1.442695, %v7116_v1  ;;  %v8352_v45 = vmul.f32 1.299, %v11244_v36  ;;  %v8723_v50 = vpop.permute.xlu1 %8722 }
 0x697   : > { %11259 = vtanh.f32 %v7106_v55 }
 0x698   : > { %v11246_v18 = vpop.eup %11245  ;;  %11261 = vrcp.f32 %v9055_v15  ;;  %v8800_v35 = vadd.f32 %v8703_v27, %v8352_v45  ;;  %v8718_v15 = vpop.permute.xlu0 %8717 }
 0x699   : > { %v11248_v3 = vpop.eup %11247  ;;  %v9249_v32 = vsel %vm9195_vm1, %v8798_v34, %v11246_v18  ;;  %11263 = vpow2.f32 %v9705_v2 }
 0x69a   : > { %v11250_v44 = vpop.eup %11249  ;;  %9314 = vst.msk [vmem:[%s16677_s17 + $0x1a8] sm:$0xff] %vm9260_vm10, %v9249_v32  ;;  %11265 = vpow2.f32 %v9704_v31  ;;  %v8351_v49 = vmul.f32 1.299, %v11248_v3 }
 0x69b   : > { %v11252_v39 = vpop.eup %11251  ;;  %v9248_v58 = vsel %vm9195_vm1, %v8797_v9, %v11250_v44  ;;  %11267 = vtanh.f32 %v10269_v56  ;;  %v8733_v44 = vpop.permute.xlu1 %8732 }
 0x69c   : > { %9313 = vst.msk [vmem:[%s16677_s17 + $0x1a0] sm:$0xff] %vm9260_vm10, %v9248_v58  ;;  %v9058_v42 = vadd.f32 1.0, %v11252_v39  ;;  %v11254_v6 = vpop.eup %11253  ;;  %v8799_v62 = vadd.f32 %v8698_v46, %v8351_v49 }
 0x69d   : > { %v10272_v16 = vpop.f32.mrb[28].mxu1  ;;  %v9057_v24 = vadd.f32 1.0, %v11254_v6  ;;  %v11256_v14 = vpop.eup %11255 }
 0x69e   : > { %11269 = vrcp.f32 %v9058_v42  ;;  %v9707_v59 = vmul.f32 -1.442695, %v10272_v16  ;;  %v7126_v53 = vpop.f32.mrb[29].mxu1  ;;  %v8354_v4 = vmul.f32 1.299, %v11256_v14  ;;  %v8728_v6 = vpop.permute.xlu0 %8727 }
 0x69f   : > { %11271 = vtanh.f32 %v7116_v1  ;;  %v9706_v40 = vmul.f32 -1.442695, %v7126_v53 }
 0x6a0   : > { %v11258_v13 = vpop.eup %11257  ;;  %11273 = vrcp.f32 %v9057_v24  ;;  %v8802_v52 = vadd.f32 %v8713_v60, %v8354_v4 }
 0x6a1   : > { %v11260_v54 = vpop.eup %11259  ;;  %v9251_v5 = vsel %vm9195_vm1, %v8800_v35, %v11258_v13  ;;  %11275 = vpow2.f32 %v9707_v59  ;;  %v8743_v35 = vpop.permute.xlu1 %8742 }
 0x6a2   : > { %v11262_v33 = vpop.eup %11261  ;;  %9316 = vst.msk [vmem:[%s16677_s17 + $0x1b8] sm:$0xff] %vm9260_vm10, %v9251_v5  ;;  %11277 = vpow2.f32 %v9706_v40  ;;  %v8353_v41 = vmul.f32 1.299, %v11260_v54  ;;  %v8738_v46 = vpop.permute.xlu0 %8737 }
 0x6a3   : > { %v11264_v30 = vpop.eup %11263  ;;  %v9250_v25 = vsel %vm9195_vm1, %v8799_v62, %v11262_v33  ;;  %11279 = vtanh.f32 %v10272_v16 }
 0x6a4   : > { %9315 = vst.msk [vmem:[%s16677_s17 + $0x1b0] sm:$0xff] %vm9260_vm10, %v9250_v25  ;;  %v9060_v17 = vadd.f32 1.0, %v11264_v30  ;;  %v11266_v38 = vpop.eup %11265  ;;  %v10275_v37 = vpop.f32.mrb[30].mxu1  ;;  %v8801_v21 = vadd.f32 %v8708_v23, %v8353_v41 }
 0x6a5   : > { %v9059_v8 = vadd.f32 1.0, %v11266_v38  ;;  %v9709_v20 = vmul.f32 -1.442695, %v10275_v37  ;;  %v7136_v22 = vpop.f32.mrb[31].mxu1  ;;  %v11268_v63 = vpop.eup %11267 }
 0x6a6   : > { %11281 = vrcp.f32 %v9060_v17  ;;  %v9708_v55 = vmul.f32 -1.442695, %v7136_v22  ;;  %v8356_v47 = vmul.f32 1.299, %v11268_v63 }
 0x6a7   : > { %11283 = vtanh.f32 %v7126_v53 }
 0x6a8   : > { %v11270_v29 = vpop.eup %11269  ;;  %11285 = vrcp.f32 %v9059_v8  ;;  %v8804_v56 = vadd.f32 %v8723_v50, %v8356_v47 }
 0x6a9   : > { %v11272_v12 = vpop.eup %11271  ;;  %v9253_v57 = vsel %vm9195_vm1, %v8802_v52, %v11270_v29  ;;  %11287 = vpow2.f32 %v9709_v20 }
 0x6aa   : > { %v11274_v7 = vpop.eup %11273  ;;  %9318 = vst.msk [vmem:[%s16677_s17 + $0x1c8] sm:$0xff] %vm9260_vm10, %v9253_v57  ;;  %11289 = vpow2.f32 %v9708_v55  ;;  %v8355_v26 = vmul.f32 1.299, %v11272_v12 }
 0x6ab   : > { %v11276_v28 = vpop.eup %11275  ;;  %v9252_v51 = vsel %vm9195_vm1, %v8801_v21, %v11274_v7  ;;  %11291 = vtanh.f32 %v10275_v37 }
 0x6ac   : > { %9317 = vst.msk [vmem:[%s16677_s17 + $0x1c0] sm:$0xff] %vm9260_vm10, %v9252_v51  ;;  %v9062_v61 = vadd.f32 1.0, %v11276_v28  ;;  %v11278_v11 = vpop.eup %11277  ;;  %v8803_v36 = vadd.f32 %v8718_v15, %v8355_v26 }
 0x6ad   : > { %v9061_v0 = vadd.f32 1.0, %v11278_v11  ;;  %v11280_v19 = vpop.eup %11279 }
 0x6ae   : > { %11293 = vrcp.f32 %v9062_v61  ;;  %v8358_v43 = vmul.f32 1.299, %v11280_v19 }
 0x6af   : > { %11295 = vtanh.f32 %v7136_v22 }
 0x6b0   : > { %v11282_v10 = vpop.eup %11281  ;;  %11297 = vrcp.f32 %v9061_v0  ;;  %v8806_v45 = vadd.f32 %v8733_v44, %v8358_v43 }
 0x6b1   : > { %v11284_v2 = vpop.eup %11283  ;;  %v9255_v1 = vsel %vm9195_vm1, %v8804_v56, %v11282_v10 }
 0x6b2   : > { %v11286_v34 = vpop.eup %11285  ;;  %9320 = vst.msk [vmem:[%s16677_s17 + $0x1d8] sm:$0xff] %vm9260_vm10, %v9255_v1  ;;  %v8357_v9 = vmul.f32 1.299, %v11284_v2 }
 0x6b3   : > { %v11288_v31 = vpop.eup %11287  ;;  %v9254_v18 = vsel %vm9195_vm1, %v8803_v36, %v11286_v34 }
 0x6b4   : > { %9319 = vst.msk [vmem:[%s16677_s17 + $0x1d0] sm:$0xff] %vm9260_vm10, %v9254_v18  ;;  %v9064_v3 = vadd.f32 1.0, %v11288_v31  ;;  %v11290_v32 = vpop.eup %11289  ;;  %v8805_v27 = vadd.f32 %v8728_v6, %v8357_v9 }
 0x6b5   : > { %v9063_v39 = vadd.f32 1.0, %v11290_v32  ;;  %v11292_v58 = vpop.eup %11291 }
 0x6b6   : > { %11299 = vrcp.f32 %v9064_v3  ;;  %v8360_v53 = vmul.f32 1.299, %v11292_v58 }
 0x6b7   : > { %11301 = vrcp.f32 %v9063_v39 }
 0x6b8   : > { %v11294_v42 = vpop.eup %11293  ;;  %v8808_v40 = vadd.f32 %v8743_v35, %v8360_v53 }
 0x6b9   : > { %v11296_v49 = vpop.eup %11295  ;;  %v9257_v16 = vsel %vm9195_vm1, %v8806_v45, %v11294_v42 }
 0x6ba   : > { %v11298_v24 = vpop.eup %11297  ;;  %9322 = vst.msk [vmem:[%s16677_s17 + $0x1e8] sm:$0xff] %vm9260_vm10, %v9257_v16  ;;  %v8359_v14 = vmul.f32 1.299, %v11296_v49 }
 0x6bb   : > { %v9256_v59 = vsel %vm9195_vm1, %v8805_v27, %v11298_v24 }
 0x6bc   : > { %9321 = vst.msk [vmem:[%s16677_s17 + $0x1e0] sm:$0xff] %vm9260_vm10, %v9256_v59  ;;  %v8807_v5 = vadd.f32 %v8738_v46, %v8359_v14 }
 0x6c0   : > { %v11300_v13 = vpop.eup %11299 }
 0x6c1   : > { %v9259_v54 = vsel %vm9195_vm1, %v8808_v40, %v11300_v13  ;;  %v11302_v62 = vpop.eup %11301 }
 0x6c2   : > { %9324 = vst.msk [vmem:[%s16677_s17 + $0x1f8] sm:$0xff] %vm9260_vm10, %v9259_v54  ;;  %v9258_v33 = vsel %vm9195_vm1, %v8807_v5, %v11302_v62 }
 0x6c3   : > { %9323 = vst.msk [vmem:[%s16677_s17 + $0x1f0] sm:$0xff] %vm9260_vm10, %v9258_v33 }
 0x6c4 PF: > { %s16_s21 = sadd.s32 1, %s11373_s21  }
 0x6c5   : > { %p13_p4 = scmp.ge.s32.totalorder %s16_s21, 4  }
 0x6c7   :  { %15 = sbr.rel (!%p13_p4) target bundleno = 1 (0x1), region = 74 }

</bundles_post_ra>
